<compile_context>
chip_gen: v7x
topology: tpu7x:2x2x1
jax: 0.10.0
libtpu: 0.0.40
codegen_flags: <defaults>
</compile_context>

<pallas_src>
import functools
import math

import jax
import jax.numpy as jnp
from jax import lax
from jax.experimental import pallas as pl
from jax.experimental.pallas import tpu as pltpu

HIDDEN_DIM = 512
LN_EPS = 1e-5                    # PyTorch nn.LayerNorm default
WEIGHT_DTYPE = jnp.bfloat16      # storage dtype of the large matmul weights
VMEM_LIMIT_BYTES = 48 << 20      # > v5e's 16 MiB default scoped limit, < v7x 64 MiB physical


# --------------------------------------------------------------------------- chip gating
def _head_axis_semantics():
    """v7x: split the two Q-heads across the two TensorCores (CORE_PARALLEL).

    Plain "parallel" does not change codegen; only CORE_PARALLEL does, and it
    only makes sense with 2 TCs per chip (v7x).  1-TC chips (v5e/v6e) fall back
    to PARALLEL (harmless no-op).
    """
    try:
        kind = jax.devices()[0].device_kind.lower()
    except Exception:
        return pltpu.PARALLEL
    if "v7" in kind or "7x" in kind:
        return pltpu.CORE_PARALLEL
    return pltpu.PARALLEL


def _compiler_params():
    return pltpu.CompilerParams(
        dimension_semantics=(_head_axis_semantics(), pltpu.ARBITRARY),
        vmem_limit_bytes=VMEM_LIMIT_BYTES)


# --------------------------------------------------------------------------- BlockSpec helpers
def _spec_batch(shape, tile_b):
    """[B, D] activations: tiled over the batch grid axis, shared across heads."""
    d = shape[1]
    return pl.BlockSpec((tile_b, d), lambda h, b: (b, 0))


def _spec_head(shape):
    """[2, ...] per-head weights: head dim squeezed; same block across batch tiles
    (batch axis is innermost, so the block stays VMEM-resident across it)."""
    rest = tuple(shape[1:])
    zeros = (0,) * len(rest)
    return pl.BlockSpec((None,) + rest, lambda h, b: (h,) + zeros)


# --------------------------------------------------------------------------- in-kernel helpers
def _ln(x, g, b):
    mu = jnp.mean(x, axis=-1, keepdims=True)
    var = jnp.mean(jnp.square(x - mu), axis=-1, keepdims=True)
    return (x - mu) * lax.rsqrt(var + LN_EPS) * g + b


def _mxu(x, w):
    """bf16 x bf16 -> f32 MXU matmul (weights stored bf16, activations cast)."""
    return jnp.dot(x.astype(w.dtype), w, preferred_element_type=jnp.float32)


# --------------------------------------------------------------------------- kernels
def _residual_kernel(s_ref, a_ref, w1s_ref, w1a_ref, b1_ref,
                     blk_g_ref, blk_b_ref, blk_w1_ref, blk_b1_ref,
                     blk_w2_ref, blk_b2_ref,
                     ln_g_ref, ln_b_ref, w3_ref, b3_ref, o_ref,
                     *, n_blocks, use_layernorm):
    """One grid step = (head h, batch tile b): l1 -> resblocks -> [LN] -> l3."""
    # l1 / l4 on concat(state, action) == state @ Ws + action @ Wa + bias
    x = _mxu(s_ref[...], w1s_ref[...]) + _mxu(a_ref[...], w1a_ref[...]) + b1_ref[...]
    # n_blocks == 2 and the activation is only a few vregs, so a static Python
    # loop (static ref indices, no dynamic slices) is fine here.
    for k in range(n_blocks):
        y = _ln(x, blk_g_ref[k], blk_b_ref[k])
        hmid = jnp.maximum(_mxu(y, blk_w1_ref[k]) + blk_b1_ref[k], 0.0)
        x = _mxu(hmid, blk_w2_ref[k]) + blk_b2_ref[k] + x
    if use_layernorm:
        x = _ln(x, ln_g_ref[...], ln_b_ref[...])
    # final hidden -> 1 projection: VPU multiply + lane reduce (no N=1 MXU pass)
    o_ref[...] = (jnp.sum(x * w3_ref[...].astype(jnp.float32), axis=-1, keepdims=True)
                  + b3_ref[...])


def _plain_kernel(s_ref, a_ref, w1s_ref, w1a_ref, b1_ref,
                  ln_g_ref, ln_b_ref, w3_ref, b3_ref, o_ref, *, use_layernorm):
    # Matches PyTorch forward with use_Residual=False, use_MLP_ReLU=False:
    # q = l3(LN?(l1(sa)))   (no ReLU, l2/l5 unused in that branch)
    x = _mxu(s_ref[...], w1s_ref[...]) + _mxu(a_ref[...], w1a_ref[...]) + b1_ref[...]
    if use_layernorm:
        x = _ln(x, ln_g_ref[...], ln_b_ref[...])
    o_ref[...] = (jnp.sum(x * w3_ref[...].astype(jnp.float32), axis=-1, keepdims=True)
                  + b3_ref[...])


def _mlp_kernel(s_ref, a_ref, w1s_ref, w1a_ref, b1_ref,
                w2_ref, b2_ref, w3_ref, b3_ref, o_ref):
    h1 = jnp.maximum(_mxu(s_ref[...], w1s_ref[...]) + _mxu(a_ref[...], w1a_ref[...])
                     + b1_ref[...], 0.0)
    h2 = jnp.maximum(_mxu(h1, w2_ref[...]) + b2_ref[...], 0.0)
    o_ref[...] = (jnp.sum(h2 * w3_ref[...].astype(jnp.float32), axis=-1, keepdims=True)
                  + b3_ref[...])


# --------------------------------------------------------------------------- pallas_call wrappers
def _batch_tiling(B):
    if B <= 256:
        return B, 1, B                 # single tile; block == full dim
    tile_b = 128
    n_bt = -(-B // tile_b)
    return tile_b, n_bt, n_bt * tile_b


def _pad_batch(x, b_pad):
    B = x.shape[0]
    return x if b_pad == B else jnp.pad(x, ((0, b_pad - B), (0, 0)))


def _call_residual(p, state, action, use_layernorm):
    B = state.shape[0]
    n_blocks = p["blk_w1"].shape[1]
    tile_b, n_bt, b_pad = _batch_tiling(B)
    s = _pad_batch(state, b_pad)
    a = _pad_batch(action, b_pad)
    out = pl.pallas_call(
        functools.partial(_residual_kernel, n_blocks=n_blocks,
                          use_layernorm=use_layernorm),
        out_shape=jax.ShapeDtypeStruct((2, b_pad, 1), jnp.float32),
        grid=(2, n_bt),
        in_specs=[
            _spec_batch(s.shape, tile_b), _spec_batch(a.shape, tile_b),
            _spec_head(p["w1s"].shape), _spec_head(p["w1a"].shape),
            _spec_head(p["b1"].shape),
            _spec_head(p["blk_g"].shape), _spec_head(p["blk_b"].shape),
            _spec_head(p["blk_w1"].shape), _spec_head(p["blk_b1"].shape),
            _spec_head(p["blk_w2"].shape), _spec_head(p["blk_b2"].shape),
            _spec_head(p["ln_g"].shape), _spec_head(p["ln_b"].shape),
            _spec_head(p["w3"].shape), _spec_head(p["b3"].shape),
        ],
        out_specs=pl.BlockSpec((None, tile_b, 1), lambda h, b: (h, b, 0)),
        compiler_params=_compiler_params(),
    )(s, a, p["w1s"], p["w1a"], p["b1"],
      p["blk_g"], p["blk_b"], p["blk_w1"], p["blk_b1"], p["blk_w2"], p["blk_b2"],
      p["ln_g"], p["ln_b"], p["w3"], p["b3"])
    return out[0, :B], out[1, :B]


def _call_plain(p, state, action, use_layernorm):
    B = state.shape[0]
    tile_b, n_bt, b_pad = _batch_tiling(B)
    s = _pad_batch(state, b_pad)
    a = _pad_batch(action, b_pad)
    out = pl.pallas_call(
        functools.partial(_plain_kernel, use_layernorm=use_layernorm),
        out_shape=jax.ShapeDtypeStruct((2, b_pad, 1), jnp.float32),
        grid=(2, n_bt),
        in_specs=[
            _spec_batch(s.shape, tile_b), _spec_batch(a.shape, tile_b),
            _spec_head(p["w1s"].shape), _spec_head(p["w1a"].shape),
            _spec_head(p["b1"].shape),
            _spec_head(p["ln_g"].shape), _spec_head(p["ln_b"].shape),
            _spec_head(p["w3"].shape), _spec_head(p["b3"].shape),
        ],
        out_specs=pl.BlockSpec((None, tile_b, 1), lambda h, b: (h, b, 0)),
        compiler_params=_compiler_params(),
    )(s, a, p["w1s"], p["w1a"], p["b1"],
      p["ln_g"], p["ln_b"], p["w3"], p["b3"])
    return out[0, :B], out[1, :B]


def _call_mlp(p, state, action):
    B = state.shape[0]
    tile_b, n_bt, b_pad = _batch_tiling(B)
    s = _pad_batch(state, b_pad)
    a = _pad_batch(action, b_pad)
    out = pl.pallas_call(
        _mlp_kernel,
        out_shape=jax.ShapeDtypeStruct((2, b_pad, 1), jnp.float32),
        grid=(2, n_bt),
        in_specs=[
            _spec_batch(s.shape, tile_b), _spec_batch(a.shape, tile_b),
            _spec_head(p["w1s"].shape), _spec_head(p["w1a"].shape),
            _spec_head(p["b1"].shape),
            _spec_head(p["w2"].shape), _spec_head(p["b2"].shape),
            _spec_head(p["w3"].shape), _spec_head(p["b3"].shape),
        ],
        out_specs=pl.BlockSpec((None, tile_b, 1), lambda h, b: (h, b, 0)),
        compiler_params=_compiler_params(),
    )(s, a, p["w1s"], p["w1a"], p["b1"],
      p["w2"], p["b2"], p["w3"], p["b3"])
    return out[0, :B], out[1, :B]


def critic_sac_forward(p, state, action, *, use_RSNorm=False, use_LayerNorm=False,
                       use_Residual=False, use_MLP_ReLU=False):
    """Returns (q1, q2), matching Critic_SAC.forward for the given flags."""
    if use_RSNorm and not use_MLP_ReLU:
        # TODO(synk): RunningNorm (state_norm / action_norm) was not provided in the
        # reference module, so the RSNorm pre-normalization path is not implemented.
        raise NotImplementedError("use_RSNorm=True requires RunningNorm (not provided)")
    if use_MLP_ReLU:
        return _call_mlp(p, state, action)
    if use_Residual:
        return _call_residual(p, state, action, use_LayerNorm)
    return _call_plain(p, state, action, use_LayerNorm)


# --------------------------------------------------------------------------- params
def _init_linear(key, fan_in, fan_out):
    kw, kb = jax.random.split(key)
    bound = 1.0 / math.sqrt(fan_in)
    w = jax.random.uniform(kw, (fan_in, fan_out), jnp.float32, -bound, bound)
    b = jax.random.uniform(kb, (1, fan_out), jnp.float32, -bound, bound)
    return w, b


def init_critic_params(key, state_dim, action_dim, hidden=HIDDEN_DIM, n_blocks=2):
    """f32 master params, pre-stacked over the 2 Q-heads (dim 0) and resblocks (dim 1)."""
    keys = jax.random.split(key, 6 + 4 * n_blocks)
    sa = state_dim + action_dim
    l1 = [_init_linear(keys[0], sa, hidden), _init_linear(keys[1], sa, hidden)]          # l1, l4
    l2 = [_init_linear(keys[2], hidden, hidden), _init_linear(keys[3], hidden, hidden)]  # l2, l5
    l3 = [_init_linear(keys[4], hidden, 1), _init_linear(keys[5], hidden, 1)]            # l3, l6

    blk_w1, blk_b1, blk_w2, blk_b2 = [], [], [], []
    idx = 6
    for _h in range(2):
        bw1, bb1, bw2, bb2 = [], [], [], []
        for _ in range(n_blocks):
            w1, b1 = _init_linear(keys[idx], hidden, 4 * hidden); idx += 1
            w2, b2 = _init_linear(keys[idx], 4 * hidden, hidden); idx += 1
            bw1.append(w1); bb1.append(b1); bw2.append(w2); bb2.append(b2)
        blk_w1.append(jnp.stack(bw1)); blk_b1.append(jnp.stack(bb1))
        blk_w2.append(jnp.stack(bw2)); blk_b2.append(jnp.stack(bb2))

    return {
        # l1/l4, weight split into state / action halves (avoids run-time concat)
        "w1s": jnp.stack([l1[0][0][:state_dim], l1[1][0][:state_dim]]),     # [2,S,H]
        "w1a": jnp.stack([l1[0][0][state_dim:], l1[1][0][state_dim:]]),     # [2,A,H]
        "b1":  jnp.stack([l1[0][1], l1[1][1]]),                             # [2,1,H]
        # l2/l5 (only used on the MLP-ReLU path)
        "w2":  jnp.stack([l2[0][0], l2[1][0]]),                             # [2,H,H]
        "b2":  jnp.stack([l2[0][1], l2[1][1]]),                             # [2,1,H]
        # l3/l6, stored as row vectors for the VPU multiply+reduce head
        "w3":  jnp.stack([l3[0][0].T, l3[1][0].T]),                         # [2,1,H]
        "b3":  jnp.stack([l3[0][1], l3[1][1]]),                             # [2,1,1]
        # layer_norm2 / layer_norm3
        "ln_g": jnp.ones((2, 1, hidden), jnp.float32),
        "ln_b": jnp.zeros((2, 1, hidden), jnp.float32),
        # residual blocks (blocks / blocks2), stacked [head, block, ...]
        "blk_g":  jnp.ones((2, n_blocks, 1, hidden), jnp.float32),
        "blk_b":  jnp.zeros((2, n_blocks, 1, hidden), jnp.float32),
        "blk_w1": jnp.stack(blk_w1),                                        # [2,NB,H,4H]
        "blk_b1": jnp.stack(blk_b1),                                        # [2,NB,1,4H]
        "blk_w2": jnp.stack(blk_w2),                                        # [2,NB,4H,H]
        "blk_b2": jnp.stack(blk_b2),                                        # [2,NB,1,H]
    }


def quantize_params(p, weight_dtype=WEIGHT_DTYPE):
    """Cast the large matmul weights to the kernel's storage dtype (bf16)."""
    q = dict(p)
    for k in ("w1s", "w1a", "w2", "w3", "blk_w1", "blk_w2"):
        q[k] = p[k].astype(weight_dtype)
    return q


# --------------------------------------------------------------------------- pure-JAX reference
def _ref_dot(x, w):
    return jnp.dot(x.astype(w.dtype), w, preferred_element_type=jnp.float32)


def _ref_ln(x, g, b):
    mu = jnp.mean(x, axis=-1, keepdims=True)
    var = jnp.mean(jnp.square(x - mu), axis=-1, keepdims=True)
    return (x - mu) * lax.rsqrt(var + LN_EPS) * g + b


def critic_sac_ref(p, state, action, *, use_LayerNorm=False, use_Residual=False,
                   use_MLP_ReLU=False):
    """Reference forward.  Pass bf16 params -> kernel-matched numerics;
    pass f32 master params -> full-f32 fidelity reference."""
    qs = []
    for h in range(2):
        x = _ref_dot(state, p["w1s"][h]) + _ref_dot(action, p["w1a"][h]) + p["b1"][h]
        if use_MLP_ReLU:
            x = jnp.maximum(x, 0.0)
            x = jnp.maximum(_ref_dot(x, p["w2"][h]) + p["b2"][h], 0.0)
        else:
            if use_Residual:
                for k in range(p["blk_w1"].shape[1]):
                    y = _ref_ln(x, p["blk_g"][h, k], p["blk_b"][h, k])
                    hm = jnp.maximum(_ref_dot(y, p["blk_w1"][h, k]) + p["blk_b1"][h, k], 0.0)
                    x = _ref_dot(hm, p["blk_w2"][h, k]) + p["blk_b2"][h, k] + x
            if use_LayerNorm:
                x = _ref_ln(x, p["ln_g"][h], p["ln_b"][h])
        q = jnp.sum(x * p["w3"][h].astype(jnp.float32), axis=-1, keepdims=True) + p["b3"][h]
        qs.append(q)
    return qs[0], qs[1]


# --------------------------------------------------------------------------- main
if __name__ == "__main__":
    B, STATE_DIM, ACTION_DIM = 8, 24, 8

    key = jax.random.PRNGKey(0)
    kp, ks, ka = jax.random.split(key, 3)
    params_f32 = init_critic_params(kp, STATE_DIM, ACTION_DIM)
    params = quantize_params(params_f32)

    state = jax.random.normal(ks, (B, STATE_DIM), jnp.float32)
    action = jax.random.normal(ka, (B, ACTION_DIM), jnp.float32)

    # Primary configuration: residual blocks + LayerNorm head (one fused pallas_call).
    fwd = jax.jit(functools.partial(critic_sac_forward,
                                    use_LayerNorm=True, use_Residual=True))
    q1, q2 = jax.block_until_ready(fwd(params, state, action))
    assert q1.shape == (B, 1) and q2.shape == (B, 1)
    # (a) kernel-matched (bf16-weight) reference: tight tolerance.
    r1, r2 = critic_sac_ref(params, state, action, use_LayerNorm=True, use_Residual=True)
    assert jnp.allclose(q1, r1, atol=5e-3, rtol=5e-3), float(jnp.max(jnp.abs(q1 - r1)))
    assert jnp.allclose(q2, r2, atol=5e-3, rtol=5e-3), float(jnp.max(jnp.abs(q2 - r2)))
    # (b) full-f32 fidelity reference (addresses the review's bf16-numerics concern).
    f1, f2 = critic_sac_ref(params_f32, state, action, use_LayerNorm=True, use_Residual=True)
    assert jnp.allclose(q1, f1, atol=5e-2, rtol=5e-2), float(jnp.max(jnp.abs(q1 - f1)))
    assert jnp.allclose(q2, f2, atol=5e-2, rtol=5e-2), float(jnp.max(jnp.abs(q2 - f2)))

    # MLP-ReLU configuration.
    m1, m2 = jax.block_until_ready(critic_sac_forward(params, state, action, use_MLP_ReLU=True))
    s1, s2 = critic_sac_ref(params, state, action, use_MLP_ReLU=True)
    assert jnp.allclose(m1, s1, atol=5e-3, rtol=5e-3), float(jnp.max(jnp.abs(m1 - s1)))
    assert jnp.allclose(m2, s2, atol=5e-3, rtol=5e-3), float(jnp.max(jnp.abs(m2 - s2)))

    # Plain linear + LayerNorm configuration (no l2/l5, no ReLU — matches PyTorch branch).
    p1, p2 = jax.block_until_ready(critic_sac_forward(params, state, action, use_LayerNorm=True))
    t1, t2 = critic_sac_ref(params, state, action, use_LayerNorm=True)
    assert jnp.allclose(p1, t1, atol=5e-3, rtol=5e-3), float(jnp.max(jnp.abs(p1 - t1)))
    assert jnp.allclose(p2, t2, atol=5e-3, rtol=5e-3), float(jnp.max(jnp.abs(p2 - t2)))

    print("KERNEL_OK")
</pallas_src>

<mosaic_0001>
module attributes {stable_mosaic.version = 11 : i64} {
  func.func @_residual_kernel(%arg0: i32, %arg1: i32, %arg2: memref<8x24xf32, #tpu.memory_space<vmem>>, %arg3: memref<8x8xf32, #tpu.memory_space<vmem>>, %arg4: memref<1x24x512xbf16, #tpu.memory_space<vmem>>, %arg5: memref<1x8x512xbf16, #tpu.memory_space<vmem>>, %arg6: memref<1x1x512xf32, #tpu.memory_space<vmem>>, %arg7: memref<1x2x1x512xf32, #tpu.memory_space<vmem>>, %arg8: memref<1x2x1x512xf32, #tpu.memory_space<vmem>>, %arg9: memref<1x2x512x2048xbf16, #tpu.memory_space<vmem>>, %arg10: memref<1x2x1x2048xf32, #tpu.memory_space<vmem>>, %arg11: memref<1x2x2048x512xbf16, #tpu.memory_space<vmem>>, %arg12: memref<1x2x1x512xf32, #tpu.memory_space<vmem>>, %arg13: memref<1x1x512xf32, #tpu.memory_space<vmem>>, %arg14: memref<1x1x512xf32, #tpu.memory_space<vmem>>, %arg15: memref<1x1x512xbf16, #tpu.memory_space<vmem>>, %arg16: memref<1x1x1xf32, #tpu.memory_space<vmem>>, %arg17: memref<1x8x1xf32, #tpu.memory_space<vmem>>) attributes {dimension_semantics = [#tpu.dimension_semantics<parallel>, #tpu.dimension_semantics<arbitrary>], iteration_bounds = array<i64: 2, 1>, scalar_prefetch = 0 : i64, scratch_operands = 0 : i64, tpu.core_type = #tpu.core_type<tc>, window_params = [{transform_indices = @transform_0, window_bounds = array<i64: 8, 24>}, {transform_indices = @transform_1, window_bounds = array<i64: 8, 8>}, {transform_indices = @transform_2, window_bounds = array<i64: 1, 24, 512>}, {transform_indices = @transform_3, window_bounds = array<i64: 1, 8, 512>}, {transform_indices = @transform_4, window_bounds = array<i64: 1, 1, 512>}, {transform_indices = @transform_5, window_bounds = array<i64: 1, 2, 1, 512>}, {transform_indices = @transform_6, window_bounds = array<i64: 1, 2, 1, 512>}, {transform_indices = @transform_7, window_bounds = array<i64: 1, 2, 512, 2048>}, {transform_indices = @transform_8, window_bounds = array<i64: 1, 2, 1, 2048>}, {transform_indices = @transform_9, window_bounds = array<i64: 1, 2, 2048, 512>}, {transform_indices = @transform_10, window_bounds = array<i64: 1, 2, 1, 512>}, {transform_indices = @transform_11, window_bounds = array<i64: 1, 1, 512>}, {transform_indices = @transform_12, window_bounds = array<i64: 1, 1, 512>}, {transform_indices = @transform_13, window_bounds = array<i64: 1, 1, 512>}, {transform_indices = @transform_14, window_bounds = array<i64: 1, 1, 1>}, {transform_indices = @transform_15, window_bounds = array<i64: 1, 8, 1>}]} {
    %c0 = arith.constant 0 : index
    %c0_0 = arith.constant 0 : index
    %0 = vector.load %arg2[%c0, %c0_0] : memref<8x24xf32, #tpu.memory_space<vmem>>, vector<8x24xf32>
    %c0_1 = arith.constant 0 : index
    %c0_2 = arith.constant 0 : index
    %c0_3 = arith.constant 0 : index
    %1 = vector.load %arg4[%c0_1, %c0_2, %c0_3] : memref<1x24x512xbf16, #tpu.memory_space<vmem>>, vector<1x24x512xbf16>
    %2 = vector.shape_cast %1 : vector<1x24x512xbf16> to vector<24x512xbf16>
    %3 = arith.truncf %0 : vector<8x24xf32> to vector<8x24xbf16>
    %cst = arith.constant dense<0.000000e+00> : vector<8x512xf32>
    %4 = tpu.matmul %3, %2, %cst {dimension_numbers = #tpu.dot_dimension_numbers<[1], [0], [0], [1], [0, 0, 1, 1], [], []>} : vector<8x24xbf16>, vector<24x512xbf16>, vector<8x512xf32> -> vector<8x512xf32>
    %c0_4 = arith.constant 0 : index
    %c0_5 = arith.constant 0 : index
    %5 = vector.load %arg3[%c0_4, %c0_5] : memref<8x8xf32, #tpu.memory_space<vmem>>, vector<8x8xf32>
    %c0_6 = arith.constant 0 : index
    %c0_7 = arith.constant 0 : index
    %c0_8 = arith.constant 0 : index
    %6 = vector.load %arg5[%c0_6, %c0_7, %c0_8] : memref<1x8x512xbf16, #tpu.memory_space<vmem>>, vector<1x8x512xbf16>
    %7 = vector.shape_cast %6 : vector<1x8x512xbf16> to vector<8x512xbf16>
    %8 = arith.truncf %5 : vector<8x8xf32> to vector<8x8xbf16>
    %cst_9 = arith.constant dense<0.000000e+00> : vector<8x512xf32>
    %9 = tpu.matmul %8, %7, %cst_9 {dimension_numbers = #tpu.dot_dimension_numbers<[1], [0], [0], [1], [0, 0, 1, 1], [], []>} : vector<8x8xbf16>, vector<8x512xbf16>, vector<8x512xf32> -> vector<8x512xf32>
    %10 = arith.addf %4, %9 : vector<8x512xf32>
    %c0_10 = arith.constant 0 : index
    %c0_11 = arith.constant 0 : index
    %c0_12 = arith.constant 0 : index
    %11 = vector.load %arg6[%c0_10, %c0_11, %c0_12] : memref<1x1x512xf32, #tpu.memory_space<vmem>>, vector<1x1x512xf32>
    %12 = vector.shape_cast %11 : vector<1x1x512xf32> to vector<1x512xf32>
    %13 = vector.broadcast %12 : vector<1x512xf32> to vector<8x512xf32>
    %14 = arith.addf %10, %13 : vector<8x512xf32>
    %c0_13 = arith.constant 0 : index
    %c0_14 = arith.constant 0 : index
    %c0_15 = arith.constant 0 : index
    %c0_16 = arith.constant 0 : index
    %15 = vector.load %arg7[%c0_13, %c0_14, %c0_15, %c0_16] : memref<1x2x1x512xf32, #tpu.memory_space<vmem>>, vector<1x1x1x512xf32>
    %16 = vector.shape_cast %15 : vector<1x1x1x512xf32> to vector<1x512xf32>
    %c0_17 = arith.constant 0 : index
    %c0_18 = arith.constant 0 : index
    %c0_19 = arith.constant 0 : index
    %c0_20 = arith.constant 0 : index
    %17 = vector.load %arg8[%c0_17, %c0_18, %c0_19, %c0_20] : memref<1x2x1x512xf32, #tpu.memory_space<vmem>>, vector<1x1x1x512xf32>
    %18 = vector.shape_cast %17 : vector<1x1x1x512xf32> to vector<1x512xf32>
    %cst_21 = arith.constant dense<0.000000e+00> : vector<8xf32>
    %19 = vector.multi_reduction <add>, %14, %cst_21 [1] : vector<8x512xf32> to vector<8xf32>
    %20 = vector.shape_cast %19 : vector<8xf32> to vector<8x1xf32>
    %cst_22 = arith.constant 5.120000e+02 : f32
    %21 = vector.broadcast %cst_22 : f32 to vector<8x1xf32>
    %22 = arith.divf %20, %21 : vector<8x1xf32>
    %23 = vector.broadcast %22 : vector<8x1xf32> to vector<8x512xf32>
    %24 = arith.subf %14, %23 : vector<8x512xf32>
    %25 = arith.mulf %24, %24 : vector<8x512xf32>
    %cst_23 = arith.constant dense<0.000000e+00> : vector<8xf32>
    %26 = vector.multi_reduction <add>, %25, %cst_23 [1] : vector<8x512xf32> to vector<8xf32>
    %27 = vector.shape_cast %26 : vector<8xf32> to vector<8x1xf32>
    %cst_24 = arith.constant 5.120000e+02 : f32
    %28 = vector.broadcast %cst_24 : f32 to vector<8x1xf32>
    %29 = arith.divf %27, %28 : vector<8x1xf32>
    %30 = vector.broadcast %22 : vector<8x1xf32> to vector<8x512xf32>
    %31 = arith.subf %14, %30 : vector<8x512xf32>
    %cst_25 = arith.constant 9.99999974E-6 : f32
    %32 = vector.broadcast %cst_25 : f32 to vector<8x1xf32>
    %33 = arith.addf %29, %32 : vector<8x1xf32>
    %34 = math.rsqrt %33 : vector<8x1xf32>
    %35 = vector.broadcast %34 : vector<8x1xf32> to vector<8x512xf32>
    %36 = arith.mulf %31, %35 : vector<8x512xf32>
    %37 = vector.broadcast %16 : vector<1x512xf32> to vector<8x512xf32>
    %38 = arith.mulf %36, %37 : vector<8x512xf32>
    %39 = vector.broadcast %18 : vector<1x512xf32> to vector<8x512xf32>
    %40 = arith.addf %38, %39 : vector<8x512xf32>
    %c0_26 = arith.constant 0 : index
    %c0_27 = arith.constant 0 : index
    %c0_28 = arith.constant 0 : index
    %c0_29 = arith.constant 0 : index
    %41 = vector.load %arg9[%c0_26, %c0_27, %c0_28, %c0_29] : memref<1x2x512x2048xbf16, #tpu.memory_space<vmem>>, vector<1x1x512x2048xbf16>
    %42 = vector.shape_cast %41 : vector<1x1x512x2048xbf16> to vector<512x2048xbf16>
    %43 = arith.truncf %40 : vector<8x512xf32> to vector<8x512xbf16>
    %cst_30 = arith.constant dense<0.000000e+00> : vector<8x2048xf32>
    %44 = tpu.matmul %43, %42, %cst_30 {dimension_numbers = #tpu.dot_dimension_numbers<[1], [0], [0], [1], [0, 0, 1, 1], [], []>} : vector<8x512xbf16>, vector<512x2048xbf16>, vector<8x2048xf32> -> vector<8x2048xf32>
    %c0_31 = arith.constant 0 : index
    %c0_32 = arith.constant 0 : index
    %c0_33 = arith.constant 0 : index
    %c0_34 = arith.constant 0 : index
    %45 = vector.load %arg10[%c0_31, %c0_32, %c0_33, %c0_34] : memref<1x2x1x2048xf32, #tpu.memory_space<vmem>>, vector<1x1x1x2048xf32>
    %46 = vector.shape_cast %45 : vector<1x1x1x2048xf32> to vector<1x2048xf32>
    %47 = vector.broadcast %46 : vector<1x2048xf32> to vector<8x2048xf32>
    %48 = arith.addf %44, %47 : vector<8x2048xf32>
    %cst_35 = arith.constant 0.000000e+00 : f32
    %49 = vector.broadcast %cst_35 : f32 to vector<8x2048xf32>
    %50 = arith.maximumf %48, %49 : vector<8x2048xf32>
    %c0_36 = arith.constant 0 : index
    %c0_37 = arith.constant 0 : index
    %c0_38 = arith.constant 0 : index
    %c0_39 = arith.constant 0 : index
    %51 = vector.load %arg11[%c0_36, %c0_37, %c0_38, %c0_39] : memref<1x2x2048x512xbf16, #tpu.memory_space<vmem>>, vector<1x1x2048x512xbf16>
    %52 = vector.shape_cast %51 : vector<1x1x2048x512xbf16> to vector<2048x512xbf16>
    %53 = arith.truncf %50 : vector<8x2048xf32> to vector<8x2048xbf16>
    %cst_40 = arith.constant dense<0.000000e+00> : vector<8x512xf32>
    %54 = tpu.matmul %53, %52, %cst_40 {dimension_numbers = #tpu.dot_dimension_numbers<[1], [0], [0], [1], [0, 0, 1, 1], [], []>} : vector<8x2048xbf16>, vector<2048x512xbf16>, vector<8x512xf32> -> vector<8x512xf32>
    %c0_41 = arith.constant 0 : index
    %c0_42 = arith.constant 0 : index
    %c0_43 = arith.constant 0 : index
    %c0_44 = arith.constant 0 : index
    %55 = vector.load %arg12[%c0_41, %c0_42, %c0_43, %c0_44] : memref<1x2x1x512xf32, #tpu.memory_space<vmem>>, vector<1x1x1x512xf32>
    %56 = vector.shape_cast %55 : vector<1x1x1x512xf32> to vector<1x512xf32>
    %57 = vector.broadcast %56 : vector<1x512xf32> to vector<8x512xf32>
    %58 = arith.addf %54, %57 : vector<8x512xf32>
    %59 = arith.addf %58, %14 : vector<8x512xf32>
    %c0_45 = arith.constant 0 : index
    %c1 = arith.constant 1 : index
    %c0_46 = arith.constant 0 : index
    %c0_47 = arith.constant 0 : index
    %60 = vector.load %arg7[%c0_45, %c1, %c0_46, %c0_47] : memref<1x2x1x512xf32, #tpu.memory_space<vmem>>, vector<1x1x1x512xf32>
    %61 = vector.shape_cast %60 : vector<1x1x1x512xf32> to vector<1x512xf32>
    %c0_48 = arith.constant 0 : index
    %c1_49 = arith.constant 1 : index
    %c0_50 = arith.constant 0 : index
    %c0_51 = arith.constant 0 : index
    %62 = vector.load %arg8[%c0_48, %c1_49, %c0_50, %c0_51] : memref<1x2x1x512xf32, #tpu.memory_space<vmem>>, vector<1x1x1x512xf32>
    %63 = vector.shape_cast %62 : vector<1x1x1x512xf32> to vector<1x512xf32>
    %cst_52 = arith.constant dense<0.000000e+00> : vector<8xf32>
    %64 = vector.multi_reduction <add>, %59, %cst_52 [1] : vector<8x512xf32> to vector<8xf32>
    %65 = vector.shape_cast %64 : vector<8xf32> to vector<8x1xf32>
    %cst_53 = arith.constant 5.120000e+02 : f32
    %66 = vector.broadcast %cst_53 : f32 to vector<8x1xf32>
    %67 = arith.divf %65, %66 : vector<8x1xf32>
    %68 = vector.broadcast %67 : vector<8x1xf32> to vector<8x512xf32>
    %69 = arith.subf %59, %68 : vector<8x512xf32>
    %70 = arith.mulf %69, %69 : vector<8x512xf32>
    %cst_54 = arith.constant dense<0.000000e+00> : vector<8xf32>
    %71 = vector.multi_reduction <add>, %70, %cst_54 [1] : vector<8x512xf32> to vector<8xf32>
    %72 = vector.shape_cast %71 : vector<8xf32> to vector<8x1xf32>
    %cst_55 = arith.constant 5.120000e+02 : f32
    %73 = vector.broadcast %cst_55 : f32 to vector<8x1xf32>
    %74 = arith.divf %72, %73 : vector<8x1xf32>
    %75 = vector.broadcast %67 : vector<8x1xf32> to vector<8x512xf32>
    %76 = arith.subf %59, %75 : vector<8x512xf32>
    %cst_56 = arith.constant 9.99999974E-6 : f32
    %77 = vector.broadcast %cst_56 : f32 to vector<8x1xf32>
    %78 = arith.addf %74, %77 : vector<8x1xf32>
    %79 = math.rsqrt %78 : vector<8x1xf32>
    %80 = vector.broadcast %79 : vector<8x1xf32> to vector<8x512xf32>
    %81 = arith.mulf %76, %80 : vector<8x512xf32>
    %82 = vector.broadcast %61 : vector<1x512xf32> to vector<8x512xf32>
    %83 = arith.mulf %81, %82 : vector<8x512xf32>
    %84 = vector.broadcast %63 : vector<1x512xf32> to vector<8x512xf32>
    %85 = arith.addf %83, %84 : vector<8x512xf32>
    %c0_57 = arith.constant 0 : index
    %c1_58 = arith.constant 1 : index
    %c0_59 = arith.constant 0 : index
    %c0_60 = arith.constant 0 : index
    %86 = vector.load %arg9[%c0_57, %c1_58, %c0_59, %c0_60] : memref<1x2x512x2048xbf16, #tpu.memory_space<vmem>>, vector<1x1x512x2048xbf16>
    %87 = vector.shape_cast %86 : vector<1x1x512x2048xbf16> to vector<512x2048xbf16>
    %88 = arith.truncf %85 : vector<8x512xf32> to vector<8x512xbf16>
    %cst_61 = arith.constant dense<0.000000e+00> : vector<8x2048xf32>
    %89 = tpu.matmul %88, %87, %cst_61 {dimension_numbers = #tpu.dot_dimension_numbers<[1], [0], [0], [1], [0, 0, 1, 1], [], []>} : vector<8x512xbf16>, vector<512x2048xbf16>, vector<8x2048xf32> -> vector<8x2048xf32>
    %c0_62 = arith.constant 0 : index
    %c1_63 = arith.constant 1 : index
    %c0_64 = arith.constant 0 : index
    %c0_65 = arith.constant 0 : index
    %90 = vector.load %arg10[%c0_62, %c1_63, %c0_64, %c0_65] : memref<1x2x1x2048xf32, #tpu.memory_space<vmem>>, vector<1x1x1x2048xf32>
    %91 = vector.shape_cast %90 : vector<1x1x1x2048xf32> to vector<1x2048xf32>
    %92 = vector.broadcast %91 : vector<1x2048xf32> to vector<8x2048xf32>
    %93 = arith.addf %89, %92 : vector<8x2048xf32>
    %cst_66 = arith.constant 0.000000e+00 : f32
    %94 = vector.broadcast %cst_66 : f32 to vector<8x2048xf32>
    %95 = arith.maximumf %93, %94 : vector<8x2048xf32>
    %c0_67 = arith.constant 0 : index
    %c1_68 = arith.constant 1 : index
    %c0_69 = arith.constant 0 : index
    %c0_70 = arith.constant 0 : index
    %96 = vector.load %arg11[%c0_67, %c1_68, %c0_69, %c0_70] : memref<1x2x2048x512xbf16, #tpu.memory_space<vmem>>, vector<1x1x2048x512xbf16>
    %97 = vector.shape_cast %96 : vector<1x1x2048x512xbf16> to vector<2048x512xbf16>
    %98 = arith.truncf %95 : vector<8x2048xf32> to vector<8x2048xbf16>
    %cst_71 = arith.constant dense<0.000000e+00> : vector<8x512xf32>
    %99 = tpu.matmul %98, %97, %cst_71 {dimension_numbers = #tpu.dot_dimension_numbers<[1], [0], [0], [1], [0, 0, 1, 1], [], []>} : vector<8x2048xbf16>, vector<2048x512xbf16>, vector<8x512xf32> -> vector<8x512xf32>
    %c0_72 = arith.constant 0 : index
    %c1_73 = arith.constant 1 : index
    %c0_74 = arith.constant 0 : index
    %c0_75 = arith.constant 0 : index
    %100 = vector.load %arg12[%c0_72, %c1_73, %c0_74, %c0_75] : memref<1x2x1x512xf32, #tpu.memory_space<vmem>>, vector<1x1x1x512xf32>
    %101 = vector.shape_cast %100 : vector<1x1x1x512xf32> to vector<1x512xf32>
    %102 = vector.broadcast %101 : vector<1x512xf32> to vector<8x512xf32>
    %103 = arith.addf %99, %102 : vector<8x512xf32>
    %104 = arith.addf %103, %59 : vector<8x512xf32>
    %c0_76 = arith.constant 0 : index
    %c0_77 = arith.constant 0 : index
    %c0_78 = arith.constant 0 : index
    %105 = vector.load %arg13[%c0_76, %c0_77, %c0_78] : memref<1x1x512xf32, #tpu.memory_space<vmem>>, vector<1x1x512xf32>
    %106 = vector.shape_cast %105 : vector<1x1x512xf32> to vector<1x512xf32>
    %c0_79 = arith.constant 0 : index
    %c0_80 = arith.constant 0 : index
    %c0_81 = arith.constant 0 : index
    %107 = vector.load %arg14[%c0_79, %c0_80, %c0_81] : memref<1x1x512xf32, #tpu.memory_space<vmem>>, vector<1x1x512xf32>
    %108 = vector.shape_cast %107 : vector<1x1x512xf32> to vector<1x512xf32>
    %cst_82 = arith.constant dense<0.000000e+00> : vector<8xf32>
    %109 = vector.multi_reduction <add>, %104, %cst_82 [1] : vector<8x512xf32> to vector<8xf32>
    %110 = vector.shape_cast %109 : vector<8xf32> to vector<8x1xf32>
    %cst_83 = arith.constant 5.120000e+02 : f32
    %111 = vector.broadcast %cst_83 : f32 to vector<8x1xf32>
    %112 = arith.divf %110, %111 : vector<8x1xf32>
    %113 = vector.broadcast %112 : vector<8x1xf32> to vector<8x512xf32>
    %114 = arith.subf %104, %113 : vector<8x512xf32>
    %115 = arith.mulf %114, %114 : vector<8x512xf32>
    %cst_84 = arith.constant dense<0.000000e+00> : vector<8xf32>
    %116 = vector.multi_reduction <add>, %115, %cst_84 [1] : vector<8x512xf32> to vector<8xf32>
    %117 = vector.shape_cast %116 : vector<8xf32> to vector<8x1xf32>
    %cst_85 = arith.constant 5.120000e+02 : f32
    %118 = vector.broadcast %cst_85 : f32 to vector<8x1xf32>
    %119 = arith.divf %117, %118 : vector<8x1xf32>
    %120 = vector.broadcast %112 : vector<8x1xf32> to vector<8x512xf32>
    %121 = arith.subf %104, %120 : vector<8x512xf32>
    %cst_86 = arith.constant 9.99999974E-6 : f32
    %122 = vector.broadcast %cst_86 : f32 to vector<8x1xf32>
    %123 = arith.addf %119, %122 : vector<8x1xf32>
    %124 = math.rsqrt %123 : vector<8x1xf32>
    %125 = vector.broadcast %124 : vector<8x1xf32> to vector<8x512xf32>
    %126 = arith.mulf %121, %125 : vector<8x512xf32>
    %127 = vector.broadcast %106 : vector<1x512xf32> to vector<8x512xf32>
    %128 = arith.mulf %126, %127 : vector<8x512xf32>
    %129 = vector.broadcast %108 : vector<1x512xf32> to vector<8x512xf32>
    %130 = arith.addf %128, %129 : vector<8x512xf32>
    %c0_87 = arith.constant 0 : index
    %c0_88 = arith.constant 0 : index
    %c0_89 = arith.constant 0 : index
    %131 = vector.load %arg15[%c0_87, %c0_88, %c0_89] : memref<1x1x512xbf16, #tpu.memory_space<vmem>>, vector<1x1x512xbf16>
    %132 = vector.shape_cast %131 : vector<1x1x512xbf16> to vector<1x512xbf16>
    %133 = arith.extf %132 : vector<1x512xbf16> to vector<1x512xf32>
    %134 = vector.broadcast %133 : vector<1x512xf32> to vector<8x512xf32>
    %135 = arith.mulf %130, %134 : vector<8x512xf32>
    %cst_90 = arith.constant dense<0.000000e+00> : vector<8xf32>
    %136 = vector.multi_reduction <add>, %135, %cst_90 [1] : vector<8x512xf32> to vector<8xf32>
    %137 = vector.shape_cast %136 : vector<8xf32> to vector<8x1xf32>
    %c0_91 = arith.constant 0 : index
    %c0_92 = arith.constant 0 : index
    %c0_93 = arith.constant 0 : index
    %138 = vector.load %arg16[%c0_91, %c0_92, %c0_93] : memref<1x1x1xf32, #tpu.memory_space<vmem>>, vector<1x1x1xf32>
    %139 = vector.shape_cast %138 : vector<1x1x1xf32> to vector<1x1xf32>
    %140 = vector.broadcast %139 : vector<1x1xf32> to vector<8x1xf32>
    %141 = arith.addf %137, %140 : vector<8x1xf32>
    %c0_94 = arith.constant 0 : index
    %c0_95 = arith.constant 0 : index
    %c0_96 = arith.constant 0 : index
    %142 = vector.load %arg17[%c0_94, %c0_95, %c0_96] : memref<1x8x1xf32, #tpu.memory_space<vmem>>, vector<1x8x1xf32>
    %143 = vector.shape_cast %142 : vector<1x8x1xf32> to vector<8x1xf32>
    %144 = vector.shape_cast %141 : vector<8x1xf32> to vector<1x8x1xf32>
    tpu.vector_store %arg17[%c0_94, %c0_95, %c0_96], %144 {strides = array<i32>} : memref<1x8x1xf32, #tpu.memory_space<vmem>>, vector<1x8x1xf32>,
    return
  }
  func.func @transform_0(%arg0: i32, %arg1: i32) -> (i32, i32) {
    %c0_i32 = arith.constant 0 : i32
    %c0_i32_0 = arith.constant 0 : i32
    return %arg1, %c0_i32 : i32, i32
  }
  func.func @transform_1(%arg0: i32, %arg1: i32) -> (i32, i32) {
    %c0_i32 = arith.constant 0 : i32
    %c0_i32_0 = arith.constant 0 : i32
    return %arg1, %c0_i32 : i32, i32
  }
  func.func @transform_2(%arg0: i32, %arg1: i32) -> (i32, i32, i32) {
    %c0_i32 = arith.constant 0 : i32
    %c0_i32_0 = arith.constant 0 : i32
    %c0_i32_1 = arith.constant 0 : i32
    return %arg0, %c0_i32, %c0_i32_0 : i32, i32, i32
  }
  func.func @transform_3(%arg0: i32, %arg1: i32) -> (i32, i32, i32) {
    %c0_i32 = arith.constant 0 : i32
    %c0_i32_0 = arith.constant 0 : i32
    %c0_i32_1 = arith.constant 0 : i32
    return %arg0, %c0_i32, %c0_i32_0 : i32, i32, i32
  }
  func.func @transform_4(%arg0: i32, %arg1: i32) -> (i32, i32, i32) {
    %c0_i32 = arith.constant 0 : i32
    %c0_i32_0 = arith.constant 0 : i32
    %c0_i32_1 = arith.constant 0 : i32
    return %arg0, %c0_i32, %c0_i32_0 : i32, i32, i32
  }
  func.func @transform_5(%arg0: i32, %arg1: i32) -> (i32, i32, i32, i32) {
    %c0_i32 = arith.constant 0 : i32
    %c0_i32_0 = arith.constant 0 : i32
    %c0_i32_1 = arith.constant 0 : i32
    %c0_i32_2 = arith.constant 0 : i32
    return %arg0, %c0_i32, %c0_i32_0, %c0_i32_1 : i32, i32, i32, i32
  }
  func.func @transform_6(%arg0: i32, %arg1: i32) -> (i32, i32, i32, i32) {
    %c0_i32 = arith.constant 0 : i32
    %c0_i32_0 = arith.constant 0 : i32
    %c0_i32_1 = arith.constant 0 : i32
    %c0_i32_2 = arith.constant 0 : i32
    return %arg0, %c0_i32, %c0_i32_0, %c0_i32_1 : i32, i32, i32, i32
  }
  func.func @transform_7(%arg0: i32, %arg1: i32) -> (i32, i32, i32, i32) {
    %c0_i32 = arith.constant 0 : i32
    %c0_i32_0 = arith.constant 0 : i32
    %c0_i32_1 = arith.constant 0 : i32
    %c0_i32_2 = arith.constant 0 : i32
    return %arg0, %c0_i32, %c0_i32_0, %c0_i32_1 : i32, i32, i32, i32
  }
  func.func @transform_8(%arg0: i32, %arg1: i32) -> (i32, i32, i32, i32) {
    %c0_i32 = arith.constant 0 : i32
    %c0_i32_0 = arith.constant 0 : i32
    %c0_i32_1 = arith.constant 0 : i32
    %c0_i32_2 = arith.constant 0 : i32
    return %arg0, %c0_i32, %c0_i32_0, %c0_i32_1 : i32, i32, i32, i32
  }
  func.func @transform_9(%arg0: i32, %arg1: i32) -> (i32, i32, i32, i32) {
    %c0_i32 = arith.constant 0 : i32
    %c0_i32_0 = arith.constant 0 : i32
    %c0_i32_1 = arith.constant 0 : i32
    %c0_i32_2 = arith.constant 0 : i32
    return %arg0, %c0_i32, %c0_i32_0, %c0_i32_1 : i32, i32, i32, i32
  }
  func.func @transform_10(%arg0: i32, %arg1: i32) -> (i32, i32, i32, i32) {
    %c0_i32 = arith.constant 0 : i32
    %c0_i32_0 = arith.constant 0 : i32
    %c0_i32_1 = arith.constant 0 : i32
    %c0_i32_2 = arith.constant 0 : i32
    return %arg0, %c0_i32, %c0_i32_0, %c0_i32_1 : i32, i32, i32, i32
  }
  func.func @transform_11(%arg0: i32, %arg1: i32) -> (i32, i32, i32) {
    %c0_i32 = arith.constant 0 : i32
    %c0_i32_0 = arith.constant 0 : i32
    %c0_i32_1 = arith.constant 0 : i32
    return %arg0, %c0_i32, %c0_i32_0 : i32, i32, i32
  }
  func.func @transform_12(%arg0: i32, %arg1: i32) -> (i32, i32, i32) {
    %c0_i32 = arith.constant 0 : i32
    %c0_i32_0 = arith.constant 0 : i32
    %c0_i32_1 = arith.constant 0 : i32
    return %arg0, %c0_i32, %c0_i32_0 : i32, i32, i32
  }
  func.func @transform_13(%arg0: i32, %arg1: i32) -> (i32, i32, i32) {
    %c0_i32 = arith.constant 0 : i32
    %c0_i32_0 = arith.constant 0 : i32
    %c0_i32_1 = arith.constant 0 : i32
    return %arg0, %c0_i32, %c0_i32_0 : i32, i32, i32
  }
  func.func @transform_14(%arg0: i32, %arg1: i32) -> (i32, i32, i32) {
    %c0_i32 = arith.constant 0 : i32
    %c0_i32_0 = arith.constant 0 : i32
    %c0_i32_1 = arith.constant 0 : i32
    return %arg0, %c0_i32, %c0_i32_0 : i32, i32, i32
  }
  func.func @transform_15(%arg0: i32, %arg1: i32) -> (i32, i32, i32) {
    %c0_i32 = arith.constant 0 : i32
    %c0_i32_0 = arith.constant 0 : i32
    return %arg0, %arg1, %c0_i32 : i32, i32, i32
  }
}

</mosaic_0001>

<bundles_post_ra>
// kernel: critic_sac_forward.1
= control target key start
LH: loop header
LB: loop body
LE: loop exit
PB: predicated region body
PF: predicated region fallthrough
CT: control target
= control target key end

     0   :  { %s25783_s0 = inlined_call_operand.hbm [shape: f32[8,24], index: 0, kind: input, shape index: {}]   ;;  %s25784_s1 = inlined_call_operand.hbm [shape: f32[8,8], index: 1, kind: input, shape index: {}]   ;;  %s25785_s2 = inlined_call_operand.hbm [shape: bf16[2,24,512], index: 2, kind: input, shape index: {}]   ;;  %s25786_s3 = inlined_call_operand.hbm [shape: bf16[2,8,512], index: 3, kind: input, shape index: {}]   ;;  %s25787_s4 = inlined_call_operand.hbm [shape: f32[2,1,512], index: 4, kind: input, shape index: {}]   ;;  %s25788_s5 = inlined_call_operand.hbm [shape: f32[2,2,1,512], index: 5, kind: input, shape index: {}]   ;;  %s25789_s6 = inlined_call_operand.hbm [shape: f32[2,2,1,512], index: 6, kind: input, shape index: {}]   ;;  %s25790_s7 = inlined_call_operand.hbm [shape: bf16[2,2,512,2048], index: 7, kind: input, shape index: {}]   ;;  %s25791_s8 = inlined_call_operand.hbm [shape: f32[2,2,1,2048], index: 8, kind: input, shape index: {}]   ;;  %s25792_s9 = inlined_call_operand.hbm [shape: bf16[2,2,2048,512], index: 9, kind: input, shape index: {}]   ;;  %s25793_s10 = inlined_call_operand.hbm [shape: f32[2,2,1,512], index: 10, kind: input, shape index: {}]   ;;  %s25794_s11 = inlined_call_operand.hbm [shape: f32[2,1,512], index: 11, kind: input, shape index: {}]   ;;  %s25795_s12 = inlined_call_operand.hbm [shape: f32[2,1,512], index: 12, kind: input, shape index: {}]   ;;  %s25796_s13 = inlined_call_operand.vmem [shape: bf16[2,1,512], index: 13, kind: input, shape index: {}]   ;;  %s25797_s14 = inlined_call_operand.vmem [shape: f32[2,1,1], index: 14, kind: input, shape index: {}]   ;;  %s25798_s15 = inlined_call_operand.vmem [shape: f32[2,8,1], index: 15, kind: output, shape index: {}]  }
   0x1   :  { %25830 = sst [smem:[#allocation29_spill]] %s25783_s0 }
   0x2   :  { %25831 = sst [smem:[#allocation30_spill]] %s25785_s2 }
   0x3   :  { %25832 = sst [smem:[#allocation31_spill]] %s25786_s3 }
   0x4   :  { %25833 = sst [smem:[#allocation32_spill]] %s25787_s4 }
   0x5   :  { %25834 = sst [smem:[#allocation33_spill]] %s25788_s5 }
   0x6   :  { %25835 = sst [smem:[#allocation34_spill]] %s25789_s6 }
   0x7   :  { %25836 = sst [smem:[#allocation35_spill]] %s25790_s7 }
   0x8   :  { %25837 = sst [smem:[#allocation36_spill]] %s25791_s8 }
   0x9   :  { %25838 = sst [smem:[#allocation37_spill]] %s25796_s13 }
   0xa   :  { %25839 = sst [smem:[#allocation38_spill]] %s25797_s14 }
   0xb   :  { %25840 = sst [smem:[#allocation39_spill]] %s25798_s15 }
   0xc   :  { %20 = vsyncpa [#allocation3], 0 }
   0xd   :  { %21 = vsyncpa [#allocation5], 0  ;;  %s22567_s18 = smov 0   ;;  %s22569_s19 = smov 0  }
   0xe   :  { %s22571_s20 = smov 0   ;;  %s22573_s21 = smov 0  }
   0xf   :  { %s22575_s22 = smov 0   ;;  %s22577_s23 = smov 0  }
  0x10 LB: > { %25841 = sst [smem:[#allocation20_spill]] %s22450_s19  ;;  %s25799_s24 = sadd.s32 4294967295, %s22466_s23   ;;  %s22466_s23 = sphi %s22577_s23, %s27_s23   ;;  %s22462_s22 = sphi %s22575_s22, %s25895_s22   ;;  %s22458_s21 = sphi %s22573_s21, %s25894_s21   ;;  %s22454_s20 = sphi %s22571_s20, %s25893_s20   ;;  %s22450_s19 = sphi %s22569_s19, %s25892_s19   ;;  %s22446_s18 = sphi %s22567_s18, %s25891_s18  }
  0x11   : > { %25842 = sst [smem:[#allocation21_spill]] %s22454_s20  ;;  %s39_s25 = sadd.s32 1, %s22462_s22 }
  0x12   : > { %25843 = sst [smem:[#allocation22_spill]] %s22458_s21  ;;  %p41_p0 = scmp.ge.s32.totalorder %s39_s25, 2 }
  0x13   : > { %25844 = sst [smem:[#allocation23_spill]] %s22462_s22  ;;  %s98_s26 = sadd.s32 1, %s22454_s20 }
  0x14   : > { %25845 = sst [smem:[#allocation24_spill]] %s22466_s23  ;;  %p105_p1 = scmp.ne.s32.totalorder %s22454_s20, %s22450_s19 }
  0x15   : > { %p106_p2 = scmp.eq.s32.totalorder %s22466_s23, 0  ;;  %s25897_s25 = smov (%p41_p0, %s39_s25), 0 }
  0x16   : > { %25846 = sst [smem:[#allocation25_spill]] %s25897_s25  ;;  %p111_p4 = scmp.ne.s32.totalorder %s22450_s19, %s22446_s18 }
  0x17   : > { %p22603_p3 = por %p106_p2, %p105_p1  ;;  %s95_s28 = ssub.s32 %s22462_s22, %s25897_s25 }
  0x18   : > { %p22612_p5 = scmp.eq.s32.totalorder %s25799_s24, 0  ;;  %p96_p6 = scmp.eq.s32.totalorder %s95_s28, 0 }
  0x19   : > { %p17071_p7 = scmp.ge.s32.totalorder %s22466_s23, 1  ;;  %p462_p9 = scmp.lt.s32.totalorder %s22466_s23, 3 }
  0x1a   : > { %s25848_s29 = scalar_select %p22612_p5, 1, 0 }
  0x1b   : > { %p22619_p8 = por %p22612_p5, %p111_p4  ;;  %p22627_p10 = pnand %p17071_p7, %p462_p9 }
  0x1c   : > { %25849 = sst [smem:[#allocation26_spill]] %s25848_s29  ;;  %s22468_s18 = smov [#allocation2]  }
  0x1d   : > { %s25850_s30 = scalar_select %p22619_p8, 1, 0 }
  0x1e   : > { %s22625_s16 = scalar_select %p96_p6, %s22454_s20, %s98_s26  }
  0x1f   : > { %25851 = sst [smem:[#allocation27_spill]] %s25850_s30  ;;  %p20360_p11 = pneg %p22627_p10 }
  0x20   : > { %25852 = sst [smem:[#allocation28_spill]] %s22625_s16  ;;  %s477_s24 = sshll.u32 %s22468_s18, 4  ;;  %s478_s24 = int_to_ptr.vmem [resolvable:$true] %s477_s24 }
  0x21   : > { %s25853_s17 = scalar_select %p22627_p10, 1, 0 }
  0x22   : > { %p20403_p12 = scmp.lt.s32.totalorder %s22466_s23, 2  ;;  %p22636_p13 = pnand %p20360_p11, %p22612_p5 }
  0x23   : > { %s22641_s26 = sand.u32 1, %s22454_s20   ;;  %s501_s16 = sand.u32 1, %s22466_s23  }
  0x24   : > { %s25854_s28 = scalar_select %p22636_p13, 1, 0 }
  0x25   : > { %p22645_p0 = pnand %p20403_p12, %p22603_p3  ;;  %s25856_s0 = sld [smem:[#allocation29_spill]] }
  0x26   : > { %p25812_p2 = pneg %p22636_p13 }
  0x27   : > { %s25855_s25 = scalar_select %p22645_p0, 1, 0 }
  0x2b   : > { %s22022_s18 = scalar_lea.hbm %s25856_s0, 128 }
  0x2c   : > { %p22023_p1 = scmp.ne.s32.totalorder %s25856_s0, %s22022_s18  ;;  %p22029_p3 = scmp.lt.u32.totalorder %s22022_s18, %s25856_s0 }
  0x2e   : > { %p22025_p4 = pnand %p25812_p2, %p22023_p1 }
  0x30   : > { %p22026_p6 = pneg %p22025_p4 }
  0x32   : > { %p22031_p7 = pnand %p22029_p3, %p22026_p6 }
  0x34   : > { %22034 = shalt.err (!%p22031_p7)
}
  0x35   : > { %s22035_s30 = scalar_lea.vmem %s478_s24, 128  ;;  %p22043_p8 = scmp.lt.s32.totalorder %s478_s24, %s478_s24 }
  0x36   : > { %p22036_p9 = scmp.ne.s32.totalorder %s478_s24, %s22035_s30  ;;  %p22044_p5 = scmp.lt.s32.totalorder %s22035_s30, %s22035_s30 }
  0x38   : > { %p22038_p11 = pnand %p22036_p9, %p25812_p2  ;;  %p22045_p10 = por %p22044_p5, %p22043_p8 }
  0x3a   : > { %p22039_p12 = pneg %p22038_p11 }
  0x3c   : > { %p22046_p0 = pnand %p22045_p10, %p22039_p12 }
  0x3e   : > { %22049 = shalt.err (!%p22046_p0)
}
  0x3f   : > { %20363 = dma.hbm_to_vmem [thread:$0]  (!%p22636_p13), %s25856_s0, 128, %s478_s24, [#allocation3]  }
  0x40   : > { %s20327_s15 = smul.u32 48, %s22641_s26  ;;  %s25857_s2 = sld [smem:[#allocation30_spill]] }
  0x41   : > { %s20328_s20 = smul.u32 768, %s22462_s22  ;;  %s17076_s13 = sshll.u32 %s22641_s26, 4 }
  0x42   : > { %s505_s30 = scalar_lea.vmem [#allocation6], %s20327_s15  ;;  %s22682_s14 = scalar_lea.sflag [#allocation3], %s501_s16 }
  0x43   : > { %s512_s19 = sshll.u32 %s505_s30, 4  ;;  %p25858_p8 = scmp.ne.s32.totalorder %s25855_s25, 0  ;;  %s22679_s19 = int_to_ptr.vmem [resolvable:$true] %s512_s19 }
  0x45   : > { %p22688_p10 = pneg %p25858_p8 }
  0x46   : > { %s22677_s27 = scalar_lea.hbm %s25857_s2, %s20328_s20  ;;  %s22055_s15 = scalar_lea.hbm %s25857_s2, 1536 }
  0x47   : > { %s22050_s23 = scalar_lea.hbm %s22677_s27, 768  ;;  %p22056_p4 = scmp.lt.u32.totalorder %s22677_s27, %s25857_s2 }
  0x48   : > { %p22051_p5 = scmp.ne.s32.totalorder %s22677_s27, %s22050_s23  ;;  %p22057_p6 = scmp.lt.u32.totalorder %s22055_s15, %s22050_s23 }
  0x49   : > { %s25859_s24 = scalar_select %p22688_p10, 1, 0 }
  0x4a   : > { %p22053_p0 = pnand %p22688_p10, %p22051_p5  ;;  %p22058_p3 = por %p22057_p6, %p22056_p4 }
  0x4b   : > { %p22059_p7 = scmp.lt.u32.totalorder %s22050_s23, %s22677_s27 }
  0x4c   : > { %p22054_p1 = pneg %p22053_p0 }
  0x4d   : > { %p22060_p9 = por %p22059_p7, %p22058_p3 }
  0x4f   : > { %p22061_p11 = pnand %p22060_p9, %p22054_p1 }
  0x51   : > { %22064 = shalt.err (!%p22061_p11)
}
  0x52   : > { %s22065_s16 = scalar_lea.vmem %s22679_s19, 768  ;;  %s22469_s20 = smov [#allocation6]  }
  0x53   : > { %p22066_p12 = scmp.ne.s32.totalorder %s22679_s19, %s22065_s16  ;;  %s22070_s21 = sshll.u32 %s22469_s20, 4  ;;  %s22071_s21 = int_to_ptr.vmem [resolvable:$false] %s22070_s21 }
  0x54   : > { %s22072_s18 = scalar_lea.vmem %s22071_s21, 1536  ;;  %p22073_p2 = scmp.lt.s32.totalorder %s22679_s19, %s22071_s21 }
  0x55   : > { %p22068_p5 = pnand %p22066_p12, %p22688_p10  ;;  %p22074_p13 = scmp.lt.s32.totalorder %s22072_s18, %s22065_s16 }
  0x57   : > { %p22069_p0 = pneg %p22068_p5  ;;  %p22075_p4 = por %p22074_p13, %p22073_p2 }
  0x59   : > { %p22076_p6 = pnand %p22075_p4, %p22069_p0 }
  0x5b   : > { %22079 = shalt.err (!%p22076_p6)
}
  0x5c   : > { %s25817_s23 = smov 256   ;;  %s25820_s15 = smov 16  }
  0x5d   : > { %20370 = dma.hbm_to_vmem [thread:$0]  (!%p25858_p8), %s22677_s27, 768, %s22679_s19, %s22682_s14, %s25817_s23, %s25817_s23, %s25820_s15  }
  0x5e   : > { %s20221_s30 = sshll.u32 %s22462_s22, 8  ;;  %s25860_s3 = sld [smem:[#allocation31_spill]] }
  0x5f   : > { %s526_s18 = scalar_lea.vmem [#allocation7], %s17076_s13  ;;  %s22724_s2 = sshll.u32 %s22641_s26, 2 }
  0x60   : > { %s534_s0 = sshll.u32 %s526_s18, 4  ;;  %s535_s0 = int_to_ptr.vmem [resolvable:$true] %s534_s0 }
  0x64   : > { %s22719_s21 = scalar_lea.hbm %s25860_s3, %s20221_s30  ;;  %s22085_s30 = scalar_lea.hbm %s25860_s3, 512 }
  0x65   : > { %s22080_s29 = scalar_lea.hbm %s22719_s21, 256  ;;  %p22086_p3 = scmp.lt.u32.totalorder %s22719_s21, %s25860_s3 }
  0x66   : > { %p22081_p13 = scmp.ne.s32.totalorder %s22719_s21, %s22080_s29  ;;  %p22087_p7 = scmp.lt.u32.totalorder %s22085_s30, %s22080_s29 }
  0x67   : > { %p22089_p11 = scmp.lt.u32.totalorder %s22080_s29, %s22719_s21 }
  0x68   : > { %p22083_p2 = pnand %p22081_p13, %p22688_p10  ;;  %p22088_p9 = por %p22087_p7, %p22086_p3 }
  0x6a   : > { %p22084_p1 = pneg %p22083_p2  ;;  %p22090_p12 = por %p22089_p11, %p22088_p9 }
  0x6c   : > { %p22091_p5 = pnand %p22090_p12, %p22084_p1 }
  0x6e   : > { %22094 = shalt.err (!%p22091_p5)
}
  0x6f   : > { %s22095_s13 = scalar_lea.vmem %s535_s0, 256  ;;  %s22472_s18 = smov [#allocation7]  }
  0x70   : > { %p22096_p0 = scmp.ne.s32.totalorder %s535_s0, %s22095_s13  ;;  %s22100_s23 = sshll.u32 %s22472_s18, 4  ;;  %s22101_s23 = int_to_ptr.vmem [resolvable:$false] %s22100_s23 }
  0x71   : > { %s22102_s19 = scalar_lea.vmem %s22101_s23, 512  ;;  %p22103_p13 = scmp.lt.s32.totalorder %s535_s0, %s22101_s23 }
  0x72   : > { %p22098_p4 = pnand %p22096_p0, %p22688_p10  ;;  %p22104_p2 = scmp.lt.s32.totalorder %s22102_s19, %s22095_s13 }
  0x74   : > { %p22099_p6 = pneg %p22098_p4  ;;  %p22105_p8 = por %p22104_p2, %p22103_p13 }
  0x76   : > { %p22106_p3 = pnand %p22105_p8, %p22099_p6 }
  0x78   : > { %22109 = shalt.err (!%p22106_p3)
}
  0x79   : > { %p25861_p7 = scmp.ne.s32.totalorder %s25855_s25, 0  ;;  %s22745_s29 = sshll.u32 %s22462_s22, 6 }
  0x7a   : > { %s25862_s4 = sld [smem:[#allocation32_spill]]  ;;  %s545_s16 = scalar_lea.vmem [#allocation8], %s22724_s2 }
  0x7b   : > { %20373 = dma.hbm_to_vmem [thread:$0]  (!%p25861_p7), %s22719_s21, 256, %s535_s0, %s22682_s14  }
  0x7c   : > { %s553_s20 = sshll.u32 %s545_s16, 4  ;;  %s22755_s13 = sshll.u32 %s22641_s26, 3  ;;  %s554_s20 = int_to_ptr.vmem [resolvable:$true] %s553_s20 }
  0x80   : > { %s22751_s23 = scalar_lea.hbm %s25862_s4, %s22745_s29  ;;  %s22115_s19 = scalar_lea.hbm %s25862_s4, 128 }
  0x81   : > { %s22110_s18 = scalar_lea.hbm %s22751_s23, 64  ;;  %p22116_p11 = scmp.lt.u32.totalorder %s22751_s23, %s25862_s4 }
  0x82   : > { %p22111_p8 = scmp.ne.s32.totalorder %s22751_s23, %s22110_s18  ;;  %p22117_p12 = scmp.lt.u32.totalorder %s22115_s19, %s22110_s18 }
  0x83   : > { %p22119_p0 = scmp.lt.u32.totalorder %s22110_s18, %s22751_s23 }
  0x84   : > { %p22113_p1 = pnand %p22111_p8, %p22688_p10  ;;  %p22118_p5 = por %p22117_p12, %p22116_p11 }
  0x86   : > { %p22114_p9 = pneg %p22113_p1  ;;  %p22120_p4 = por %p22119_p0, %p22118_p5 }
  0x88   : > { %p22121_p6 = pnand %p22120_p4, %p22114_p9 }
  0x8a   : > { %22124 = shalt.err (!%p22121_p6)
}
  0x8b   : > { %s22125_s16 = scalar_lea.vmem %s554_s20, 64  ;;  %s22473_s15 = smov [#allocation8]  }
  0x8c   : > { %p22126_p13 = scmp.ne.s32.totalorder %s554_s20, %s22125_s16  ;;  %s22130_s3 = sshll.u32 %s22473_s15, 4  ;;  %s22131_s3 = int_to_ptr.vmem [resolvable:$false] %s22130_s3 }
  0x8d   : > { %s22132_s0 = scalar_lea.vmem %s22131_s3, 128  ;;  %p22133_p8 = scmp.lt.s32.totalorder %s554_s20, %s22131_s3 }
  0x8e   : > { %p22128_p2 = pnand %p22126_p13, %p22688_p10  ;;  %p22134_p1 = scmp.lt.s32.totalorder %s22132_s0, %s22125_s16 }
  0x90   : > { %p22129_p3 = pneg %p22128_p2  ;;  %p22135_p7 = por %p22134_p1, %p22133_p8 }
  0x92   : > { %p22136_p11 = pnand %p22135_p7, %p22129_p3 }
  0x94   : > { %22139 = shalt.err (!%p22136_p11)
}
  0x95   : > { %p25863_p12 = scmp.ne.s32.totalorder %s25855_s25, 0  ;;  %s22776_s18 = sshll.u32 %s22462_s22, 7 }
  0x96   : > { %s25864_s5 = sld [smem:[#allocation33_spill]]  ;;  %s564_s3 = scalar_lea.vmem [#allocation9], %s22755_s13 }
  0x97   : > { %20376 = dma.hbm_to_vmem [thread:$0]  (!%p25863_p12), %s22751_s23, 64, %s554_s20, %s22682_s14  }
  0x98   : > { %s571_s27 = sshll.u32 %s564_s3, 4  ;;  %s22785_s27 = int_to_ptr.vmem [resolvable:$true] %s571_s27 }
  0x9c   : > { %s22782_s19 = scalar_lea.hbm %s25864_s5, %s22776_s18  ;;  %s22145_s16 = scalar_lea.hbm %s25864_s5, 256 }
  0x9d   : > { %s22140_s30 = scalar_lea.hbm %s22782_s19, 128  ;;  %p22146_p0 = scmp.lt.u32.totalorder %s22782_s19, %s25864_s5 }
  0x9e   : > { %p22141_p7 = scmp.ne.s32.totalorder %s22782_s19, %s22140_s30  ;;  %p22147_p4 = scmp.lt.u32.totalorder %s22145_s16, %s22140_s30 }
  0x9f   : > { %p22149_p13 = scmp.lt.u32.totalorder %s22140_s30, %s22782_s19 }
  0xa0   : > { %p22143_p9 = pnand %p22141_p7, %p22688_p10  ;;  %p22148_p6 = por %p22147_p4, %p22146_p0 }
  0xa2   : > { %p22144_p5 = pneg %p22143_p9  ;;  %p22150_p2 = por %p22149_p13, %p22148_p6 }
  0xa4   : > { %p22151_p3 = pnand %p22150_p2, %p22144_p5 }
  0xa6   : > { %22154 = shalt.err (!%p22151_p3)
}
  0xa7   : > { %s22155_s15 = scalar_lea.vmem %s22785_s27, 128  ;;  %s22474_s3 = smov [#allocation9]  }
  0xa8   : > { %p22156_p8 = scmp.ne.s32.totalorder %s22785_s27, %s22155_s15  ;;  %s22160_s23 = sshll.u32 %s22474_s3, 4  ;;  %s22161_s23 = int_to_ptr.vmem [resolvable:$false] %s22160_s23 }
  0xa9   : > { %s22162_s20 = scalar_lea.vmem %s22161_s23, 256  ;;  %p22163_p7 = scmp.lt.s32.totalorder %s22785_s27, %s22161_s23 }
  0xaa   : > { %p22158_p1 = pnand %p22156_p8, %p22688_p10  ;;  %p22164_p9 = scmp.lt.s32.totalorder %s22162_s20, %s22155_s15 }
  0xac   : > { %p22159_p11 = pneg %p22158_p1  ;;  %p22165_p0 = por %p22164_p9, %p22163_p7 }
  0xae   : > { %p22166_p4 = pnand %p22165_p0, %p22159_p11 }
  0xb0   : > { %22169 = shalt.err (!%p22166_p4)
}
  0xb1   : > { %s25822_s30 = smov 64   ;;  %s25824_s16 = smov 4  }
  0xb2   : > { %20379 = dma.hbm_to_vmem [thread:$0]  (!%p25863_p12), %s22782_s19, 128, %s22785_s27, %s22682_s14, %s25822_s30, %s25822_s30, %s25824_s16  }
  0xb3   : > { %s25865_s6 = sld [smem:[#allocation34_spill]]  ;;  %s585_s3 = scalar_lea.vmem [#allocation10], %s22755_s13 }
  0xb4   : > { %s592_s23 = sshll.u32 %s585_s3, 4  ;;  %s25825_s20 = sshll.u32 %s22641_s26, 13  ;;  %s22819_s23 = int_to_ptr.vmem [resolvable:$true] %s592_s23 }
  0xb9   : > { %s22816_s15 = scalar_lea.hbm %s25865_s6, %s22776_s18  ;;  %s22175_s0 = scalar_lea.hbm %s25865_s6, 256 }
  0xba   : > { %s22170_s4 = scalar_lea.hbm %s22816_s15, 128  ;;  %p22176_p2 = scmp.lt.u32.totalorder %s22816_s15, %s25865_s6 }
  0xbb   : > { %p22171_p5 = scmp.ne.s32.totalorder %s22816_s15, %s22170_s4  ;;  %p22177_p3 = scmp.lt.u32.totalorder %s22175_s0, %s22170_s4 }
  0xbc   : > { %p22179_p1 = scmp.lt.u32.totalorder %s22170_s4, %s22816_s15 }
  0xbd   : > { %p22173_p6 = pnand %p22171_p5, %p22688_p10  ;;  %p22178_p8 = por %p22177_p3, %p22176_p2 }
  0xbf   : > { %p22174_p13 = pneg %p22173_p6  ;;  %p22180_p11 = por %p22179_p1, %p22178_p8 }
  0xc1   : > { %p22181_p7 = pnand %p22180_p11, %p22174_p13 }
  0xc3   : > { %22184 = shalt.err (!%p22181_p7)
}
  0xc4   : > { %s22185_s3 = scalar_lea.vmem %s22819_s23, 128  ;;  %s22477_s19 = smov [#allocation10]  }
  0xc5   : > { %p22186_p9 = scmp.ne.s32.totalorder %s22819_s23, %s22185_s3  ;;  %s22190_s27 = sshll.u32 %s22477_s19, 4  ;;  %s22191_s27 = int_to_ptr.vmem [resolvable:$false] %s22190_s27 }
  0xc6   : > { %s22192_s30 = scalar_lea.vmem %s22191_s27, 256  ;;  %p22193_p5 = scmp.lt.s32.totalorder %s22819_s23, %s22191_s27 }
  0xc7   : > { %p22188_p0 = pnand %p22186_p9, %p22688_p10  ;;  %p22194_p6 = scmp.lt.s32.totalorder %s22192_s30, %s22185_s3 }
  0xc9   : > { %p22189_p4 = pneg %p22188_p0  ;;  %p22195_p2 = por %p22194_p6, %p22193_p5 }
  0xcb   : > { %p22196_p3 = pnand %p22195_p2, %p22189_p4 }
  0xcd   : > { %22199 = shalt.err (!%p22196_p3)
}
  0xce   : > { %s25866_s4 = smov 64   ;;  %s20225_s0 = sshll.u32 %s22462_s22, 17 }
  0xcf   : > { %20382 = dma.hbm_to_vmem [thread:$0]  (!%p25863_p12), %s22816_s15, 128, %s22819_s23, %s22682_s14, %s25866_s4, %s25866_s4, %s25824_s16  }
  0xd0   : > { %s25867_s7 = sld [smem:[#allocation35_spill]]  ;;  %s606_s27 = scalar_lea.vmem [#allocation11], %s25825_s20 }
  0xd1   : > { %s613_s30 = sshll.u32 %s606_s27, 4  ;;  %s22857_s30 = int_to_ptr.vmem [resolvable:$true] %s613_s30 }
  0xd6   : > { %s22853_s19 = scalar_lea.hbm %s25867_s7, %s20225_s0  ;;  %s22205_s21 = scalar_lea.hbm %s25867_s7, 262144 }
  0xd7   : > { %s22200_s5 = scalar_lea.hbm %s22853_s19, 131072  ;;  %p22206_p11 = scmp.lt.u32.totalorder %s22853_s19, %s25867_s7 }
  0xd8   : > { %p22201_p13 = scmp.ne.s32.totalorder %s22853_s19, %s22200_s5  ;;  %p22207_p7 = scmp.lt.u32.totalorder %s22205_s21, %s22200_s5 }
  0xd9   : > { %p22209_p0 = scmp.lt.u32.totalorder %s22200_s5, %s22853_s19 }
  0xda   : > { %p22203_p8 = pnand %p22201_p13, %p22688_p10  ;;  %p22208_p9 = por %p22207_p7, %p22206_p11 }
  0xdc   : > { %p22204_p1 = pneg %p22203_p8  ;;  %p22210_p4 = por %p22209_p0, %p22208_p9 }
  0xde   : > { %p22211_p5 = pnand %p22210_p4, %p22204_p1 }
  0xe0   : > { %22214 = shalt.err (!%p22211_p5)
}
  0xe1   : > { %s22215_s27 = scalar_lea.vmem %s22857_s30, 131072  ;;  %s22478_s15 = smov [#allocation11]  }
  0xe2   : > { %p22216_p6 = scmp.ne.s32.totalorder %s22857_s30, %s22215_s27  ;;  %s22220_s23 = sshll.u32 %s22478_s15, 4  ;;  %s22221_s23 = int_to_ptr.vmem [resolvable:$false] %s22220_s23 }
  0xe3   : > { %s22222_s16 = scalar_lea.vmem %s22221_s23, 262144  ;;  %p22223_p13 = scmp.lt.s32.totalorder %s22857_s30, %s22221_s23 }
  0xe4   : > { %p22218_p2 = pnand %p22216_p6, %p22688_p10  ;;  %p22224_p8 = scmp.lt.s32.totalorder %s22222_s16, %s22215_s27 }
  0xe6   : > { %p22219_p3 = pneg %p22218_p2  ;;  %p22225_p11 = por %p22224_p8, %p22223_p13 }
  0xe8   : > { %p22226_p7 = pnand %p22225_p11, %p22219_p3 }
  0xea   : > { %22229 = shalt.err (!%p22226_p7)
}
  0xeb   : > { %s22479_s5 = smov 1024   ;;  %s17091_s21 = sshll.u32 %s22641_s26, 5 }
  0xec   : > { %20385 = dma.hbm_to_vmem [thread:$0]  (!%p25863_p12), %s22853_s19, 131072, %s22857_s30, %s22682_s14, %s22479_s5, %s22479_s5, %s25866_s4  }
  0xed   : > { %s20226_s3 = sshll.u32 %s22462_s22, 9  ;;  %s25868_s8 = sld [smem:[#allocation36_spill]] }
  0xee   : > { %s627_s16 = scalar_lea.vmem [#allocation12], %s17091_s21  ;;  %s22896_s19 = scalar_lea.hbm %s25792_s9, %s20225_s0 }
  0xef   : > { %s634_s20 = sshll.u32 %s627_s16, 4  ;;  %s22889_s20 = int_to_ptr.vmem [resolvable:$true] %s634_s20 }
  0xf3   : > { %s22887_s27 = scalar_lea.hbm %s25868_s8, %s20226_s3  ;;  %s22235_s15 = scalar_lea.hbm %s25868_s8, 1024 }
  0xf4   : > { %s22230_s30 = scalar_lea.hbm %s22887_s27, 512  ;;  %p22236_p4 = scmp.lt.u32.totalorder %s22887_s27, %s25868_s8 }
  0xf5   : > { %p22231_p1 = scmp.ne.s32.totalorder %s22887_s27, %s22230_s30  ;;  %p22237_p5 = scmp.lt.u32.totalorder %s22235_s15, %s22230_s30 }
  0xf6   : > { %p22239_p2 = scmp.lt.u32.totalorder %s22230_s30, %s22887_s27 }
  0xf7   : > { %p22233_p9 = pnand %p22231_p1, %p22688_p10  ;;  %p22238_p6 = por %p22237_p5, %p22236_p4 }
  0xf9   : > { %p22234_p0 = pneg %p22233_p9  ;;  %p22240_p3 = por %p22239_p2, %p22238_p6 }
  0xfb   : > { %p22241_p13 = pnand %p22240_p3, %p22234_p0 }
  0xfd   : > { %22244 = shalt.err (!%p22241_p13)
}
  0xfe   : > { %s22245_s6 = scalar_lea.vmem %s22889_s20, 512  ;;  %s22480_s7 = smov [#allocation12]  }
  0xff   : > { %p22246_p8 = scmp.ne.s32.totalorder %s22889_s20, %s22245_s6  ;;  %s22250_s0 = sshll.u32 %s22480_s7, 4  ;;  %s22251_s0 = int_to_ptr.vmem [resolvable:$false] %s22250_s0 }
 0x100   : > { %s22252_s16 = scalar_lea.vmem %s22251_s0, 1024  ;;  %p22253_p1 = scmp.lt.s32.totalorder %s22889_s20, %s22251_s0 }
 0x101   : > { %p22248_p11 = pnand %p22246_p8, %p22688_p10  ;;  %p22254_p9 = scmp.lt.s32.totalorder %s22252_s16, %s22245_s6 }
 0x103   : > { %p22249_p7 = pneg %p22248_p11  ;;  %p22255_p4 = por %p22254_p9, %p22253_p1 }
 0x105   : > { %p22256_p5 = pnand %p22255_p4, %p22249_p7 }
 0x107   : > { %22259 = shalt.err (!%p22256_p5)
}
 0x108   : > { %s25869_s30 = smov 16   ;;  %s25870_s5 = smov 256  }
 0x109   : > { %20388 = dma.hbm_to_vmem [thread:$0]  (!%p25863_p12), %s22887_s27, 512, %s22889_s20, %s22682_s14, %s25870_s5, %s25870_s5, %s25869_s30  }
 0x10a   : > { %s25871_s3 = sshll.u32 %s22641_s26, 13  ;;  %s22931_s7 = scalar_lea.hbm %s25793_s10, %s22776_s18 }
 0x10b   : > { %s648_s15 = scalar_lea.vmem [#allocation13], %s25871_s3  ;;  %s22260_s0 = scalar_lea.hbm %s22896_s19, 131072 }
 0x10c   : > { %s655_s23 = sshll.u32 %s648_s15, 4  ;;  %p22261_p0 = scmp.ne.s32.totalorder %s22896_s19, %s22260_s0  ;;  %s22925_s23 = int_to_ptr.vmem [resolvable:$true] %s655_s23 }
 0x10d   : > { %s22265_s22 = scalar_lea.hbm %s25792_s9, 262144  ;;  %p22266_p3 = scmp.lt.u32.totalorder %s22896_s19, %s25792_s9 }
 0x10e   : > { %p22263_p6 = pnand %p22261_p0, %p22688_p10  ;;  %p22267_p13 = scmp.lt.u32.totalorder %s22265_s22, %s22260_s0 }
 0x10f   : > { %p22269_p11 = scmp.lt.u32.totalorder %s22260_s0, %s22896_s19 }
 0x110   : > { %p22264_p2 = pneg %p22263_p6  ;;  %p22268_p8 = por %p22267_p13, %p22266_p3 }
 0x112   : > { %p22270_p7 = por %p22269_p11, %p22268_p8 }
 0x114   : > { %p22271_p1 = pnand %p22270_p7, %p22264_p2 }
 0x116   : > { %22274 = shalt.err (!%p22271_p1)
}
 0x117   : > { %s22275_s18 = scalar_lea.vmem %s22925_s23, 131072  ;;  %s22481_s8 = smov [#allocation13]  }
 0x118   : > { %p22276_p9 = scmp.ne.s32.totalorder %s22925_s23, %s22275_s18  ;;  %s22280_s27 = sshll.u32 %s22481_s8, 4  ;;  %s22281_s27 = int_to_ptr.vmem [resolvable:$false] %s22280_s27 }
 0x119   : > { %s22282_s3 = scalar_lea.vmem %s22281_s27, 262144  ;;  %p22283_p0 = scmp.lt.s32.totalorder %s22925_s23, %s22281_s27 }
 0x11a   : > { %p22278_p4 = pnand %p22276_p9, %p22688_p10  ;;  %p22284_p6 = scmp.lt.s32.totalorder %s22282_s3, %s22275_s18 }
 0x11c   : > { %p22279_p5 = pneg %p22278_p4  ;;  %p22285_p3 = por %p22284_p6, %p22283_p0 }
 0x11e   : > { %p22286_p13 = pnand %p22285_p3, %p22279_p5 }
 0x120   : > { %22289 = shalt.err (!%p22286_p13)
}
 0x121   : > { %20391 = dma.hbm_to_vmem [thread:$0]  (!%p25863_p12), %s22896_s19, 131072, %s22925_s23, %s22682_s14, %s25870_s5, %s25870_s5, %s25869_s30  }
 0x122   : > { %s669_s22 = scalar_lea.vmem [#allocation14], %s22755_s13  ;;  %s22965_s0 = scalar_lea.hbm %s25794_s11, %s22745_s29 }
 0x123   : > { %s676_s15 = sshll.u32 %s669_s22, 4  ;;  %s22290_s16 = scalar_lea.hbm %s22931_s7, 128  ;;  %s22959_s15 = int_to_ptr.vmem [resolvable:$true] %s676_s15 }
 0x124   : > { %p22291_p2 = scmp.ne.s32.totalorder %s22931_s7, %s22290_s16  ;;  %s22295_s18 = scalar_lea.hbm %s25793_s10, 256 }
 0x125   : > { %p22296_p7 = scmp.lt.u32.totalorder %s22931_s7, %s25793_s10  ;;  %p22297_p1 = scmp.lt.u32.totalorder %s22295_s18, %s22290_s16 }
 0x126   : > { %p22293_p8 = pnand %p22291_p2, %p22688_p10  ;;  %p22299_p4 = scmp.lt.u32.totalorder %s22290_s16, %s22931_s7 }
 0x127   : > { %p22298_p9 = por %p22297_p1, %p22296_p7 }
 0x128   : > { %p22294_p11 = pneg %p22293_p8 }
 0x129   : > { %p22300_p5 = por %p22299_p4, %p22298_p9 }
 0x12b   : > { %p22301_p0 = pnand %p22300_p5, %p22294_p11 }
 0x12d   : > { %22304 = shalt.err (!%p22301_p0)
}
 0x12e   : > { %s22305_s13 = scalar_lea.vmem %s22959_s15, 128  ;;  %s22482_s30 = smov [#allocation14]  }
 0x12f   : > { %p22306_p6 = scmp.ne.s32.totalorder %s22959_s15, %s22305_s13  ;;  %s22310_s5 = sshll.u32 %s22482_s30, 4  ;;  %s22311_s5 = int_to_ptr.vmem [resolvable:$false] %s22310_s5 }
 0x130   : > { %s22312_s23 = scalar_lea.vmem %s22311_s5, 256  ;;  %p22313_p2 = scmp.lt.s32.totalorder %s22959_s15, %s22311_s5 }
 0x131   : > { %p22308_p3 = pnand %p22306_p6, %p22688_p10  ;;  %p22314_p8 = scmp.lt.s32.totalorder %s22312_s23, %s22305_s13 }
 0x133   : > { %p22309_p13 = pneg %p22308_p3  ;;  %p22315_p7 = por %p22314_p8, %p22313_p2 }
 0x135   : > { %p22316_p1 = pnand %p22315_p7, %p22309_p13 }
 0x137   : > { %22319 = shalt.err (!%p22316_p1)
}
 0x138   : > { %s25872_s27 = smov 4   ;;  %s690_s3 = scalar_lea.vmem [#allocation15], %s22724_s2 }
 0x139   : > { %20394 = dma.hbm_to_vmem [thread:$0]  (!%p25863_p12), %s22931_s7, 128, %s22959_s15, %s22682_s14, %s25866_s4, %s25866_s4, %s25872_s27  }
 0x13a   : > { %s698_s22 = sshll.u32 %s690_s3, 4  ;;  %s22483_s21 = smov [#allocation4]   ;;  %s22993_s22 = int_to_ptr.vmem [resolvable:$true] %s698_s22 }
 0x13b   : > { %s490_s6 = sshll.u32 %s22483_s21, 4  ;;  %s22320_s16 = scalar_lea.hbm %s22965_s0, 64  ;;  %s491_s6 = int_to_ptr.vmem [resolvable:$true] %s490_s6 }
 0x13c   : > { %p22321_p11 = scmp.ne.s32.totalorder %s22965_s0, %s22320_s16  ;;  %s22325_s18 = scalar_lea.hbm %s25794_s11, 128 }
 0x13d   : > { %p22326_p5 = scmp.lt.u32.totalorder %s22965_s0, %s25794_s11  ;;  %p22327_p0 = scmp.lt.u32.totalorder %s22325_s18, %s22320_s16 }
 0x13e   : > { %p22323_p9 = pnand %p22321_p11, %p22688_p10  ;;  %p22329_p3 = scmp.lt.u32.totalorder %s22320_s16, %s22965_s0 }
 0x13f   : > { %p22328_p6 = por %p22327_p0, %p22326_p5 }
 0x140   : > { %p22324_p4 = pneg %p22323_p9 }
 0x141   : > { %p22330_p13 = por %p22329_p3, %p22328_p6 }
 0x143   : > { %p22331_p2 = pnand %p22330_p13, %p22324_p4 }
 0x145   : > { %22334 = shalt.err (!%p22331_p2)
}
 0x146   : > { %s22335_s4 = scalar_lea.vmem %s22993_s22, 64  ;;  %s22484_s7 = smov [#allocation15]  }
 0x147   : > { %p22336_p8 = scmp.ne.s32.totalorder %s22993_s22, %s22335_s4  ;;  %s22340_s15 = sshll.u32 %s22484_s7, 4  ;;  %s22341_s15 = int_to_ptr.vmem [resolvable:$false] %s22340_s15 }
 0x148   : > { %s22342_s13 = scalar_lea.vmem %s22341_s15, 128  ;;  %p22343_p11 = scmp.lt.s32.totalorder %s22993_s22, %s22341_s15 }
 0x149   : > { %p22338_p7 = pnand %p22336_p8, %p22688_p10  ;;  %p22344_p9 = scmp.lt.s32.totalorder %s22342_s13, %s22335_s4 }
 0x14b   : > { %p22339_p1 = pneg %p22338_p7  ;;  %p22345_p5 = por %p22344_p9, %p22343_p11 }
 0x14d   : > { %p22346_p0 = pnand %p22345_p5, %p22339_p1 }
 0x14f   : > { %22349 = shalt.err (!%p22346_p0)
}
 0x150   : > { %20397 = dma.hbm_to_vmem [thread:$0]  (!%p25863_p12), %s22965_s0, 64, %s22993_s22, %s22682_s14  }
 0x151   : > { %s22350_s23 = scalar_lea.hbm %s25784_s1, 128  ;;  %p25873_p6 = scmp.ne.s32.totalorder %s25854_s28, 0 }
 0x152   : > { %p22351_p4 = scmp.ne.s32.totalorder %s25784_s1, %s22350_s23  ;;  %p22357_p8 = scmp.lt.u32.totalorder %s22350_s23, %s25784_s1 }
 0x153   : > { %p25874_p3 = pneg %p25873_p6 }
 0x155   : > { %p22353_p13 = pnand %p22351_p4, %p25874_p3 }
 0x157   : > { %p22354_p2 = pneg %p22353_p13 }
 0x159   : > { %p22359_p7 = pnand %p22357_p8, %p22354_p2 }
 0x15b   : > { %22362 = shalt.err (!%p22359_p7)
}
 0x15c   : > { %s22363_s0 = scalar_lea.vmem %s491_s6, 128  ;;  %p25875_p11 = pmov %p25874_p3 }
 0x15d   : > { %p22364_p1 = scmp.ne.s32.totalorder %s491_s6, %s22363_s0  ;;  %p22371_p0 = scmp.lt.s32.totalorder %s491_s6, %s491_s6 }
 0x15e   : > { %p22372_p12 = scmp.lt.s32.totalorder %s22363_s0, %s22363_s0 }
 0x15f   : > { %p22366_p9 = pnand %p22364_p1, %p25875_p11 }
 0x160   : > { %p22373_p10 = por %p22372_p12, %p22371_p0 }
 0x161   : > { %p22367_p5 = pneg %p22366_p9 }
 0x163   : > { %p22374_p3 = pnand %p22373_p10, %p22367_p5 }
 0x165   : > { %22377 = shalt.err (!%p22374_p3)
}
 0x166   : > { %20366 = dma.hbm_to_vmem [thread:$0]  (!%p25873_p6), %s25784_s1, 128, %s491_s6, [#allocation5]  }
 0x167   : > { %s23041_s8 = scalar_lea.hbm %s25795_s12, %s22745_s29  ;;  %s709_s19 = scalar_lea.vmem [#allocation16], %s22724_s2 }
 0x168   : > { %s717_s4 = sshll.u32 %s709_s19, 4  ;;  %s22378_s28 = scalar_lea.hbm %s23041_s8, 64  ;;  %s718_s4 = int_to_ptr.vmem [resolvable:$true] %s717_s4 }
 0x169   : > { %p22379_p10 = scmp.ne.s32.totalorder %s23041_s8, %s22378_s28  ;;  %p25876_p12 = scmp.ne.s32.totalorder %s25859_s24, 0 }
 0x16a   : > { %s22383_s6 = scalar_lea.hbm %s25795_s12, 128  ;;  %p22384_p6 = scmp.lt.u32.totalorder %s23041_s8, %s25795_s12 }
 0x16b   : > { %p22381_p4 = pnand %p22379_p10, %p25876_p12  ;;  %p22385_p2 = scmp.lt.u32.totalorder %s22383_s6, %s22378_s28 }
 0x16c   : > { %p22387_p7 = scmp.lt.u32.totalorder %s22378_s28, %s23041_s8 }
 0x16d   : > { %p22382_p13 = pneg %p22381_p4  ;;  %p22386_p8 = por %p22385_p2, %p22384_p6 }
 0x16f   : > { %p22388_p1 = por %p22387_p7, %p22386_p8 }
 0x171   : > { %p22389_p11 = pnand %p22388_p1, %p22382_p13 }
 0x173   : > { %22392 = shalt.err (!%p22389_p11)
}
 0x174   : > { %s22393_s2 = scalar_lea.vmem %s718_s4, 64  ;;  %s22485_s29 = smov [#allocation16]  }
 0x175   : > { %p22394_p9 = scmp.ne.s32.totalorder %s718_s4, %s22393_s2  ;;  %s22398_s5 = sshll.u32 %s22485_s29, 4  ;;  %s22399_s5 = int_to_ptr.vmem [resolvable:$false] %s22398_s5 }
 0x176   : > { %s22400_s23 = scalar_lea.vmem %s22399_s5, 128  ;;  %p22401_p3 = scmp.lt.s32.totalorder %s718_s4, %s22399_s5 }
 0x177   : > { %p22396_p5 = pnand %p22394_p9, %p25876_p12  ;;  %p22402_p10 = scmp.lt.s32.totalorder %s22400_s23, %s22393_s2 }
 0x179   : > { %p22397_p0 = pneg %p22396_p5  ;;  %p22403_p4 = por %p22402_p10, %p22401_p3 }
 0x17b   : > { %p22404_p2 = pnand %p22403_p4, %p22397_p0 }
 0x17d   : > { %22407 = shalt.err (!%p22404_p2)
}
 0x17e   : > { %p25877_p6 = scmp.ne.s32.totalorder %s25855_s25, 0  ;;  %p25878_p13 = scmp.ne.s32.totalorder %s25853_s17, 0 }
 0x17f   : > { %s25879_s24 = sld [smem:[#allocation26_spill]] (!%p25878_p13) }
 0x180   : > { %20400 = dma.hbm_to_vmem [thread:$0]  (!%p25877_p6), %s23041_s8, 64, %s718_s4, %s22682_s14  }
 0x181   : > { %739 = sbr.rel (%p25878_p13) target bundleno = 4120 (0x1018), region = 80 }
 0x185   : > { %p25880_p12 = scmp.ne.s32.totalorder (!%p25878_p13), %s25879_s24, 0 }
 0x188   : > { %22433 = dma.done.wait (%p25880_p12), [#allocation3], 128  }
 0x189   : > { %22435 = vsyncadd (%p25880_p12), [#allocation3], 4294967168 }
 0x18a   : > { %22437 = dma.done.wait (%p25880_p12), [#allocation5], 128  }
 0x18b   : > { %22439 = vsyncadd (%p25880_p12), [#allocation5], 4294967168  ;;  %s25881_s27 = sld [smem:[#allocation24_spill]]  ;;  %s25883_s3 = sld [smem:[#allocation20_spill]] }
 0x18c   : > { %s25884_s21 = sld [smem:[#allocation27_spill]] }
 0x191   : > { %s25882_s25 = sadd.s32 4294967295, %s25881_s27   ;;  %s23075_s16 = sand.u32 1, %s25883_s3  }
 0x192   : > { %s749_s14 = sand.u32 1, %s25882_s25   ;;  %s20329_s17 = smul.u32 48, %s23075_s16 }
 0x193   : > { %s750_s0 = scalar_lea.sflag [#allocation3], %s749_s14  ;;  %p25885_p8 = scmp.ne.s32.totalorder %s25884_s21, 0 }
 0x194   : > { %s753_s22 = scalar_lea.vmem [#allocation6], %s20329_s17 }
 0x195   : > { %22441 = dma.done.wait (%p25885_p8), %s750_s0, 264256  }
 0x196   : > { %22443 = vsyncadd (%p25885_p8), %s750_s0, 4294703040  ;;  %s17109_s20 = sshll.u32 %s23075_s16, 4  ;;  %v22486_v0 = vmov 0   ;;  %vm990_vm0 = vcmask 1043456   ;;  %v972_v3 = vld [vmem:[#allocation4] sm:$0xff]  ;;  %vm986_vm1 = vcmask 64512   ;;  %v1215_v25 = vlaneseq }
 0x197   : > { %1035 = vmatprep.mubr.bf16.mxu0 %v22486_v0  ;;  %1076 = vmatprep.mubr.bf16.mxu1 %v22486_v0  ;;  %s762_s26 = scalar_lea.vmem [#allocation7], %s17109_s20  ;;  %v20468_v8 = vld [vmem:[%s753_s22 + $0x4] ss:$16 sps:$4 sm:$0xff]   ;;  %v975_v11 = vpack.c.bf16 %v972_v3, %v972_v3  ;;  %v20466_v12 = vld [vmem:[%s753_s22] ss:$16 sps:$4 sm:$0xff]   ;;  %v970_v16 = vld [vmem:[%s753_s22 + $0x28] sm:$0xff] }
 0x198   : > { %v973_v1 = vld [vmem:[%s762_s26] sm:$0xff]  ;;  %v974_v2 = vld [vmem:[%s762_s26 + $0x8] sm:$0xff]  ;;  %v17136_v18 = vcombine.high %v970_v16, %v970_v16  ;;  %v17135_v20 = vcombine.low %v970_v16, %v970_v16  ;;  %vm1115_vm2 = vcmask 195584   ;;  %s23092_s18 = sshll.u32 %s23075_s16, 2  ;;  %v23094_v26 = vshrl.u32 %v1215_v25, 7  ;;  %s17113_s19 = sshll.u32 %s23075_s16, 13 }
 0x199   : > { %v17122_v4 = vcombine.high %v973_v1, %v973_v1  ;;  %v17124_v5 = vcombine.high %v974_v2, %v974_v2  ;;  %v17121_v6 = vcombine.low %v973_v1, %v973_v1  ;;  %v17123_v7 = vcombine.low %v974_v2, %v974_v2  ;;  %v20471_v13 = vld [vmem:[%s753_s22 + $0xc] ss:$16 sps:$4 sm:$0xff]   ;;  %v20469_v14 = vld [vmem:[%s753_s22 + $0x8] ss:$16 sps:$4 sm:$0xff]   ;;  %v969_v15 = vld [vmem:[%s753_s22 + $0x20] sm:$0xff]  ;;  %s771_s8 = scalar_lea.vmem [#allocation8], %s23092_s18 }
 0x19a   : > { %v17134_v17 = vcombine.high %v969_v15, %v969_v15  ;;  %v17133_v19 = vcombine.low %v969_v15, %v969_v15  ;;  %v964_v21 = vld [vmem:[#allocation2] sm:$0xff]  ;;  %v1126_v23 = vsel %vm990_vm0, %v17135_v20, 0  ;;  %v23097_v35 = vsub.s32 0, %v23094_v26  ;;  %v1213_v36 = vld [vmem:[%s771_s8] sm:$0xf]  ;;  %s23128_s4 = scalar_lea.vmem [#allocation11], %s17113_s19 }
 0x19b   : > { %17125 = vmatprep.subr.msk.bf16.mxu0 %vm990_vm0, %v17122_v4  ;;  %17127 = vmatprep.subr.msk.bf16.mxu1 %vm990_vm0, %v17124_v5  ;;  %v992_v9 = vsel %vm990_vm0, %v17121_v6, 0  ;;  %v998_v10 = vsel %vm990_vm0, %v17123_v7, 0  ;;  %v971_v24 = vpack.c.bf16 %v964_v21, %v964_v21  ;;  %v23101_v37 = vsub.s32 1, %v23094_v26  ;;  %v1318_v63 = vld [vmem:[%s23128_s4] sm:$0xff]  ;;  %v1319_v1 = vld [vmem:[%s23128_s4 + $0x8] sm:$0xff]  ;;  %s23219_s28 = sshll.u32 %s23075_s16, 3 }
 0x19c   : > { %1004 = vmatpush1.bf16.msra.mxu0 %v992_v9  ;;  %1045 = vmatpush1.bf16.msra.mxu1 %v998_v10  ;;  %v1120_v22 = vsel %vm990_vm0, %v17133_v19, 0  ;;  %v23104_v38 = vsub.s32 2, %v23094_v26  ;;  %v1218_v39 = vrot.slane %v1213_v36, %v23097_v35  ;;  %v23109_v43 = vsub.s32 3, %v23094_v26  ;;  %v1327_v4 = vld [vmem:[%s23128_s4 + $0x48] sm:$0xff]  ;;  %v1334_v5 = vld [vmem:[%s23128_s4 + $0x80] sm:$0xff]  ;;  %s780_s7 = scalar_lea.vmem [#allocation9], %s23219_s28 }
 0x19d   : > { %1131 = vmatprep.subr.bf16.mxu0 %v20468_v8  ;;  %1172 = vmatprep.subr.bf16.mxu1 %v20471_v13  ;;  %v1222_v42 = vrot.slane %v1213_v36, %v23101_v37  ;;  %v1342_v6 = vld [vmem:[%s23128_s4 + $0xc0] sm:$0xff]  ;;  %v17143_v7 = vcombine.low %v1319_v1, %v1327_v4  ;;  %v17144_v8 = vcombine.high %v1319_v1, %v1327_v4  ;;  %v1335_v10 = vld [vmem:[%s23128_s4 + $0x88] sm:$0xff]  ;;  %s789_s15 = scalar_lea.vmem [#allocation10], %s23219_s28  ;;  %s23612_s6 = scalar_lea.vmem [#allocation13], %s17113_s19  ;;  %vm16740_vm3 = vcmask 7168  }
 0x19e   : > { %v1226_v48 = vrot.slane %v1213_v36, %v23104_v38  ;;  %v1230_v57 = vrot.slane %v1213_v36, %v23109_v43  ;;  %v17158_v9 = vcombine.high %v1334_v5, %v1342_v6  ;;  %v1351_v15 = vld [vmem:[%s23128_s4 + $0x108] sm:$0xff]  ;;  %v1366_v21 = vld [vmem:[%s23128_s4 + $0x180] sm:$0xff]  ;;  %s17114_s13 = sshll.u32 %s23075_s16, 5  ;;  %s24150_s2 = scalar_lea.vmem [#allocation14], %s23219_s28 }
 0x19f   : > { %17126 = vmatmul.mubr.msk.bf16.vlgmr.msra.gmra.mrb[0].mxu0 %vm986_vm1, %v975_v11  ;;  %17128 = vmatmul.mubr.msk.bf16.vlgmr.msra.gmra.mrb[0].mxu1 %vm986_vm1, %v975_v11  ;;  %v1343_v11 = vld [vmem:[%s23128_s4 + $0xc8] sm:$0xff]  ;;  %s23741_s30 = scalar_lea.vmem [#allocation12], %s17114_s13  ;;  %s25886_s29 = sld [smem:[#allocation22_spill]] }
 0x1a0   : > { %1132 = vmatpush1.bf16.msra.mxu0 %v20466_v12  ;;  %1173 = vmatpush1.bf16.msra.mxu1 %v20469_v14  ;;  %v1350_v12 = vld [vmem:[%s23128_s4 + $0x100] sm:$0xff]  ;;  %v17160_v13 = vcombine.high %v1335_v10, %v1343_v11  ;;  %v1359_v16 = vld [vmem:[%s23128_s4 + $0x148] sm:$0xff]  ;;  %s25887_s27 = sld [smem:[#allocation37_spill]]  ;;  %s834_s3 = scalar_lea.vmem [#allocation15], %s23092_s18 }
 0x1a1   : > { %17137 = vmatprep.subr.msk.bf16.mxu0 %vm990_vm0, %v17134_v17  ;;  %17139 = vmatprep.subr.msk.bf16.mxu1 %vm990_vm0, %v17136_v18  ;;  %v1358_v14 = vld [vmem:[%s23128_s4 + $0x140] sm:$0xff]  ;;  %v17157_v17 = vcombine.low %v1334_v5, %v1342_v6  ;;  %v17159_v18 = vcombine.low %v1335_v10, %v1343_v11  ;;  %v17176_v20 = vcombine.high %v1351_v15, %v1359_v16  ;;  %v1439_v1 = vld [vmem:[%s23128_s4 + $0x3c8] sm:$0xff]  ;;  %s843_s21 = scalar_lea.vmem [#allocation16], %s23092_s18  ;;  %s25888_s17 = sld [smem:[#allocation38_spill]] }
 0x1a2   : > { %1163 = vmatprep.mubr.bf16.mxu0 %v22486_v0  ;;  %1204 = vmatprep.mubr.bf16.mxu1 %v22486_v0  ;;  %v1326_v0 = vld [vmem:[%s23128_s4 + $0x40] sm:$0xff]  ;;  %v17174_v19 = vcombine.high %v1350_v12, %v1358_v14  ;;  %v17173_v25 = vcombine.low %v1350_v12, %v1358_v14  ;;  %s25889_s18 = sld [smem:[#allocation39_spill]] }
 0x1a3   : > { %v17141_v2 = vcombine.low %v1318_v63, %v1326_v0  ;;  %v17142_v3 = vcombine.high %v1318_v63, %v1326_v0  ;;  %v1438_v63 = vld [vmem:[%s23128_s4 + $0x3c0] sm:$0xff]  ;;  %v1431_v0 = vld [vmem:[%s23128_s4 + $0x388] sm:$0xff] }
 0x1a4   : > { %1134 = vmatpush1.bf16.msra.mxu0 %v1120_v22  ;;  %1175 = vmatpush1.bf16.msra.mxu1 %v1126_v23  ;;  %v1374_v22 = vld [vmem:[%s23128_s4 + $0x1c0] sm:$0xff]  ;;  %v1367_v23 = vld [vmem:[%s23128_s4 + $0x188] sm:$0xff]  ;;  %v17256_v5 = vcombine.high %v1431_v0, %v1439_v1  ;;  %v17255_v11 = vcombine.low %v1431_v0, %v1439_v1 }
 0x1a5   : > { %4478 = vmatprep.subr.bf16.mxu0 %v17142_v3  ;;  %4560 = vmatprep.subr.bf16.mxu1 %v17144_v8  ;;  %v1446_v6 = vld [vmem:[%s23128_s4 + $0x400] sm:$0xff]  ;;  %v1447_v8 = vld [vmem:[%s23128_s4 + $0x408] sm:$0xff]  ;;  %p949_p7 = scmp.lt.s32.totalorder %s25886_s29, 1 }
 0x1a6   : > { %v1462_v14 = vld [vmem:[%s23128_s4 + $0x480] sm:$0xff]  ;;  %v1511_v0 = vld [vmem:[%s23128_s4 + $0x608] sm:$0xff] }
 0x1a7   : > { %17138 = vmatmul.mubr.msk.bf16.vlgmr.msra.gmra.mrb[4].mxu0 %vm1115_vm2, %v971_v24  ;;  %17140 = vmatmul.mubr.msk.bf16.vlgmr.msra.gmra.mrb[4].mxu1 %vm1115_vm2, %v971_v24  ;;  %v1375_v24 = vld [vmem:[%s23128_s4 + $0x1c8] sm:$0xff]  ;;  %s25899_s29 = smov (!%p949_p7, %s25886_s29), 1 }
 0x1a8   : > { %4479 = vmatpush1.bf16.msra.mxu0 %v17141_v2  ;;  %4561 = vmatpush1.bf16.msra.mxu1 %v17143_v7  ;;  %v17191_v36 = vcombine.low %v1367_v23, %v1375_v24  ;;  %v1454_v7 = vld [vmem:[%s23128_s4 + $0x440] sm:$0xff]  ;;  %s17119_s5 = sshll.u32 %s25899_s29, 2  ;;  %s955_s0 = scalar_lea.vmem %s25888_s17, %s25899_s29 }
 0x1a9   : > { %4480 = vmatprep.subr.bf16.mxu0 %v17158_v9  ;;  %4562 = vmatprep.subr.bf16.mxu1 %v17160_v13  ;;  %v1455_v9 = vld [vmem:[%s23128_s4 + $0x448] sm:$0xff]  ;;  %v17270_v12 = vcombine.high %v1446_v6, %v1454_v7  ;;  %s952_s25 = scalar_lea.vmem %s25887_s27, %s17119_s5  ;;  %s17120_s22 = sshll.u32 %s25899_s29, 3 }
 0x1aa   : > { %v17272_v13 = vcombine.high %v1447_v8, %v1455_v9  ;;  %s962_s8 = scalar_lea.vmem %s25889_s18, %s17120_s22 }
 0x1ac   : > { %4481 = vmatpush1.bf16.msra.mxu0 %v17157_v17  ;;  %4563 = vmatpush1.bf16.msra.mxu1 %v17159_v18  ;;  %v1471_v17 = vld [vmem:[%s23128_s4 + $0x4c8] sm:$0xff]  ;;  %v17269_v18 = vcombine.low %v1446_v6, %v1454_v7 }
 0x1ad   : > { %4482 = vmatprep.subr.bf16.mxu0 %v17174_v19  ;;  %4564 = vmatprep.subr.bf16.mxu1 %v17176_v20  ;;  %v17271_v19 = vcombine.low %v1447_v8, %v1455_v9  ;;  %v1527_v9 = vld [vmem:[%s23128_s4 + $0x688] sm:$0xff] }
 0x1b0   : > { %4483 = vmatpush1.bf16.msra.mxu0 %v17173_v25  ;;  %v1487_v25 = vld [vmem:[%s23128_s4 + $0x548] sm:$0xff] }
 0x272   : > { %v1037_v27 = vpop.f32.mrb[0].mxu0  ;;  %v1078_v28 = vpop.f32.mrb[0].mxu1 }
 0x273   : > { %v1039_v29 = vpop.f32.mrb[1].mxu0  ;;  %v1080_v30 = vpop.f32.mrb[1].mxu1 }
 0x274   : > { %v1041_v31 = vpop.f32.mrb[2].mxu0  ;;  %v1082_v32 = vpop.f32.mrb[2].mxu1 }
 0x275   : > { %v1042_v33 = vpop.f32.mrb[3].mxu0  ;;  %v1083_v34 = vpop.f32.mrb[3].mxu1  ;;  %v1390_v31 = vld [vmem:[%s23128_s4 + $0x240] sm:$0xff]  ;;  %v1383_v32 = vld [vmem:[%s23128_s4 + $0x208] sm:$0xff] }
 0x276   : > { %v1391_v33 = vld [vmem:[%s23128_s4 + $0x248] sm:$0xff]  ;;  %v17189_v34 = vcombine.low %v1366_v21, %v1374_v22 }
 0x27a   : > { %v1165_v40 = vpop.f32.mrb[4].mxu0  ;;  %v1206_v41 = vpop.f32.mrb[4].mxu1 }
 0x27b   : > { %v1166_v44 = vadd.f32 %v1165_v40, %v1037_v27  ;;  %v1207_v45 = vadd.f32 %v1206_v41, %v1078_v28  ;;  %v1167_v46 = vpop.f32.mrb[5].mxu0  ;;  %v1208_v47 = vpop.f32.mrb[5].mxu1  ;;  %v17175_v27 = vcombine.low %v1351_v15, %v1359_v16  ;;  %v17190_v28 = vcombine.high %v1366_v21, %v1374_v22  ;;  %v1398_v41 = vld [vmem:[%s23128_s4 + $0x280] sm:$0xff]  ;;  %v1463_v16 = vld [vmem:[%s23128_s4 + $0x488] sm:$0xff] }
 0x27c   : > { %v1168_v49 = vadd.f32 %v1167_v46, %v1039_v29  ;;  %v1209_v50 = vadd.f32 %v1208_v47, %v1080_v30  ;;  %v1169_v51 = vpop.f32.mrb[6].mxu0  ;;  %v1210_v52 = vpop.f32.mrb[6].mxu1  ;;  %v17192_v29 = vcombine.high %v1367_v23, %v1375_v24  ;;  %v1382_v30 = vld [vmem:[%s23128_s4 + $0x200] sm:$0xff]  ;;  %v17208_v40 = vcombine.high %v1383_v32, %v1391_v33  ;;  %v1479_v24 = vld [vmem:[%s23128_s4 + $0x508] sm:$0xff] }
 0x27d   : > { %v23112_v53 = vadd.f32 %v1218_v39, %v1166_v44  ;;  %v1170_v54 = vpop.f32.mrb[7].mxu0  ;;  %v1211_v55 = vpop.f32.mrb[7].mxu1  ;;  %v23117_v58 = vadd.f32 %v1226_v48, %v1207_v45  ;;  %4565 = vmatpush1.bf16.msra.mxu1 %v17175_v27  ;;  %4484 = vmatprep.subr.bf16.mxu0 %v17190_v28  ;;  %v17206_v39 = vcombine.high %v1382_v30, %v1390_v31  ;;  %v1399_v44 = vld [vmem:[%s23128_s4 + $0x288] sm:$0xff]  ;;  %v1422_v51 = vld [vmem:[%s23128_s4 + $0x340] sm:$0xff] }
 0x27e   : > { %v23114_v56 = vadd.f32 %v1222_v42, %v1168_v49  ;;  %v23121_v60 = vadd.f32 %v1230_v57, %v1209_v50  ;;  %4566 = vmatprep.subr.bf16.mxu1 %v17192_v29  ;;  %v1406_v42 = vld [vmem:[%s23128_s4 + $0x2c0] sm:$0xff]  ;;  %v1407_v45 = vld [vmem:[%s23128_s4 + $0x2c8] sm:$0xff]  ;;  %4485 = vmatpush1.bf16.msra.mxu0 %v17189_v34  ;;  %v17205_v46 = vcombine.low %v1382_v30, %v1390_v31 }
 0x27f   : > { %4486 = vmatprep.subr.bf16.mxu0 %v17206_v39  ;;  %v17207_v47 = vcombine.low %v1383_v32, %v1391_v33  ;;  %v17222_v48 = vcombine.high %v1398_v41, %v1406_v42  ;;  %v17224_v49 = vcombine.high %v1399_v44, %v1407_v45  ;;  %v1414_v50 = vld [vmem:[%s23128_s4 + $0x300] sm:$0xff]  ;;  %v1415_v52 = vld [vmem:[%s23128_s4 + $0x308] sm:$0xff]  ;;  %v17221_v55 = vcombine.low %v1398_v41, %v1406_v42 }
 0x280   : > { %v1241_v59 = vadd.f32 %v23114_v56, %v23112_v53  ;;  %v1423_v54 = vld [vmem:[%s23128_s4 + $0x348] sm:$0xff]  ;;  %v17223_v57 = vcombine.low %v1399_v44, %v1407_v45  ;;  %v17237_v2 = vcombine.low %v1414_v50, %v1422_v51  ;;  %v1470_v15 = vld [vmem:[%s23128_s4 + $0x4c0] sm:$0xff]  ;;  %v17288_v21 = vcombine.high %v1463_v16, %v1471_v17 }
 0x281   : > { %4567 = vmatpush1.bf16.msra.mxu1 %v17191_v36  ;;  %v17239_v3 = vcombine.low %v1415_v52, %v1423_v54  ;;  %v17286_v20 = vcombine.high %v1462_v14, %v1470_v15  ;;  %v1478_v22 = vld [vmem:[%s23128_s4 + $0x500] sm:$0xff]  ;;  %v17285_v27 = vcombine.low %v1462_v14, %v1470_v15  ;;  %v17287_v28 = vcombine.low %v1463_v16, %v1471_v17  ;;  %v1543_v14 = vld [vmem:[%s23128_s4 + $0x708] sm:$0xff] }
 0x282   : > { %v1242_v61 = vadd.f32 %v1241_v59, %v23117_v58  ;;  %4568 = vmatprep.subr.bf16.mxu1 %v17208_v40  ;;  %4487 = vmatpush1.bf16.msra.mxu0 %v17205_v46  ;;  %v17238_v59 = vcombine.high %v1414_v50, %v1422_v51  ;;  %v1486_v23 = vld [vmem:[%s23128_s4 + $0x540] sm:$0xff]  ;;  %v17304_v30 = vcombine.high %v1479_v24, %v1487_v25  ;;  %v1551_v15 = vld [vmem:[%s23128_s4 + $0x748] sm:$0xff] }
 0x283   : > { %4488 = vmatprep.subr.bf16.mxu0 %v17222_v48  ;;  %v17302_v29 = vcombine.high %v1478_v22, %v1486_v23  ;;  %v17301_v31 = vcombine.low %v1478_v22, %v1486_v23  ;;  %v17303_v32 = vcombine.low %v1479_v24, %v1487_v25  ;;  %v1494_v50 = vld [vmem:[%s23128_s4 + $0x580] sm:$0xff]  ;;  %v1559_v22 = vld [vmem:[%s23128_s4 + $0x788] sm:$0xff]  ;;  %v17367_v25 = vcombine.low %v1543_v14, %v1551_v15 }
 0x284   : > { %v1243_v62 = vadd.f32 %v1242_v61, %v23121_v60  ;;  %v17240_v61 = vcombine.high %v1415_v52, %v1423_v54  ;;  %v1502_v51 = vld [vmem:[%s23128_s4 + $0x5c0] sm:$0xff]  ;;  %v1495_v52 = vld [vmem:[%s23128_s4 + $0x588] sm:$0xff] }
 0x285   : > { %4569 = vmatpush1.bf16.msra.mxu1 %v17207_v47  ;;  %v17318_v54 = vcombine.high %v1494_v50, %v1502_v51  ;;  %v1567_v23 = vld [vmem:[%s23128_s4 + $0x7c8] sm:$0xff] }
 0x286   : > { %1244 = vadd.xlane.f32.xlu0 %v1243_v62  ;;  %4570 = vmatprep.subr.bf16.mxu1 %v17224_v49  ;;  %v1430_v62 = vld [vmem:[%s23128_s4 + $0x380] sm:$0xff] }
 0x287   : > { %4489 = vmatpush1.bf16.msra.mxu0 %v17221_v55  ;;  %v17254_v4 = vcombine.high %v1430_v62, %v1438_v63  ;;  %v17253_v10 = vcombine.low %v1430_v62, %v1438_v63  ;;  %v1503_v55 = vld [vmem:[%s23128_s4 + $0x5c8] sm:$0xff]  ;;  %v1510_v62 = vld [vmem:[%s23128_s4 + $0x600] sm:$0xff] }
 0x288   : > { %4490 = vmatprep.subr.bf16.mxu0 %v17238_v59  ;;  %v17319_v59 = vcombine.low %v1495_v52, %v1503_v55  ;;  %v1518_v63 = vld [vmem:[%s23128_s4 + $0x640] sm:$0xff] }
 0x289   : > { %4571 = vmatpush1.bf16.msra.mxu1 %v17223_v57  ;;  %v17317_v57 = vcombine.low %v1494_v50, %v1502_v51  ;;  %v17333_v1 = vcombine.low %v1510_v62, %v1518_v63  ;;  %v1239_v50 = vld [vmem:[%s780_s7] sm:$0xf]  ;;  %v1240_v51 = vld [vmem:[%s789_s15] sm:$0xf] }
 0x28a   : > { %4572 = vmatprep.subr.bf16.mxu1 %v17240_v61  ;;  %v17320_v61 = vcombine.high %v1495_v52, %v1503_v55  ;;  %v1276_v52 = vrot.slane %v1239_v50, %v23101_v37  ;;  %v1284_v55 = vrot.slane %v1239_v50, %v23109_v43 }
 0x28b   : > { %4491 = vmatpush1.bf16.msra.mxu0 %v17237_v2  ;;  %v17334_v2 = vcombine.high %v1510_v62, %v1518_v63  ;;  %v1297_v62 = vrot.slane %v1240_v51, %v23097_v35  ;;  %v1305_v63 = vrot.slane %v1240_v51, %v23104_v38 }
 0x28c   : > { %4492 = vmatprep.subr.bf16.mxu0 %v17254_v4  ;;  %v1526_v4 = vld [vmem:[%s23128_s4 + $0x680] sm:$0xff] }
 0x28d   : > { %4573 = vmatpush1.bf16.msra.mxu1 %v17239_v3  ;;  %v1519_v3 = vld [vmem:[%s23128_s4 + $0x648] sm:$0xff] }
 0x28e   : > { %4574 = vmatprep.subr.bf16.mxu1 %v17256_v5  ;;  %v1534_v5 = vld [vmem:[%s23128_s4 + $0x6c0] sm:$0xff]  ;;  %v17335_v6 = vcombine.low %v1511_v0, %v1519_v3  ;;  %v17336_v7 = vcombine.high %v1511_v0, %v1519_v3 }
 0x28f   : > { %4493 = vmatpush1.bf16.msra.mxu0 %v17253_v10  ;;  %v17350_v8 = vcombine.high %v1526_v4, %v1534_v5  ;;  %v1535_v10 = vld [vmem:[%s23128_s4 + $0x6c8] sm:$0xff]  ;;  %v17349_v16 = vcombine.low %v1526_v4, %v1534_v5  ;;  %v1309_v4 = vrot.slane %v1240_v51, %v23109_v43 }
 0x290   : > { %4494 = vmatprep.subr.bf16.mxu0 %v17270_v12  ;;  %v17352_v12 = vcombine.high %v1527_v9, %v1535_v10  ;;  %v17351_v17 = vcombine.low %v1527_v9, %v1535_v10 }
 0x291   : > { %4575 = vmatpush1.bf16.msra.mxu1 %v17255_v11  ;;  %v1542_v11 = vld [vmem:[%s23128_s4 + $0x700] sm:$0xff] }
 0x292   : > { %4576 = vmatprep.subr.bf16.mxu1 %v17272_v13  ;;  %v1550_v13 = vld [vmem:[%s23128_s4 + $0x740] sm:$0xff] }
 0x293   : > { %4495 = vmatpush1.bf16.msra.mxu0 %v17269_v18  ;;  %v17366_v18 = vcombine.high %v1542_v11, %v1550_v13  ;;  %v17365_v24 = vcombine.low %v1542_v11, %v1550_v13  ;;  %v1599_v13 = vld [vmem:[%s23128_s4 + $0x8c8] sm:$0xff] }
 0x294   : > { %4496 = vmatprep.subr.bf16.mxu0 %v17286_v20  ;;  %v1558_v20 = vld [vmem:[%s23128_s4 + $0x780] sm:$0xff] }
 0x295   : > { %4577 = vmatpush1.bf16.msra.mxu1 %v17271_v19  ;;  %v17368_v19 = vcombine.high %v1543_v14, %v1551_v15  ;;  %v1606_v15 = vld [vmem:[%s23128_s4 + $0x900] sm:$0xff] }
 0x296   : > { %4578 = vmatprep.subr.bf16.mxu1 %v17288_v21  ;;  %v1566_v21 = vld [vmem:[%s23128_s4 + $0x7c0] sm:$0xff] }
 0x297   : > { %4497 = vmatpush1.bf16.msra.mxu0 %v17285_v27  ;;  %v17382_v27 = vcombine.high %v1558_v20, %v1566_v21 }
 0x298   : > { %4498 = vmatprep.subr.bf16.mxu0 %v17302_v29  ;;  %v17381_v29 = vcombine.low %v1558_v20, %v1566_v21  ;;  %v1615_v20 = vld [vmem:[%s23128_s4 + $0x948] sm:$0xff] }
 0x299   : > { %4579 = vmatpush1.bf16.msra.mxu1 %v17287_v28  ;;  %v17384_v28 = vcombine.high %v1559_v22, %v1567_v23 }
 0x29a   : > { %4580 = vmatprep.subr.bf16.mxu1 %v17304_v30  ;;  %v17383_v30 = vcombine.low %v1559_v22, %v1567_v23 }
 0x29b   : > { %4499 = vmatpush1.bf16.msra.mxu0 %v17301_v31  ;;  %v1574_v31 = vld [vmem:[%s23128_s4 + $0x800] sm:$0xff] }
 0x29c   : > { %4500 = vmatprep.subr.bf16.mxu0 %v17318_v54  ;;  %v1272_v54 = vrot.slane %v1239_v50, %v23097_v35 }
 0x29d   : > { %4581 = vmatpush1.bf16.msra.mxu1 %v17303_v32  ;;  %v1582_v32 = vld [vmem:[%s23128_s4 + $0x840] sm:$0xff] }
 0x29e   : > { %4582 = vmatprep.subr.bf16.mxu1 %v17320_v61  ;;  %v1301_v61 = vrot.slane %v1240_v51, %v23101_v37  ;;  %v1654_v51 = vld [vmem:[%s23128_s4 + $0xa80] sm:$0xff] }
 0x29f   : > { %4501 = vmatpush1.bf16.msra.mxu0 %v17317_v57  ;;  %v1280_v57 = vrot.slane %v1239_v50, %v23104_v38 }
 0x2a0   : > { %4502 = vmatprep.subr.bf16.mxu0 %v17334_v2 }
 0x2a1   : > { %4583 = vmatpush1.bf16.msra.mxu1 %v17319_v59 }
 0x2a2   : > { %4584 = vmatprep.subr.bf16.mxu1 %v17336_v7 }
 0x2a3   : > { %4503 = vmatpush1.bf16.msra.mxu0 %v17333_v1 }
 0x2a4   : > { %4504 = vmatprep.subr.bf16.mxu0 %v17350_v8 }
 0x2a5   : > { %4585 = vmatpush1.bf16.msra.mxu1 %v17335_v6 }
 0x2a6   : > { %4586 = vmatprep.subr.bf16.mxu1 %v17352_v12  ;;  %v1598_v12 = vld [vmem:[%s23128_s4 + $0x8c0] sm:$0xff] }
 0x2a7   : > { %4505 = vmatpush1.bf16.msra.mxu0 %v17349_v16 }
 0x2a8   : > { %4506 = vmatprep.subr.bf16.mxu0 %v17366_v18  ;;  %v1614_v18 = vld [vmem:[%s23128_s4 + $0x940] sm:$0xff] }
 0x2a9   : > { %4587 = vmatpush1.bf16.msra.mxu1 %v17351_v17 }
 0x2aa   : > { %4588 = vmatprep.subr.bf16.mxu1 %v17368_v19  ;;  %v1607_v19 = vld [vmem:[%s23128_s4 + $0x908] sm:$0xff] }
 0x2ab   : > { %4507 = vmatpush1.bf16.msra.mxu0 %v17365_v24  ;;  %v17430_v24 = vcombine.high %v1606_v15, %v1614_v18 }
 0x2ac   : > { %4508 = vmatprep.subr.bf16.mxu0 %v17382_v27  ;;  %v1622_v27 = vld [vmem:[%s23128_s4 + $0x980] sm:$0xff] }
 0x2ad   : > { %4589 = vmatpush1.bf16.msra.mxu1 %v17367_v25  ;;  %v17432_v25 = vcombine.high %v1607_v19, %v1615_v20 }
 0x2ae   : > { %4590 = vmatprep.subr.bf16.mxu1 %v17384_v28  ;;  %v1630_v28 = vld [vmem:[%s23128_s4 + $0x9c0] sm:$0xff] }
 0x2af   : > { %4509 = vmatpush1.bf16.msra.mxu0 %v17381_v29  ;;  %v1623_v29 = vld [vmem:[%s23128_s4 + $0x988] sm:$0xff] }
 0x2b1   : > { %4591 = vmatpush1.bf16.msra.mxu1 %v17383_v30  ;;  %v1631_v30 = vld [vmem:[%s23128_s4 + $0x9c8] sm:$0xff] }
 0x313   : > { %v1245_v33 = vpop.xlane.xlu0 %1244 }
 0x314   : > { %v1247_v34 = vmul.f32 0.001953125, %v1245_v33  ;;  %v1575_v33 = vld [vmem:[%s23128_s4 + $0x808] sm:$0xff] }
 0x316   : > { %v23175_v36 = vsub.f32 %v23112_v53, %v1247_v34  ;;  %v23178_v39 = vsub.f32 %v23114_v56, %v1247_v34  ;;  %v23181_v40 = vsub.f32 %v23117_v58, %v1247_v34  ;;  %v23184_v41 = vsub.f32 %v23121_v60, %v1247_v34 }
 0x317   : > { %v17398_v34 = vcombine.high %v1574_v31, %v1582_v32 }
 0x318   : > { %v1252_v42 = vmul.f32 %v23175_v36, %v23175_v36  ;;  %v1253_v44 = vmul.f32 %v23178_v39, %v23178_v39  ;;  %v1254_v45 = vmul.f32 %v23181_v40, %v23181_v40  ;;  %v1255_v47 = vmul.f32 %v23184_v41, %v23184_v41 }
 0x319   : > { %4519 = vmatprep.subr.bf16.mxu0 %v17398_v34  ;;  %v17448_v34 = vcombine.high %v1623_v29, %v1631_v30 }
 0x31a   : > { %v1256_v46 = vadd.f32 %v1253_v44, %v1252_v42  ;;  %v1583_v42 = vld [vmem:[%s23128_s4 + $0x848] sm:$0xff]  ;;  %v17397_v44 = vcombine.low %v1574_v31, %v1582_v32  ;;  %v17429_v31 = vcombine.low %v1606_v15, %v1614_v18  ;;  %v17431_v32 = vcombine.low %v1607_v19, %v1615_v20  ;;  %v1710_v15 = vld [vmem:[%s23128_s4 + $0xc40] sm:$0xff] }
 0x31c   : > { %v1257_v48 = vadd.f32 %v1256_v46, %v1254_v45  ;;  %v17399_v45 = vcombine.low %v1575_v33, %v1583_v42  ;;  %v17400_v46 = vcombine.high %v1575_v33, %v1583_v42  ;;  %v17446_v33 = vcombine.high %v1622_v27, %v1630_v28  ;;  %v1638_v42 = vld [vmem:[%s23128_s4 + $0xa00] sm:$0xff] }
 0x31e   : > { %v1258_v49 = vadd.f32 %v1257_v48, %v1255_v47  ;;  %4601 = vmatprep.subr.bf16.mxu1 %v17400_v46  ;;  %v1647_v46 = vld [vmem:[%s23128_s4 + $0xa48] sm:$0xff] }
 0x320   : > { %1259 = vadd.xlane.f32.xlu0 %v1258_v49 }
 0x3ad   : > { %v1260_v47 = vpop.xlane.xlu0 %1259 }
 0x3ae   : > { %v1261_v48 = vmul.f32 0.001953125, %v1260_v47  ;;  %v17445_v47 = vcombine.low %v1622_v27, %v1630_v28  ;;  %v1727_v27 = vld [vmem:[%s23128_s4 + $0xcc8] sm:$0xff] }
 0x3b0   : > { %v1262_v49 = vadd.f32 1e-05, %v1261_v48  ;;  %v17447_v48 = vcombine.low %v1623_v29, %v1631_v30 }
 0x3b2   : > { %22012 = vrsqrt.f32 %v1262_v49 }
 0x3bc   : > { %v22013_v59 = vpop.eup %22012 }
 0x3bd   : > { %v1265_v0 = vmul.f32 %v22013_v59, %v23178_v39  ;;  %v1264_v1 = vmul.f32 %v22013_v59, %v23175_v36  ;;  %v1267_v2 = vmul.f32 %v22013_v59, %v23184_v41  ;;  %v1266_v3 = vmul.f32 %v22013_v59, %v23181_v40  ;;  %v1590_v39 = vld [vmem:[%s23128_s4 + $0x880] sm:$0xff]  ;;  %v1591_v41 = vld [vmem:[%s23128_s4 + $0x888] sm:$0xff] }
 0x3be   : > { %v17414_v16 = vcombine.high %v1590_v39, %v1598_v12  ;;  %v17416_v17 = vcombine.high %v1591_v41, %v1599_v13  ;;  %v17413_v22 = vcombine.low %v1590_v39, %v1598_v12  ;;  %v17415_v23 = vcombine.low %v1591_v41, %v1599_v13  ;;  %v1702_v13 = vld [vmem:[%s23128_s4 + $0xc00] sm:$0xff] }
 0x3bf   : > { %v1290_v5 = vmul.f32 %v1276_v52, %v1265_v0  ;;  %v1289_v6 = vmul.f32 %v1272_v54, %v1264_v1  ;;  %v1292_v7 = vmul.f32 %v1284_v55, %v1267_v2  ;;  %v1291_v8 = vmul.f32 %v1280_v57, %v1266_v3  ;;  %v1662_v52 = vld [vmem:[%s23128_s4 + $0xac0] sm:$0xff]  ;;  %v1655_v54 = vld [vmem:[%s23128_s4 + $0xa88] sm:$0xff] }
 0x3c0   : > { %v1663_v55 = vld [vmem:[%s23128_s4 + $0xac8] sm:$0xff]  ;;  %v1678_v0 = vld [vmem:[%s23128_s4 + $0xb40] sm:$0xff]  ;;  %v17477_v3 = vcombine.low %v1654_v51, %v1662_v52  ;;  %v17526_v20 = vcombine.high %v1702_v13, %v1710_v15  ;;  %v17525_v28 = vcombine.low %v1702_v13, %v1710_v15 }
 0x3c1   : > { %v1315_v9 = vadd.f32 %v1301_v61, %v1290_v5  ;;  %v1314_v10 = vadd.f32 %v1297_v62, %v1289_v6  ;;  %v23240_v11 = vadd.f32 %v1305_v63, %v1291_v8  ;;  %v1317_v36 = vadd.f32 %v1309_v4, %v1292_v7  ;;  %v1670_v63 = vld [vmem:[%s23128_s4 + $0xb00] sm:$0xff]  ;;  %v1671_v1 = vld [vmem:[%s23128_s4 + $0xb08] sm:$0xff] }
 0x3c2   : > { %v17478_v61 = vcombine.high %v1654_v51, %v1662_v52  ;;  %v17480_v62 = vcombine.high %v1655_v54, %v1663_v55  ;;  %v1679_v2 = vld [vmem:[%s23128_s4 + $0xb48] sm:$0xff]  ;;  %v17479_v4 = vcombine.low %v1655_v54, %v1663_v55  ;;  %v17494_v5 = vcombine.high %v1670_v63, %v1678_v0  ;;  %v1686_v7 = vld [vmem:[%s23128_s4 + $0xb80] sm:$0xff] }
 0x3c3   : > { %v23245_v40 = vpack.c.bf16 %v1315_v9, %v1315_v9  ;;  %v23247_v14 = vpack.c.bf16 %v1314_v10, %v1314_v10  ;;  %v23257_v21 = vpack.c.bf16 %v1317_v36, %v1317_v36  ;;  %v17496_v6 = vcombine.high %v1671_v1, %v1679_v2  ;;  %v1694_v8 = vld [vmem:[%s23128_s4 + $0xbc0] sm:$0xff]  ;;  %v1687_v9 = vld [vmem:[%s23128_s4 + $0xb88] sm:$0xff] }
 0x3c4   : > { %v1695_v10 = vld [vmem:[%s23128_s4 + $0xbc8] sm:$0xff]  ;;  %v17493_v39 = vcombine.low %v1670_v63, %v1678_v0  ;;  %v17495_v36 = vcombine.low %v1671_v1, %v1679_v2  ;;  %v17510_v12 = vcombine.high %v1686_v7, %v1694_v8  ;;  %v17509_v18 = vcombine.low %v1686_v7, %v1694_v8 }
 0x3c5   : > { %4510 = vmatprep.mubr.bf16.mxu0 %v23245_v40  ;;  %4592 = vmatprep.mubr.bf16.mxu1 %v23245_v40  ;;  %v17512_v41 = vcombine.high %v1687_v9, %v1695_v10  ;;  %v17511_v19 = vcombine.low %v1687_v9, %v1695_v10  ;;  %v1759_v51 = vld [vmem:[%s23128_s4 + $0xdc8] sm:$0xff] }
 0x3c6   : > { %4511 = vmatmul.mubr.bf16.vlgmr.msra.gmra.mrb[8].mxu0 %v23247_v14  ;;  %4593 = vmatmul.mubr.bf16.vlgmr.msra.gmra.mrb[8].mxu1 %v23247_v14  ;;  %v1775_v63 = vld [vmem:[%s23128_s4 + $0xe48] sm:$0xff] }
 0x3c7   : > { %4520 = vmatpush1.bf16.msra.mxu0 %v17397_v44  ;;  %4602 = vmatpush1.bf16.msra.mxu1 %v17399_v45  ;;  %v1646_v44 = vld [vmem:[%s23128_s4 + $0xa40] sm:$0xff]  ;;  %v1639_v45 = vld [vmem:[%s23128_s4 + $0xa08] sm:$0xff] }
 0x3c8   : > { %4551 = vmatprep.mubr.bf16.mxu0 %v23257_v21  ;;  %4633 = vmatprep.mubr.bf16.mxu1 %v23257_v21  ;;  %v17462_v49 = vcombine.high %v1638_v42, %v1646_v44  ;;  %v17464_v50 = vcombine.high %v1639_v45, %v1647_v46  ;;  %v17461_v57 = vcombine.low %v1638_v42, %v1646_v44  ;;  %v1743_v42 = vld [vmem:[%s23128_s4 + $0xd48] sm:$0xff] }
 0x3c9   : > { %4521 = vmatprep.subr.bf16.mxu0 %v17414_v16  ;;  %4603 = vmatprep.subr.bf16.mxu1 %v17416_v17  ;;  %v17463_v59 = vcombine.low %v1639_v45, %v1647_v46  ;;  %v1703_v16 = vld [vmem:[%s23128_s4 + $0xc08] sm:$0xff] }
 0x3ca   : > { %v1711_v17 = vld [vmem:[%s23128_s4 + $0xc48] sm:$0xff] }
 0x3cb   : > { %4522 = vmatpush1.bf16.msra.mxu0 %v17413_v22  ;;  %4604 = vmatpush1.bf16.msra.mxu1 %v17415_v23  ;;  %v17528_v22 = vcombine.high %v1703_v16, %v1711_v17  ;;  %v1718_v23 = vld [vmem:[%s23128_s4 + $0xc80] sm:$0xff]  ;;  %v17527_v29 = vcombine.low %v1703_v16, %v1711_v17  ;;  %v1791_v7 = vld [vmem:[%s23128_s4 + $0xec8] sm:$0xff] }
 0x3cc   : > { %4523 = vmatprep.subr.bf16.mxu0 %v17430_v24  ;;  %4605 = vmatprep.subr.bf16.mxu1 %v17432_v25  ;;  %v1726_v24 = vld [vmem:[%s23128_s4 + $0xcc0] sm:$0xff]  ;;  %v1719_v25 = vld [vmem:[%s23128_s4 + $0xc88] sm:$0xff] }
 0x3cd   : > { %v17542_v30 = vcombine.high %v1718_v23, %v1726_v24  ;;  %v17541_v44 = vcombine.low %v1718_v23, %v1726_v24  ;;  %v17543_v45 = vcombine.low %v1719_v25, %v1727_v27  ;;  %v1807_v13 = vld [vmem:[%s23128_s4 + $0xf48] sm:$0xff] }
 0x3ce   : > { %v1823_v23 = vld [vmem:[%s23128_s4 + $0xfc8] sm:$0xff] }
 0x3cf   : > { %4524 = vmatpush1.bf16.msra.mxu0 %v17429_v31  ;;  %4606 = vmatpush1.bf16.msra.mxu1 %v17431_v32  ;;  %v17544_v31 = vcombine.high %v1719_v25, %v1727_v27  ;;  %v1734_v32 = vld [vmem:[%s23128_s4 + $0xd00] sm:$0xff] }
 0x3d0   : > { %4525 = vmatprep.subr.bf16.mxu0 %v17446_v33  ;;  %4607 = vmatprep.subr.bf16.mxu1 %v17448_v34  ;;  %v1742_v33 = vld [vmem:[%s23128_s4 + $0xd40] sm:$0xff]  ;;  %v1735_v34 = vld [vmem:[%s23128_s4 + $0xd08] sm:$0xff] }
 0x3d1   : > { %v17558_v46 = vcombine.high %v1734_v32, %v1742_v33  ;;  %v17557_v52 = vcombine.low %v1734_v32, %v1742_v33  ;;  %v17559_v54 = vcombine.low %v1735_v34, %v1743_v42  ;;  %v1329_v32 = vld [vmem:[%s23128_s4 + $0x58] sm:$0xff] }
 0x3d3   : > { %4526 = vmatpush1.bf16.msra.mxu0 %v17445_v47  ;;  %4608 = vmatpush1.bf16.msra.mxu1 %v17447_v48  ;;  %v17560_v47 = vcombine.high %v1735_v34, %v1743_v42  ;;  %v1750_v48 = vld [vmem:[%s23128_s4 + $0xd80] sm:$0xff] }
 0x3d4   : > { %4527 = vmatprep.subr.bf16.mxu0 %v17462_v49  ;;  %4609 = vmatprep.subr.bf16.mxu1 %v17464_v50  ;;  %v1758_v49 = vld [vmem:[%s23128_s4 + $0xdc0] sm:$0xff]  ;;  %v1751_v50 = vld [vmem:[%s23128_s4 + $0xd88] sm:$0xff] }
 0x3d5   : > { %v17574_v55 = vcombine.high %v1750_v48, %v1758_v49  ;;  %v17573_v0 = vcombine.low %v1750_v48, %v1758_v49  ;;  %v17575_v1 = vcombine.low %v1751_v50, %v1759_v51  ;;  %v1345_v48 = vld [vmem:[%s23128_s4 + $0xd8] sm:$0xff] }
 0x3d7   : > { %4528 = vmatpush1.bf16.msra.mxu0 %v17461_v57  ;;  %4610 = vmatpush1.bf16.msra.mxu1 %v17463_v59  ;;  %v17576_v57 = vcombine.high %v1751_v50, %v1759_v51  ;;  %v1766_v59 = vld [vmem:[%s23128_s4 + $0xe00] sm:$0xff]  ;;  %v23323_v50 = vpack.c.bf16 %v23240_v11, %v23240_v11 }
 0x3d8   : > { %4529 = vmatprep.subr.bf16.mxu0 %v17478_v61  ;;  %4611 = vmatprep.subr.bf16.mxu1 %v17480_v62  ;;  %v1774_v61 = vld [vmem:[%s23128_s4 + $0xe40] sm:$0xff]  ;;  %v1767_v62 = vld [vmem:[%s23128_s4 + $0xe08] sm:$0xff] }
 0x3d9   : > { %v17590_v2 = vcombine.high %v1766_v59, %v1774_v61  ;;  %v17589_v8 = vcombine.low %v1766_v59, %v1774_v61  ;;  %v17591_v9 = vcombine.low %v1767_v62, %v1775_v63  ;;  %v1353_v59 = vld [vmem:[%s23128_s4 + $0x118] sm:$0xff] }
 0x3da   : > { %v1361_v61 = vld [vmem:[%s23128_s4 + $0x158] sm:$0xff] }
 0x3db   : > { %4530 = vmatpush1.bf16.msra.mxu0 %v17477_v3  ;;  %4612 = vmatpush1.bf16.msra.mxu1 %v17479_v4  ;;  %v17592_v3 = vcombine.high %v1767_v62, %v1775_v63  ;;  %v1782_v4 = vld [vmem:[%s23128_s4 + $0xe80] sm:$0xff] }
 0x3dc   : > { %4531 = vmatprep.subr.bf16.mxu0 %v17494_v5  ;;  %4613 = vmatprep.subr.bf16.mxu1 %v17496_v6  ;;  %v1790_v5 = vld [vmem:[%s23128_s4 + $0xec0] sm:$0xff]  ;;  %v1783_v6 = vld [vmem:[%s23128_s4 + $0xe88] sm:$0xff] }
 0x3dd   : > { %v17606_v10 = vcombine.high %v1782_v4, %v1790_v5  ;;  %v17605_v15 = vcombine.low %v1782_v4, %v1790_v5  ;;  %v17607_v16 = vcombine.low %v1783_v6, %v1791_v7  ;;  %v1377_v4 = vld [vmem:[%s23128_s4 + $0x1d8] sm:$0xff] }
 0x3df   : > { %4532 = vmatpush1.bf16.msra.mxu0 %v17493_v39  ;;  %4614 = vmatpush1.bf16.msra.mxu1 %v17495_v36  ;;  %v17608_v39 = vcombine.high %v1783_v6, %v1791_v7  ;;  %v1798_v36 = vld [vmem:[%s23128_s4 + $0xf00] sm:$0xff]  ;;  %v17179_v6 = vcombine.low %v1353_v59, %v1361_v61 }
 0x3e0   : > { %4533 = vmatprep.subr.bf16.mxu0 %v17510_v12  ;;  %4615 = vmatprep.subr.bf16.mxu1 %v17512_v41  ;;  %v1806_v12 = vld [vmem:[%s23128_s4 + $0xf40] sm:$0xff]  ;;  %v1799_v41 = vld [vmem:[%s23128_s4 + $0xf08] sm:$0xff] }
 0x3e1   : > { %v17622_v17 = vcombine.high %v1798_v36, %v1806_v12  ;;  %v17621_v24 = vcombine.low %v1798_v36, %v1806_v12  ;;  %v17623_v25 = vcombine.low %v1799_v41, %v1807_v13  ;;  %v1393_v36 = vld [vmem:[%s23128_s4 + $0x258] sm:$0xff] }
 0x3e3   : > { %4534 = vmatpush1.bf16.msra.mxu0 %v17509_v18  ;;  %4616 = vmatpush1.bf16.msra.mxu1 %v17511_v19  ;;  %v17624_v18 = vcombine.high %v1799_v41, %v1807_v13  ;;  %v1814_v19 = vld [vmem:[%s23128_s4 + $0xf80] sm:$0xff] }
 0x3e4   : > { %4535 = vmatprep.subr.bf16.mxu0 %v17526_v20  ;;  %4617 = vmatprep.subr.bf16.mxu1 %v17528_v22  ;;  %v1822_v20 = vld [vmem:[%s23128_s4 + $0xfc0] sm:$0xff]  ;;  %v1815_v22 = vld [vmem:[%s23128_s4 + $0xf88] sm:$0xff] }
 0x3e5   : > { %v17638_v27 = vcombine.high %v1814_v19, %v1822_v20  ;;  %v17637_v33 = vcombine.low %v1814_v19, %v1822_v20  ;;  %v17639_v34 = vcombine.low %v1815_v22, %v1823_v23  ;;  %v1409_v19 = vld [vmem:[%s23128_s4 + $0x2d8] sm:$0xff] }
 0x3e7   : > { %4536 = vmatpush1.bf16.msra.mxu0 %v17525_v28  ;;  %4618 = vmatpush1.bf16.msra.mxu1 %v17527_v29  ;;  %v17640_v28 = vcombine.high %v1815_v22, %v1823_v23  ;;  %v1320_v29 = vld [vmem:[%s23128_s4 + $0x10] sm:$0xff] }
 0x3e8   : > { %4537 = vmatprep.subr.bf16.mxu0 %v17542_v30  ;;  %4619 = vmatprep.subr.bf16.mxu1 %v17544_v31  ;;  %v1328_v30 = vld [vmem:[%s23128_s4 + $0x50] sm:$0xff]  ;;  %v1321_v31 = vld [vmem:[%s23128_s4 + $0x18] sm:$0xff] }
 0x3e9   : > { %v17146_v42 = vcombine.high %v1320_v29, %v1328_v30  ;;  %v17145_v49 = vcombine.low %v1320_v29, %v1328_v30  ;;  %v17147_v51 = vcombine.low %v1321_v31, %v1329_v32  ;;  %v1425_v29 = vld [vmem:[%s23128_s4 + $0x358] sm:$0xff] }
 0x3eb   : > { %4538 = vmatpush1.bf16.msra.mxu0 %v17541_v44  ;;  %4620 = vmatpush1.bf16.msra.mxu1 %v17543_v45  ;;  %v17148_v44 = vcombine.high %v1321_v31, %v1329_v32  ;;  %v1336_v45 = vld [vmem:[%s23128_s4 + $0x90] sm:$0xff] }
 0x3ec   : > { %4539 = vmatprep.subr.bf16.mxu0 %v17558_v46  ;;  %4621 = vmatprep.subr.bf16.mxu1 %v17560_v47  ;;  %v1344_v46 = vld [vmem:[%s23128_s4 + $0xd0] sm:$0xff]  ;;  %v1337_v47 = vld [vmem:[%s23128_s4 + $0x98] sm:$0xff] }
 0x3ed   : > { %v17161_v11 = vcombine.low %v1336_v45, %v1344_v46  ;;  %v17163_v62 = vcombine.low %v1337_v47, %v1345_v48 }
 0x3ef   : > { %4540 = vmatpush1.bf16.msra.mxu0 %v17557_v52  ;;  %4622 = vmatpush1.bf16.msra.mxu1 %v17559_v54  ;;  %v17162_v52 = vcombine.high %v1336_v45, %v1344_v46  ;;  %v17164_v54 = vcombine.high %v1337_v47, %v1345_v48  ;;  %v1441_v45 = vld [vmem:[%s23128_s4 + $0x3d8] sm:$0xff] }
 0x3f0   : > { %4541 = vmatprep.subr.bf16.mxu0 %v17574_v55  ;;  %4623 = vmatprep.subr.bf16.mxu1 %v17576_v57  ;;  %v1352_v55 = vld [vmem:[%s23128_s4 + $0x110] sm:$0xff] }
 0x3f1   : > { %v1360_v57 = vld [vmem:[%s23128_s4 + $0x150] sm:$0xff] }
 0x3f2   : > { %v17178_v63 = vcombine.high %v1352_v55, %v1360_v57  ;;  %v17177_v5 = vcombine.low %v1352_v55, %v1360_v57  ;;  %v1457_v55 = vld [vmem:[%s23128_s4 + $0x458] sm:$0xff] }
 0x3f3   : > { %4542 = vmatpush1.bf16.msra.mxu0 %v17573_v0  ;;  %4624 = vmatpush1.bf16.msra.mxu1 %v17575_v1  ;;  %v17180_v0 = vcombine.high %v1353_v59, %v1361_v61  ;;  %v1368_v1 = vld [vmem:[%s23128_s4 + $0x190] sm:$0xff] }
 0x3f4   : > { %4543 = vmatprep.subr.bf16.mxu0 %v17590_v2  ;;  %4625 = vmatprep.subr.bf16.mxu1 %v17592_v3  ;;  %v1376_v2 = vld [vmem:[%s23128_s4 + $0x1d0] sm:$0xff]  ;;  %v1369_v3 = vld [vmem:[%s23128_s4 + $0x198] sm:$0xff] }
 0x3f5   : > { %v17194_v7 = vcombine.high %v1368_v1, %v1376_v2  ;;  %v17193_v12 = vcombine.low %v1368_v1, %v1376_v2  ;;  %v17195_v41 = vcombine.low %v1369_v3, %v1377_v4  ;;  %v1473_v1 = vld [vmem:[%s23128_s4 + $0x4d8] sm:$0xff] }
 0x3f7   : > { %4544 = vmatpush1.bf16.msra.mxu0 %v17589_v8  ;;  %4626 = vmatpush1.bf16.msra.mxu1 %v17591_v9  ;;  %v17196_v8 = vcombine.high %v1369_v3, %v1377_v4  ;;  %v1384_v9 = vld [vmem:[%s23128_s4 + $0x210] sm:$0xff] }
 0x3f8   : > { %4545 = vmatprep.subr.bf16.mxu0 %v17606_v10  ;;  %4627 = vmatprep.subr.bf16.mxu1 %v17608_v39  ;;  %v1392_v10 = vld [vmem:[%s23128_s4 + $0x250] sm:$0xff]  ;;  %v1385_v39 = vld [vmem:[%s23128_s4 + $0x218] sm:$0xff] }
 0x3f9   : > { %v17210_v13 = vcombine.high %v1384_v9, %v1392_v10  ;;  %v17209_v20 = vcombine.low %v1384_v9, %v1392_v10  ;;  %v17211_v22 = vcombine.low %v1385_v39, %v1393_v36  ;;  %v1489_v9 = vld [vmem:[%s23128_s4 + $0x558] sm:$0xff] }
 0x3fb   : > { %4546 = vmatpush1.bf16.msra.mxu0 %v17605_v15  ;;  %4628 = vmatpush1.bf16.msra.mxu1 %v17607_v16  ;;  %v17212_v15 = vcombine.high %v1385_v39, %v1393_v36  ;;  %v1400_v16 = vld [vmem:[%s23128_s4 + $0x290] sm:$0xff] }
 0x3fc   : > { %4547 = vmatprep.subr.bf16.mxu0 %v17622_v17  ;;  %4629 = vmatprep.subr.bf16.mxu1 %v17624_v18  ;;  %v1408_v17 = vld [vmem:[%s23128_s4 + $0x2d0] sm:$0xff]  ;;  %v1401_v18 = vld [vmem:[%s23128_s4 + $0x298] sm:$0xff] }
 0x3fd   : > { %v17226_v23 = vcombine.high %v1400_v16, %v1408_v17  ;;  %v17225_v30 = vcombine.low %v1400_v16, %v1408_v17  ;;  %v17227_v31 = vcombine.low %v1401_v18, %v1409_v19  ;;  %v1505_v16 = vld [vmem:[%s23128_s4 + $0x5d8] sm:$0xff] }
 0x3ff   : > { %4548 = vmatpush1.bf16.msra.mxu0 %v17621_v24  ;;  %4630 = vmatpush1.bf16.msra.mxu1 %v17623_v25  ;;  %v17228_v24 = vcombine.high %v1401_v18, %v1409_v19  ;;  %v1416_v25 = vld [vmem:[%s23128_s4 + $0x310] sm:$0xff] }
 0x400   : > { %4549 = vmatprep.subr.bf16.mxu0 %v17638_v27  ;;  %4631 = vmatprep.subr.bf16.mxu1 %v17640_v28  ;;  %v1424_v27 = vld [vmem:[%s23128_s4 + $0x350] sm:$0xff]  ;;  %v1417_v28 = vld [vmem:[%s23128_s4 + $0x318] sm:$0xff] }
 0x401   : > { %v17242_v32 = vcombine.high %v1416_v25, %v1424_v27  ;;  %v17241_v46 = vcombine.low %v1416_v25, %v1424_v27  ;;  %v17243_v47 = vcombine.low %v1417_v28, %v1425_v29  ;;  %v1521_v25 = vld [vmem:[%s23128_s4 + $0x658] sm:$0xff] }
 0x403   : > { %4550 = vmatpush1.bf16.msra.mxu0 %v17637_v33  ;;  %4632 = vmatpush1.bf16.msra.mxu1 %v17639_v34  ;;  %v17244_v33 = vcombine.high %v1417_v28, %v1425_v29  ;;  %v1432_v34 = vld [vmem:[%s23128_s4 + $0x390] sm:$0xff] }
 0x404   : > { %4642 = vmatprep.subr.bf16.mxu0 %v17146_v42  ;;  %4724 = vmatprep.subr.bf16.mxu1 %v17148_v44  ;;  %v1440_v42 = vld [vmem:[%s23128_s4 + $0x3d0] sm:$0xff]  ;;  %v1433_v44 = vld [vmem:[%s23128_s4 + $0x398] sm:$0xff] }
 0x405   : > { %v17258_v48 = vcombine.high %v1432_v34, %v1440_v42  ;;  %v17257_v57 = vcombine.low %v1432_v34, %v1440_v42  ;;  %v17259_v59 = vcombine.low %v1433_v44, %v1441_v45  ;;  %v1537_v34 = vld [vmem:[%s23128_s4 + $0x6d8] sm:$0xff] }
 0x406   : > { %4552 = vmatmul.mubr.bf16.vlgmr.msra.gmra.mrb[8].mxu0 %v23323_v50  ;;  %4634 = vmatmul.mubr.bf16.vlgmr.msra.gmra.mrb[8].mxu1 %v23323_v50 }
 0x407   : > { %4643 = vmatpush1.bf16.msra.mxu0 %v17145_v49  ;;  %4674 = vmatprep.mubr.bf16.mxu0 %v23245_v40  ;;  %v17260_v49 = vcombine.high %v1433_v44, %v1441_v45 }
 0x408   : > { %4725 = vmatpush1.bf16.msra.mxu1 %v17147_v51  ;;  %4756 = vmatprep.mubr.bf16.mxu1 %v23245_v40  ;;  %v1448_v51 = vld [vmem:[%s23128_s4 + $0x410] sm:$0xff] }
 0x409   : > { %4644 = vmatprep.subr.bf16.mxu0 %v17162_v52  ;;  %4726 = vmatprep.subr.bf16.mxu1 %v17164_v54  ;;  %v1456_v52 = vld [vmem:[%s23128_s4 + $0x450] sm:$0xff]  ;;  %v1449_v54 = vld [vmem:[%s23128_s4 + $0x418] sm:$0xff] }
 0x40a   : > { %v17274_v61 = vcombine.high %v1448_v51, %v1456_v52  ;;  %v17273_v2 = vcombine.low %v1448_v51, %v1456_v52  ;;  %v17275_v3 = vcombine.low %v1449_v54, %v1457_v55  ;;  %v1553_v51 = vld [vmem:[%s23128_s4 + $0x758] sm:$0xff] }
 0x40b   : > { %4645 = vmatpush1.bf16.msra.mxu0 %v17161_v11  ;;  %v17276_v11 = vcombine.high %v1449_v54, %v1457_v55 }
 0x40c   : > { %4727 = vmatpush1.bf16.msra.mxu1 %v17163_v62  ;;  %4646 = vmatprep.subr.bf16.mxu0 %v17178_v63  ;;  %v1464_v62 = vld [vmem:[%s23128_s4 + $0x490] sm:$0xff] }
 0x40d   : > { %4728 = vmatprep.subr.bf16.mxu1 %v17180_v0  ;;  %v1472_v63 = vld [vmem:[%s23128_s4 + $0x4d0] sm:$0xff]  ;;  %v1465_v0 = vld [vmem:[%s23128_s4 + $0x498] sm:$0xff] }
 0x40e   : > { %v17290_v4 = vcombine.high %v1464_v62, %v1472_v63  ;;  %v17289_v10 = vcombine.low %v1464_v62, %v1472_v63  ;;  %v17291_v39 = vcombine.low %v1465_v0, %v1473_v1  ;;  %v1569_v62 = vld [vmem:[%s23128_s4 + $0x7d8] sm:$0xff] }
 0x40f   : > { %4647 = vmatpush1.bf16.msra.mxu0 %v17177_v5  ;;  %v17292_v5 = vcombine.high %v1465_v0, %v1473_v1 }
 0x410   : > { %4729 = vmatpush1.bf16.msra.mxu1 %v17179_v6  ;;  %4648 = vmatprep.subr.bf16.mxu0 %v17194_v7  ;;  %v1480_v6 = vld [vmem:[%s23128_s4 + $0x510] sm:$0xff] }
 0x411   : > { %4730 = vmatprep.subr.bf16.mxu1 %v17196_v8  ;;  %v1488_v7 = vld [vmem:[%s23128_s4 + $0x550] sm:$0xff]  ;;  %v1481_v8 = vld [vmem:[%s23128_s4 + $0x518] sm:$0xff] }
 0x412   : > { %v17306_v36 = vcombine.high %v1480_v6, %v1488_v7  ;;  %v17305_v17 = vcombine.low %v1480_v6, %v1488_v7  ;;  %v17307_v18 = vcombine.low %v1481_v8, %v1489_v9  ;;  %v1585_v6 = vld [vmem:[%s23128_s4 + $0x858] sm:$0xff] }
 0x413   : > { %4649 = vmatpush1.bf16.msra.mxu0 %v17193_v12  ;;  %v17308_v12 = vcombine.high %v1481_v8, %v1489_v9 }
 0x414   : > { %4731 = vmatpush1.bf16.msra.mxu1 %v17195_v41  ;;  %4650 = vmatprep.subr.bf16.mxu0 %v17210_v13  ;;  %v1496_v41 = vld [vmem:[%s23128_s4 + $0x590] sm:$0xff] }
 0x415   : > { %4732 = vmatprep.subr.bf16.mxu1 %v17212_v15  ;;  %v1504_v13 = vld [vmem:[%s23128_s4 + $0x5d0] sm:$0xff]  ;;  %v1497_v15 = vld [vmem:[%s23128_s4 + $0x598] sm:$0xff] }
 0x416   : > { %v17322_v19 = vcombine.high %v1496_v41, %v1504_v13  ;;  %v17321_v27 = vcombine.low %v1496_v41, %v1504_v13  ;;  %v17323_v28 = vcombine.low %v1497_v15, %v1505_v16  ;;  %v1593_v41 = vld [vmem:[%s23128_s4 + $0x898] sm:$0xff] }
 0x417   : > { %4651 = vmatpush1.bf16.msra.mxu0 %v17209_v20  ;;  %v17324_v20 = vcombine.high %v1497_v15, %v1505_v16  ;;  %v1601_v13 = vld [vmem:[%s23128_s4 + $0x8d8] sm:$0xff] }
 0x418   : > { %4733 = vmatpush1.bf16.msra.mxu1 %v17211_v22  ;;  %4652 = vmatprep.subr.bf16.mxu0 %v17226_v23  ;;  %v1512_v22 = vld [vmem:[%s23128_s4 + $0x610] sm:$0xff] }
 0x419   : > { %4734 = vmatprep.subr.bf16.mxu1 %v17228_v24  ;;  %v1520_v23 = vld [vmem:[%s23128_s4 + $0x650] sm:$0xff]  ;;  %v1513_v24 = vld [vmem:[%s23128_s4 + $0x618] sm:$0xff] }
 0x41a   : > { %v17338_v29 = vcombine.high %v1512_v22, %v1520_v23  ;;  %v17337_v42 = vcombine.low %v1512_v22, %v1520_v23  ;;  %v17339_v44 = vcombine.low %v1513_v24, %v1521_v25  ;;  %v1617_v22 = vld [vmem:[%s23128_s4 + $0x958] sm:$0xff] }
 0x41b   : > { %4653 = vmatpush1.bf16.msra.mxu0 %v17225_v30  ;;  %v17340_v30 = vcombine.high %v1513_v24, %v1521_v25  ;;  %v17419_v24 = vcombine.low %v1593_v41, %v1601_v13 }
 0x41c   : > { %4735 = vmatpush1.bf16.msra.mxu1 %v17227_v31  ;;  %4654 = vmatprep.subr.bf16.mxu0 %v17242_v32  ;;  %v1528_v31 = vld [vmem:[%s23128_s4 + $0x690] sm:$0xff] }
 0x41d   : > { %4736 = vmatprep.subr.bf16.mxu1 %v17244_v33  ;;  %v1536_v32 = vld [vmem:[%s23128_s4 + $0x6d0] sm:$0xff]  ;;  %v1529_v33 = vld [vmem:[%s23128_s4 + $0x698] sm:$0xff] }
 0x41e   : > { %v17354_v45 = vcombine.high %v1528_v31, %v1536_v32  ;;  %v17353_v52 = vcombine.low %v1528_v31, %v1536_v32  ;;  %v17355_v54 = vcombine.low %v1529_v33, %v1537_v34  ;;  %v1633_v31 = vld [vmem:[%s23128_s4 + $0x9d8] sm:$0xff] }
 0x41f   : > { %4655 = vmatpush1.bf16.msra.mxu0 %v17241_v46  ;;  %v17356_v46 = vcombine.high %v1529_v33, %v1537_v34 }
 0x420   : > { %4737 = vmatpush1.bf16.msra.mxu1 %v17243_v47  ;;  %4656 = vmatprep.subr.bf16.mxu0 %v17258_v48  ;;  %v1544_v47 = vld [vmem:[%s23128_s4 + $0x710] sm:$0xff] }
 0x421   : > { %4738 = vmatprep.subr.bf16.mxu1 %v17260_v49  ;;  %v1552_v48 = vld [vmem:[%s23128_s4 + $0x750] sm:$0xff]  ;;  %v1545_v49 = vld [vmem:[%s23128_s4 + $0x718] sm:$0xff] }
 0x422   : > { %v17370_v55 = vcombine.high %v1544_v47, %v1552_v48  ;;  %v17369_v63 = vcombine.low %v1544_v47, %v1552_v48  ;;  %v17371_v0 = vcombine.low %v1545_v49, %v1553_v51  ;;  %v1649_v47 = vld [vmem:[%s23128_s4 + $0xa58] sm:$0xff] }
 0x423   : > { %4657 = vmatpush1.bf16.msra.mxu0 %v17257_v57  ;;  %v17372_v57 = vcombine.high %v1545_v49, %v1553_v51 }
 0x424   : > { %4739 = vmatpush1.bf16.msra.mxu1 %v17259_v59  ;;  %4658 = vmatprep.subr.bf16.mxu0 %v17274_v61  ;;  %v1560_v59 = vld [vmem:[%s23128_s4 + $0x790] sm:$0xff] }
 0x425   : > { %4740 = vmatprep.subr.bf16.mxu1 %v17276_v11  ;;  %v1568_v61 = vld [vmem:[%s23128_s4 + $0x7d0] sm:$0xff]  ;;  %v1561_v11 = vld [vmem:[%s23128_s4 + $0x798] sm:$0xff] }
 0x426   : > { %v17386_v1 = vcombine.high %v1560_v59, %v1568_v61  ;;  %v17385_v7 = vcombine.low %v1560_v59, %v1568_v61  ;;  %v17387_v8 = vcombine.low %v1561_v11, %v1569_v62  ;;  %v1665_v59 = vld [vmem:[%s23128_s4 + $0xad8] sm:$0xff] }
 0x427   : > { %4659 = vmatpush1.bf16.msra.mxu0 %v17273_v2  ;;  %v17388_v2 = vcombine.high %v1561_v11, %v1569_v62 }
 0x428   : > { %4741 = vmatpush1.bf16.msra.mxu1 %v17275_v3  ;;  %4660 = vmatprep.subr.bf16.mxu0 %v17290_v4  ;;  %v1576_v3 = vld [vmem:[%s23128_s4 + $0x810] sm:$0xff] }
 0x429   : > { %4742 = vmatprep.subr.bf16.mxu1 %v17292_v5  ;;  %v1584_v4 = vld [vmem:[%s23128_s4 + $0x850] sm:$0xff]  ;;  %v1577_v5 = vld [vmem:[%s23128_s4 + $0x818] sm:$0xff] }
 0x42a   : > { %v17402_v9 = vcombine.high %v1576_v3, %v1584_v4  ;;  %v17403_v15 = vcombine.low %v1577_v5, %v1585_v6 }
 0x42b   : > { %4661 = vmatpush1.bf16.msra.mxu0 %v17289_v10  ;;  %v17404_v10 = vcombine.high %v1577_v5, %v1585_v6 }
 0x42c   : > { %4743 = vmatpush1.bf16.msra.mxu1 %v17291_v39  ;;  %4662 = vmatprep.subr.bf16.mxu0 %v17306_v36  ;;  %v1592_v39 = vld [vmem:[%s23128_s4 + $0x890] sm:$0xff] }
 0x42d   : > { %4744 = vmatprep.subr.bf16.mxu1 %v17308_v12  ;;  %v1600_v36 = vld [vmem:[%s23128_s4 + $0x8d0] sm:$0xff]  ;;  %v17401_v12 = vcombine.low %v1576_v3, %v1584_v4  ;;  %v1681_v3 = vld [vmem:[%s23128_s4 + $0xb58] sm:$0xff] }
 0x42e   : > { %v17418_v16 = vcombine.high %v1592_v39, %v1600_v36  ;;  %v17417_v23 = vcombine.low %v1592_v39, %v1600_v36  ;;  %v1697_v39 = vld [vmem:[%s23128_s4 + $0xbd8] sm:$0xff] }
 0x42f   : > { %4663 = vmatpush1.bf16.msra.mxu0 %v17305_v17  ;;  %v1608_v17 = vld [vmem:[%s23128_s4 + $0x910] sm:$0xff] }
 0x430   : > { %4745 = vmatpush1.bf16.msra.mxu1 %v17307_v18  ;;  %4664 = vmatprep.subr.bf16.mxu0 %v17322_v19  ;;  %v1616_v18 = vld [vmem:[%s23128_s4 + $0x950] sm:$0xff]  ;;  %v17420_v19 = vcombine.high %v1593_v41, %v1601_v13 }
 0x431   : > { %4746 = vmatprep.subr.bf16.mxu1 %v17324_v20  ;;  %v1609_v20 = vld [vmem:[%s23128_s4 + $0x918] sm:$0xff]  ;;  %v17434_v25 = vcombine.high %v1608_v17, %v1616_v18  ;;  %v17433_v32 = vcombine.low %v1608_v17, %v1616_v18 }
 0x432   : > { %v17435_v33 = vcombine.low %v1609_v20, %v1617_v22  ;;  %v1705_v17 = vld [vmem:[%s23128_s4 + $0xc18] sm:$0xff] }
 0x433   : > { %4665 = vmatpush1.bf16.msra.mxu0 %v17321_v27  ;;  %v17436_v27 = vcombine.high %v1609_v20, %v1617_v22  ;;  %v1713_v18 = vld [vmem:[%s23128_s4 + $0xc58] sm:$0xff] }
 0x434   : > { %4747 = vmatpush1.bf16.msra.mxu1 %v17323_v28  ;;  %4666 = vmatprep.subr.bf16.mxu0 %v17338_v29  ;;  %v1624_v28 = vld [vmem:[%s23128_s4 + $0x990] sm:$0xff] }
 0x435   : > { %4748 = vmatprep.subr.bf16.mxu1 %v17340_v30  ;;  %v1632_v29 = vld [vmem:[%s23128_s4 + $0x9d0] sm:$0xff]  ;;  %v1625_v30 = vld [vmem:[%s23128_s4 + $0x998] sm:$0xff] }
 0x436   : > { %v17450_v34 = vcombine.high %v1624_v28, %v1632_v29  ;;  %v17449_v48 = vcombine.low %v1624_v28, %v1632_v29  ;;  %v17451_v49 = vcombine.low %v1625_v30, %v1633_v31  ;;  %v1729_v28 = vld [vmem:[%s23128_s4 + $0xcd8] sm:$0xff] }
 0x437   : > { %4667 = vmatpush1.bf16.msra.mxu0 %v17337_v42  ;;  %v17452_v42 = vcombine.high %v1625_v30, %v1633_v31  ;;  %v17531_v30 = vcombine.low %v1705_v17, %v1713_v18 }
 0x438   : > { %4749 = vmatpush1.bf16.msra.mxu1 %v17339_v44  ;;  %4668 = vmatprep.subr.bf16.mxu0 %v17354_v45  ;;  %v1640_v44 = vld [vmem:[%s23128_s4 + $0xa10] sm:$0xff] }
 0x439   : > { %4750 = vmatprep.subr.bf16.mxu1 %v17356_v46  ;;  %v1648_v45 = vld [vmem:[%s23128_s4 + $0xa50] sm:$0xff]  ;;  %v1641_v46 = vld [vmem:[%s23128_s4 + $0xa18] sm:$0xff] }
 0x43a   : > { %v17466_v51 = vcombine.high %v1640_v44, %v1648_v45  ;;  %v17465_v61 = vcombine.low %v1640_v44, %v1648_v45  ;;  %v17467_v11 = vcombine.low %v1641_v46, %v1649_v47  ;;  %v1745_v44 = vld [vmem:[%s23128_s4 + $0xd58] sm:$0xff] }
 0x43b   : > { %4669 = vmatpush1.bf16.msra.mxu0 %v17353_v52  ;;  %v17468_v52 = vcombine.high %v1641_v46, %v1649_v47 }
 0x43c   : > { %4751 = vmatpush1.bf16.msra.mxu1 %v17355_v54  ;;  %4670 = vmatprep.subr.bf16.mxu0 %v17370_v55  ;;  %v1656_v54 = vld [vmem:[%s23128_s4 + $0xa90] sm:$0xff] }
 0x43d   : > { %4752 = vmatprep.subr.bf16.mxu1 %v17372_v57  ;;  %v1664_v55 = vld [vmem:[%s23128_s4 + $0xad0] sm:$0xff]  ;;  %v1657_v57 = vld [vmem:[%s23128_s4 + $0xa98] sm:$0xff] }
 0x43e   : > { %v17482_v62 = vcombine.high %v1656_v54, %v1664_v55  ;;  %v17481_v4 = vcombine.low %v1656_v54, %v1664_v55  ;;  %v17483_v5 = vcombine.low %v1657_v57, %v1665_v59  ;;  %v1761_v54 = vld [vmem:[%s23128_s4 + $0xdd8] sm:$0xff] }
 0x43f   : > { %4671 = vmatpush1.bf16.msra.mxu0 %v17369_v63  ;;  %v17484_v63 = vcombine.high %v1657_v57, %v1665_v59 }
 0x440   : > { %4753 = vmatpush1.bf16.msra.mxu1 %v17371_v0  ;;  %4672 = vmatprep.subr.bf16.mxu0 %v17386_v1  ;;  %v1672_v0 = vld [vmem:[%s23128_s4 + $0xb10] sm:$0xff] }
 0x441   : > { %4754 = vmatprep.subr.bf16.mxu1 %v17388_v2  ;;  %v1680_v1 = vld [vmem:[%s23128_s4 + $0xb50] sm:$0xff]  ;;  %v1673_v2 = vld [vmem:[%s23128_s4 + $0xb18] sm:$0xff] }
 0x442   : > { %v17498_v6 = vcombine.high %v1672_v0, %v1680_v1  ;;  %v17497_v36 = vcombine.low %v1672_v0, %v1680_v1  ;;  %v1777_v0 = vld [vmem:[%s23128_s4 + $0xe58] sm:$0xff] }
 0x443   : > { %4673 = vmatpush1.bf16.msra.mxu0 %v17385_v7  ;;  %v17500_v7 = vcombine.high %v1673_v2, %v1681_v3 }
 0x444   : > { %4755 = vmatpush1.bf16.msra.mxu1 %v17387_v8  ;;  %4683 = vmatprep.subr.bf16.mxu0 %v17402_v9  ;;  %v1688_v8 = vld [vmem:[%s23128_s4 + $0xb90] sm:$0xff] }
 0x445   : > { %4765 = vmatprep.subr.bf16.mxu1 %v17404_v10  ;;  %v1696_v9 = vld [vmem:[%s23128_s4 + $0xbd0] sm:$0xff]  ;;  %v1689_v10 = vld [vmem:[%s23128_s4 + $0xb98] sm:$0xff] }
 0x446   : > { %4675 = vmatmul.mubr.bf16.vlgmr.msra.gmra.mrb[12].mxu0 %v23247_v14  ;;  %v17514_v41 = vcombine.high %v1688_v8, %v1696_v9  ;;  %v17516_v13 = vcombine.high %v1689_v10, %v1697_v39  ;;  %v17515_v20 = vcombine.low %v1689_v10, %v1697_v39 }
 0x447   : > { %4757 = vmatmul.mubr.bf16.vlgmr.msra.gmra.mrb[12].mxu1 %v23247_v14  ;;  %4684 = vmatpush1.bf16.msra.mxu0 %v17401_v12  ;;  %v17499_v12 = vcombine.low %v1673_v2, %v1681_v3 }
 0x448   : > { %4715 = vmatprep.mubr.bf16.mxu0 %v23257_v21  ;;  %4766 = vmatpush1.bf16.msra.mxu1 %v17403_v15  ;;  %v1704_v15 = vld [vmem:[%s23128_s4 + $0xc10] sm:$0xff] }
 0x449   : > { %4797 = vmatprep.mubr.bf16.mxu1 %v23257_v21  ;;  %4685 = vmatprep.subr.bf16.mxu0 %v17418_v16  ;;  %v1712_v16 = vld [vmem:[%s23128_s4 + $0xc50] sm:$0xff] }
 0x44a   : > { %4767 = vmatprep.subr.bf16.mxu1 %v17420_v19  ;;  %v17513_v19 = vcombine.low %v1688_v8, %v1696_v9  ;;  %v17530_v22 = vcombine.high %v1704_v15, %v1712_v16  ;;  %v17529_v29 = vcombine.low %v1704_v15, %v1712_v16  ;;  %v1793_v8 = vld [vmem:[%s23128_s4 + $0xed8] sm:$0xff] }
 0x44b   : > { %4686 = vmatpush1.bf16.msra.mxu0 %v17417_v23  ;;  %v17532_v23 = vcombine.high %v1705_v17, %v1713_v18  ;;  %v1809_v15 = vld [vmem:[%s23128_s4 + $0xf58] sm:$0xff] }
 0x44c   : > { %4768 = vmatpush1.bf16.msra.mxu1 %v17419_v24  ;;  %4687 = vmatprep.subr.bf16.mxu0 %v17434_v25  ;;  %v1720_v24 = vld [vmem:[%s23128_s4 + $0xc90] sm:$0xff] }
 0x44d   : > { %4769 = vmatprep.subr.bf16.mxu1 %v17436_v27  ;;  %v1728_v25 = vld [vmem:[%s23128_s4 + $0xcd0] sm:$0xff]  ;;  %v1721_v27 = vld [vmem:[%s23128_s4 + $0xc98] sm:$0xff] }
 0x44e   : > { %v17546_v31 = vcombine.high %v1720_v24, %v1728_v25  ;;  %v17545_v45 = vcombine.low %v1720_v24, %v1728_v25  ;;  %v17547_v46 = vcombine.low %v1721_v27, %v1729_v28  ;;  %v1825_v24 = vld [vmem:[%s23128_s4 + $0xfd8] sm:$0xff] }
 0x44f   : > { %4688 = vmatpush1.bf16.msra.mxu0 %v17433_v32  ;;  %v17548_v32 = vcombine.high %v1721_v27, %v1729_v28 }
 0x450   : > { %4770 = vmatpush1.bf16.msra.mxu1 %v17435_v33  ;;  %4689 = vmatprep.subr.bf16.mxu0 %v17450_v34  ;;  %v1736_v33 = vld [vmem:[%s23128_s4 + $0xd10] sm:$0xff] }
 0x451   : > { %4771 = vmatprep.subr.bf16.mxu1 %v17452_v42  ;;  %v1744_v34 = vld [vmem:[%s23128_s4 + $0xd50] sm:$0xff]  ;;  %v1737_v42 = vld [vmem:[%s23128_s4 + $0xd18] sm:$0xff] }
 0x452   : > { %v17562_v47 = vcombine.high %v1736_v33, %v1744_v34  ;;  %v17561_v55 = vcombine.low %v1736_v33, %v1744_v34  ;;  %v17563_v57 = vcombine.low %v1737_v42, %v1745_v44  ;;  %v1331_v33 = vld [vmem:[%s23128_s4 + $0x68] sm:$0xff] }
 0x453   : > { %4690 = vmatpush1.bf16.msra.mxu0 %v17449_v48  ;;  %v17564_v48 = vcombine.high %v1737_v42, %v1745_v44 }
 0x454   : > { %4772 = vmatpush1.bf16.msra.mxu1 %v17451_v49  ;;  %4691 = vmatprep.subr.bf16.mxu0 %v17466_v51  ;;  %v1752_v49 = vld [vmem:[%s23128_s4 + $0xd90] sm:$0xff] }
 0x455   : > { %4773 = vmatprep.subr.bf16.mxu1 %v17468_v52  ;;  %v1760_v51 = vld [vmem:[%s23128_s4 + $0xdd0] sm:$0xff]  ;;  %v1753_v52 = vld [vmem:[%s23128_s4 + $0xd98] sm:$0xff] }
 0x456   : > { %v17578_v59 = vcombine.high %v1752_v49, %v1760_v51  ;;  %v17577_v1 = vcombine.low %v1752_v49, %v1760_v51  ;;  %v17579_v2 = vcombine.low %v1753_v52, %v1761_v54  ;;  %v1339_v49 = vld [vmem:[%s23128_s4 + $0xa8] sm:$0xff] }
 0x457   : > { %4692 = vmatpush1.bf16.msra.mxu0 %v17465_v61  ;;  %v17580_v61 = vcombine.high %v1753_v52, %v1761_v54  ;;  %v1347_v51 = vld [vmem:[%s23128_s4 + $0xe8] sm:$0xff] }
 0x458   : > { %4774 = vmatpush1.bf16.msra.mxu1 %v17467_v11  ;;  %4693 = vmatprep.subr.bf16.mxu0 %v17482_v62  ;;  %v1768_v11 = vld [vmem:[%s23128_s4 + $0xe10] sm:$0xff] }
 0x459   : > { %4775 = vmatprep.subr.bf16.mxu1 %v17484_v63  ;;  %v1776_v62 = vld [vmem:[%s23128_s4 + $0xe50] sm:$0xff]  ;;  %v1769_v63 = vld [vmem:[%s23128_s4 + $0xe18] sm:$0xff] }
 0x45a   : > { %v17594_v3 = vcombine.high %v1768_v11, %v1776_v62  ;;  %v17593_v9 = vcombine.low %v1768_v11, %v1776_v62  ;;  %v17595_v10 = vcombine.low %v1769_v63, %v1777_v0  ;;  %v1363_v11 = vld [vmem:[%s23128_s4 + $0x168] sm:$0xff] }
 0x45b   : > { %4694 = vmatpush1.bf16.msra.mxu0 %v17481_v4  ;;  %v17596_v4 = vcombine.high %v1769_v63, %v1777_v0  ;;  %v17167_v63 = vcombine.low %v1339_v49, %v1347_v51 }
 0x45c   : > { %4776 = vmatpush1.bf16.msra.mxu1 %v17483_v5  ;;  %4695 = vmatprep.subr.bf16.mxu0 %v17498_v6  ;;  %v1784_v5 = vld [vmem:[%s23128_s4 + $0xe90] sm:$0xff] }
 0x45d   : > { %4777 = vmatprep.subr.bf16.mxu1 %v17500_v7  ;;  %v1792_v6 = vld [vmem:[%s23128_s4 + $0xed0] sm:$0xff]  ;;  %v1785_v7 = vld [vmem:[%s23128_s4 + $0xe98] sm:$0xff] }
 0x45e   : > { %v17610_v39 = vcombine.high %v1784_v5, %v1792_v6  ;;  %v17609_v16 = vcombine.low %v1784_v5, %v1792_v6  ;;  %v17611_v17 = vcombine.low %v1785_v7, %v1793_v8  ;;  %v1379_v5 = vld [vmem:[%s23128_s4 + $0x1e8] sm:$0xff] }
 0x45f   : > { %4696 = vmatpush1.bf16.msra.mxu0 %v17497_v36  ;;  %v17612_v36 = vcombine.high %v1785_v7, %v1793_v8 }
 0x460   : > { %4778 = vmatpush1.bf16.msra.mxu1 %v17499_v12  ;;  %4697 = vmatprep.subr.bf16.mxu0 %v17514_v41  ;;  %v1800_v12 = vld [vmem:[%s23128_s4 + $0xf10] sm:$0xff] }
 0x461   : > { %4779 = vmatprep.subr.bf16.mxu1 %v17516_v13  ;;  %v1808_v41 = vld [vmem:[%s23128_s4 + $0xf50] sm:$0xff]  ;;  %v1801_v13 = vld [vmem:[%s23128_s4 + $0xf18] sm:$0xff] }
 0x462   : > { %v17626_v18 = vcombine.high %v1800_v12, %v1808_v41  ;;  %v17625_v25 = vcombine.low %v1800_v12, %v1808_v41  ;;  %v17627_v27 = vcombine.low %v1801_v13, %v1809_v15  ;;  %v1395_v12 = vld [vmem:[%s23128_s4 + $0x268] sm:$0xff] }
 0x463   : > { %4698 = vmatpush1.bf16.msra.mxu0 %v17513_v19  ;;  %v17628_v19 = vcombine.high %v1801_v13, %v1809_v15 }
 0x464   : > { %4780 = vmatpush1.bf16.msra.mxu1 %v17515_v20  ;;  %4699 = vmatprep.subr.bf16.mxu0 %v17530_v22  ;;  %v1816_v20 = vld [vmem:[%s23128_s4 + $0xf90] sm:$0xff] }
 0x465   : > { %4781 = vmatprep.subr.bf16.mxu1 %v17532_v23  ;;  %v1824_v22 = vld [vmem:[%s23128_s4 + $0xfd0] sm:$0xff]  ;;  %v1817_v23 = vld [vmem:[%s23128_s4 + $0xf98] sm:$0xff] }
 0x466   : > { %v17642_v28 = vcombine.high %v1816_v20, %v1824_v22  ;;  %v17641_v34 = vcombine.low %v1816_v20, %v1824_v22  ;;  %v17643_v42 = vcombine.low %v1817_v23, %v1825_v24  ;;  %v1411_v20 = vld [vmem:[%s23128_s4 + $0x2e8] sm:$0xff] }
 0x467   : > { %4700 = vmatpush1.bf16.msra.mxu0 %v17529_v29  ;;  %v17644_v29 = vcombine.high %v1817_v23, %v1825_v24 }
 0x468   : > { %4782 = vmatpush1.bf16.msra.mxu1 %v17531_v30  ;;  %4701 = vmatprep.subr.bf16.mxu0 %v17546_v31  ;;  %v1322_v30 = vld [vmem:[%s23128_s4 + $0x20] sm:$0xff] }
 0x469   : > { %4783 = vmatprep.subr.bf16.mxu1 %v17548_v32  ;;  %v1330_v31 = vld [vmem:[%s23128_s4 + $0x60] sm:$0xff]  ;;  %v1323_v32 = vld [vmem:[%s23128_s4 + $0x28] sm:$0xff] }
 0x46a   : > { %v17150_v44 = vcombine.high %v1322_v30, %v1330_v31  ;;  %v17151_v52 = vcombine.low %v1323_v32, %v1331_v33 }
 0x46b   : > { %4702 = vmatpush1.bf16.msra.mxu0 %v17545_v45  ;;  %v17152_v45 = vcombine.high %v1323_v32, %v1331_v33 }
 0x46c   : > { %4784 = vmatpush1.bf16.msra.mxu1 %v17547_v46  ;;  %4703 = vmatprep.subr.bf16.mxu0 %v17562_v47  ;;  %v1338_v46 = vld [vmem:[%s23128_s4 + $0xa0] sm:$0xff] }
 0x46d   : > { %4785 = vmatprep.subr.bf16.mxu1 %v17564_v48  ;;  %v1346_v47 = vld [vmem:[%s23128_s4 + $0xe0] sm:$0xff]  ;;  %v17149_v48 = vcombine.low %v1322_v30, %v1330_v31  ;;  %v1427_v30 = vld [vmem:[%s23128_s4 + $0x368] sm:$0xff] }
 0x46e   : > { %v17166_v54 = vcombine.high %v1338_v46, %v1346_v47  ;;  %v17165_v62 = vcombine.low %v1338_v46, %v1346_v47  ;;  %v1443_v46 = vld [vmem:[%s23128_s4 + $0x3e8] sm:$0xff] }
 0x46f   : > { %4704 = vmatpush1.bf16.msra.mxu0 %v17561_v55  ;;  %v1354_v55 = vld [vmem:[%s23128_s4 + $0x120] sm:$0xff] }
 0x470   : > { %4786 = vmatpush1.bf16.msra.mxu1 %v17563_v57  ;;  %4705 = vmatprep.subr.bf16.mxu0 %v17578_v59  ;;  %v1362_v57 = vld [vmem:[%s23128_s4 + $0x160] sm:$0xff]  ;;  %v17168_v59 = vcombine.high %v1339_v49, %v1347_v51 }
 0x471   : > { %4787 = vmatprep.subr.bf16.mxu1 %v17580_v61  ;;  %v1355_v61 = vld [vmem:[%s23128_s4 + $0x128] sm:$0xff]  ;;  %v17182_v0 = vcombine.high %v1354_v55, %v1362_v57  ;;  %v17181_v6 = vcombine.low %v1354_v55, %v1362_v57 }
 0x472   : > { %v17183_v7 = vcombine.low %v1355_v61, %v1363_v11  ;;  %v1451_v55 = vld [vmem:[%s23128_s4 + $0x428] sm:$0xff] }
 0x473   : > { %4706 = vmatpush1.bf16.msra.mxu0 %v17577_v1  ;;  %v17184_v1 = vcombine.high %v1355_v61, %v1363_v11  ;;  %v1459_v57 = vld [vmem:[%s23128_s4 + $0x468] sm:$0xff] }
 0x474   : > { %4788 = vmatpush1.bf16.msra.mxu1 %v17579_v2  ;;  %4707 = vmatprep.subr.bf16.mxu0 %v17594_v3  ;;  %v1370_v2 = vld [vmem:[%s23128_s4 + $0x1a0] sm:$0xff] }
 0x475   : > { %4789 = vmatprep.subr.bf16.mxu1 %v17596_v4  ;;  %v1378_v3 = vld [vmem:[%s23128_s4 + $0x1e0] sm:$0xff]  ;;  %v1371_v4 = vld [vmem:[%s23128_s4 + $0x1a8] sm:$0xff] }
 0x476   : > { %v17198_v8 = vcombine.high %v1370_v2, %v1378_v3  ;;  %v17197_v41 = vcombine.low %v1370_v2, %v1378_v3  ;;  %v17199_v13 = vcombine.low %v1371_v4, %v1379_v5  ;;  %v1475_v2 = vld [vmem:[%s23128_s4 + $0x4e8] sm:$0xff] }
 0x477   : > { %4708 = vmatpush1.bf16.msra.mxu0 %v17593_v9  ;;  %v17200_v9 = vcombine.high %v1371_v4, %v1379_v5  ;;  %v17279_v4 = vcombine.low %v1451_v55, %v1459_v57 }
 0x478   : > { %4790 = vmatpush1.bf16.msra.mxu1 %v17595_v10  ;;  %4709 = vmatprep.subr.bf16.mxu0 %v17610_v39  ;;  %v1386_v10 = vld [vmem:[%s23128_s4 + $0x220] sm:$0xff] }
 0x479   : > { %4791 = vmatprep.subr.bf16.mxu1 %v17612_v36  ;;  %v1394_v39 = vld [vmem:[%s23128_s4 + $0x260] sm:$0xff]  ;;  %v1387_v36 = vld [vmem:[%s23128_s4 + $0x228] sm:$0xff] }
 0x47a   : > { %v17214_v15 = vcombine.high %v1386_v10, %v1394_v39  ;;  %v17213_v22 = vcombine.low %v1386_v10, %v1394_v39  ;;  %v17215_v23 = vcombine.low %v1387_v36, %v1395_v12  ;;  %v1491_v10 = vld [vmem:[%s23128_s4 + $0x568] sm:$0xff] }
 0x47b   : > { %4710 = vmatpush1.bf16.msra.mxu0 %v17609_v16  ;;  %v17216_v16 = vcombine.high %v1387_v36, %v1395_v12 }
 0x47c   : > { %4792 = vmatpush1.bf16.msra.mxu1 %v17611_v17  ;;  %4711 = vmatprep.subr.bf16.mxu0 %v17626_v18  ;;  %v1402_v17 = vld [vmem:[%s23128_s4 + $0x2a0] sm:$0xff] }
 0x47d   : > { %4793 = vmatprep.subr.bf16.mxu1 %v17628_v19  ;;  %v1410_v18 = vld [vmem:[%s23128_s4 + $0x2e0] sm:$0xff]  ;;  %v1403_v19 = vld [vmem:[%s23128_s4 + $0x2a8] sm:$0xff] }
 0x47e   : > { %v17230_v24 = vcombine.high %v1402_v17, %v1410_v18  ;;  %v17229_v31 = vcombine.low %v1402_v17, %v1410_v18  ;;  %v17231_v32 = vcombine.low %v1403_v19, %v1411_v20  ;;  %v1507_v17 = vld [vmem:[%s23128_s4 + $0x5e8] sm:$0xff] }
 0x47f   : > { %4712 = vmatpush1.bf16.msra.mxu0 %v17625_v25  ;;  %v17232_v25 = vcombine.high %v1403_v19, %v1411_v20 }
 0x480   : > { %4794 = vmatpush1.bf16.msra.mxu1 %v17627_v27  ;;  %4713 = vmatprep.subr.bf16.mxu0 %v17642_v28  ;;  %v1418_v27 = vld [vmem:[%s23128_s4 + $0x320] sm:$0xff] }
 0x481   : > { %4795 = vmatprep.subr.bf16.mxu1 %v17644_v29  ;;  %v1426_v28 = vld [vmem:[%s23128_s4 + $0x360] sm:$0xff]  ;;  %v1419_v29 = vld [vmem:[%s23128_s4 + $0x328] sm:$0xff] }
 0x482   : > { %v17246_v33 = vcombine.high %v1418_v27, %v1426_v28  ;;  %v17245_v47 = vcombine.low %v1418_v27, %v1426_v28  ;;  %v1523_v27 = vld [vmem:[%s23128_s4 + $0x668] sm:$0xff] }
 0x483   : > { %4714 = vmatpush1.bf16.msra.mxu0 %v17641_v34  ;;  %v17248_v34 = vcombine.high %v1419_v29, %v1427_v30 }
 0x484   : > { %4796 = vmatpush1.bf16.msra.mxu1 %v17643_v42  ;;  %4806 = vmatprep.subr.bf16.mxu0 %v17150_v44  ;;  %v1434_v42 = vld [vmem:[%s23128_s4 + $0x3a0] sm:$0xff] }
 0x485   : > { %4888 = vmatprep.subr.bf16.mxu1 %v17152_v45  ;;  %v1442_v44 = vld [vmem:[%s23128_s4 + $0x3e0] sm:$0xff]  ;;  %v1435_v45 = vld [vmem:[%s23128_s4 + $0x3a8] sm:$0xff] }
 0x486   : > { %4716 = vmatmul.mubr.bf16.vlgmr.msra.gmra.mrb[12].mxu0 %v23323_v50  ;;  %v17262_v49 = vcombine.high %v1434_v42, %v1442_v44  ;;  %v17264_v51 = vcombine.high %v1435_v45, %v1443_v46  ;;  %v17263_v61 = vcombine.low %v1435_v45, %v1443_v46 }
 0x487   : > { %4798 = vmatmul.mubr.bf16.vlgmr.msra.gmra.mrb[12].mxu1 %v23323_v50  ;;  %4807 = vmatpush1.bf16.msra.mxu0 %v17149_v48  ;;  %v17247_v48 = vcombine.low %v1419_v29, %v1427_v30 }
 0x488   : > { %4838 = vmatprep.mubr.bf16.mxu0 %v23245_v40  ;;  %4889 = vmatpush1.bf16.msra.mxu1 %v17151_v52  ;;  %v1450_v52 = vld [vmem:[%s23128_s4 + $0x420] sm:$0xff] }
 0x489   : > { %4920 = vmatprep.mubr.bf16.mxu1 %v23245_v40  ;;  %4808 = vmatprep.subr.bf16.mxu0 %v17166_v54  ;;  %v1458_v54 = vld [vmem:[%s23128_s4 + $0x460] sm:$0xff] }
 0x48a   : > { %4890 = vmatprep.subr.bf16.mxu1 %v17168_v59  ;;  %v17261_v59 = vcombine.low %v1434_v42, %v1442_v44  ;;  %v17278_v11 = vcombine.high %v1450_v52, %v1458_v54  ;;  %v17277_v3 = vcombine.low %v1450_v52, %v1458_v54  ;;  %v1539_v42 = vld [vmem:[%s23128_s4 + $0x6e8] sm:$0xff] }
 0x48b   : > { %4809 = vmatpush1.bf16.msra.mxu0 %v17165_v62  ;;  %v17280_v62 = vcombine.high %v1451_v55, %v1459_v57  ;;  %v1555_v52 = vld [vmem:[%s23128_s4 + $0x768] sm:$0xff] }
 0x48c   : > { %4891 = vmatpush1.bf16.msra.mxu1 %v17167_v63  ;;  %4810 = vmatprep.subr.bf16.mxu0 %v17182_v0  ;;  %v1466_v63 = vld [vmem:[%s23128_s4 + $0x4a0] sm:$0xff] }
 0x48d   : > { %4892 = vmatprep.subr.bf16.mxu1 %v17184_v1  ;;  %v1474_v0 = vld [vmem:[%s23128_s4 + $0x4e0] sm:$0xff]  ;;  %v1467_v1 = vld [vmem:[%s23128_s4 + $0x4a8] sm:$0xff] }
 0x48e   : > { %v17294_v5 = vcombine.high %v1466_v63, %v1474_v0  ;;  %v17293_v39 = vcombine.low %v1466_v63, %v1474_v0  ;;  %v17295_v36 = vcombine.low %v1467_v1, %v1475_v2  ;;  %v1571_v63 = vld [vmem:[%s23128_s4 + $0x7e8] sm:$0xff] }
 0x48f   : > { %4811 = vmatpush1.bf16.msra.mxu0 %v17181_v6  ;;  %v17296_v6 = vcombine.high %v1467_v1, %v1475_v2 }
 0x490   : > { %4893 = vmatpush1.bf16.msra.mxu1 %v17183_v7  ;;  %4812 = vmatprep.subr.bf16.mxu0 %v17198_v8  ;;  %v1482_v7 = vld [vmem:[%s23128_s4 + $0x520] sm:$0xff] }
 0x491   : > { %4894 = vmatprep.subr.bf16.mxu1 %v17200_v9  ;;  %v1490_v8 = vld [vmem:[%s23128_s4 + $0x560] sm:$0xff]  ;;  %v1483_v9 = vld [vmem:[%s23128_s4 + $0x528] sm:$0xff] }
 0x492   : > { %v17310_v12 = vcombine.high %v1482_v7, %v1490_v8  ;;  %v17309_v18 = vcombine.low %v1482_v7, %v1490_v8  ;;  %v17311_v19 = vcombine.low %v1483_v9, %v1491_v10  ;;  %v1587_v7 = vld [vmem:[%s23128_s4 + $0x868] sm:$0xff] }
 0x493   : > { %4813 = vmatpush1.bf16.msra.mxu0 %v17197_v41  ;;  %v17312_v41 = vcombine.high %v1483_v9, %v1491_v10 }
 0x494   : > { %4895 = vmatpush1.bf16.msra.mxu1 %v17199_v13  ;;  %4814 = vmatprep.subr.bf16.mxu0 %v17214_v15  ;;  %v1498_v13 = vld [vmem:[%s23128_s4 + $0x5a0] sm:$0xff] }
 0x495   : > { %4896 = vmatprep.subr.bf16.mxu1 %v17216_v16  ;;  %v1506_v15 = vld [vmem:[%s23128_s4 + $0x5e0] sm:$0xff]  ;;  %v1499_v16 = vld [vmem:[%s23128_s4 + $0x5a8] sm:$0xff] }
 0x496   : > { %v17326_v20 = vcombine.high %v1498_v13, %v1506_v15  ;;  %v17325_v28 = vcombine.low %v1498_v13, %v1506_v15  ;;  %v17327_v29 = vcombine.low %v1499_v16, %v1507_v17  ;;  %v1595_v13 = vld [vmem:[%s23128_s4 + $0x8a8] sm:$0xff] }
 0x497   : > { %4815 = vmatpush1.bf16.msra.mxu0 %v17213_v22  ;;  %v17328_v22 = vcombine.high %v1499_v16, %v1507_v17  ;;  %v1603_v15 = vld [vmem:[%s23128_s4 + $0x8e8] sm:$0xff] }
 0x498   : > { %4897 = vmatpush1.bf16.msra.mxu1 %v17215_v23  ;;  %4816 = vmatprep.subr.bf16.mxu0 %v17230_v24  ;;  %v1514_v23 = vld [vmem:[%s23128_s4 + $0x620] sm:$0xff] }
 0x499   : > { %4898 = vmatprep.subr.bf16.mxu1 %v17232_v25  ;;  %v1522_v24 = vld [vmem:[%s23128_s4 + $0x660] sm:$0xff]  ;;  %v1515_v25 = vld [vmem:[%s23128_s4 + $0x628] sm:$0xff] }
 0x49a   : > { %v17342_v30 = vcombine.high %v1514_v23, %v1522_v24  ;;  %v17341_v44 = vcombine.low %v1514_v23, %v1522_v24  ;;  %v17343_v45 = vcombine.low %v1515_v25, %v1523_v27  ;;  %v1619_v23 = vld [vmem:[%s23128_s4 + $0x968] sm:$0xff] }
 0x49b   : > { %4817 = vmatpush1.bf16.msra.mxu0 %v17229_v31  ;;  %v17344_v31 = vcombine.high %v1515_v25, %v1523_v27  ;;  %v17423_v25 = vcombine.low %v1595_v13, %v1603_v15 }
 0x49c   : > { %4899 = vmatpush1.bf16.msra.mxu1 %v17231_v32  ;;  %4818 = vmatprep.subr.bf16.mxu0 %v17246_v33  ;;  %v1530_v32 = vld [vmem:[%s23128_s4 + $0x6a0] sm:$0xff] }
 0x49d   : > { %4900 = vmatprep.subr.bf16.mxu1 %v17248_v34  ;;  %v1538_v33 = vld [vmem:[%s23128_s4 + $0x6e0] sm:$0xff]  ;;  %v1531_v34 = vld [vmem:[%s23128_s4 + $0x6a8] sm:$0xff] }
 0x49e   : > { %v17358_v46 = vcombine.high %v1530_v32, %v1538_v33  ;;  %v17357_v54 = vcombine.low %v1530_v32, %v1538_v33  ;;  %v17359_v55 = vcombine.low %v1531_v34, %v1539_v42  ;;  %v1635_v32 = vld [vmem:[%s23128_s4 + $0x9e8] sm:$0xff] }
 0x49f   : > { %4819 = vmatpush1.bf16.msra.mxu0 %v17245_v47  ;;  %v17360_v47 = vcombine.high %v1531_v34, %v1539_v42 }
 0x4a0   : > { %4901 = vmatpush1.bf16.msra.mxu1 %v17247_v48  ;;  %4820 = vmatprep.subr.bf16.mxu0 %v17262_v49  ;;  %v1546_v48 = vld [vmem:[%s23128_s4 + $0x720] sm:$0xff] }
 0x4a1   : > { %4902 = vmatprep.subr.bf16.mxu1 %v17264_v51  ;;  %v1554_v49 = vld [vmem:[%s23128_s4 + $0x760] sm:$0xff]  ;;  %v1547_v51 = vld [vmem:[%s23128_s4 + $0x728] sm:$0xff] }
 0x4a2   : > { %v17374_v57 = vcombine.high %v1546_v48, %v1554_v49  ;;  %v17373_v0 = vcombine.low %v1546_v48, %v1554_v49  ;;  %v17375_v1 = vcombine.low %v1547_v51, %v1555_v52  ;;  %v1651_v48 = vld [vmem:[%s23128_s4 + $0xa68] sm:$0xff] }
 0x4a3   : > { %4821 = vmatpush1.bf16.msra.mxu0 %v17261_v59  ;;  %v17376_v59 = vcombine.high %v1547_v51, %v1555_v52 }
 0x4a4   : > { %4903 = vmatpush1.bf16.msra.mxu1 %v17263_v61  ;;  %4822 = vmatprep.subr.bf16.mxu0 %v17278_v11  ;;  %v1562_v61 = vld [vmem:[%s23128_s4 + $0x7a0] sm:$0xff] }
 0x4a5   : > { %4904 = vmatprep.subr.bf16.mxu1 %v17280_v62  ;;  %v1570_v11 = vld [vmem:[%s23128_s4 + $0x7e0] sm:$0xff]  ;;  %v1563_v62 = vld [vmem:[%s23128_s4 + $0x7a8] sm:$0xff] }
 0x4a6   : > { %v17390_v2 = vcombine.high %v1562_v61, %v1570_v11  ;;  %v17389_v8 = vcombine.low %v1562_v61, %v1570_v11  ;;  %v17391_v9 = vcombine.low %v1563_v62, %v1571_v63  ;;  %v1667_v61 = vld [vmem:[%s23128_s4 + $0xae8] sm:$0xff] }
 0x4a7   : > { %4823 = vmatpush1.bf16.msra.mxu0 %v17277_v3  ;;  %v17392_v3 = vcombine.high %v1563_v62, %v1571_v63 }
 0x4a8   : > { %4905 = vmatpush1.bf16.msra.mxu1 %v17279_v4  ;;  %4824 = vmatprep.subr.bf16.mxu0 %v17294_v5  ;;  %v1578_v4 = vld [vmem:[%s23128_s4 + $0x820] sm:$0xff] }
 0x4a9   : > { %4906 = vmatprep.subr.bf16.mxu1 %v17296_v6  ;;  %v1586_v5 = vld [vmem:[%s23128_s4 + $0x860] sm:$0xff]  ;;  %v1579_v6 = vld [vmem:[%s23128_s4 + $0x828] sm:$0xff] }
 0x4aa   : > { %v17406_v10 = vcombine.high %v1578_v4, %v1586_v5  ;;  %v17407_v16 = vcombine.low %v1579_v6, %v1587_v7 }
 0x4ab   : > { %4825 = vmatpush1.bf16.msra.mxu0 %v17293_v39  ;;  %v17408_v39 = vcombine.high %v1579_v6, %v1587_v7 }
 0x4ac   : > { %4907 = vmatpush1.bf16.msra.mxu1 %v17295_v36  ;;  %4826 = vmatprep.subr.bf16.mxu0 %v17310_v12  ;;  %v1594_v36 = vld [vmem:[%s23128_s4 + $0x8a0] sm:$0xff] }
 0x4ad   : > { %4908 = vmatprep.subr.bf16.mxu1 %v17312_v41  ;;  %v1602_v12 = vld [vmem:[%s23128_s4 + $0x8e0] sm:$0xff]  ;;  %v17405_v41 = vcombine.low %v1578_v4, %v1586_v5  ;;  %v1683_v4 = vld [vmem:[%s23128_s4 + $0xb68] sm:$0xff] }
 0x4ae   : > { %v17422_v17 = vcombine.high %v1594_v36, %v1602_v12  ;;  %v17421_v24 = vcombine.low %v1594_v36, %v1602_v12  ;;  %v1698_v36 = vld [vmem:[%s23128_s4 + $0xbe0] sm:$0xff] }
 0x4af   : > { %4827 = vmatpush1.bf16.msra.mxu0 %v17309_v18  ;;  %v1610_v18 = vld [vmem:[%s23128_s4 + $0x920] sm:$0xff] }
 0x4b0   : > { %4909 = vmatpush1.bf16.msra.mxu1 %v17311_v19  ;;  %4828 = vmatprep.subr.bf16.mxu0 %v17326_v20  ;;  %v1618_v19 = vld [vmem:[%s23128_s4 + $0x960] sm:$0xff]  ;;  %v17424_v20 = vcombine.high %v1595_v13, %v1603_v15  ;;  %v1691_v13 = vld [vmem:[%s23128_s4 + $0xba8] sm:$0xff] }
 0x4b1   : > { %4910 = vmatprep.subr.bf16.mxu1 %v17328_v22  ;;  %v1611_v22 = vld [vmem:[%s23128_s4 + $0x928] sm:$0xff]  ;;  %v17438_v27 = vcombine.high %v1610_v18, %v1618_v19  ;;  %v17437_v33 = vcombine.low %v1610_v18, %v1618_v19 }
 0x4b2   : > { %v17439_v34 = vcombine.low %v1611_v22, %v1619_v23  ;;  %v1699_v15 = vld [vmem:[%s23128_s4 + $0xbe8] sm:$0xff] }
 0x4b3   : > { %4829 = vmatpush1.bf16.msra.mxu0 %v17325_v28  ;;  %v17440_v28 = vcombine.high %v1611_v22, %v1619_v23 }
 0x4b4   : > { %4911 = vmatpush1.bf16.msra.mxu1 %v17327_v29  ;;  %4830 = vmatprep.subr.bf16.mxu0 %v17342_v30  ;;  %v1626_v29 = vld [vmem:[%s23128_s4 + $0x9a0] sm:$0xff] }
 0x4b5   : > { %4912 = vmatprep.subr.bf16.mxu1 %v17344_v31  ;;  %v1634_v30 = vld [vmem:[%s23128_s4 + $0x9e0] sm:$0xff]  ;;  %v1627_v31 = vld [vmem:[%s23128_s4 + $0x9a8] sm:$0xff] }
 0x4b6   : > { %v17454_v42 = vcombine.high %v1626_v29, %v1634_v30  ;;  %v17453_v49 = vcombine.low %v1626_v29, %v1634_v30  ;;  %v17455_v51 = vcombine.low %v1627_v31, %v1635_v32  ;;  %v1715_v29 = vld [vmem:[%s23128_s4 + $0xc68] sm:$0xff] }
 0x4b7   : > { %4831 = vmatpush1.bf16.msra.mxu0 %v17341_v44  ;;  %v17456_v44 = vcombine.high %v1627_v31, %v1635_v32  ;;  %v17519_v31 = vcombine.low %v1691_v13, %v1699_v15 }
 0x4b8   : > { %4913 = vmatpush1.bf16.msra.mxu1 %v17343_v45  ;;  %4832 = vmatprep.subr.bf16.mxu0 %v17358_v46  ;;  %v1642_v45 = vld [vmem:[%s23128_s4 + $0xa20] sm:$0xff] }
 0x4b9   : > { %4914 = vmatprep.subr.bf16.mxu1 %v17360_v47  ;;  %v1650_v46 = vld [vmem:[%s23128_s4 + $0xa60] sm:$0xff]  ;;  %v1643_v47 = vld [vmem:[%s23128_s4 + $0xa28] sm:$0xff] }
 0x4ba   : > { %v17470_v52 = vcombine.high %v1642_v45, %v1650_v46  ;;  %v17469_v11 = vcombine.low %v1642_v45, %v1650_v46  ;;  %v17471_v62 = vcombine.low %v1643_v47, %v1651_v48  ;;  %v1731_v45 = vld [vmem:[%s23128_s4 + $0xce8] sm:$0xff] }
 0x4bb   : > { %4833 = vmatpush1.bf16.msra.mxu0 %v17357_v54  ;;  %v17472_v54 = vcombine.high %v1643_v47, %v1651_v48 }
 0x4bc   : > { %4915 = vmatpush1.bf16.msra.mxu1 %v17359_v55  ;;  %4834 = vmatprep.subr.bf16.mxu0 %v17374_v57  ;;  %v1658_v55 = vld [vmem:[%s23128_s4 + $0xaa0] sm:$0xff] }
 0x4bd   : > { %4916 = vmatprep.subr.bf16.mxu1 %v17376_v59  ;;  %v1666_v57 = vld [vmem:[%s23128_s4 + $0xae0] sm:$0xff]  ;;  %v1659_v59 = vld [vmem:[%s23128_s4 + $0xaa8] sm:$0xff] }
 0x4be   : > { %v17486_v63 = vcombine.high %v1658_v55, %v1666_v57  ;;  %v17485_v5 = vcombine.low %v1658_v55, %v1666_v57  ;;  %v17487_v6 = vcombine.low %v1659_v59, %v1667_v61  ;;  %v1747_v55 = vld [vmem:[%s23128_s4 + $0xd68] sm:$0xff] }
 0x4bf   : > { %4835 = vmatpush1.bf16.msra.mxu0 %v17373_v0  ;;  %v17488_v0 = vcombine.high %v1659_v59, %v1667_v61 }
 0x4c0   : > { %4917 = vmatpush1.bf16.msra.mxu1 %v17375_v1  ;;  %4836 = vmatprep.subr.bf16.mxu0 %v17390_v2  ;;  %v1674_v1 = vld [vmem:[%s23128_s4 + $0xb20] sm:$0xff] }
 0x4c1   : > { %4918 = vmatprep.subr.bf16.mxu1 %v17392_v3  ;;  %v1682_v2 = vld [vmem:[%s23128_s4 + $0xb60] sm:$0xff]  ;;  %v1675_v3 = vld [vmem:[%s23128_s4 + $0xb28] sm:$0xff] }
 0x4c2   : > { %v17502_v7 = vcombine.high %v1674_v1, %v1682_v2  ;;  %v17501_v18 = vcombine.low %v1674_v1, %v1682_v2  ;;  %v17503_v22 = vcombine.low %v1675_v3, %v1683_v4  ;;  %v1763_v1 = vld [vmem:[%s23128_s4 + $0xde8] sm:$0xff] }
 0x4c3   : > { %4837 = vmatpush1.bf16.msra.mxu0 %v17389_v8 }
 0x4c4   : > { %4919 = vmatpush1.bf16.msra.mxu1 %v17391_v9  ;;  %4847 = vmatprep.subr.bf16.mxu0 %v17406_v10  ;;  %v17504_v10 = vcombine.high %v1675_v3, %v1683_v4 }
 0x4c5   : > { %4929 = vmatprep.subr.bf16.mxu1 %v17408_v39  ;;  %v1690_v39 = vld [vmem:[%s23128_s4 + $0xba0] sm:$0xff] }
 0x4c6   : > { %4839 = vmatmul.mubr.bf16.vlgmr.msra.gmra.mrb[16].mxu0 %v23247_v14  ;;  %v17518_v23 = vcombine.high %v1690_v39, %v1698_v36  ;;  %v17517_v30 = vcombine.low %v1690_v39, %v1698_v36  ;;  %v1779_v39 = vld [vmem:[%s23128_s4 + $0xe68] sm:$0xff] }
 0x4c7   : > { %4921 = vmatmul.mubr.bf16.vlgmr.msra.gmra.mrb[16].mxu1 %v23247_v14  ;;  %4848 = vmatpush1.bf16.msra.mxu0 %v17405_v41 }
 0x4c8   : > { %4879 = vmatprep.mubr.bf16.mxu0 %v23257_v21  ;;  %4930 = vmatpush1.bf16.msra.mxu1 %v17407_v16 }
 0x4c9   : > { %4961 = vmatprep.mubr.bf16.mxu1 %v23257_v21  ;;  %4849 = vmatprep.subr.bf16.mxu0 %v17422_v17 }
 0x4ca   : > { %4931 = vmatprep.subr.bf16.mxu1 %v17424_v20 }
 0x4cb   : > { %4850 = vmatpush1.bf16.msra.mxu0 %v17421_v24  ;;  %v17520_v24 = vcombine.high %v1691_v13, %v1699_v15 }
 0x4cc   : > { %4932 = vmatpush1.bf16.msra.mxu1 %v17423_v25  ;;  %4851 = vmatprep.subr.bf16.mxu0 %v17438_v27  ;;  %v1706_v25 = vld [vmem:[%s23128_s4 + $0xc20] sm:$0xff] }
 0x4cd   : > { %4933 = vmatprep.subr.bf16.mxu1 %v17440_v28  ;;  %v1714_v27 = vld [vmem:[%s23128_s4 + $0xc60] sm:$0xff]  ;;  %v1707_v28 = vld [vmem:[%s23128_s4 + $0xc28] sm:$0xff] }
 0x4ce   : > { %v17534_v32 = vcombine.high %v1706_v25, %v1714_v27  ;;  %v17533_v46 = vcombine.low %v1706_v25, %v1714_v27  ;;  %v17535_v47 = vcombine.low %v1707_v28, %v1715_v29  ;;  %v1802_v27 = vld [vmem:[%s23128_s4 + $0xf20] sm:$0xff] }
 0x4cf   : > { %4852 = vmatpush1.bf16.msra.mxu0 %v17437_v33  ;;  %v17536_v33 = vcombine.high %v1707_v28, %v1715_v29  ;;  %v1810_v28 = vld [vmem:[%s23128_s4 + $0xf60] sm:$0xff]  ;;  %v1803_v29 = vld [vmem:[%s23128_s4 + $0xf28] sm:$0xff] }
 0x4d0   : > { %4934 = vmatpush1.bf16.msra.mxu1 %v17439_v34  ;;  %4853 = vmatprep.subr.bf16.mxu0 %v17454_v42  ;;  %v1722_v34 = vld [vmem:[%s23128_s4 + $0xca0] sm:$0xff] }
 0x4d1   : > { %4935 = vmatprep.subr.bf16.mxu1 %v17456_v44  ;;  %v1730_v42 = vld [vmem:[%s23128_s4 + $0xce0] sm:$0xff]  ;;  %v1723_v44 = vld [vmem:[%s23128_s4 + $0xca8] sm:$0xff] }
 0x4d2   : > { %v17550_v48 = vcombine.high %v1722_v34, %v1730_v42  ;;  %v17549_v57 = vcombine.low %v1722_v34, %v1730_v42  ;;  %v17551_v59 = vcombine.low %v1723_v44, %v1731_v45  ;;  %v1818_v42 = vld [vmem:[%s23128_s4 + $0xfa0] sm:$0xff] }
 0x4d3   : > { %4854 = vmatpush1.bf16.msra.mxu0 %v17453_v49  ;;  %v17552_v49 = vcombine.high %v1723_v44, %v1731_v45  ;;  %v1826_v44 = vld [vmem:[%s23128_s4 + $0xfe0] sm:$0xff]  ;;  %v1819_v45 = vld [vmem:[%s23128_s4 + $0xfa8] sm:$0xff] }
 0x4d4   : > { %4936 = vmatpush1.bf16.msra.mxu1 %v17455_v51  ;;  %4855 = vmatprep.subr.bf16.mxu0 %v17470_v52  ;;  %v1738_v51 = vld [vmem:[%s23128_s4 + $0xd20] sm:$0xff] }
 0x4d5   : > { %4937 = vmatprep.subr.bf16.mxu1 %v17472_v54  ;;  %v1746_v52 = vld [vmem:[%s23128_s4 + $0xd60] sm:$0xff]  ;;  %v1739_v54 = vld [vmem:[%s23128_s4 + $0xd28] sm:$0xff] }
 0x4d6   : > { %v17566_v61 = vcombine.high %v1738_v51, %v1746_v52  ;;  %v17565_v2 = vcombine.low %v1738_v51, %v1746_v52  ;;  %v17567_v3 = vcombine.low %v1739_v54, %v1747_v55  ;;  %v1324_v52 = vld [vmem:[%s23128_s4 + $0x30] sm:$0xff] }
 0x4d7   : > { %4856 = vmatpush1.bf16.msra.mxu0 %v17469_v11  ;;  %v17568_v11 = vcombine.high %v1739_v54, %v1747_v55  ;;  %v1332_v54 = vld [vmem:[%s23128_s4 + $0x70] sm:$0xff]  ;;  %v1325_v55 = vld [vmem:[%s23128_s4 + $0x38] sm:$0xff] }
 0x4d8   : > { %4938 = vmatpush1.bf16.msra.mxu1 %v17471_v62  ;;  %4857 = vmatprep.subr.bf16.mxu0 %v17486_v63  ;;  %v1754_v62 = vld [vmem:[%s23128_s4 + $0xda0] sm:$0xff] }
 0x4d9   : > { %v23553_v8 = vpop.f32.mrb[8].mxu0  ;;  %v23555_v9 = vpop.f32.mrb[8].mxu1  ;;  %4939 = vmatprep.subr.bf16.mxu1 %v17488_v0  ;;  %v1762_v63 = vld [vmem:[%s23128_s4 + $0xde0] sm:$0xff]  ;;  %v1755_v0 = vld [vmem:[%s23128_s4 + $0xda8] sm:$0xff] }
 0x4da   : > { %v23559_v12 = vpop.f32.mrb[9].mxu0  ;;  %v23561_v41 = vpop.f32.mrb[9].mxu1  ;;  %v17582_v4 = vcombine.high %v1754_v62, %v1762_v63  ;;  %v17581_v36 = vcombine.low %v1754_v62, %v1762_v63  ;;  %v17583_v13 = vcombine.low %v1755_v0, %v1763_v1  ;;  %v1340_v63 = vld [vmem:[%s23128_s4 + $0xb0] sm:$0xff] }
 0x4db   : > { %v4557_v16 = vpop.f32.mrb[10].mxu0  ;;  %v4639_v17 = vpop.f32.mrb[10].mxu1  ;;  %4858 = vmatpush1.bf16.msra.mxu0 %v17485_v5  ;;  %v17584_v5 = vcombine.high %v1755_v0, %v1763_v1  ;;  %v1348_v0 = vld [vmem:[%s23128_s4 + $0xf0] sm:$0xff]  ;;  %v17153_v1 = vcombine.low %v1324_v52, %v1332_v54 }
 0x4dc   : > { %4940 = vmatpush1.bf16.msra.mxu1 %v17487_v6  ;;  %v4558_v19 = vpop.f32.mrb[11].mxu0  ;;  %v4640_v20 = vpop.f32.mrb[11].mxu1  ;;  %4859 = vmatprep.subr.bf16.mxu0 %v17502_v7  ;;  %v1770_v6 = vld [vmem:[%s23128_s4 + $0xe20] sm:$0xff] }
 0x4dd   : > { %4941 = vmatprep.subr.bf16.mxu1 %v17504_v10  ;;  %v1778_v7 = vld [vmem:[%s23128_s4 + $0xe60] sm:$0xff]  ;;  %v1771_v10 = vld [vmem:[%s23128_s4 + $0xe28] sm:$0xff] }
 0x4de   : > { %v17598_v15 = vcombine.high %v1770_v6, %v1778_v7  ;;  %v17600_v16 = vcombine.high %v1771_v10, %v1779_v39  ;;  %v1786_v17 = vld [vmem:[%s23128_s4 + $0xea0] sm:$0xff]  ;;  %v1787_v19 = vld [vmem:[%s23128_s4 + $0xea8] sm:$0xff] }
 0x4df   : > { %4860 = vmatpush1.bf16.msra.mxu0 %v17501_v18  ;;  %v1794_v18 = vld [vmem:[%s23128_s4 + $0xee0] sm:$0xff]  ;;  %v1795_v20 = vld [vmem:[%s23128_s4 + $0xee8] sm:$0xff] }
 0x4e0   : > { %4942 = vmatpush1.bf16.msra.mxu1 %v17503_v22  ;;  %4861 = vmatprep.subr.bf16.mxu0 %v17518_v23  ;;  %v17597_v22 = vcombine.low %v1770_v6, %v1778_v7  ;;  %v17599_v23 = vcombine.low %v1771_v10, %v1779_v39  ;;  %v17616_v25 = vcombine.high %v1787_v19, %v1795_v20  ;;  %v1356_v6 = vld [vmem:[%s23128_s4 + $0x130] sm:$0xff]  ;;  %v1357_v10 = vld [vmem:[%s23128_s4 + $0x138] sm:$0xff] }
 0x4e1   : > { %4943 = vmatprep.subr.bf16.mxu1 %v17520_v24  ;;  %v17614_v24 = vcombine.high %v1786_v17, %v1794_v18  ;;  %v1364_v7 = vld [vmem:[%s23128_s4 + $0x170] sm:$0xff] }
 0x4e3   : > { %4862 = vmatpush1.bf16.msra.mxu0 %v17517_v30  ;;  %v1811_v30 = vld [vmem:[%s23128_s4 + $0xf68] sm:$0xff] }
 0x4e4   : > { %4944 = vmatpush1.bf16.msra.mxu1 %v17519_v31  ;;  %4863 = vmatprep.subr.bf16.mxu0 %v17534_v32  ;;  %v17613_v31 = vcombine.low %v1786_v17, %v1794_v18  ;;  %v17615_v32 = vcombine.low %v1787_v19, %v1795_v20  ;;  %v17632_v34 = vcombine.high %v1803_v29, %v1811_v30  ;;  %v1372_v17 = vld [vmem:[%s23128_s4 + $0x1b0] sm:$0xff]  ;;  %v1373_v20 = vld [vmem:[%s23128_s4 + $0x1b8] sm:$0xff] }
 0x4e5   : > { %4945 = vmatprep.subr.bf16.mxu1 %v17536_v33  ;;  %v17630_v33 = vcombine.high %v1802_v27, %v1810_v28  ;;  %v1380_v19 = vld [vmem:[%s23128_s4 + $0x1f0] sm:$0xff] }
 0x4e7   : > { %4864 = vmatpush1.bf16.msra.mxu0 %v17533_v46  ;;  %v1827_v46 = vld [vmem:[%s23128_s4 + $0xfe8] sm:$0xff] }
 0x4e8   : > { %4946 = vmatpush1.bf16.msra.mxu1 %v17535_v47  ;;  %4865 = vmatprep.subr.bf16.mxu0 %v17550_v48  ;;  %v17629_v47 = vcombine.low %v1802_v27, %v1810_v28  ;;  %v17631_v48 = vcombine.low %v1803_v29, %v1811_v30  ;;  %v17648_v51 = vcombine.high %v1819_v45, %v1827_v46  ;;  %v1388_v27 = vld [vmem:[%s23128_s4 + $0x230] sm:$0xff]  ;;  %v1389_v29 = vld [vmem:[%s23128_s4 + $0x238] sm:$0xff] }
 0x4e9   : > { %4947 = vmatprep.subr.bf16.mxu1 %v17552_v49  ;;  %v17646_v49 = vcombine.high %v1818_v42, %v1826_v44  ;;  %v1396_v28 = vld [vmem:[%s23128_s4 + $0x270] sm:$0xff]  ;;  %v1397_v30 = vld [vmem:[%s23128_s4 + $0x278] sm:$0xff] }
 0x4eb   : > { %4866 = vmatpush1.bf16.msra.mxu0 %v17549_v57  ;;  %v1333_v57 = vld [vmem:[%s23128_s4 + $0x78] sm:$0xff] }
 0x4ec   : > { %4948 = vmatpush1.bf16.msra.mxu1 %v17551_v59  ;;  %4867 = vmatprep.subr.bf16.mxu0 %v17566_v61  ;;  %v17645_v59 = vcombine.low %v1818_v42, %v1826_v44  ;;  %v17647_v61 = vcombine.low %v1819_v45, %v1827_v46  ;;  %v17156_v62 = vcombine.high %v1325_v55, %v1333_v57  ;;  %v1412_v42 = vld [vmem:[%s23128_s4 + $0x2f0] sm:$0xff]  ;;  %v1405_v44 = vld [vmem:[%s23128_s4 + $0x2b8] sm:$0xff] }
 0x4ed   : > { %4949 = vmatprep.subr.bf16.mxu1 %v17568_v11  ;;  %v17154_v11 = vcombine.high %v1324_v52, %v1332_v54  ;;  %v17220_v45 = vcombine.high %v1389_v29, %v1397_v30  ;;  %v1413_v46 = vld [vmem:[%s23128_s4 + $0x2f8] sm:$0xff]  ;;  %v1428_v52 = vld [vmem:[%s23128_s4 + $0x370] sm:$0xff] }
 0x4ee   : > { %v1421_v54 = vld [vmem:[%s23128_s4 + $0x338] sm:$0xff] }
 0x4ef   : > { %4868 = vmatpush1.bf16.msra.mxu0 %v17565_v2  ;;  %v1341_v2 = vld [vmem:[%s23128_s4 + $0xb8] sm:$0xff] }
 0x4f0   : > { %4950 = vmatpush1.bf16.msra.mxu1 %v17567_v3  ;;  %4869 = vmatprep.subr.bf16.mxu0 %v17582_v4  ;;  %v1349_v3 = vld [vmem:[%s23128_s4 + $0xf8] sm:$0xff]  ;;  %v17155_v4 = vcombine.low %v1325_v55, %v1333_v57  ;;  %v17236_v55 = vcombine.high %v1405_v44, %v1413_v46 }
 0x4f1   : > { %4951 = vmatprep.subr.bf16.mxu1 %v17584_v5  ;;  %v17170_v5 = vcombine.high %v1340_v63, %v1348_v0  ;;  %v17172_v39 = vcombine.high %v1341_v2, %v1349_v3  ;;  %v1429_v57 = vld [vmem:[%s23128_s4 + $0x378] sm:$0xff] }
 0x4f3   : > { %4870 = vmatpush1.bf16.msra.mxu0 %v17581_v36  ;;  %v1365_v36 = vld [vmem:[%s23128_s4 + $0x178] sm:$0xff] }
 0x4f4   : > { %4952 = vmatpush1.bf16.msra.mxu1 %v17583_v13  ;;  %4871 = vmatprep.subr.bf16.mxu0 %v17598_v15  ;;  %v17169_v13 = vcombine.low %v1340_v63, %v1348_v0  ;;  %v17171_v15 = vcombine.low %v1341_v2, %v1349_v3  ;;  %v17188_v18 = vcombine.high %v1357_v10, %v1365_v36  ;;  %v1444_v63 = vld [vmem:[%s23128_s4 + $0x3f0] sm:$0xff]  ;;  %v1437_v0 = vld [vmem:[%s23128_s4 + $0x3b8] sm:$0xff] }
 0x4f5   : > { %4953 = vmatprep.subr.bf16.mxu1 %v17600_v16  ;;  %v17186_v16 = vcombine.high %v1356_v6, %v1364_v7  ;;  %v1445_v2 = vld [vmem:[%s23128_s4 + $0x3f8] sm:$0xff] }
 0x4f7   : > { %4872 = vmatpush1.bf16.msra.mxu0 %v17597_v22  ;;  %v1381_v22 = vld [vmem:[%s23128_s4 + $0x1f8] sm:$0xff] }
 0x4f8   : > { %4954 = vmatpush1.bf16.msra.mxu1 %v17599_v23  ;;  %4873 = vmatprep.subr.bf16.mxu0 %v17614_v24  ;;  %v17185_v23 = vcombine.low %v1356_v6, %v1364_v7  ;;  %v17187_v24 = vcombine.low %v1357_v10, %v1365_v36  ;;  %v1452_v6 = vld [vmem:[%s23128_s4 + $0x430] sm:$0xff]  ;;  %v1453_v10 = vld [vmem:[%s23128_s4 + $0x438] sm:$0xff] }
 0x4f9   : > { %4955 = vmatprep.subr.bf16.mxu1 %v17616_v25  ;;  %v17202_v25 = vcombine.high %v1372_v17, %v1380_v19  ;;  %v1460_v7 = vld [vmem:[%s23128_s4 + $0x470] sm:$0xff]  ;;  %v1461_v36 = vld [vmem:[%s23128_s4 + $0x478] sm:$0xff] }
 0x4fb   : > { %4874 = vmatpush1.bf16.msra.mxu0 %v17613_v31  ;;  %v17201_v31 = vcombine.low %v1372_v17, %v1380_v19  ;;  %v1468_v17 = vld [vmem:[%s23128_s4 + $0x4b0] sm:$0xff]  ;;  %v1469_v19 = vld [vmem:[%s23128_s4 + $0x4b8] sm:$0xff] }
 0x4fc   : > { %4956 = vmatpush1.bf16.msra.mxu1 %v17615_v32  ;;  %4875 = vmatprep.subr.bf16.mxu0 %v17630_v33  ;;  %v17203_v32 = vcombine.low %v1373_v20, %v1381_v22  ;;  %v17218_v33 = vcombine.high %v1388_v27, %v1396_v28 }
 0x4fd   : > { %4957 = vmatprep.subr.bf16.mxu1 %v17632_v34  ;;  %v1404_v34 = vld [vmem:[%s23128_s4 + $0x2b0] sm:$0xff] }
 0x4ff   : > { %4876 = vmatpush1.bf16.msra.mxu0 %v17629_v47  ;;  %v17217_v47 = vcombine.low %v1388_v27, %v1396_v28  ;;  %v1484_v27 = vld [vmem:[%s23128_s4 + $0x530] sm:$0xff] }
 0x500   : > { %4958 = vmatpush1.bf16.msra.mxu1 %v17631_v48  ;;  %4877 = vmatprep.subr.bf16.mxu0 %v17646_v49  ;;  %v17219_v48 = vcombine.low %v1389_v29, %v1397_v30  ;;  %v17234_v49 = vcombine.high %v1404_v34, %v1412_v42  ;;  %v1492_v28 = vld [vmem:[%s23128_s4 + $0x570] sm:$0xff]  ;;  %v1493_v30 = vld [vmem:[%s23128_s4 + $0x578] sm:$0xff] }
 0x501   : > { %4959 = vmatprep.subr.bf16.mxu1 %v17648_v51  ;;  %v1420_v51 = vld [vmem:[%s23128_s4 + $0x330] sm:$0xff] }
 0x502   : > { %v17249_v3 = vcombine.low %v1420_v51, %v1428_v52 }
 0x503   : > { %4878 = vmatpush1.bf16.msra.mxu0 %v17645_v59  ;;  %v17233_v59 = vcombine.low %v1404_v34, %v1412_v42  ;;  %v1500_v34 = vld [vmem:[%s23128_s4 + $0x5b0] sm:$0xff] }
 0x504   : > { %4960 = vmatpush1.bf16.msra.mxu1 %v17647_v61  ;;  %4970 = vmatprep.subr.bf16.mxu0 %v17154_v11  ;;  %v17235_v61 = vcombine.low %v1405_v44, %v1413_v46  ;;  %v17250_v11 = vcombine.high %v1420_v51, %v1428_v52  ;;  %v1508_v42 = vld [vmem:[%s23128_s4 + $0x5f0] sm:$0xff]  ;;  %v1501_v44 = vld [vmem:[%s23128_s4 + $0x5b8] sm:$0xff] }
 0x505   : > { %5052 = vmatprep.subr.bf16.mxu1 %v17156_v62  ;;  %v1436_v62 = vld [vmem:[%s23128_s4 + $0x3b0] sm:$0xff]  ;;  %v1509_v46 = vld [vmem:[%s23128_s4 + $0x5f8] sm:$0xff] }
 0x506   : > { %4880 = vmatmul.mubr.bf16.vlgmr.msra.gmra.mrb[16].mxu0 %v23323_v50  ;;  %v1516_v51 = vld [vmem:[%s23128_s4 + $0x630] sm:$0xff] }
 0x507   : > { %4962 = vmatmul.mubr.bf16.vlgmr.msra.gmra.mrb[16].mxu1 %v23323_v50  ;;  %4971 = vmatpush1.bf16.msra.mxu0 %v17153_v1  ;;  %v17252_v1 = vcombine.high %v1421_v54, %v1429_v57  ;;  %v1524_v52 = vld [vmem:[%s23128_s4 + $0x670] sm:$0xff] }
 0x508   : > { %5002 = vmatprep.mubr.bf16.mxu0 %v23245_v40  ;;  %5053 = vmatpush1.bf16.msra.mxu1 %v17155_v4  ;;  %v17251_v4 = vcombine.low %v1421_v54, %v1429_v57  ;;  %v1517_v54 = vld [vmem:[%s23128_s4 + $0x638] sm:$0xff] }
 0x509   : > { %5084 = vmatprep.mubr.bf16.mxu1 %v23245_v40  ;;  %4972 = vmatprep.subr.bf16.mxu0 %v17170_v5  ;;  %v17204_v40 = vcombine.high %v1373_v20, %v1381_v22  ;;  %v17266_v5 = vcombine.high %v1436_v62, %v1444_v63  ;;  %v17284_v20 = vcombine.high %v1453_v10, %v1461_v36  ;;  %v1477_v22 = vld [vmem:[%s23128_s4 + $0x4f8] sm:$0xff] }
 0x50a   : > { %5054 = vmatprep.subr.bf16.mxu1 %v17172_v39  ;;  %v17268_v39 = vcombine.high %v1437_v0, %v1445_v2  ;;  %v17300_v29 = vcombine.high %v1469_v19, %v1477_v22  ;;  %v1525_v57 = vld [vmem:[%s23128_s4 + $0x678] sm:$0xff] }
 0x50b   : > { %4973 = vmatpush1.bf16.msra.mxu0 %v17169_v13  ;;  %v17265_v13 = vcombine.low %v1436_v62, %v1444_v63  ;;  %v1532_v62 = vld [vmem:[%s23128_s4 + $0x6b0] sm:$0xff] }
 0x50c   : > { %5055 = vmatpush1.bf16.msra.mxu1 %v17171_v15  ;;  %4974 = vmatprep.subr.bf16.mxu0 %v17186_v16  ;;  %v17267_v15 = vcombine.low %v1437_v0, %v1445_v2  ;;  %v17282_v16 = vcombine.high %v1452_v6, %v1460_v7  ;;  %v1540_v63 = vld [vmem:[%s23128_s4 + $0x6f0] sm:$0xff]  ;;  %v1533_v0 = vld [vmem:[%s23128_s4 + $0x6b8] sm:$0xff] }
 0x50d   : > { %5056 = vmatprep.subr.bf16.mxu1 %v17188_v18  ;;  %v1476_v18 = vld [vmem:[%s23128_s4 + $0x4f0] sm:$0xff]  ;;  %v1541_v2 = vld [vmem:[%s23128_s4 + $0x6f8] sm:$0xff] }
 0x50f   : > { %4975 = vmatpush1.bf16.msra.mxu0 %v17185_v23  ;;  %v17281_v23 = vcombine.low %v1452_v6, %v1460_v7  ;;  %v1548_v6 = vld [vmem:[%s23128_s4 + $0x730] sm:$0xff] }
 0x510   : > { %5057 = vmatpush1.bf16.msra.mxu1 %v17187_v24  ;;  %4976 = vmatprep.subr.bf16.mxu0 %v17202_v25  ;;  %v17283_v24 = vcombine.low %v1453_v10, %v1461_v36  ;;  %v17298_v25 = vcombine.high %v1468_v17, %v1476_v18  ;;  %v1556_v7 = vld [vmem:[%s23128_s4 + $0x770] sm:$0xff]  ;;  %v1549_v10 = vld [vmem:[%s23128_s4 + $0x738] sm:$0xff] }
 0x511   : > { %5058 = vmatprep.subr.bf16.mxu1 %v17204_v40  ;;  %v1485_v40 = vld [vmem:[%s23128_s4 + $0x538] sm:$0xff] }
 0x512   : > { %v1557_v36 = vld [vmem:[%s23128_s4 + $0x778] sm:$0xff] }
 0x513   : > { %4977 = vmatpush1.bf16.msra.mxu0 %v17201_v31  ;;  %v17297_v31 = vcombine.low %v1468_v17, %v1476_v18  ;;  %v1564_v17 = vld [vmem:[%s23128_s4 + $0x7b0] sm:$0xff] }
 0x514   : > { %5059 = vmatpush1.bf16.msra.mxu1 %v17203_v32  ;;  %4978 = vmatprep.subr.bf16.mxu0 %v17218_v33  ;;  %v17299_v32 = vcombine.low %v1469_v19, %v1477_v22  ;;  %v17314_v33 = vcombine.high %v1484_v27, %v1492_v28  ;;  %v1572_v18 = vld [vmem:[%s23128_s4 + $0x7f0] sm:$0xff]  ;;  %v1565_v19 = vld [vmem:[%s23128_s4 + $0x7b8] sm:$0xff] }
 0x515   : > { %5060 = vmatprep.subr.bf16.mxu1 %v17220_v45  ;;  %v17316_v45 = vcombine.high %v1485_v40, %v1493_v30  ;;  %v1573_v22 = vld [vmem:[%s23128_s4 + $0x7f8] sm:$0xff] }
 0x517   : > { %4979 = vmatpush1.bf16.msra.mxu0 %v17217_v47  ;;  %v17313_v47 = vcombine.low %v1484_v27, %v1492_v28  ;;  %v1580_v27 = vld [vmem:[%s23128_s4 + $0x830] sm:$0xff] }
 0x518   : > { %5061 = vmatpush1.bf16.msra.mxu1 %v17219_v48  ;;  %4980 = vmatprep.subr.bf16.mxu0 %v17234_v49  ;;  %v17315_v48 = vcombine.low %v1485_v40, %v1493_v30  ;;  %v17330_v49 = vcombine.high %v1500_v34, %v1508_v42  ;;  %v1588_v28 = vld [vmem:[%s23128_s4 + $0x870] sm:$0xff]  ;;  %v1581_v40 = vld [vmem:[%s23128_s4 + $0x838] sm:$0xff] }
 0x519   : > { %5062 = vmatprep.subr.bf16.mxu1 %v17236_v55  ;;  %v17332_v55 = vcombine.high %v1501_v44, %v1509_v46  ;;  %v1589_v30 = vld [vmem:[%s23128_s4 + $0x878] sm:$0xff] }
 0x51b   : > { %4981 = vmatpush1.bf16.msra.mxu0 %v17233_v59  ;;  %v17329_v59 = vcombine.low %v1500_v34, %v1508_v42  ;;  %v1596_v34 = vld [vmem:[%s23128_s4 + $0x8b0] sm:$0xff] }
 0x51c   : > { %5063 = vmatpush1.bf16.msra.mxu1 %v17235_v61  ;;  %4982 = vmatprep.subr.bf16.mxu0 %v17250_v11  ;;  %v17331_v61 = vcombine.low %v1501_v44, %v1509_v46  ;;  %v17346_v11 = vcombine.high %v1516_v51, %v1524_v52  ;;  %v1604_v42 = vld [vmem:[%s23128_s4 + $0x8f0] sm:$0xff]  ;;  %v17412_v44 = vcombine.high %v1581_v40, %v1589_v30  ;;  %v1605_v46 = vld [vmem:[%s23128_s4 + $0x8f8] sm:$0xff] }
 0x51d   : > { %5064 = vmatprep.subr.bf16.mxu1 %v17252_v1  ;;  %v17348_v1 = vcombine.high %v1517_v54, %v1525_v57 }
 0x51f   : > { %4983 = vmatpush1.bf16.msra.mxu0 %v17249_v3  ;;  %v17345_v3 = vcombine.low %v1516_v51, %v1524_v52  ;;  %v17411_v51 = vcombine.low %v1581_v40, %v1589_v30  ;;  %v17426_v52 = vcombine.high %v1596_v34, %v1604_v42  ;;  %v1685_v40 = vld [vmem:[%s23128_s4 + $0xb78] sm:$0xff]  ;;  %v1692_v30 = vld [vmem:[%s23128_s4 + $0xbb0] sm:$0xff] }
 0x520   : > { %5065 = vmatpush1.bf16.msra.mxu1 %v17251_v4  ;;  %4984 = vmatprep.subr.bf16.mxu0 %v17266_v5  ;;  %v17347_v4 = vcombine.low %v1517_v54, %v1525_v57  ;;  %v17362_v5 = vcombine.high %v1532_v62, %v1540_v63  ;;  %v1621_v57 = vld [vmem:[%s23128_s4 + $0x978] sm:$0xff] }
 0x521   : > { %5066 = vmatprep.subr.bf16.mxu1 %v17268_v39  ;;  %v17364_v39 = vcombine.high %v1533_v0, %v1541_v2 }
 0x523   : > { %4985 = vmatpush1.bf16.msra.mxu0 %v17265_v13  ;;  %v17361_v13 = vcombine.low %v1532_v62, %v1540_v63  ;;  %v1628_v63 = vld [vmem:[%s23128_s4 + $0x9b0] sm:$0xff] }
 0x524   : > { %5067 = vmatpush1.bf16.msra.mxu1 %v17267_v15  ;;  %4986 = vmatprep.subr.bf16.mxu0 %v17282_v16  ;;  %v17363_v15 = vcombine.low %v1533_v0, %v1541_v2  ;;  %v17378_v16 = vcombine.high %v1548_v6, %v1556_v7  ;;  %v1636_v0 = vld [vmem:[%s23128_s4 + $0x9f0] sm:$0xff] }
 0x525   : > { %5068 = vmatprep.subr.bf16.mxu1 %v17284_v20  ;;  %v17380_v20 = vcombine.high %v1549_v10, %v1557_v36 }
 0x527   : > { %4987 = vmatpush1.bf16.msra.mxu0 %v17281_v23  ;;  %v17377_v23 = vcombine.low %v1548_v6, %v1556_v7  ;;  %v1645_v6 = vld [vmem:[%s23128_s4 + $0xa38] sm:$0xff] }
 0x528   : > { %5069 = vmatpush1.bf16.msra.mxu1 %v17283_v24  ;;  %4988 = vmatprep.subr.bf16.mxu0 %v17298_v25  ;;  %v17379_v24 = vcombine.low %v1549_v10, %v1557_v36  ;;  %v17394_v25 = vcombine.high %v1564_v17, %v1572_v18  ;;  %v1653_v10 = vld [vmem:[%s23128_s4 + $0xa78] sm:$0xff] }
 0x529   : > { %5070 = vmatprep.subr.bf16.mxu1 %v17300_v29  ;;  %v17396_v29 = vcombine.high %v1565_v19, %v1573_v22 }
 0x52b   : > { %4989 = vmatpush1.bf16.msra.mxu0 %v17297_v31  ;;  %v17393_v31 = vcombine.low %v1564_v17, %v1572_v18  ;;  %v1661_v17 = vld [vmem:[%s23128_s4 + $0xab8] sm:$0xff]  ;;  %v17476_v18 = vcombine.high %v1645_v6, %v1653_v10 }
 0x52c   : > { %5071 = vmatpush1.bf16.msra.mxu1 %v17299_v32  ;;  %4990 = vmatprep.subr.bf16.mxu0 %v17314_v33  ;;  %v17395_v32 = vcombine.low %v1565_v19, %v1573_v22  ;;  %v17410_v33 = vcombine.high %v1580_v27, %v1588_v28  ;;  %v1669_v19 = vld [vmem:[%s23128_s4 + $0xaf8] sm:$0xff]  ;;  %v17475_v22 = vcombine.low %v1645_v6, %v1653_v10 }
 0x52d   : > { %5072 = vmatprep.subr.bf16.mxu1 %v17316_v45  ;;  %v1597_v45 = vld [vmem:[%s23128_s4 + $0x8b8] sm:$0xff] }
 0x52e   : > { %v17428_v54 = vcombine.high %v1597_v45, %v1605_v46  ;;  %v1733_v6 = vld [vmem:[%s23128_s4 + $0xcf8] sm:$0xff] }
 0x52f   : > { %4991 = vmatpush1.bf16.msra.mxu0 %v17313_v47  ;;  %v17409_v47 = vcombine.low %v1580_v27, %v1588_v28  ;;  %v1677_v27 = vld [vmem:[%s23128_s4 + $0xb38] sm:$0xff]  ;;  %v17492_v28 = vcombine.high %v1661_v17, %v1669_v19 }
 0x530   : > { %5073 = vmatpush1.bf16.msra.mxu1 %v17315_v48  ;;  %4992 = vmatprep.subr.bf16.mxu0 %v17330_v49  ;;  %v1612_v48 = vld [vmem:[%s23128_s4 + $0x930] sm:$0xff] }
 0x531   : > { %5074 = vmatprep.subr.bf16.mxu1 %v17332_v55  ;;  %v1620_v49 = vld [vmem:[%s23128_s4 + $0x970] sm:$0xff]  ;;  %v1613_v55 = vld [vmem:[%s23128_s4 + $0x938] sm:$0xff] }
 0x532   : > { %v17444_v62 = vcombine.high %v1613_v55, %v1621_v57  ;;  %v17441_v2 = vcombine.low %v1612_v48, %v1620_v49 }
 0x533   : > { %4993 = vmatpush1.bf16.msra.mxu0 %v17329_v59  ;;  %v17425_v59 = vcombine.low %v1596_v34, %v1604_v42  ;;  %v17508_v42 = vcombine.high %v1677_v27, %v1685_v40 }
 0x534   : > { %5075 = vmatpush1.bf16.msra.mxu1 %v17331_v61  ;;  %4994 = vmatprep.subr.bf16.mxu0 %v17346_v11  ;;  %v17427_v61 = vcombine.low %v1597_v45, %v1605_v46  ;;  %v17442_v11 = vcombine.high %v1612_v48, %v1620_v49  ;;  %v1693_v46 = vld [vmem:[%s23128_s4 + $0xbb8] sm:$0xff] }
 0x535   : > { %5076 = vmatprep.subr.bf16.mxu1 %v17348_v1  ;;  %v1629_v1 = vld [vmem:[%s23128_s4 + $0x9b8] sm:$0xff] }
 0x537   : > { %4995 = vmatpush1.bf16.msra.mxu0 %v17345_v3  ;;  %v17443_v3 = vcombine.low %v1613_v55, %v1621_v57 }
 0x538   : > { %5077 = vmatpush1.bf16.msra.mxu1 %v17347_v4  ;;  %4996 = vmatprep.subr.bf16.mxu0 %v17362_v5  ;;  %v17458_v4 = vcombine.high %v1628_v63, %v1636_v0  ;;  %v1644_v5 = vld [vmem:[%s23128_s4 + $0xa30] sm:$0xff] }
 0x539   : > { %5078 = vmatprep.subr.bf16.mxu1 %v17364_v39  ;;  %v17457_v39 = vcombine.low %v1628_v63, %v1636_v0  ;;  %v1709_v63 = vld [vmem:[%s23128_s4 + $0xc38] sm:$0xff] }
 0x53a   : > { %v1717_v0 = vld [vmem:[%s23128_s4 + $0xc78] sm:$0xff] }
 0x53b   : > { %4997 = vmatpush1.bf16.msra.mxu0 %v17361_v13  ;;  %v17539_v10 = vcombine.low %v1709_v63, %v1717_v0 }
 0x53c   : > { %5079 = vmatpush1.bf16.msra.mxu1 %v17363_v15  ;;  %4998 = vmatprep.subr.bf16.mxu0 %v17378_v16  ;;  %v1660_v15 = vld [vmem:[%s23128_s4 + $0xab0] sm:$0xff] }
 0x53d   : > { %5080 = vmatprep.subr.bf16.mxu1 %v17380_v20  ;;  %v1668_v16 = vld [vmem:[%s23128_s4 + $0xaf0] sm:$0xff] }
 0x53f   : > { %4999 = vmatpush1.bf16.msra.mxu0 %v17377_v23  ;;  %v17490_v23 = vcombine.high %v1660_v15, %v1668_v16 }
 0x540   : > { %5081 = vmatpush1.bf16.msra.mxu1 %v17379_v24  ;;  %5000 = vmatprep.subr.bf16.mxu0 %v17394_v25  ;;  %v1676_v24 = vld [vmem:[%s23128_s4 + $0xb30] sm:$0xff] }
 0x541   : > { %5082 = vmatprep.subr.bf16.mxu1 %v17396_v29  ;;  %v1684_v25 = vld [vmem:[%s23128_s4 + $0xb70] sm:$0xff]  ;;  %v17489_v29 = vcombine.low %v1660_v15, %v1668_v16  ;;  %v1741_v15 = vld [vmem:[%s23128_s4 + $0xd38] sm:$0xff] }
 0x543   : > { %5001 = vmatpush1.bf16.msra.mxu0 %v17393_v31  ;;  %v17491_v31 = vcombine.low %v1661_v17, %v1669_v19  ;;  %v1749_v17 = vld [vmem:[%s23128_s4 + $0xd78] sm:$0xff] }
 0x544   : > { %5083 = vmatpush1.bf16.msra.mxu1 %v17395_v32  ;;  %5011 = vmatprep.subr.bf16.mxu0 %v17410_v33  ;;  %v17506_v32 = vcombine.high %v1676_v24, %v1684_v25  ;;  %v1700_v33 = vld [vmem:[%s23128_s4 + $0xbf0] sm:$0xff] }
 0x545   : > { %5093 = vmatprep.subr.bf16.mxu1 %v17412_v44 }
 0x546   : > { %5003 = vmatmul.mubr.bf16.vlgmr.msra.gmra.mrb[20].mxu0 %v23247_v14 }
 0x547   : > { %5085 = vmatmul.mubr.bf16.vlgmr.msra.gmra.mrb[20].mxu1 %v23247_v14  ;;  %5012 = vmatpush1.bf16.msra.mxu0 %v17409_v47  ;;  %v1637_v14 = vld [vmem:[%s23128_s4 + $0x9f8] sm:$0xff] }
 0x548   : > { %5043 = vmatprep.mubr.bf16.mxu0 %v23257_v21  ;;  %5094 = vmatpush1.bf16.msra.mxu1 %v17411_v51  ;;  %v17460_v7 = vcombine.high %v1629_v1, %v1637_v14  ;;  %v17459_v36 = vcombine.low %v1629_v1, %v1637_v14  ;;  %v1701_v47 = vld [vmem:[%s23128_s4 + $0xbf8] sm:$0xff]  ;;  %v17505_v51 = vcombine.low %v1676_v24, %v1684_v25 }
 0x549   : > { %5125 = vmatprep.mubr.bf16.mxu1 %v23257_v21  ;;  %5013 = vmatprep.subr.bf16.mxu0 %v17426_v52  ;;  %v1652_v21 = vld [vmem:[%s23128_s4 + $0xa70] sm:$0xff]  ;;  %v17521_v1 = vcombine.low %v1692_v30, %v1700_v33  ;;  %v17523_v14 = vcombine.low %v1693_v46, %v1701_v47  ;;  %v1757_v24 = vld [vmem:[%s23128_s4 + $0xdb8] sm:$0xff]  ;;  %v17572_v25 = vcombine.high %v1741_v15, %v1749_v17 }
 0x54a   : > { %5095 = vmatprep.subr.bf16.mxu1 %v17428_v54  ;;  %v17474_v13 = vcombine.high %v1644_v5, %v1652_v21  ;;  %v17473_v20 = vcombine.low %v1644_v5, %v1652_v21  ;;  %v1708_v52 = vld [vmem:[%s23128_s4 + $0xc30] sm:$0xff]  ;;  %v1725_v5 = vld [vmem:[%s23128_s4 + $0xcb8] sm:$0xff]  ;;  %v17540_v21 = vcombine.high %v1709_v63, %v1717_v0 }
 0x54b   : > { %5014 = vmatpush1.bf16.msra.mxu0 %v17425_v59  ;;  %v1716_v54 = vld [vmem:[%s23128_s4 + $0xc70] sm:$0xff]  ;;  %v17507_v59 = vcombine.low %v1677_v27, %v1685_v40  ;;  %v17556_v16 = vcombine.high %v1725_v5, %v1733_v6  ;;  %v17555_v19 = vcombine.low %v1725_v5, %v1733_v6  ;;  %v1765_v27 = vld [vmem:[%s23128_s4 + $0xdf8] sm:$0xff]  ;;  %v17571_v40 = vcombine.low %v1741_v15, %v1749_v17 }
 0x54c   : > { %5096 = vmatpush1.bf16.msra.mxu1 %v17427_v61  ;;  %5015 = vmatprep.subr.bf16.mxu0 %v17442_v11  ;;  %v17522_v61 = vcombine.high %v1692_v30, %v1700_v33  ;;  %v1772_v30 = vld [vmem:[%s23128_s4 + $0xe30] sm:$0xff]  ;;  %v17588_v33 = vcombine.high %v1757_v24, %v1765_v27  ;;  %v1805_v0 = vld [vmem:[%s23128_s4 + $0xf38] sm:$0xff] }
 0x54d   : > { %5097 = vmatprep.subr.bf16.mxu1 %v17444_v62  ;;  %v17524_v62 = vcombine.high %v1693_v46, %v1701_v47  ;;  %v17587_v47 = vcombine.low %v1757_v24, %v1765_v27  ;;  %v1812_v63 = vld [vmem:[%s23128_s4 + $0xf70] sm:$0xff] }
 0x54e   : > { %v1828_v6 = vld [vmem:[%s23128_s4 + $0xff0] sm:$0xff] }
 0x54f   : > { %5016 = vmatpush1.bf16.msra.mxu0 %v17441_v2  ;;  %v17538_v2 = vcombine.high %v1708_v52, %v1716_v54  ;;  %v20478_v24 = vld [vmem:[%s23612_s6 + $0x4] ss:$16 sps:$4 sm:$0xff]  }
 0x550   : > { %5098 = vmatpush1.bf16.msra.mxu1 %v17443_v3  ;;  %5017 = vmatprep.subr.bf16.mxu0 %v17458_v4  ;;  %v1724_v3 = vld [vmem:[%s23128_s4 + $0xcb0] sm:$0xff] }
 0x551   : > { %5099 = vmatprep.subr.bf16.mxu1 %v17460_v7  ;;  %v1732_v4 = vld [vmem:[%s23128_s4 + $0xcf0] sm:$0xff]  ;;  %v17537_v7 = vcombine.low %v1708_v52, %v1716_v54  ;;  %v1789_v54 = vld [vmem:[%s23128_s4 + $0xeb8] sm:$0xff] }
 0x552   : > { %v1796_v52 = vld [vmem:[%s23128_s4 + $0xef0] sm:$0xff] }
 0x553   : > { %5018 = vmatpush1.bf16.msra.mxu0 %v17457_v39  ;;  %v17554_v39 = vcombine.high %v1724_v3, %v1732_v4  ;;  %v20481_v27 = vld [vmem:[%s23612_s6 + $0x204] ss:$16 sps:$4 sm:$0xff]  }
 0x554   : > { %5100 = vmatpush1.bf16.msra.mxu1 %v17459_v36  ;;  %5019 = vmatprep.subr.bf16.mxu0 %v17474_v13  ;;  %v1740_v36 = vld [vmem:[%s23128_s4 + $0xd30] sm:$0xff] }
 0x555   : > { %5101 = vmatprep.subr.bf16.mxu1 %v17476_v18  ;;  %v1748_v13 = vld [vmem:[%s23128_s4 + $0xd70] sm:$0xff]  ;;  %v17553_v18 = vcombine.low %v1724_v3, %v1732_v4 }
 0x557   : > { %5020 = vmatpush1.bf16.msra.mxu0 %v17473_v20  ;;  %v17570_v20 = vcombine.high %v1740_v36, %v1748_v13 }
 0x558   : > { %5102 = vmatpush1.bf16.msra.mxu1 %v17475_v22  ;;  %5021 = vmatprep.subr.bf16.mxu0 %v17490_v23  ;;  %v1756_v22 = vld [vmem:[%s23128_s4 + $0xdb0] sm:$0xff] }
 0x559   : > { %v23703_v34 = vpop.f32.mrb[12].mxu0  ;;  %5103 = vmatprep.subr.bf16.mxu1 %v17492_v28  ;;  %v1764_v23 = vld [vmem:[%s23128_s4 + $0xdf0] sm:$0xff]  ;;  %v17569_v28 = vcombine.low %v1740_v36, %v1748_v13 }
 0x55a   : > { %v23705_v44 = vpop.f32.mrb[12].mxu1  ;;  %v23707_v45 = vpop.f32.mrb[13].mxu0  ;;  %v17585_v46 = vcombine.low %v1756_v22, %v1764_v23 }
 0x55b   : > { %v23711_v48 = vpop.f32.mrb[13].mxu1  ;;  %v4721_v49 = vpop.f32.mrb[14].mxu0  ;;  %5022 = vmatpush1.bf16.msra.mxu0 %v17489_v29  ;;  %v17586_v29 = vcombine.high %v1756_v22, %v1764_v23 }
 0x55c   : > { %v4803_v55 = vpop.f32.mrb[14].mxu1  ;;  %5104 = vmatpush1.bf16.msra.mxu1 %v17491_v31  ;;  %v4722_v57 = vpop.f32.mrb[15].mxu0  ;;  %5023 = vmatprep.subr.bf16.mxu0 %v17506_v32  ;;  %v1780_v31 = vld [vmem:[%s23128_s4 + $0xe70] sm:$0xff]  ;;  %v1773_v32 = vld [vmem:[%s23128_s4 + $0xe38] sm:$0xff] }
 0x55d   : > { %v4804_v11 = vpop.f32.mrb[15].mxu1  ;;  %5105 = vmatprep.subr.bf16.mxu1 %v17508_v42  ;;  %v1781_v42 = vld [vmem:[%s23128_s4 + $0xe78] sm:$0xff]  ;;  %v17602_v49 = vcombine.high %v1772_v30, %v1780_v31 }
 0x55e   : > { %v17604_v55 = vcombine.high %v1773_v32, %v1781_v42  ;;  %v1797_v57 = vld [vmem:[%s23128_s4 + $0xef8] sm:$0xff] }
 0x55f   : > { %5024 = vmatpush1.bf16.msra.mxu0 %v17505_v51  ;;  %v1788_v51 = vld [vmem:[%s23128_s4 + $0xeb0] sm:$0xff]  ;;  %v17619_v4 = vcombine.low %v1789_v54, %v1797_v57 }
 0x560   : > { %5106 = vmatpush1.bf16.msra.mxu1 %v17507_v59  ;;  %5025 = vmatprep.subr.bf16.mxu0 %v17522_v61  ;;  %v17601_v59 = vcombine.low %v1772_v30, %v1780_v31  ;;  %v17603_v61 = vcombine.low %v1773_v32, %v1781_v42  ;;  %v17618_v11 = vcombine.high %v1788_v51, %v1796_v52  ;;  %v20482_v30 = vld [vmem:[%s23612_s6 + $0x20] ss:$16 sps:$4 sm:$0xff]   ;;  %v20487_v31 = vld [vmem:[%s23612_s6 + $0x224] ss:$16 sps:$4 sm:$0xff]  }
 0x561   : > { %5107 = vmatprep.subr.bf16.mxu1 %v17524_v62  ;;  %v1804_v62 = vld [vmem:[%s23128_s4 + $0xf30] sm:$0xff]  ;;  %v17617_v3 = vcombine.low %v1788_v51, %v1796_v52 }
 0x562   : > { %v17634_v5 = vcombine.high %v1804_v62, %v1812_v63  ;;  %v17633_v15 = vcombine.low %v1804_v62, %v1812_v63  ;;  %v20490_v42 = vld [vmem:[%s23612_s6 + $0x44] ss:$16 sps:$4 sm:$0xff]   ;;  %v20494_v51 = vld [vmem:[%s23612_s6 + $0x60] ss:$16 sps:$4 sm:$0xff]  }
 0x563   : > { %5026 = vmatpush1.bf16.msra.mxu0 %v17521_v1  ;;  %v23744_v1 = vld [vmem:[%s23741_s30] sm:$0xff] }
 0x564   : > { %5108 = vmatpush1.bf16.msra.mxu1 %v17523_v14  ;;  %5027 = vmatprep.subr.bf16.mxu0 %v17538_v2  ;;  %v17620_v14 = vcombine.high %v1789_v54, %v1797_v57  ;;  %v1813_v2 = vld [vmem:[%s23128_s4 + $0xf78] sm:$0xff]  ;;  %v1845_v36 = vrot.slane %v23744_v1, %v23101_v37  ;;  %v1853_v13 = vrot.slane %v23744_v1, %v23109_v43  ;;  %v20499_v52 = vld [vmem:[%s23612_s6 + $0x264] ss:$16 sps:$4 sm:$0xff]   ;;  %v20497_v54 = vld [vmem:[%s23612_s6 + $0x260] ss:$16 sps:$4 sm:$0xff]  }
 0x565   : > { %5109 = vmatprep.subr.bf16.mxu1 %v17540_v21  ;;  %v1820_v21 = vld [vmem:[%s23128_s4 + $0xfb0] sm:$0xff] }
 0x566   : > { %v17650_v17 = vcombine.high %v1820_v21, %v1828_v6  ;;  %v17649_v22 = vcombine.low %v1820_v21, %v1828_v6  ;;  %v20500_v57 = vld [vmem:[%s23612_s6 + $0x80] ss:$16 sps:$4 sm:$0xff]   ;;  %v20511_v63 = vld [vmem:[%s23612_s6 + $0x2a4] ss:$16 sps:$4 sm:$0xff]  }
 0x567   : > { %5028 = vmatpush1.bf16.msra.mxu0 %v17537_v7  ;;  %v1821_v7 = vld [vmem:[%s23128_s4 + $0xfb8] sm:$0xff]  ;;  %v20506_v62 = vld [vmem:[%s23612_s6 + $0xa0] ss:$16 sps:$4 sm:$0xff]   ;;  %v20523_v6 = vld [vmem:[%s23612_s6 + $0x2e4] ss:$16 sps:$4 sm:$0xff]  }
 0x568   : > { %5110 = vmatpush1.bf16.msra.mxu1 %v17539_v10  ;;  %5029 = vmatprep.subr.bf16.mxu0 %v17554_v39  ;;  %v17636_v10 = vcombine.high %v1805_v0, %v1813_v2  ;;  %v1829_v39 = vld [vmem:[%s23128_s4 + $0xff8] sm:$0xff]  ;;  %v20518_v21 = vld [vmem:[%s23612_s6 + $0xe0] ss:$16 sps:$4 sm:$0xff]  }
 0x569   : > { %5111 = vmatprep.subr.bf16.mxu1 %v17556_v16  ;;  %v17635_v16 = vcombine.low %v1805_v0, %v1813_v2  ;;  %v17651_v23 = vcombine.low %v1821_v7, %v1829_v39  ;;  %v20509_v0 = vld [vmem:[%s23612_s6 + $0x2a0] ss:$16 sps:$4 sm:$0xff]  }
 0x56a   : > { %v20512_v2 = vld [vmem:[%s23612_s6 + $0xc0] ss:$16 sps:$4 sm:$0xff]  }
 0x56b   : > { %5030 = vmatpush1.bf16.msra.mxu0 %v17553_v18  ;;  %v17652_v18 = vcombine.high %v1821_v7, %v1829_v39  ;;  %v20521_v7 = vld [vmem:[%s23612_s6 + $0x2e0] ss:$16 sps:$4 sm:$0xff]  }
 0x56c   : > { %5112 = vmatpush1.bf16.msra.mxu1 %v17555_v19  ;;  %5031 = vmatprep.subr.bf16.mxu0 %v17570_v20  ;;  %v20232_v19 = vadd.f32 %v23559_v12, %v1845_v36  ;;  %v20234_v20 = vadd.f32 %v23561_v41, %v1853_v13  ;;  %v20484_v12 = vld [vmem:[%s23612_s6 + $0x24] ss:$16 sps:$4 sm:$0xff]   ;;  %v20524_v39 = vld [vmem:[%s23612_s6 + $0x100] ss:$16 sps:$4 sm:$0xff]  }
 0x56d   : > { %5113 = vmatprep.subr.bf16.mxu1 %v17572_v25  ;;  %v20476_v25 = vld [vmem:[%s23612_s6] ss:$16 sps:$4 sm:$0xff]   ;;  %v20529_v36 = vld [vmem:[%s23612_s6 + $0x304] ss:$16 sps:$4 sm:$0xff]  }
 0x56e   : > { %v20527_v13 = vld [vmem:[%s23612_s6 + $0x300] ss:$16 sps:$4 sm:$0xff]  }
 0x56f   : > { %5032 = vmatpush1.bf16.msra.mxu0 %v17569_v28  ;;  %v5135_v28 = vmax.f32 %v20232_v19, 0.0  ;;  %v20538_v19 = vld [vmem:[%s23612_s6 + $0x144] ss:$16 sps:$4 sm:$0xff]  }
 0x570   : > { %5114 = vmatpush1.bf16.msra.mxu1 %v17571_v40  ;;  %5033 = vmatprep.subr.bf16.mxu0 %v17586_v29  ;;  %v20479_v40 = vld [vmem:[%s23612_s6 + $0x200] ss:$16 sps:$4 sm:$0xff]   ;;  %v5137_v29 = vmax.f32 %v20234_v20, 0.0 }
 0x571   : > { %5115 = vmatprep.subr.bf16.mxu1 %v17588_v33  ;;  %v23762_v41 = vpack.c.bf16 %v5135_v28, %v5135_v28  ;;  %v20485_v33 = vld [vmem:[%s23612_s6 + $0x220] ss:$16 sps:$4 sm:$0xff]  }
 0x572   : > { %v23767_v32 = vpack.c.bf16 %v5137_v29, %v5137_v29  ;;  %v20536_v20 = vld [vmem:[%s23612_s6 + $0x140] ss:$16 sps:$4 sm:$0xff]  }
 0x573   : > { %5034 = vmatpush1.bf16.msra.mxu0 %v17585_v46  ;;  %v20493_v46 = vld [vmem:[%s23612_s6 + $0x244] ss:$16 sps:$4 sm:$0xff]   ;;  %v20545_v28 = vld [vmem:[%s23612_s6 + $0x360] ss:$16 sps:$4 sm:$0xff]  }
 0x574   : > { %5116 = vmatpush1.bf16.msra.mxu1 %v17587_v47  ;;  %5035 = vmatprep.subr.bf16.mxu0 %v17602_v49  ;;  %v20488_v47 = vld [vmem:[%s23612_s6 + $0x40] ss:$16 sps:$4 sm:$0xff]   ;;  %v20496_v49 = vld [vmem:[%s23612_s6 + $0x64] ss:$16 sps:$4 sm:$0xff]  }
 0x575   : > { %5117 = vmatprep.subr.bf16.mxu1 %v17604_v55  ;;  %v20502_v55 = vld [vmem:[%s23612_s6 + $0x84] ss:$16 sps:$4 sm:$0xff]   ;;  %v20548_v29 = vld [vmem:[%s23612_s6 + $0x180] ss:$16 sps:$4 sm:$0xff]  }
 0x577   : > { %5036 = vmatpush1.bf16.msra.mxu0 %v17601_v59  ;;  %v20505_v59 = vld [vmem:[%s23612_s6 + $0x284] ss:$16 sps:$4 sm:$0xff]  }
 0x578   : > { %5118 = vmatpush1.bf16.msra.mxu1 %v17603_v61  ;;  %5037 = vmatprep.subr.bf16.mxu0 %v17618_v11  ;;  %v20503_v61 = vld [vmem:[%s23612_s6 + $0x280] ss:$16 sps:$4 sm:$0xff]   ;;  %v20508_v11 = vld [vmem:[%s23612_s6 + $0xa4] ss:$16 sps:$4 sm:$0xff]  }
 0x579   : > { %5119 = vmatprep.subr.bf16.mxu1 %v17620_v14  ;;  %v20514_v14 = vld [vmem:[%s23612_s6 + $0xc4] ss:$16 sps:$4 sm:$0xff]  }
 0x57b   : > { %5038 = vmatpush1.bf16.msra.mxu0 %v17617_v3  ;;  %v20517_v3 = vld [vmem:[%s23612_s6 + $0x2c4] ss:$16 sps:$4 sm:$0xff]  }
 0x57c   : > { %5120 = vmatpush1.bf16.msra.mxu1 %v17619_v4  ;;  %5039 = vmatprep.subr.bf16.mxu0 %v17634_v5  ;;  %v20515_v4 = vld [vmem:[%s23612_s6 + $0x2c0] ss:$16 sps:$4 sm:$0xff]   ;;  %v20520_v5 = vld [vmem:[%s23612_s6 + $0xe4] ss:$16 sps:$4 sm:$0xff]  }
 0x57d   : > { %5121 = vmatprep.subr.bf16.mxu1 %v17636_v10  ;;  %v20526_v10 = vld [vmem:[%s23612_s6 + $0x104] ss:$16 sps:$4 sm:$0xff]  }
 0x57f   : > { %5040 = vmatpush1.bf16.msra.mxu0 %v17633_v15  ;;  %v20532_v15 = vld [vmem:[%s23612_s6 + $0x124] ss:$16 sps:$4 sm:$0xff]  }
 0x580   : > { %5122 = vmatpush1.bf16.msra.mxu1 %v17635_v16  ;;  %5041 = vmatprep.subr.bf16.mxu0 %v17650_v17  ;;  %v20530_v16 = vld [vmem:[%s23612_s6 + $0x120] ss:$16 sps:$4 sm:$0xff]   ;;  %v20535_v17 = vld [vmem:[%s23612_s6 + $0x324] ss:$16 sps:$4 sm:$0xff]  }
 0x581   : > { %5123 = vmatprep.subr.bf16.mxu1 %v17652_v18  ;;  %v20533_v18 = vld [vmem:[%s23612_s6 + $0x320] ss:$16 sps:$4 sm:$0xff]  }
 0x583   : > { %5042 = vmatpush1.bf16.msra.mxu0 %v17649_v22  ;;  %v20541_v22 = vld [vmem:[%s23612_s6 + $0x344] ss:$16 sps:$4 sm:$0xff]  }
 0x584   : > { %5124 = vmatpush1.bf16.msra.mxu1 %v17651_v23  ;;  %8260 = vmatprep.subr.bf16.mxu0 %v20478_v24  ;;  %v20539_v23 = vld [vmem:[%s23612_s6 + $0x340] ss:$16 sps:$4 sm:$0xff]   ;;  %v20544_v24 = vld [vmem:[%s23612_s6 + $0x164] ss:$16 sps:$4 sm:$0xff]  }
 0x585   : > { %8301 = vmatprep.subr.bf16.mxu1 %v20481_v27  ;;  %v20547_v27 = vld [vmem:[%s23612_s6 + $0x364] ss:$16 sps:$4 sm:$0xff]  }
 0x586   : > { %5044 = vmatmul.mubr.bf16.vlgmr.msra.gmra.mrb[20].mxu0 %v23323_v50 }
 0x587   : > { %5126 = vmatmul.mubr.bf16.vlgmr.msra.gmra.mrb[20].mxu1 %v23323_v50  ;;  %8261 = vmatpush1.bf16.msra.mxu0 %v20476_v25  ;;  %v20491_v50 = vld [vmem:[%s23612_s6 + $0x240] ss:$16 sps:$4 sm:$0xff]  }
 0x588   : > { %8292 = vmatprep.mubr.bf16.mxu0 %v23762_v41  ;;  %8302 = vmatpush1.bf16.msra.mxu1 %v20479_v40  ;;  %v20542_v25 = vld [vmem:[%s23612_s6 + $0x160] ss:$16 sps:$4 sm:$0xff]   ;;  %v20550_v40 = vld [vmem:[%s23612_s6 + $0x184] ss:$16 sps:$4 sm:$0xff]  }
 0x589   : > { %8333 = vmatprep.mubr.bf16.mxu1 %v23767_v32  ;;  %8262 = vmatprep.subr.bf16.mxu0 %v20484_v12  ;;  %v20553_v12 = vld [vmem:[%s23612_s6 + $0x384] ss:$16 sps:$4 sm:$0xff]  }
 0x58a   : > { %8303 = vmatprep.subr.bf16.mxu1 %v20487_v31  ;;  %v20556_v31 = vld [vmem:[%s23612_s6 + $0x1a4] ss:$16 sps:$4 sm:$0xff]  }
 0x58b   : > { %8263 = vmatpush1.bf16.msra.mxu0 %v20482_v30  ;;  %v20551_v30 = vld [vmem:[%s23612_s6 + $0x380] ss:$16 sps:$4 sm:$0xff]  }
 0x58c   : > { %8304 = vmatpush1.bf16.msra.mxu1 %v20485_v33  ;;  %8264 = vmatprep.subr.bf16.mxu0 %v20490_v42  ;;  %v20554_v33 = vld [vmem:[%s23612_s6 + $0x1a0] ss:$16 sps:$4 sm:$0xff]   ;;  %v20559_v42 = vld [vmem:[%s23612_s6 + $0x3a4] ss:$16 sps:$4 sm:$0xff]  }
 0x58d   : > { %8305 = vmatprep.subr.bf16.mxu1 %v20493_v46  ;;  %v23821_v46 = vsub.s32 5, %v23094_v26 }
 0x58f   : > { %8265 = vmatpush1.bf16.msra.mxu0 %v20488_v47  ;;  %v1841_v47 = vrot.slane %v23744_v1, %v23097_v35 }
 0x590   : > { %8306 = vmatpush1.bf16.msra.mxu1 %v20491_v50  ;;  %8266 = vmatprep.subr.bf16.mxu0 %v20496_v49  ;;  %v23826_v50 = vsub.s32 7, %v23094_v26  ;;  %v20557_v49 = vld [vmem:[%s23612_s6 + $0x3a0] ss:$16 sps:$4 sm:$0xff]  }
 0x591   : > { %8307 = vmatprep.subr.bf16.mxu1 %v20499_v52  ;;  %v1849_v52 = vrot.slane %v23744_v1, %v23104_v38 }
 0x593   : > { %8267 = vmatpush1.bf16.msra.mxu0 %v20494_v51  ;;  %v20562_v51 = vld [vmem:[%s23612_s6 + $0x1c4] ss:$16 sps:$4 sm:$0xff]  }
 0x594   : > { %8308 = vmatpush1.bf16.msra.mxu1 %v20497_v54  ;;  %8268 = vmatprep.subr.bf16.mxu0 %v20502_v55  ;;  %v20560_v54 = vld [vmem:[%s23612_s6 + $0x1c0] ss:$16 sps:$4 sm:$0xff]   ;;  %v20565_v55 = vld [vmem:[%s23612_s6 + $0x3c4] ss:$16 sps:$4 sm:$0xff]  }
 0x595   : > { %8309 = vmatprep.subr.bf16.mxu1 %v20505_v59  ;;  %v20231_v59 = vadd.f32 %v23553_v8, %v1841_v47  ;;  %v20610_v47 = vld [vmem:[%s23612_s6 + $0x4c4] ss:$16 sps:$4 sm:$0xff]  }
 0x597   : > { %8269 = vmatpush1.bf16.msra.mxu0 %v20500_v57  ;;  %v1861_v57 = vrot.slane %v23744_v1, %v23821_v46 }
 0x598   : > { %8310 = vmatpush1.bf16.msra.mxu1 %v20503_v61  ;;  %8270 = vmatprep.subr.bf16.mxu0 %v20508_v11  ;;  %v1869_v61 = vrot.slane %v23744_v1, %v23826_v50  ;;  %v20563_v11 = vld [vmem:[%s23612_s6 + $0x3c0] ss:$16 sps:$4 sm:$0xff]  }
 0x599   : > { %8311 = vmatprep.subr.bf16.mxu1 %v20511_v63  ;;  %v20233_v63 = vadd.f32 %v23555_v9, %v1849_v52  ;;  %v20236_v8 = vadd.f32 %v23707_v45, %v1861_v57  ;;  %v20572_v9 = vld [vmem:[%s23612_s6 + $0x400] ss:$16 sps:$4 sm:$0xff]   ;;  %v20580_v45 = vld [vmem:[%s23612_s6 + $0x424] ss:$16 sps:$4 sm:$0xff]  }
 0x59a   : > { %v20238_v1 = vadd.f32 %v23711_v48, %v1869_v61  ;;  %v20611_v57 = vld [vmem:[%s23612_s6 + $0x6c0] ss:$16 sps:$4 sm:$0xff]  }
 0x59b   : > { %8271 = vmatpush1.bf16.msra.mxu0 %v20506_v62  ;;  %v20568_v62 = vld [vmem:[%s23612_s6 + $0x1e4] ss:$16 sps:$4 sm:$0xff]  }
 0x59c   : > { %8312 = vmatpush1.bf16.msra.mxu1 %v20509_v0  ;;  %8272 = vmatprep.subr.bf16.mxu0 %v20514_v14  ;;  %v20566_v0 = vld [vmem:[%s23612_s6 + $0x1e0] ss:$16 sps:$4 sm:$0xff]   ;;  %v20571_v14 = vld [vmem:[%s23612_s6 + $0x3e4] ss:$16 sps:$4 sm:$0xff]  }
 0x59d   : > { %8313 = vmatprep.subr.bf16.mxu1 %v20517_v3  ;;  %v20569_v3 = vld [vmem:[%s23612_s6 + $0x3e0] ss:$16 sps:$4 sm:$0xff]  }
 0x59f   : > { %8273 = vmatpush1.bf16.msra.mxu0 %v20512_v2  ;;  %v5134_v2 = vmax.f32 %v20231_v59, 0.0 }
 0x5a0   : > { %8314 = vmatpush1.bf16.msra.mxu1 %v20515_v4  ;;  %8274 = vmatprep.subr.bf16.mxu0 %v20520_v5  ;;  %v20574_v4 = vld [vmem:[%s23612_s6 + $0x404] ss:$16 sps:$4 sm:$0xff]  }
 0x5a1   : > { %8315 = vmatprep.subr.bf16.mxu1 %v20523_v6  ;;  %v20577_v5 = vld [vmem:[%s23612_s6 + $0x604] ss:$16 sps:$4 sm:$0xff]   ;;  %v5139_v6 = vmax.f32 %v20236_v8, 0.0  ;;  %v20614_v8 = vld [vmem:[%s23612_s6 + $0x4e0] ss:$16 sps:$4 sm:$0xff]  }
 0x5a3   : > { %8275 = vmatpush1.bf16.msra.mxu0 %v20518_v21  ;;  %v5136_v21 = vmax.f32 %v20233_v63, 0.0 }
 0x5a4   : > { %8316 = vmatpush1.bf16.msra.mxu1 %v20521_v7  ;;  %8276 = vmatprep.subr.bf16.mxu0 %v20526_v10  ;;  %v20575_v7 = vld [vmem:[%s23612_s6 + $0x600] ss:$16 sps:$4 sm:$0xff]   ;;  %v5141_v10 = vmax.f32 %v20238_v1, 0.0  ;;  %v20622_v1 = vld [vmem:[%s23612_s6 + $0x504] ss:$16 sps:$4 sm:$0xff]  }
 0x5a5   : > { %8317 = vmatprep.subr.bf16.mxu1 %v20529_v36  ;;  %v23854_v48 = vpack.c.bf16 %v5136_v21, %v5136_v21  ;;  %v23856_v36 = vpack.c.bf16 %v5139_v6, %v5139_v6  ;;  %v20628_v21 = vld [vmem:[%s23612_s6 + $0x524] ss:$16 sps:$4 sm:$0xff]  }
 0x5a6   : > { %v20631_v6 = vld [vmem:[%s23612_s6 + $0x724] ss:$16 sps:$4 sm:$0xff]  }
 0x5a7   : > { %8277 = vmatpush1.bf16.msra.mxu0 %v20524_v39  ;;  %v23852_v39 = vpack.c.bf16 %v5134_v2, %v5134_v2  ;;  %v20617_v2 = vld [vmem:[%s23612_s6 + $0x6e0] ss:$16 sps:$4 sm:$0xff]  }
 0x5a8   : > { %8318 = vmatpush1.bf16.msra.mxu1 %v20527_v13  ;;  %8278 = vmatprep.subr.bf16.mxu0 %v20532_v15  ;;  %v20583_v13 = vld [vmem:[%s23612_s6 + $0x624] ss:$16 sps:$4 sm:$0xff]   ;;  %v23860_v15 = vpack.c.bf16 %v5141_v10, %v5141_v10 }
 0x5a9   : > { %8319 = vmatprep.subr.bf16.mxu1 %v20535_v17  ;;  %v20581_v17 = vld [vmem:[%s23612_s6 + $0x620] ss:$16 sps:$4 sm:$0xff]   ;;  %v20634_v10 = vld [vmem:[%s23612_s6 + $0x544] ss:$16 sps:$4 sm:$0xff]  }
 0x5ab   : > { %8279 = vmatpush1.bf16.msra.mxu0 %v20530_v16  ;;  %v20578_v16 = vld [vmem:[%s23612_s6 + $0x420] ss:$16 sps:$4 sm:$0xff]  }
 0x5ac   : > { %8320 = vmatpush1.bf16.msra.mxu1 %v20533_v18  ;;  %8280 = vmatprep.subr.bf16.mxu0 %v20538_v19  ;;  %v20586_v18 = vld [vmem:[%s23612_s6 + $0x444] ss:$16 sps:$4 sm:$0xff]   ;;  %v20584_v19 = vld [vmem:[%s23612_s6 + $0x440] ss:$16 sps:$4 sm:$0xff]  }
 0x5ad   : > { %8321 = vmatprep.subr.bf16.mxu1 %v20541_v22  ;;  %v20587_v22 = vld [vmem:[%s23612_s6 + $0x640] ss:$16 sps:$4 sm:$0xff]  }
 0x5af   : > { %8281 = vmatpush1.bf16.msra.mxu0 %v20536_v20  ;;  %v20589_v20 = vld [vmem:[%s23612_s6 + $0x644] ss:$16 sps:$4 sm:$0xff]  }
 0x5b0   : > { %8322 = vmatpush1.bf16.msra.mxu1 %v20539_v23  ;;  %8282 = vmatprep.subr.bf16.mxu0 %v20544_v24  ;;  %v20592_v23 = vld [vmem:[%s23612_s6 + $0x464] ss:$16 sps:$4 sm:$0xff]   ;;  %v20590_v24 = vld [vmem:[%s23612_s6 + $0x460] ss:$16 sps:$4 sm:$0xff]  }
 0x5b1   : > { %8323 = vmatprep.subr.bf16.mxu1 %v20547_v27  ;;  %v20593_v27 = vld [vmem:[%s23612_s6 + $0x660] ss:$16 sps:$4 sm:$0xff]  }
 0x5b3   : > { %8283 = vmatpush1.bf16.msra.mxu0 %v20542_v25  ;;  %v20595_v25 = vld [vmem:[%s23612_s6 + $0x664] ss:$16 sps:$4 sm:$0xff]  }
 0x5b4   : > { %8324 = vmatpush1.bf16.msra.mxu1 %v20545_v28  ;;  %8284 = vmatprep.subr.bf16.mxu0 %v20550_v40  ;;  %v20598_v28 = vld [vmem:[%s23612_s6 + $0x484] ss:$16 sps:$4 sm:$0xff]   ;;  %v20596_v40 = vld [vmem:[%s23612_s6 + $0x480] ss:$16 sps:$4 sm:$0xff]  }
 0x5b5   : > { %8325 = vmatprep.subr.bf16.mxu1 %v20553_v12  ;;  %v20599_v12 = vld [vmem:[%s23612_s6 + $0x680] ss:$16 sps:$4 sm:$0xff]  }
 0x5b7   : > { %8285 = vmatpush1.bf16.msra.mxu0 %v20548_v29  ;;  %v20601_v29 = vld [vmem:[%s23612_s6 + $0x684] ss:$16 sps:$4 sm:$0xff]  }
 0x5b8   : > { %8326 = vmatpush1.bf16.msra.mxu1 %v20551_v30  ;;  %8286 = vmatprep.subr.bf16.mxu0 %v20556_v31  ;;  %v20604_v30 = vld [vmem:[%s23612_s6 + $0x4a4] ss:$16 sps:$4 sm:$0xff]  }
 0x5b9   : > { %8327 = vmatprep.subr.bf16.mxu1 %v20559_v42  ;;  %v20607_v31 = vld [vmem:[%s23612_s6 + $0x6a4] ss:$16 sps:$4 sm:$0xff]   ;;  %v20605_v42 = vld [vmem:[%s23612_s6 + $0x6a0] ss:$16 sps:$4 sm:$0xff]  }
 0x5bb   : > { %8287 = vmatpush1.bf16.msra.mxu0 %v20554_v33  ;;  %v20602_v33 = vld [vmem:[%s23612_s6 + $0x4a0] ss:$16 sps:$4 sm:$0xff]  }
 0x5bc   : > { %8328 = vmatpush1.bf16.msra.mxu1 %v20557_v49  ;;  %8288 = vmatprep.subr.bf16.mxu0 %v20562_v51  ;;  %v20613_v49 = vld [vmem:[%s23612_s6 + $0x6c4] ss:$16 sps:$4 sm:$0xff]  }
 0x5bd   : > { %8329 = vmatprep.subr.bf16.mxu1 %v20565_v55  ;;  %v20608_v55 = vld [vmem:[%s23612_s6 + $0x4c0] ss:$16 sps:$4 sm:$0xff]  }
 0x5bf   : > { %8289 = vmatpush1.bf16.msra.mxu0 %v20560_v54 }
 0x5c0   : > { %8330 = vmatpush1.bf16.msra.mxu1 %v20563_v11  ;;  %8290 = vmatprep.subr.bf16.mxu0 %v20568_v62  ;;  %v20616_v11 = vld [vmem:[%s23612_s6 + $0x4e4] ss:$16 sps:$4 sm:$0xff]  }
 0x5c1   : > { %8331 = vmatprep.subr.bf16.mxu1 %v20571_v14  ;;  %v20619_v62 = vld [vmem:[%s23612_s6 + $0x6e4] ss:$16 sps:$4 sm:$0xff]  }
 0x5c3   : > { %8291 = vmatpush1.bf16.msra.mxu0 %v20566_v0 }
 0x5c4   : > { %8332 = vmatpush1.bf16.msra.mxu1 %v20569_v3  ;;  %8342 = vmatprep.subr.bf16.mxu0 %v20574_v4  ;;  %v20625_v3 = vld [vmem:[%s23612_s6 + $0x704] ss:$16 sps:$4 sm:$0xff]   ;;  %v20620_v4 = vld [vmem:[%s23612_s6 + $0x500] ss:$16 sps:$4 sm:$0xff]  }
 0x5c5   : > { %8383 = vmatprep.subr.bf16.mxu1 %v20577_v5  ;;  %v20623_v5 = vld [vmem:[%s23612_s6 + $0x700] ss:$16 sps:$4 sm:$0xff]  }
 0x5c6   : > { %8293 = vmatmul.mubr.bf16.vlgmr.msra.gmra.mrb[24].mxu0 %v23852_v39 }
 0x5c7   : > { %8334 = vmatmul.mubr.bf16.vlgmr.msra.gmra.mrb[24].mxu1 %v23854_v48  ;;  %8343 = vmatpush1.bf16.msra.mxu0 %v20572_v9  ;;  %v20626_v9 = vld [vmem:[%s23612_s6 + $0x520] ss:$16 sps:$4 sm:$0xff]  }
 0x5c8   : > { %8374 = vmatprep.mubr.bf16.mxu0 %v23856_v36  ;;  %8384 = vmatpush1.bf16.msra.mxu1 %v20575_v7  ;;  %v20629_v7 = vld [vmem:[%s23612_s6 + $0x720] ss:$16 sps:$4 sm:$0xff]  }
 0x5c9   : > { %8415 = vmatprep.mubr.bf16.mxu1 %v23860_v15  ;;  %8344 = vmatprep.subr.bf16.mxu0 %v20580_v45  ;;  %v20632_v45 = vld [vmem:[%s23612_s6 + $0x540] ss:$16 sps:$4 sm:$0xff]  }
 0x5ca   : > { %8385 = vmatprep.subr.bf16.mxu1 %v20583_v13  ;;  %v20637_v13 = vld [vmem:[%s23612_s6 + $0x744] ss:$16 sps:$4 sm:$0xff]  }
 0x5cb   : > { %8345 = vmatpush1.bf16.msra.mxu0 %v20578_v16  ;;  %v20635_v16 = vld [vmem:[%s23612_s6 + $0x740] ss:$16 sps:$4 sm:$0xff]  }
 0x5cc   : > { %8386 = vmatpush1.bf16.msra.mxu1 %v20581_v17  ;;  %8346 = vmatprep.subr.bf16.mxu0 %v20586_v18  ;;  %v20640_v17 = vld [vmem:[%s23612_s6 + $0x564] ss:$16 sps:$4 sm:$0xff]   ;;  %v20638_v18 = vld [vmem:[%s23612_s6 + $0x560] ss:$16 sps:$4 sm:$0xff]  }
 0x5cd   : > { %8387 = vmatprep.subr.bf16.mxu1 %v20589_v20  ;;  %v20641_v20 = vld [vmem:[%s23612_s6 + $0x760] ss:$16 sps:$4 sm:$0xff]  }
 0x5cf   : > { %8347 = vmatpush1.bf16.msra.mxu0 %v20584_v19  ;;  %v20643_v19 = vld [vmem:[%s23612_s6 + $0x764] ss:$16 sps:$4 sm:$0xff]  }
 0x5d0   : > { %8388 = vmatpush1.bf16.msra.mxu1 %v20587_v22  ;;  %8348 = vmatprep.subr.bf16.mxu0 %v20592_v23  ;;  %v20646_v22 = vld [vmem:[%s23612_s6 + $0x584] ss:$16 sps:$4 sm:$0xff]   ;;  %v20644_v23 = vld [vmem:[%s23612_s6 + $0x580] ss:$16 sps:$4 sm:$0xff]  }
 0x5d1   : > { %8389 = vmatprep.subr.bf16.mxu1 %v20595_v25  ;;  %v23919_v25 = vsub.s32 4, %v23094_v26 }
 0x5d3   : > { %8349 = vmatpush1.bf16.msra.mxu0 %v20590_v24  ;;  %v20649_v24 = vld [vmem:[%s23612_s6 + $0x784] ss:$16 sps:$4 sm:$0xff]  }
 0x5d4   : > { %8390 = vmatpush1.bf16.msra.mxu1 %v20593_v27  ;;  %8350 = vmatprep.subr.bf16.mxu0 %v20598_v28  ;;  %v20647_v27 = vld [vmem:[%s23612_s6 + $0x780] ss:$16 sps:$4 sm:$0xff]   ;;  %v20652_v28 = vld [vmem:[%s23612_s6 + $0x5a4] ss:$16 sps:$4 sm:$0xff]  }
 0x5d5   : > { %8391 = vmatprep.subr.bf16.mxu1 %v20601_v29  ;;  %v23927_v29 = vld [vmem:[%s23741_s30 + $0x8] sm:$0xff] }
 0x5d7   : > { %8351 = vmatpush1.bf16.msra.mxu0 %v20596_v40  ;;  %v23924_v40 = vsub.s32 6, %v23094_v26 }
 0x5d8   : > { %8392 = vmatpush1.bf16.msra.mxu1 %v20599_v12  ;;  %8352 = vmatprep.subr.bf16.mxu0 %v20604_v30  ;;  %v20650_v12 = vld [vmem:[%s23612_s6 + $0x5a0] ss:$16 sps:$4 sm:$0xff]   ;;  %v20655_v30 = vld [vmem:[%s23612_s6 + $0x7a4] ss:$16 sps:$4 sm:$0xff]  }
 0x5d9   : > { %v23885_v51 = vpop.f32.mrb[16].mxu0  ;;  %8393 = vmatprep.subr.bf16.mxu1 %v20607_v31  ;;  %v22018_v31 = vld [vmem:[%s23741_s30] sm:$0xff] }
 0x5da   : > { %v23887_v52 = vpop.f32.mrb[16].mxu1  ;;  %v23889_v54 = vpop.f32.mrb[17].mxu0  ;;  %v1865_v26 = vrot.slane %v22018_v31, %v23924_v40 }
 0x5db   : > { %v23893_v59 = vpop.f32.mrb[17].mxu1  ;;  %v4885_v61 = vpop.f32.mrb[18].mxu0  ;;  %8353 = vmatpush1.bf16.msra.mxu0 %v20602_v33  ;;  %v1857_v33 = vrot.slane %v22018_v31, %v23919_v25  ;;  %v20692_v31 = vld [vmem:[%s23612_s6 + $0x880] ss:$16 sps:$4 sm:$0xff]  }
 0x5dc   : > { %v4967_v63 = vpop.f32.mrb[18].mxu1  ;;  %8394 = vmatpush1.bf16.msra.mxu1 %v20605_v42  ;;  %v4886_v0 = vpop.f32.mrb[19].mxu0  ;;  %8354 = vmatprep.subr.bf16.mxu0 %v20610_v47  ;;  %v20653_v42 = vld [vmem:[%s23612_s6 + $0x7a0] ss:$16 sps:$4 sm:$0xff]   ;;  %v20658_v47 = vld [vmem:[%s23612_s6 + $0x5c4] ss:$16 sps:$4 sm:$0xff]  }
 0x5dd   : > { %v4968_v14 = vpop.f32.mrb[19].mxu1  ;;  %8395 = vmatprep.subr.bf16.mxu1 %v20613_v49  ;;  %v20656_v49 = vld [vmem:[%s23612_s6 + $0x5c0] ss:$16 sps:$4 sm:$0xff]   ;;  %v20235_v61 = vadd.f32 %v23703_v34, %v1857_v33  ;;  %v20664_v63 = vld [vmem:[%s23612_s6 + $0x5e4] ss:$16 sps:$4 sm:$0xff]   ;;  %v20237_v0 = vadd.f32 %v23705_v44, %v1865_v26 }
 0x5de   : > { %v20662_v14 = vld [vmem:[%s23612_s6 + $0x5e0] ss:$16 sps:$4 sm:$0xff]   ;;  %v20697_v33 = vld [vmem:[%s23612_s6 + $0xa84] ss:$16 sps:$4 sm:$0xff]  }
 0x5df   : > { %8355 = vmatpush1.bf16.msra.mxu0 %v20608_v55  ;;  %v20661_v55 = vld [vmem:[%s23612_s6 + $0x7c4] ss:$16 sps:$4 sm:$0xff]   ;;  %v20668_v44 = vld [vmem:[%s23612_s6 + $0x800] ss:$16 sps:$4 sm:$0xff]  }
 0x5e0   : > { %8396 = vmatpush1.bf16.msra.mxu1 %v20611_v57  ;;  %8356 = vmatprep.subr.bf16.mxu0 %v20616_v11  ;;  %v1877_v57 = vrot.slane %v23927_v29, %v23101_v37  ;;  %v1885_v11 = vrot.slane %v23927_v29, %v23109_v43  ;;  %v20698_v26 = vld [vmem:[%s23612_s6 + $0x8a0] ss:$16 sps:$4 sm:$0xff]  }
 0x5e1   : > { %8397 = vmatprep.subr.bf16.mxu1 %v20619_v62  ;;  %v20659_v62 = vld [vmem:[%s23612_s6 + $0x7c0] ss:$16 sps:$4 sm:$0xff]  }
 0x5e2   : > { %v20240_v34 = vadd.f32 %v23889_v54, %v1877_v57  ;;  %v20676_v54 = vld [vmem:[%s23612_s6 + $0x824] ss:$16 sps:$4 sm:$0xff]  }
 0x5e3   : > { %8357 = vmatpush1.bf16.msra.mxu0 %v20614_v8  ;;  %v20667_v8 = vld [vmem:[%s23612_s6 + $0x7e4] ss:$16 sps:$4 sm:$0xff]  }
 0x5e4   : > { %8398 = vmatpush1.bf16.msra.mxu1 %v20617_v2  ;;  %8358 = vmatprep.subr.bf16.mxu0 %v20622_v1  ;;  %v5138_v2 = vmax.f32 %v20235_v61, 0.0  ;;  %v20242_v1 = vadd.f32 %v23893_v59, %v1885_v11  ;;  %v20706_v57 = vld [vmem:[%s23612_s6 + $0x8c4] ss:$16 sps:$4 sm:$0xff]   ;;  %v20704_v11 = vld [vmem:[%s23612_s6 + $0x8c0] ss:$16 sps:$4 sm:$0xff]  }
 0x5e5   : > { %8399 = vmatprep.subr.bf16.mxu1 %v20625_v3  ;;  %v20665_v3 = vld [vmem:[%s23612_s6 + $0x7e0] ss:$16 sps:$4 sm:$0xff]   ;;  %v20709_v61 = vld [vmem:[%s23612_s6 + $0xac4] ss:$16 sps:$4 sm:$0xff]  }
 0x5e7   : > { %8359 = vmatpush1.bf16.msra.mxu0 %v20620_v4  ;;  %v20670_v4 = vld [vmem:[%s23612_s6 + $0x804] ss:$16 sps:$4 sm:$0xff]  }
 0x5e8   : > { %8400 = vmatpush1.bf16.msra.mxu1 %v20623_v5  ;;  %8360 = vmatprep.subr.bf16.mxu0 %v20628_v21  ;;  %v20673_v5 = vld [vmem:[%s23612_s6 + $0xa04] ss:$16 sps:$4 sm:$0xff]   ;;  %v5140_v21 = vmax.f32 %v20237_v0, 0.0 }
 0x5e9   : > { %8401 = vmatprep.subr.bf16.mxu1 %v20631_v6  ;;  %v20671_v6 = vld [vmem:[%s23612_s6 + $0xa00] ss:$16 sps:$4 sm:$0xff]   ;;  %v20715_v0 = vld [vmem:[%s23612_s6 + $0xae4] ss:$16 sps:$4 sm:$0xff]  }
 0x5ea   : > { %v23958_v59 = vpack.c.bf16 %v5140_v21, %v5140_v21  ;;  %v20727_v21 = vld [vmem:[%s23612_s6 + $0xb24] ss:$16 sps:$4 sm:$0xff]  }
 0x5eb   : > { %8361 = vmatpush1.bf16.msra.mxu0 %v20626_v9  ;;  %v5143_v9 = vmax.f32 %v20240_v34, 0.0  ;;  %v20718_v34 = vld [vmem:[%s23612_s6 + $0x904] ss:$16 sps:$4 sm:$0xff]  }
 0x5ec   : > { %8402 = vmatpush1.bf16.msra.mxu1 %v20629_v7  ;;  %8362 = vmatprep.subr.bf16.mxu0 %v20634_v10  ;;  %v5145_v7 = vmax.f32 %v20242_v1, 0.0  ;;  %v23956_v10 = vpack.c.bf16 %v5138_v2, %v5138_v2  ;;  %v20716_v2 = vld [vmem:[%s23612_s6 + $0x900] ss:$16 sps:$4 sm:$0xff]   ;;  %v20721_v1 = vld [vmem:[%s23612_s6 + $0xb04] ss:$16 sps:$4 sm:$0xff]  }
 0x5ed   : > { %8403 = vmatprep.subr.bf16.mxu1 %v20637_v13  ;;  %v20674_v13 = vld [vmem:[%s23612_s6 + $0x820] ss:$16 sps:$4 sm:$0xff]  }
 0x5ef   : > { %8363 = vmatpush1.bf16.msra.mxu0 %v20632_v45  ;;  %v23960_v45 = vpack.c.bf16 %v5143_v9, %v5143_v9  ;;  %v20730_v9 = vld [vmem:[%s23612_s6 + $0x944] ss:$16 sps:$4 sm:$0xff]  }
 0x5f0   : > { %8404 = vmatpush1.bf16.msra.mxu1 %v20635_v16  ;;  %8364 = vmatprep.subr.bf16.mxu0 %v20640_v17  ;;  %v20679_v16 = vld [vmem:[%s23612_s6 + $0xa24] ss:$16 sps:$4 sm:$0xff]   ;;  %v23965_v17 = vpack.c.bf16 %v5145_v7, %v5145_v7 }
 0x5f1   : > { %8405 = vmatprep.subr.bf16.mxu1 %v20643_v19  ;;  %v20682_v19 = vld [vmem:[%s23612_s6 + $0x844] ss:$16 sps:$4 sm:$0xff]  }
 0x5f2   : > { %v20733_v7 = vld [vmem:[%s23612_s6 + $0xb44] ss:$16 sps:$4 sm:$0xff]  }
 0x5f3   : > { %8365 = vmatpush1.bf16.msra.mxu0 %v20638_v18  ;;  %v20677_v18 = vld [vmem:[%s23612_s6 + $0xa20] ss:$16 sps:$4 sm:$0xff]  }
 0x5f4   : > { %8406 = vmatpush1.bf16.msra.mxu1 %v20641_v20  ;;  %8366 = vmatprep.subr.bf16.mxu0 %v20646_v22  ;;  %v20685_v20 = vld [vmem:[%s23612_s6 + $0xa44] ss:$16 sps:$4 sm:$0xff]   ;;  %v20680_v22 = vld [vmem:[%s23612_s6 + $0x840] ss:$16 sps:$4 sm:$0xff]  }
 0x5f5   : > { %8407 = vmatprep.subr.bf16.mxu1 %v20649_v24  ;;  %v20688_v24 = vld [vmem:[%s23612_s6 + $0x864] ss:$16 sps:$4 sm:$0xff]  }
 0x5f7   : > { %8367 = vmatpush1.bf16.msra.mxu0 %v20644_v23  ;;  %v20683_v23 = vld [vmem:[%s23612_s6 + $0xa40] ss:$16 sps:$4 sm:$0xff]  }
 0x5f8   : > { %8408 = vmatpush1.bf16.msra.mxu1 %v20647_v27  ;;  %8368 = vmatprep.subr.bf16.mxu0 %v20652_v28  ;;  %v20686_v27 = vld [vmem:[%s23612_s6 + $0x860] ss:$16 sps:$4 sm:$0xff]   ;;  %v20691_v28 = vld [vmem:[%s23612_s6 + $0xa64] ss:$16 sps:$4 sm:$0xff]  }
 0x5f9   : > { %8409 = vmatprep.subr.bf16.mxu1 %v20655_v30  ;;  %v20694_v30 = vld [vmem:[%s23612_s6 + $0x884] ss:$16 sps:$4 sm:$0xff]  }
 0x5fb   : > { %8369 = vmatpush1.bf16.msra.mxu0 %v20650_v12  ;;  %v20689_v12 = vld [vmem:[%s23612_s6 + $0xa60] ss:$16 sps:$4 sm:$0xff]  }
 0x5fc   : > { %8410 = vmatpush1.bf16.msra.mxu1 %v20653_v42  ;;  %8370 = vmatprep.subr.bf16.mxu0 %v20658_v47  ;;  %v20695_v42 = vld [vmem:[%s23612_s6 + $0xa80] ss:$16 sps:$4 sm:$0xff]   ;;  %v20700_v47 = vld [vmem:[%s23612_s6 + $0x8a4] ss:$16 sps:$4 sm:$0xff]  }
 0x5fd   : > { %8411 = vmatprep.subr.bf16.mxu1 %v20661_v55  ;;  %v20701_v55 = vld [vmem:[%s23612_s6 + $0xaa0] ss:$16 sps:$4 sm:$0xff]  }
 0x5ff   : > { %8371 = vmatpush1.bf16.msra.mxu0 %v20656_v49  ;;  %v20703_v49 = vld [vmem:[%s23612_s6 + $0xaa4] ss:$16 sps:$4 sm:$0xff]  }
 0x600   : > { %8412 = vmatpush1.bf16.msra.mxu1 %v20659_v62  ;;  %8372 = vmatprep.subr.bf16.mxu0 %v20664_v63  ;;  %v20707_v62 = vld [vmem:[%s23612_s6 + $0xac0] ss:$16 sps:$4 sm:$0xff]   ;;  %v20712_v63 = vld [vmem:[%s23612_s6 + $0x8e4] ss:$16 sps:$4 sm:$0xff]  }
 0x601   : > { %8413 = vmatprep.subr.bf16.mxu1 %v20667_v8  ;;  %v20713_v8 = vld [vmem:[%s23612_s6 + $0xae0] ss:$16 sps:$4 sm:$0xff]  }
 0x603   : > { %8373 = vmatpush1.bf16.msra.mxu0 %v20662_v14  ;;  %v20710_v14 = vld [vmem:[%s23612_s6 + $0x8e0] ss:$16 sps:$4 sm:$0xff]  }
 0x604   : > { %8414 = vmatpush1.bf16.msra.mxu1 %v20665_v3  ;;  %8424 = vmatprep.subr.bf16.mxu0 %v20670_v4  ;;  %v20719_v3 = vld [vmem:[%s23612_s6 + $0xb00] ss:$16 sps:$4 sm:$0xff]   ;;  %v20724_v4 = vld [vmem:[%s23612_s6 + $0x924] ss:$16 sps:$4 sm:$0xff]  }
 0x605   : > { %8465 = vmatprep.subr.bf16.mxu1 %v20673_v5  ;;  %v20722_v5 = vld [vmem:[%s23612_s6 + $0x920] ss:$16 sps:$4 sm:$0xff]  }
 0x606   : > { %8375 = vmatmul.mubr.bf16.vlgmr.msra.gmra.mrb[28].mxu0 %v23956_v10 }
 0x607   : > { %8416 = vmatmul.mubr.bf16.vlgmr.msra.gmra.mrb[28].mxu1 %v23958_v59  ;;  %8425 = vmatpush1.bf16.msra.mxu0 %v20668_v44  ;;  %v20725_v44 = vld [vmem:[%s23612_s6 + $0xb20] ss:$16 sps:$4 sm:$0xff]  }
 0x608   : > { %8456 = vmatprep.mubr.bf16.mxu0 %v23960_v45  ;;  %8466 = vmatpush1.bf16.msra.mxu1 %v20671_v6  ;;  %v20728_v6 = vld [vmem:[%s23612_s6 + $0x940] ss:$16 sps:$4 sm:$0xff]  }
 0x609   : > { %8497 = vmatprep.mubr.bf16.mxu1 %v23965_v17  ;;  %8426 = vmatprep.subr.bf16.mxu0 %v20676_v54  ;;  %v20731_v54 = vld [vmem:[%s23612_s6 + $0xb40] ss:$16 sps:$4 sm:$0xff]  }
 0x60a   : > { %8467 = vmatprep.subr.bf16.mxu1 %v20679_v16  ;;  %v20734_v16 = vld [vmem:[%s23612_s6 + $0x960] ss:$16 sps:$4 sm:$0xff]  }
 0x60b   : > { %8427 = vmatpush1.bf16.msra.mxu0 %v20674_v13  ;;  %v20736_v13 = vld [vmem:[%s23612_s6 + $0x964] ss:$16 sps:$4 sm:$0xff]  }
 0x60c   : > { %8468 = vmatpush1.bf16.msra.mxu1 %v20677_v18  ;;  %8428 = vmatprep.subr.bf16.mxu0 %v20682_v19  ;;  %v20739_v18 = vld [vmem:[%s23612_s6 + $0xb64] ss:$16 sps:$4 sm:$0xff]   ;;  %v20737_v19 = vld [vmem:[%s23612_s6 + $0xb60] ss:$16 sps:$4 sm:$0xff]  }
 0x60d   : > { %8469 = vmatprep.subr.bf16.mxu1 %v20685_v20  ;;  %v20742_v20 = vld [vmem:[%s23612_s6 + $0x984] ss:$16 sps:$4 sm:$0xff]  }
 0x60f   : > { %8429 = vmatpush1.bf16.msra.mxu0 %v20680_v22  ;;  %v20740_v22 = vld [vmem:[%s23612_s6 + $0x980] ss:$16 sps:$4 sm:$0xff]  }
 0x610   : > { %8470 = vmatpush1.bf16.msra.mxu1 %v20683_v23  ;;  %8430 = vmatprep.subr.bf16.mxu0 %v20688_v24  ;;  %v20745_v23 = vld [vmem:[%s23612_s6 + $0xb84] ss:$16 sps:$4 sm:$0xff]   ;;  %v20743_v24 = vld [vmem:[%s23612_s6 + $0xb80] ss:$16 sps:$4 sm:$0xff]  }
 0x611   : > { %8471 = vmatprep.subr.bf16.mxu1 %v20691_v28  ;;  %v20746_v28 = vld [vmem:[%s23612_s6 + $0x9a0] ss:$16 sps:$4 sm:$0xff]  }
 0x613   : > { %8431 = vmatpush1.bf16.msra.mxu0 %v20686_v27  ;;  %v20748_v27 = vld [vmem:[%s23612_s6 + $0x9a4] ss:$16 sps:$4 sm:$0xff]  }
 0x614   : > { %8472 = vmatpush1.bf16.msra.mxu1 %v20689_v12  ;;  %8432 = vmatprep.subr.bf16.mxu0 %v20694_v30  ;;  %v20751_v12 = vld [vmem:[%s23612_s6 + $0xba4] ss:$16 sps:$4 sm:$0xff]   ;;  %v1873_v30 = vrot.slane %v23927_v29, %v23097_v35 }
 0x615   : > { %8473 = vmatprep.subr.bf16.mxu1 %v20697_v33  ;;  %v20754_v33 = vld [vmem:[%s23612_s6 + $0x9c4] ss:$16 sps:$4 sm:$0xff]  }
 0x617   : > { %8433 = vmatpush1.bf16.msra.mxu0 %v20692_v31  ;;  %v20749_v31 = vld [vmem:[%s23612_s6 + $0xba0] ss:$16 sps:$4 sm:$0xff]  }
 0x618   : > { %8474 = vmatpush1.bf16.msra.mxu1 %v20695_v42  ;;  %8434 = vmatprep.subr.bf16.mxu0 %v20700_v47  ;;  %v1881_v42 = vrot.slane %v23927_v29, %v23104_v38  ;;  %v20752_v47 = vld [vmem:[%s23612_s6 + $0x9c0] ss:$16 sps:$4 sm:$0xff]  }
 0x619   : > { %8475 = vmatprep.subr.bf16.mxu1 %v20703_v49  ;;  %v20239_v49 = vadd.f32 %v23885_v51, %v1873_v30  ;;  %v20766_v51 = vld [vmem:[%s23612_s6 + $0xc04] ss:$16 sps:$4 sm:$0xff]  }
 0x61a   : > { %v20802_v30 = vld [vmem:[%s23612_s6 + $0xcc4] ss:$16 sps:$4 sm:$0xff]  }
 0x61b   : > { %8435 = vmatpush1.bf16.msra.mxu0 %v20698_v26  ;;  %v20757_v26 = vld [vmem:[%s23612_s6 + $0xbc4] ss:$16 sps:$4 sm:$0xff]  }
 0x61c   : > { %8476 = vmatpush1.bf16.msra.mxu1 %v20701_v55  ;;  %8436 = vmatprep.subr.bf16.mxu0 %v20706_v57  ;;  %v20755_v55 = vld [vmem:[%s23612_s6 + $0xbc0] ss:$16 sps:$4 sm:$0xff]   ;;  %v20760_v57 = vld [vmem:[%s23612_s6 + $0x9e4] ss:$16 sps:$4 sm:$0xff]  }
 0x61d   : > { %8477 = vmatprep.subr.bf16.mxu1 %v20709_v61  ;;  %v20241_v61 = vadd.f32 %v23887_v52, %v1881_v42  ;;  %v20775_v52 = vld [vmem:[%s23612_s6 + $0xe24] ss:$16 sps:$4 sm:$0xff]   ;;  %v1901_v42 = vrot.slane %v23927_v29, %v23826_v50 }
 0x61f   : > { %8437 = vmatpush1.bf16.msra.mxu0 %v20704_v11  ;;  %v20758_v11 = vld [vmem:[%s23612_s6 + $0x9e0] ss:$16 sps:$4 sm:$0xff]  }
 0x620   : > { %8478 = vmatpush1.bf16.msra.mxu1 %v20707_v62  ;;  %8438 = vmatprep.subr.bf16.mxu0 %v20712_v63  ;;  %v20763_v62 = vld [vmem:[%s23612_s6 + $0xbe4] ss:$16 sps:$4 sm:$0xff]   ;;  %v20761_v63 = vld [vmem:[%s23612_s6 + $0xbe0] ss:$16 sps:$4 sm:$0xff]  }
 0x621   : > { %8479 = vmatprep.subr.bf16.mxu1 %v20715_v0  ;;  %v5142_v0 = vmax.f32 %v20239_v49, 0.0 }
 0x623   : > { %8439 = vmatpush1.bf16.msra.mxu0 %v20710_v14  ;;  %v20769_v14 = vld [vmem:[%s23612_s6 + $0xe04] ss:$16 sps:$4 sm:$0xff]  }
 0x624   : > { %8480 = vmatpush1.bf16.msra.mxu1 %v20713_v8  ;;  %8440 = vmatprep.subr.bf16.mxu0 %v20718_v34  ;;  %v5144_v8 = vmax.f32 %v20241_v61, 0.0  ;;  %v20764_v34 = vld [vmem:[%s23612_s6 + $0xc00] ss:$16 sps:$4 sm:$0xff]  }
 0x625   : > { %8481 = vmatprep.subr.bf16.mxu1 %v20721_v1  ;;  %v20772_v1 = vld [vmem:[%s23612_s6 + $0xc24] ss:$16 sps:$4 sm:$0xff]  }
 0x627   : > { %8441 = vmatpush1.bf16.msra.mxu0 %v20716_v2  ;;  %v20767_v2 = vld [vmem:[%s23612_s6 + $0xe00] ss:$16 sps:$4 sm:$0xff]  }
 0x628   : > { %8482 = vmatpush1.bf16.msra.mxu1 %v20719_v3  ;;  %8442 = vmatprep.subr.bf16.mxu0 %v20724_v4  ;;  %v24039_v3 = vpack.c.bf16 %v5142_v0, %v5142_v0  ;;  %v24041_v4 = vpack.c.bf16 %v5144_v8, %v5144_v8 }
 0x629   : > { %8483 = vmatprep.subr.bf16.mxu1 %v20727_v21  ;;  %v20773_v21 = vld [vmem:[%s23612_s6 + $0xe20] ss:$16 sps:$4 sm:$0xff]  }
 0x62b   : > { %8443 = vmatpush1.bf16.msra.mxu0 %v20722_v5  ;;  %v20770_v5 = vld [vmem:[%s23612_s6 + $0xc20] ss:$16 sps:$4 sm:$0xff]  }
 0x62c   : > { %8484 = vmatpush1.bf16.msra.mxu1 %v20725_v44  ;;  %8444 = vmatprep.subr.bf16.mxu0 %v20730_v9  ;;  %v20778_v44 = vld [vmem:[%s23612_s6 + $0xc44] ss:$16 sps:$4 sm:$0xff]  }
 0x62d   : > { %8485 = vmatprep.subr.bf16.mxu1 %v20733_v7  ;;  %v20781_v9 = vld [vmem:[%s23612_s6 + $0xe44] ss:$16 sps:$4 sm:$0xff]   ;;  %v20779_v7 = vld [vmem:[%s23612_s6 + $0xe40] ss:$16 sps:$4 sm:$0xff]  }
 0x62f   : > { %8445 = vmatpush1.bf16.msra.mxu0 %v20728_v6  ;;  %v20776_v6 = vld [vmem:[%s23612_s6 + $0xc40] ss:$16 sps:$4 sm:$0xff]  }
 0x630   : > { %8486 = vmatpush1.bf16.msra.mxu1 %v20731_v54  ;;  %8446 = vmatprep.subr.bf16.mxu0 %v20736_v13  ;;  %v20784_v54 = vld [vmem:[%s23612_s6 + $0xc64] ss:$16 sps:$4 sm:$0xff]   ;;  %v20782_v13 = vld [vmem:[%s23612_s6 + $0xc60] ss:$16 sps:$4 sm:$0xff]  }
 0x631   : > { %8487 = vmatprep.subr.bf16.mxu1 %v20739_v18  ;;  %v20785_v18 = vld [vmem:[%s23612_s6 + $0xe60] ss:$16 sps:$4 sm:$0xff]  }
 0x633   : > { %8447 = vmatpush1.bf16.msra.mxu0 %v20734_v16  ;;  %v20787_v16 = vld [vmem:[%s23612_s6 + $0xe64] ss:$16 sps:$4 sm:$0xff]  }
 0x634   : > { %8488 = vmatpush1.bf16.msra.mxu1 %v20737_v19  ;;  %8448 = vmatprep.subr.bf16.mxu0 %v20742_v20  ;;  %v20790_v19 = vld [vmem:[%s23612_s6 + $0xc84] ss:$16 sps:$4 sm:$0xff]   ;;  %v20788_v20 = vld [vmem:[%s23612_s6 + $0xc80] ss:$16 sps:$4 sm:$0xff]  }
 0x635   : > { %8489 = vmatprep.subr.bf16.mxu1 %v20745_v23  ;;  %v20791_v23 = vld [vmem:[%s23612_s6 + $0xe80] ss:$16 sps:$4 sm:$0xff]  }
 0x637   : > { %8449 = vmatpush1.bf16.msra.mxu0 %v20740_v22  ;;  %v20793_v22 = vld [vmem:[%s23612_s6 + $0xe84] ss:$16 sps:$4 sm:$0xff]  }
 0x638   : > { %8490 = vmatpush1.bf16.msra.mxu1 %v20743_v24  ;;  %8450 = vmatprep.subr.bf16.mxu0 %v20748_v27  ;;  %v20796_v24 = vld [vmem:[%s23612_s6 + $0xca4] ss:$16 sps:$4 sm:$0xff]  }
 0x639   : > { %8491 = vmatprep.subr.bf16.mxu1 %v20751_v12  ;;  %v20799_v27 = vld [vmem:[%s23612_s6 + $0xea4] ss:$16 sps:$4 sm:$0xff]   ;;  %v20797_v12 = vld [vmem:[%s23612_s6 + $0xea0] ss:$16 sps:$4 sm:$0xff]  }
 0x63b   : > { %8451 = vmatpush1.bf16.msra.mxu0 %v20746_v28  ;;  %v20794_v28 = vld [vmem:[%s23612_s6 + $0xca0] ss:$16 sps:$4 sm:$0xff]  }
 0x63c   : > { %8492 = vmatpush1.bf16.msra.mxu1 %v20749_v31  ;;  %8452 = vmatprep.subr.bf16.mxu0 %v20754_v33  ;;  %v1893_v31 = vrot.slane %v23927_v29, %v23821_v46  ;;  %v20805_v33 = vld [vmem:[%s23612_s6 + $0xec4] ss:$16 sps:$4 sm:$0xff]  }
 0x63d   : > { %8493 = vmatprep.subr.bf16.mxu1 %v20757_v26 }
 0x63f   : > { %8453 = vmatpush1.bf16.msra.mxu0 %v20752_v47 }
 0x640   : > { %8494 = vmatpush1.bf16.msra.mxu1 %v20755_v55  ;;  %8454 = vmatprep.subr.bf16.mxu0 %v20760_v57  ;;  %v20800_v55 = vld [vmem:[%s23612_s6 + $0xcc0] ss:$16 sps:$4 sm:$0xff]  }
 0x641   : > { %8495 = vmatprep.subr.bf16.mxu1 %v20763_v62  ;;  %v20803_v62 = vld [vmem:[%s23612_s6 + $0xec0] ss:$16 sps:$4 sm:$0xff]  }
 0x643   : > { %8455 = vmatpush1.bf16.msra.mxu0 %v20758_v11 }
 0x644   : > { %8496 = vmatpush1.bf16.msra.mxu1 %v20761_v63  ;;  %8506 = vmatprep.subr.bf16.mxu0 %v20766_v51  ;;  %v20808_v63 = vld [vmem:[%s23612_s6 + $0xce4] ss:$16 sps:$4 sm:$0xff]  }
 0x645   : > { %8547 = vmatprep.subr.bf16.mxu1 %v20769_v14 }
 0x646   : > { %8457 = vmatmul.mubr.bf16.vlgmr.msra.gmra.mrb[32].mxu0 %v24039_v3 }
 0x647   : > { %8498 = vmatmul.mubr.bf16.vlgmr.msra.gmra.mrb[32].mxu1 %v24041_v4  ;;  %8507 = vmatpush1.bf16.msra.mxu0 %v20764_v34  ;;  %v20811_v34 = vld [vmem:[%s23612_s6 + $0xee4] ss:$16 sps:$4 sm:$0xff]  }
 0x648   : > { %8548 = vmatpush1.bf16.msra.mxu1 %v20767_v2  ;;  %8508 = vmatprep.subr.bf16.mxu0 %v20772_v1 }
 0x649   : > { %8549 = vmatprep.subr.bf16.mxu1 %v20775_v52  ;;  %v20806_v52 = vld [vmem:[%s23612_s6 + $0xce0] ss:$16 sps:$4 sm:$0xff]  }
 0x64b   : > { %8509 = vmatpush1.bf16.msra.mxu0 %v20770_v5 }
 0x64c   : > { %8550 = vmatpush1.bf16.msra.mxu1 %v20773_v21  ;;  %8510 = vmatprep.subr.bf16.mxu0 %v20778_v44  ;;  %v20809_v21 = vld [vmem:[%s23612_s6 + $0xee0] ss:$16 sps:$4 sm:$0xff]   ;;  %v20814_v44 = vld [vmem:[%s23612_s6 + $0xd04] ss:$16 sps:$4 sm:$0xff]  }
 0x64d   : > { %8551 = vmatprep.subr.bf16.mxu1 %v20781_v9  ;;  %v20812_v9 = vld [vmem:[%s23612_s6 + $0xd00] ss:$16 sps:$4 sm:$0xff]  }
 0x64f   : > { %8511 = vmatpush1.bf16.msra.mxu0 %v20776_v6  ;;  %v20817_v6 = vld [vmem:[%s23612_s6 + $0xf04] ss:$16 sps:$4 sm:$0xff]  }
 0x650   : > { %8552 = vmatpush1.bf16.msra.mxu1 %v20779_v7  ;;  %8512 = vmatprep.subr.bf16.mxu0 %v20784_v54  ;;  %v20815_v7 = vld [vmem:[%s23612_s6 + $0xf00] ss:$16 sps:$4 sm:$0xff]   ;;  %v20820_v54 = vld [vmem:[%s23612_s6 + $0xd24] ss:$16 sps:$4 sm:$0xff]  }
 0x651   : > { %8553 = vmatprep.subr.bf16.mxu1 %v20787_v16  ;;  %v20823_v16 = vld [vmem:[%s23612_s6 + $0xf24] ss:$16 sps:$4 sm:$0xff]  }
 0x653   : > { %8513 = vmatpush1.bf16.msra.mxu0 %v20782_v13  ;;  %v20818_v13 = vld [vmem:[%s23612_s6 + $0xd20] ss:$16 sps:$4 sm:$0xff]  }
 0x654   : > { %8554 = vmatpush1.bf16.msra.mxu1 %v20785_v18  ;;  %8514 = vmatprep.subr.bf16.mxu0 %v20790_v19  ;;  %v20821_v18 = vld [vmem:[%s23612_s6 + $0xf20] ss:$16 sps:$4 sm:$0xff]   ;;  %v20826_v19 = vld [vmem:[%s23612_s6 + $0xd44] ss:$16 sps:$4 sm:$0xff]  }
 0x655   : > { %8555 = vmatprep.subr.bf16.mxu1 %v20793_v22  ;;  %v20829_v22 = vld [vmem:[%s23612_s6 + $0xf44] ss:$16 sps:$4 sm:$0xff]  }
 0x657   : > { %8515 = vmatpush1.bf16.msra.mxu0 %v20788_v20  ;;  %v20824_v20 = vld [vmem:[%s23612_s6 + $0xd40] ss:$16 sps:$4 sm:$0xff]  }
 0x658   : > { %8556 = vmatpush1.bf16.msra.mxu1 %v20791_v23  ;;  %8516 = vmatprep.subr.bf16.mxu0 %v20796_v24  ;;  %v20827_v23 = vld [vmem:[%s23612_s6 + $0xf40] ss:$16 sps:$4 sm:$0xff]   ;;  %v20832_v24 = vld [vmem:[%s23612_s6 + $0xd64] ss:$16 sps:$4 sm:$0xff]  }
 0x659   : > { %v24069_v47 = vpop.f32.mrb[20].mxu0  ;;  %8557 = vmatprep.subr.bf16.mxu1 %v20799_v27  ;;  %v20830_v27 = vld [vmem:[%s23612_s6 + $0xd60] ss:$16 sps:$4 sm:$0xff]  }
 0x65a   : > { %v24071_v26 = vpop.f32.mrb[20].mxu1  ;;  %v5047_v49 = vpop.f32.mrb[21].mxu0 }
 0x65b   : > { %v20244_v57 = vadd.f32 %v5047_v49, %v1893_v31  ;;  %v5129_v61 = vpop.f32.mrb[21].mxu1  ;;  %v5049_v11 = vpop.f32.mrb[22].mxu0  ;;  %8517 = vmatpush1.bf16.msra.mxu0 %v20794_v28  ;;  %v20835_v28 = vld [vmem:[%s23612_s6 + $0xf64] ss:$16 sps:$4 sm:$0xff]   ;;  %v20836_v31 = vld [vmem:[%s23612_s6 + $0xd80] ss:$16 sps:$4 sm:$0xff]  }
 0x65c   : > { %v20246_v0 = vadd.f32 %v5129_v61, %v1901_v42  ;;  %v5131_v51 = vpop.f32.mrb[22].mxu1  ;;  %8558 = vmatpush1.bf16.msra.mxu1 %v20797_v12  ;;  %v5050_v29 = vpop.f32.mrb[23].mxu0  ;;  %8518 = vmatprep.subr.bf16.mxu0 %v20802_v30  ;;  %v20833_v12 = vld [vmem:[%s23612_s6 + $0xf60] ss:$16 sps:$4 sm:$0xff]   ;;  %v20838_v30 = vld [vmem:[%s23612_s6 + $0xd84] ss:$16 sps:$4 sm:$0xff]  }
 0x65d   : > { %v5147_v14 = vmax.f32 %v20244_v57, 0.0  ;;  %v5132_v8 = vpop.f32.mrb[23].mxu1  ;;  %8559 = vmatprep.subr.bf16.mxu1 %v20805_v33  ;;  %v20841_v33 = vld [vmem:[%s23612_s6 + $0xf84] ss:$16 sps:$4 sm:$0xff]   ;;  %v20839_v42 = vld [vmem:[%s23612_s6 + $0xf80] ss:$16 sps:$4 sm:$0xff]  }
 0x65e   : > { %v5149_v2 = vmax.f32 %v20246_v0, 0.0  ;;  %v20844_v49 = vld [vmem:[%s23612_s6 + $0xda4] ss:$16 sps:$4 sm:$0xff]   ;;  %v22019_v61 = vld [vmem:[%s23741_s30 + $0x8] sm:$0xff]  ;;  %v20848_v51 = vld [vmem:[%s23612_s6 + $0xdc0] ss:$16 sps:$4 sm:$0xff]  }
 0x65f   : > { %v24077_v1 = vpack.c.bf16 %v5147_v14, %v5147_v14  ;;  %8519 = vmatpush1.bf16.msra.mxu0 %v20800_v55  ;;  %v20842_v55 = vld [vmem:[%s23612_s6 + $0xda0] ss:$16 sps:$4 sm:$0xff]   ;;  %v20847_v57 = vld [vmem:[%s23612_s6 + $0xfa4] ss:$16 sps:$4 sm:$0xff]   ;;  %v1889_v11 = vrot.slane %v22019_v61, %v23919_v25  ;;  %v1897_v0 = vrot.slane %v22019_v61, %v23924_v40  ;;  %v20895_v61 = vld [vmem:[%s23612_s6 + $0x2ac] ss:$16 sps:$4 sm:$0xff]  }
 0x660   : > { %v24080_v5 = vpack.c.bf16 %v5149_v2, %v5149_v2  ;;  %8560 = vmatpush1.bf16.msra.mxu1 %v20803_v62  ;;  %8520 = vmatprep.subr.bf16.mxu0 %v20808_v63  ;;  %v20845_v62 = vld [vmem:[%s23612_s6 + $0xfa0] ss:$16 sps:$4 sm:$0xff]   ;;  %v20850_v63 = vld [vmem:[%s23612_s6 + $0xdc4] ss:$16 sps:$4 sm:$0xff]  }
 0x661   : > { %8538 = vmatprep.mubr.bf16.mxu0 %v24077_v1  ;;  %8561 = vmatprep.subr.bf16.mxu1 %v20811_v34  ;;  %v20853_v29 = vld [vmem:[%s23612_s6 + $0xfc4] ss:$16 sps:$4 sm:$0xff]   ;;  %v20243_v14 = vadd.f32 %v24069_v47, %v1889_v11  ;;  %v20851_v8 = vld [vmem:[%s23612_s6 + $0xfc0] ss:$16 sps:$4 sm:$0xff]   ;;  %v20245_v2 = vadd.f32 %v24071_v26, %v1897_v0  ;;  %v20862_v47 = vld [vmem:[%s23612_s6 + $0xc] ss:$16 sps:$4 sm:$0xff]  }
 0x662   : > { %8579 = vmatprep.mubr.bf16.mxu1 %v24080_v5  ;;  %v20856_v34 = vld [vmem:[%s23612_s6 + $0xde4] ss:$16 sps:$4 sm:$0xff]   ;;  %v20868_v26 = vld [vmem:[%s23612_s6 + $0x2c] ss:$16 sps:$4 sm:$0xff]   ;;  %v20890_v11 = vld [vmem:[%s23612_s6 + $0xa8] ss:$16 sps:$4 sm:$0xff]  }
 0x663   : > { %8521 = vmatpush1.bf16.msra.mxu0 %v20806_v52  ;;  %v20854_v52 = vld [vmem:[%s23612_s6 + $0xde0] ss:$16 sps:$4 sm:$0xff]   ;;  %v20898_v0 = vld [vmem:[%s23612_s6 + $0xcc] ss:$16 sps:$4 sm:$0xff]  }
 0x664   : > { %8562 = vmatpush1.bf16.msra.mxu1 %v20809_v21  ;;  %8522 = vmatprep.subr.bf16.mxu0 %v20814_v44  ;;  %v20859_v21 = vld [vmem:[%s23612_s6 + $0xfe4] ss:$16 sps:$4 sm:$0xff]   ;;  %v20857_v44 = vld [vmem:[%s23612_s6 + $0xfe0] ss:$16 sps:$4 sm:$0xff]  }
 0x665   : > { %8563 = vmatprep.subr.bf16.mxu1 %v20817_v6  ;;  %v20865_v6 = vld [vmem:[%s23612_s6 + $0x20c] ss:$16 sps:$4 sm:$0xff]  }
 0x667   : > { %8523 = vmatpush1.bf16.msra.mxu0 %v20812_v9  ;;  %v5146_v9 = vmax.f32 %v20243_v14, 0.0 }
 0x668   : > { %8564 = vmatpush1.bf16.msra.mxu1 %v20815_v7  ;;  %8524 = vmatprep.subr.bf16.mxu0 %v20820_v54  ;;  %v5148_v7 = vmax.f32 %v20245_v2, 0.0  ;;  %v20860_v54 = vld [vmem:[%s23612_s6 + $0x8] ss:$16 sps:$4 sm:$0xff]  }
 0x669   : > { %8565 = vmatprep.subr.bf16.mxu1 %v20823_v16  ;;  %v24127_v16 = vpack.c.bf16 %v5146_v9, %v5146_v9 }
 0x66b   : > { %8525 = vmatpush1.bf16.msra.mxu0 %v20818_v13  ;;  %v20863_v13 = vld [vmem:[%s23612_s6 + $0x208] ss:$16 sps:$4 sm:$0xff]  }
 0x66c   : > { %8566 = vmatpush1.bf16.msra.mxu1 %v20821_v18  ;;  %8526 = vmatprep.subr.bf16.mxu0 %v20826_v19  ;;  %v24129_v18 = vpack.c.bf16 %v5148_v7, %v5148_v7  ;;  %v20866_v19 = vld [vmem:[%s23612_s6 + $0x28] ss:$16 sps:$4 sm:$0xff]  }
 0x66d   : > { %8567 = vmatprep.subr.bf16.mxu1 %v20829_v22  ;;  %v20869_v22 = vld [vmem:[%s23612_s6 + $0x228] ss:$16 sps:$4 sm:$0xff]  }
 0x66f   : > { %8527 = vmatpush1.bf16.msra.mxu0 %v20824_v20  ;;  %v20871_v20 = vld [vmem:[%s23612_s6 + $0x22c] ss:$16 sps:$4 sm:$0xff]  }
 0x670   : > { %8568 = vmatpush1.bf16.msra.mxu1 %v20827_v23  ;;  %8528 = vmatprep.subr.bf16.mxu0 %v20832_v24  ;;  %v20874_v23 = vld [vmem:[%s23612_s6 + $0x4c] ss:$16 sps:$4 sm:$0xff]  }
 0x671   : > { %8569 = vmatprep.subr.bf16.mxu1 %v20835_v28  ;;  %v20877_v24 = vld [vmem:[%s23612_s6 + $0x24c] ss:$16 sps:$4 sm:$0xff]   ;;  %v20875_v28 = vld [vmem:[%s23612_s6 + $0x248] ss:$16 sps:$4 sm:$0xff]  }
 0x673   : > { %8529 = vmatpush1.bf16.msra.mxu0 %v20830_v27  ;;  %v20872_v27 = vld [vmem:[%s23612_s6 + $0x48] ss:$16 sps:$4 sm:$0xff]  }
 0x674   : > { %8570 = vmatpush1.bf16.msra.mxu1 %v20833_v12  ;;  %8530 = vmatprep.subr.bf16.mxu0 %v20838_v30  ;;  %v20880_v12 = vld [vmem:[%s23612_s6 + $0x6c] ss:$16 sps:$4 sm:$0xff]  }
 0x675   : > { %8571 = vmatprep.subr.bf16.mxu1 %v20841_v33  ;;  %v20883_v30 = vld [vmem:[%s23612_s6 + $0x26c] ss:$16 sps:$4 sm:$0xff]  }
 0x676   : > { %v20889_v33 = vld [vmem:[%s23612_s6 + $0x28c] ss:$16 sps:$4 sm:$0xff]  }
 0x677   : > { %8531 = vmatpush1.bf16.msra.mxu0 %v20836_v31  ;;  %v20886_v31 = vld [vmem:[%s23612_s6 + $0x8c] ss:$16 sps:$4 sm:$0xff]  }
 0x678   : > { %8572 = vmatpush1.bf16.msra.mxu1 %v20839_v42  ;;  %8532 = vmatprep.subr.bf16.mxu0 %v20844_v49  ;;  %v20884_v42 = vld [vmem:[%s23612_s6 + $0x88] ss:$16 sps:$4 sm:$0xff]  }
 0x679   : > { %8573 = vmatprep.subr.bf16.mxu1 %v20847_v57  ;;  %v5678_v49 = vld [vmem:[%s24150_s2] sm:$0xf]  ;;  %v20892_v57 = vld [vmem:[%s23612_s6 + $0xac] ss:$16 sps:$4 sm:$0xff]  }
 0x67b   : > { %8533 = vmatpush1.bf16.msra.mxu0 %v20842_v55  ;;  %v20887_v55 = vld [vmem:[%s23612_s6 + $0x288] ss:$16 sps:$4 sm:$0xff]  }
 0x67c   : > { %8574 = vmatpush1.bf16.msra.mxu1 %v20845_v62  ;;  %8534 = vmatprep.subr.bf16.mxu0 %v20850_v63  ;;  %v5683_v62 = vrot.slane %v5678_v49, %v23097_v35  ;;  %v20893_v63 = vld [vmem:[%s23612_s6 + $0x2a8] ss:$16 sps:$4 sm:$0xff]  }
 0x67d   : > { %8575 = vmatprep.subr.bf16.mxu1 %v20853_v29  ;;  %v20901_v29 = vld [vmem:[%s23612_s6 + $0x2cc] ss:$16 sps:$4 sm:$0xff]  }
 0x67f   : > { %8535 = vmatpush1.bf16.msra.mxu0 %v20848_v51  ;;  %v5687_v51 = vrot.slane %v5678_v49, %v23101_v37  ;;  %v20925_v49 = vld [vmem:[%s23612_s6 + $0x34c] ss:$16 sps:$4 sm:$0xff]  }
 0x680   : > { %8576 = vmatpush1.bf16.msra.mxu1 %v20851_v8  ;;  %8536 = vmatprep.subr.bf16.mxu0 %v20856_v34 }
 0x681   : > { %8577 = vmatprep.subr.bf16.mxu1 %v20859_v21 }
 0x683   : > { %8537 = vmatpush1.bf16.msra.mxu0 %v20854_v52  ;;  %v20896_v52 = vld [vmem:[%s23612_s6 + $0xc8] ss:$16 sps:$4 sm:$0xff]  }
 0x684   : > { %8578 = vmatpush1.bf16.msra.mxu1 %v20857_v44  ;;  %8588 = vmatprep.subr.bf16.mxu0 %v20862_v47  ;;  %v20899_v47 = vld [vmem:[%s23612_s6 + $0x2c8] ss:$16 sps:$4 sm:$0xff]  }
 0x685   : > { %8629 = vmatprep.subr.bf16.mxu1 %v20865_v6  ;;  %v20904_v6 = vld [vmem:[%s23612_s6 + $0xec] ss:$16 sps:$4 sm:$0xff]  }
 0x686   : > { %8539 = vmatmul.mubr.bf16.vlgmr.msra.gmra.mrb[36].mxu0 %v24127_v16 }
 0x687   : > { %8580 = vmatmul.mubr.bf16.vlgmr.msra.gmra.mrb[36].mxu1 %v24129_v18  ;;  %8589 = vmatpush1.bf16.msra.mxu0 %v20860_v54 }
 0x688   : > { %8620 = vmatprep.mubr.bf16.mxu0 %v23762_v41  ;;  %8630 = vmatpush1.bf16.msra.mxu1 %v20863_v13  ;;  %v20878_v41 = vld [vmem:[%s23612_s6 + $0x68] ss:$16 sps:$4 sm:$0xff]  }
 0x689   : > { %8661 = vmatprep.mubr.bf16.mxu1 %v23767_v32  ;;  %8590 = vmatprep.subr.bf16.mxu0 %v20868_v26  ;;  %v20881_v32 = vld [vmem:[%s23612_s6 + $0x268] ss:$16 sps:$4 sm:$0xff]  }
 0x68a   : > { %8631 = vmatprep.subr.bf16.mxu1 %v20871_v20  ;;  %v20907_v20 = vld [vmem:[%s23612_s6 + $0x2ec] ss:$16 sps:$4 sm:$0xff]  }
 0x68b   : > { %8591 = vmatpush1.bf16.msra.mxu0 %v20866_v19 }
 0x68c   : > { %8632 = vmatpush1.bf16.msra.mxu1 %v20869_v22  ;;  %8592 = vmatprep.subr.bf16.mxu0 %v20874_v23  ;;  %v20902_v22 = vld [vmem:[%s23612_s6 + $0xe8] ss:$16 sps:$4 sm:$0xff]  }
 0x68d   : > { %8633 = vmatprep.subr.bf16.mxu1 %v20877_v24  ;;  %v20905_v23 = vld [vmem:[%s23612_s6 + $0x2e8] ss:$16 sps:$4 sm:$0xff]   ;;  %v20910_v24 = vld [vmem:[%s23612_s6 + $0x10c] ss:$16 sps:$4 sm:$0xff]  }
 0x68f   : > { %8593 = vmatpush1.bf16.msra.mxu0 %v20872_v27  ;;  %v20908_v27 = vld [vmem:[%s23612_s6 + $0x108] ss:$16 sps:$4 sm:$0xff]  }
 0x690   : > { %8634 = vmatpush1.bf16.msra.mxu1 %v20875_v28  ;;  %8594 = vmatprep.subr.bf16.mxu0 %v20880_v12  ;;  %v20913_v28 = vld [vmem:[%s23612_s6 + $0x30c] ss:$16 sps:$4 sm:$0xff]   ;;  %v20911_v12 = vld [vmem:[%s23612_s6 + $0x308] ss:$16 sps:$4 sm:$0xff]  }
 0x691   : > { %8635 = vmatprep.subr.bf16.mxu1 %v20883_v30  ;;  %v20914_v30 = vld [vmem:[%s23612_s6 + $0x128] ss:$16 sps:$4 sm:$0xff]  }
 0x693   : > { %8595 = vmatpush1.bf16.msra.mxu0 %v20878_v41  ;;  %v20916_v41 = vld [vmem:[%s23612_s6 + $0x12c] ss:$16 sps:$4 sm:$0xff]  }
 0x694   : > { %8636 = vmatpush1.bf16.msra.mxu1 %v20881_v32  ;;  %8596 = vmatprep.subr.bf16.mxu0 %v20886_v31  ;;  %v20919_v32 = vld [vmem:[%s23612_s6 + $0x32c] ss:$16 sps:$4 sm:$0xff]   ;;  %v20917_v31 = vld [vmem:[%s23612_s6 + $0x328] ss:$16 sps:$4 sm:$0xff]  }
 0x695   : > { %8637 = vmatprep.subr.bf16.mxu1 %v20889_v33  ;;  %v20922_v33 = vld [vmem:[%s23612_s6 + $0x14c] ss:$16 sps:$4 sm:$0xff]  }
 0x697   : > { %8597 = vmatpush1.bf16.msra.mxu0 %v20884_v42  ;;  %v20920_v42 = vld [vmem:[%s23612_s6 + $0x148] ss:$16 sps:$4 sm:$0xff]  }
 0x698   : > { %8638 = vmatpush1.bf16.msra.mxu1 %v20887_v55  ;;  %8598 = vmatprep.subr.bf16.mxu0 %v20892_v57  ;;  %v20923_v55 = vld [vmem:[%s23612_s6 + $0x348] ss:$16 sps:$4 sm:$0xff]   ;;  %v20928_v57 = vld [vmem:[%s23612_s6 + $0x16c] ss:$16 sps:$4 sm:$0xff]  }
 0x699   : > { %v8294_v14 = vpop.f32.mrb[24].mxu0  ;;  %8639 = vmatprep.subr.bf16.mxu1 %v20895_v61  ;;  %v20926_v61 = vld [vmem:[%s23612_s6 + $0x168] ss:$16 sps:$4 sm:$0xff]  }
 0x69a   : > { %v8295_v8 = vadd.f32 %v8294_v14, %v5683_v62  ;;  %v8335_v34 = vpop.f32.mrb[24].mxu1  ;;  %v8296_v2 = vpop.f32.mrb[25].mxu0  ;;  %v20929_v62 = vld [vmem:[%s23612_s6 + $0x368] ss:$16 sps:$4 sm:$0xff]   ;;  %v20940_v14 = vld [vmem:[%s23612_s6 + $0x1ac] ss:$16 sps:$4 sm:$0xff]  }
 0x69b   : > { %v8297_v21 = vadd.f32 %v8296_v2, %v5687_v51  ;;  %v8337_v44 = vpop.f32.mrb[25].mxu1  ;;  %v8298_v9 = vpop.f32.mrb[26].mxu0  ;;  %8599 = vmatpush1.bf16.msra.mxu0 %v20890_v11  ;;  %v20931_v11 = vld [vmem:[%s23612_s6 + $0x36c] ss:$16 sps:$4 sm:$0xff]   ;;  %v20941_v2 = vld [vmem:[%s23612_s6 + $0x3a8] ss:$16 sps:$4 sm:$0xff]  }
 0x69c   : > { %v24165_v7 = vadd.f32 %v8335_v34, %v8295_v8  ;;  %v8339_v54 = vpop.f32.mrb[26].mxu1  ;;  %8640 = vmatpush1.bf16.msra.mxu1 %v20893_v63  ;;  %v8299_v13 = vpop.f32.mrb[27].mxu0  ;;  %8600 = vmatprep.subr.bf16.mxu0 %v20898_v0  ;;  %v20934_v63 = vld [vmem:[%s23612_s6 + $0x18c] ss:$16 sps:$4 sm:$0xff]   ;;  %v20932_v0 = vld [vmem:[%s23612_s6 + $0x188] ss:$16 sps:$4 sm:$0xff]  }
 0x69d   : > { %v24167_v26 = vadd.f32 %v8337_v44, %v8297_v21  ;;  %v8340_v19 = vpop.f32.mrb[27].mxu1  ;;  %8641 = vmatprep.subr.bf16.mxu1 %v20901_v29  ;;  %v20937_v51 = vld [vmem:[%s23612_s6 + $0x38c] ss:$16 sps:$4 sm:$0xff]   ;;  %v20935_v29 = vld [vmem:[%s23612_s6 + $0x388] ss:$16 sps:$4 sm:$0xff]  }
 0x69e   : > { %v20938_v8 = vld [vmem:[%s23612_s6 + $0x1a8] ss:$16 sps:$4 sm:$0xff]   ;;  %v20943_v34 = vld [vmem:[%s23612_s6 + $0x3ac] ss:$16 sps:$4 sm:$0xff]  }
 0x69f   : > { %8601 = vmatpush1.bf16.msra.mxu0 %v20896_v52  ;;  %v20946_v52 = vld [vmem:[%s23612_s6 + $0x1cc] ss:$16 sps:$4 sm:$0xff]   ;;  %v20944_v21 = vld [vmem:[%s23612_s6 + $0x1c8] ss:$16 sps:$4 sm:$0xff]  }
 0x6a0   : > { %8642 = vmatpush1.bf16.msra.mxu1 %v20899_v47  ;;  %8602 = vmatprep.subr.bf16.mxu0 %v20904_v6  ;;  %v20949_v44 = vld [vmem:[%s23612_s6 + $0x3cc] ss:$16 sps:$4 sm:$0xff]   ;;  %v20947_v9 = vld [vmem:[%s23612_s6 + $0x3c8] ss:$16 sps:$4 sm:$0xff]  }
 0x6a1   : > { %8643 = vmatprep.subr.bf16.mxu1 %v20907_v20  ;;  %v20952_v47 = vld [vmem:[%s23612_s6 + $0x1ec] ss:$16 sps:$4 sm:$0xff]   ;;  %v20950_v6 = vld [vmem:[%s23612_s6 + $0x1e8] ss:$16 sps:$4 sm:$0xff]  }
 0x6a2   : > { %v20955_v54 = vld [vmem:[%s23612_s6 + $0x3ec] ss:$16 sps:$4 sm:$0xff]   ;;  %v20953_v13 = vld [vmem:[%s23612_s6 + $0x3e8] ss:$16 sps:$4 sm:$0xff]  }
 0x6a3   : > { %8603 = vmatpush1.bf16.msra.mxu0 %v20902_v22  ;;  %v20958_v19 = vld [vmem:[%s23612_s6 + $0x40c] ss:$16 sps:$4 sm:$0xff]   ;;  %v20956_v22 = vld [vmem:[%s23612_s6 + $0x408] ss:$16 sps:$4 sm:$0xff]  }
 0x6a4   : > { %8644 = vmatpush1.bf16.msra.mxu1 %v20905_v23  ;;  %8604 = vmatprep.subr.bf16.mxu0 %v20910_v24  ;;  %v20961_v20 = vld [vmem:[%s23612_s6 + $0x60c] ss:$16 sps:$4 sm:$0xff]   ;;  %v20959_v23 = vld [vmem:[%s23612_s6 + $0x608] ss:$16 sps:$4 sm:$0xff]  }
 0x6a5   : > { %8645 = vmatprep.subr.bf16.mxu1 %v20913_v28  ;;  %v20964_v24 = vld [vmem:[%s23612_s6 + $0x42c] ss:$16 sps:$4 sm:$0xff]  }
 0x6a6   : > { %v20967_v28 = vld [vmem:[%s23612_s6 + $0x62c] ss:$16 sps:$4 sm:$0xff]  }
 0x6a7   : > { %8605 = vmatpush1.bf16.msra.mxu0 %v20908_v27  ;;  %v20962_v27 = vld [vmem:[%s23612_s6 + $0x428] ss:$16 sps:$4 sm:$0xff]  }
 0x6a8   : > { %8646 = vmatpush1.bf16.msra.mxu1 %v20911_v12  ;;  %8606 = vmatprep.subr.bf16.mxu0 %v20916_v41  ;;  %v20965_v12 = vld [vmem:[%s23612_s6 + $0x628] ss:$16 sps:$4 sm:$0xff]   ;;  %v20970_v41 = vld [vmem:[%s23612_s6 + $0x44c] ss:$16 sps:$4 sm:$0xff]  }
 0x6a9   : > { %8647 = vmatprep.subr.bf16.mxu1 %v20919_v32  ;;  %v20976_v32 = vld [vmem:[%s23612_s6 + $0x46c] ss:$16 sps:$4 sm:$0xff]  }
 0x6ab   : > { %8607 = vmatpush1.bf16.msra.mxu0 %v20914_v30  ;;  %v20968_v30 = vld [vmem:[%s23612_s6 + $0x448] ss:$16 sps:$4 sm:$0xff]  }
 0x6ac   : > { %8648 = vmatpush1.bf16.msra.mxu1 %v20917_v31  ;;  %8608 = vmatprep.subr.bf16.mxu0 %v20922_v33  ;;  %v20979_v31 = vld [vmem:[%s23612_s6 + $0x66c] ss:$16 sps:$4 sm:$0xff]  }
 0x6ad   : > { %8649 = vmatprep.subr.bf16.mxu1 %v20925_v49  ;;  %v20982_v33 = vld [vmem:[%s23612_s6 + $0x48c] ss:$16 sps:$4 sm:$0xff]  }
 0x6ae   : > { %v20985_v49 = vld [vmem:[%s23612_s6 + $0x68c] ss:$16 sps:$4 sm:$0xff]  }
 0x6af   : > { %8609 = vmatpush1.bf16.msra.mxu0 %v20920_v42  ;;  %v20980_v42 = vld [vmem:[%s23612_s6 + $0x488] ss:$16 sps:$4 sm:$0xff]  }
 0x6b0   : > { %8650 = vmatpush1.bf16.msra.mxu1 %v20923_v55  ;;  %8610 = vmatprep.subr.bf16.mxu0 %v20928_v57  ;;  %v20983_v55 = vld [vmem:[%s23612_s6 + $0x688] ss:$16 sps:$4 sm:$0xff]   ;;  %v20988_v57 = vld [vmem:[%s23612_s6 + $0x4ac] ss:$16 sps:$4 sm:$0xff]  }
 0x6b1   : > { %8651 = vmatprep.subr.bf16.mxu1 %v20931_v11  ;;  %v20986_v11 = vld [vmem:[%s23612_s6 + $0x4a8] ss:$16 sps:$4 sm:$0xff]  }
 0x6b3   : > { %8611 = vmatpush1.bf16.msra.mxu0 %v20926_v61  ;;  %v20991_v61 = vld [vmem:[%s23612_s6 + $0x6ac] ss:$16 sps:$4 sm:$0xff]  }
 0x6b4   : > { %8652 = vmatpush1.bf16.msra.mxu1 %v20929_v62  ;;  %8612 = vmatprep.subr.bf16.mxu0 %v20934_v63  ;;  %v20989_v62 = vld [vmem:[%s23612_s6 + $0x6a8] ss:$16 sps:$4 sm:$0xff]   ;;  %v20994_v63 = vld [vmem:[%s23612_s6 + $0x4cc] ss:$16 sps:$4 sm:$0xff]  }
 0x6b5   : > { %8653 = vmatprep.subr.bf16.mxu1 %v20937_v51 }
 0x6b7   : > { %8613 = vmatpush1.bf16.msra.mxu0 %v20932_v0  ;;  %v20997_v0 = vld [vmem:[%s23612_s6 + $0x6cc] ss:$16 sps:$4 sm:$0xff]  }
 0x6b8   : > { %8654 = vmatpush1.bf16.msra.mxu1 %v20935_v29  ;;  %8614 = vmatprep.subr.bf16.mxu0 %v20940_v14 }
 0x6b9   : > { %8655 = vmatprep.subr.bf16.mxu1 %v20943_v34  ;;  %v20992_v34 = vld [vmem:[%s23612_s6 + $0x4c8] ss:$16 sps:$4 sm:$0xff]  }
 0x6bb   : > { %8615 = vmatpush1.bf16.msra.mxu0 %v20938_v8 }
 0x6bc   : > { %8656 = vmatpush1.bf16.msra.mxu1 %v20941_v2  ;;  %8616 = vmatprep.subr.bf16.mxu0 %v20946_v52  ;;  %v20995_v2 = vld [vmem:[%s23612_s6 + $0x6c8] ss:$16 sps:$4 sm:$0xff]  }
 0x6bd   : > { %8657 = vmatprep.subr.bf16.mxu1 %v20949_v44 }
 0x6bf   : > { %8617 = vmatpush1.bf16.msra.mxu0 %v20944_v21 }
 0x6c0   : > { %8658 = vmatpush1.bf16.msra.mxu1 %v20947_v9  ;;  %8618 = vmatprep.subr.bf16.mxu0 %v20952_v47  ;;  %v21000_v9 = vld [vmem:[%s23612_s6 + $0x4ec] ss:$16 sps:$4 sm:$0xff]  }
 0x6c1   : > { %8659 = vmatprep.subr.bf16.mxu1 %v20955_v54  ;;  %v21003_v47 = vld [vmem:[%s23612_s6 + $0x6ec] ss:$16 sps:$4 sm:$0xff]  }
 0x6c3   : > { %8619 = vmatpush1.bf16.msra.mxu0 %v20950_v6 }
 0x6c4   : > { %8660 = vmatpush1.bf16.msra.mxu1 %v20953_v13  ;;  %8670 = vmatprep.subr.bf16.mxu0 %v20958_v19  ;;  %v20998_v19 = vld [vmem:[%s23612_s6 + $0x4e8] ss:$16 sps:$4 sm:$0xff]  }
 0x6c5   : > { %8711 = vmatprep.subr.bf16.mxu1 %v20961_v20  ;;  %v21001_v20 = vld [vmem:[%s23612_s6 + $0x6e8] ss:$16 sps:$4 sm:$0xff]  }
 0x6c6   : > { %8621 = vmatmul.mubr.bf16.vlgmr.msra.gmra.mrb[40].mxu0 %v23852_v39  ;;  %v20973_v39 = vld [vmem:[%s23612_s6 + $0x64c] ss:$16 sps:$4 sm:$0xff]  }
 0x6c7   : > { %8662 = vmatmul.mubr.bf16.vlgmr.msra.gmra.mrb[40].mxu1 %v23854_v48  ;;  %8671 = vmatpush1.bf16.msra.mxu0 %v20956_v22  ;;  %v20971_v48 = vld [vmem:[%s23612_s6 + $0x648] ss:$16 sps:$4 sm:$0xff]   ;;  %v21006_v22 = vld [vmem:[%s23612_s6 + $0x50c] ss:$16 sps:$4 sm:$0xff]  }
 0x6c8   : > { %8702 = vmatprep.mubr.bf16.mxu0 %v23856_v36  ;;  %8712 = vmatpush1.bf16.msra.mxu1 %v20959_v23  ;;  %v20974_v36 = vld [vmem:[%s23612_s6 + $0x468] ss:$16 sps:$4 sm:$0xff]  }
 0x6c9   : > { %8743 = vmatprep.mubr.bf16.mxu1 %v23860_v15  ;;  %8672 = vmatprep.subr.bf16.mxu0 %v20964_v24  ;;  %v20977_v15 = vld [vmem:[%s23612_s6 + $0x668] ss:$16 sps:$4 sm:$0xff]   ;;  %v21009_v24 = vld [vmem:[%s23612_s6 + $0x70c] ss:$16 sps:$4 sm:$0xff]  }
 0x6ca   : > { %8713 = vmatprep.subr.bf16.mxu1 %v20967_v28  ;;  %v21004_v23 = vld [vmem:[%s23612_s6 + $0x508] ss:$16 sps:$4 sm:$0xff]   ;;  %v21012_v28 = vld [vmem:[%s23612_s6 + $0x52c] ss:$16 sps:$4 sm:$0xff]  }
 0x6cb   : > { %8673 = vmatpush1.bf16.msra.mxu0 %v20962_v27  ;;  %v21007_v27 = vld [vmem:[%s23612_s6 + $0x708] ss:$16 sps:$4 sm:$0xff]  }
 0x6cc   : > { %8714 = vmatpush1.bf16.msra.mxu1 %v20965_v12  ;;  %8674 = vmatprep.subr.bf16.mxu0 %v20970_v41  ;;  %v21010_v12 = vld [vmem:[%s23612_s6 + $0x528] ss:$16 sps:$4 sm:$0xff]   ;;  %v21015_v41 = vld [vmem:[%s23612_s6 + $0x72c] ss:$16 sps:$4 sm:$0xff]  }
 0x6cd   : > { %8715 = vmatprep.subr.bf16.mxu1 %v20973_v39  ;;  %v21013_v39 = vld [vmem:[%s23612_s6 + $0x728] ss:$16 sps:$4 sm:$0xff]  }
 0x6cf   : > { %8675 = vmatpush1.bf16.msra.mxu0 %v20968_v30  ;;  %v21018_v30 = vld [vmem:[%s23612_s6 + $0x54c] ss:$16 sps:$4 sm:$0xff]  }
 0x6d0   : > { %8716 = vmatpush1.bf16.msra.mxu1 %v20971_v48  ;;  %8676 = vmatprep.subr.bf16.mxu0 %v20976_v32  ;;  %v21016_v48 = vld [vmem:[%s23612_s6 + $0x548] ss:$16 sps:$4 sm:$0xff]   ;;  %v21021_v32 = vld [vmem:[%s23612_s6 + $0x74c] ss:$16 sps:$4 sm:$0xff]  }
 0x6d1   : > { %8717 = vmatprep.subr.bf16.mxu1 %v20979_v31  ;;  %v21024_v31 = vld [vmem:[%s23612_s6 + $0x56c] ss:$16 sps:$4 sm:$0xff]  }
 0x6d3   : > { %8677 = vmatpush1.bf16.msra.mxu0 %v20974_v36  ;;  %v21019_v36 = vld [vmem:[%s23612_s6 + $0x748] ss:$16 sps:$4 sm:$0xff]  }
 0x6d4   : > { %8718 = vmatpush1.bf16.msra.mxu1 %v20977_v15  ;;  %8678 = vmatprep.subr.bf16.mxu0 %v20982_v33  ;;  %v21022_v15 = vld [vmem:[%s23612_s6 + $0x568] ss:$16 sps:$4 sm:$0xff]   ;;  %v21027_v33 = vld [vmem:[%s23612_s6 + $0x76c] ss:$16 sps:$4 sm:$0xff]  }
 0x6d5   : > { %8719 = vmatprep.subr.bf16.mxu1 %v20985_v49  ;;  %v21030_v49 = vld [vmem:[%s23612_s6 + $0x58c] ss:$16 sps:$4 sm:$0xff]  }
 0x6d7   : > { %8679 = vmatpush1.bf16.msra.mxu0 %v20980_v42  ;;  %v21025_v42 = vld [vmem:[%s23612_s6 + $0x768] ss:$16 sps:$4 sm:$0xff]  }
 0x6d8   : > { %8720 = vmatpush1.bf16.msra.mxu1 %v20983_v55  ;;  %8680 = vmatprep.subr.bf16.mxu0 %v20988_v57  ;;  %v21028_v55 = vld [vmem:[%s23612_s6 + $0x588] ss:$16 sps:$4 sm:$0xff]   ;;  %v21033_v57 = vld [vmem:[%s23612_s6 + $0x78c] ss:$16 sps:$4 sm:$0xff]  }
 0x6d9   : > { %v8376_v51 = vpop.f32.mrb[28].mxu0  ;;  %8721 = vmatprep.subr.bf16.mxu1 %v20991_v61  ;;  %v21031_v61 = vld [vmem:[%s23612_s6 + $0x788] ss:$16 sps:$4 sm:$0xff]  }
 0x6da   : > { %v8377_v29 = vadd.f32 %v8376_v51, %v24165_v7  ;;  %v8417_v14 = vpop.f32.mrb[28].mxu1  ;;  %v8378_v8 = vpop.f32.mrb[29].mxu0  ;;  %v21042_v51 = vld [vmem:[%s23612_s6 + $0x5cc] ss:$16 sps:$4 sm:$0xff]  }
 0x6db   : > { %v8379_v52 = vadd.f32 %v8378_v8, %v24167_v26  ;;  %v8419_v21 = vpop.f32.mrb[29].mxu1  ;;  %v8380_v44 = vpop.f32.mrb[30].mxu0  ;;  %8681 = vmatpush1.bf16.msra.mxu0 %v20986_v11  ;;  %v21036_v11 = vld [vmem:[%s23612_s6 + $0x5ac] ss:$16 sps:$4 sm:$0xff]   ;;  %v21043_v8 = vld [vmem:[%s23612_s6 + $0x7c8] ss:$16 sps:$4 sm:$0xff]  }
 0x6dc   : > { %v24240_v6 = vadd.f32 %v8417_v14, %v8377_v29  ;;  %v8421_v54 = vpop.f32.mrb[30].mxu1  ;;  %8722 = vmatpush1.bf16.msra.mxu1 %v20989_v62  ;;  %v8381_v7 = vpop.f32.mrb[31].mxu0  ;;  %8682 = vmatprep.subr.bf16.mxu0 %v20994_v63  ;;  %v21034_v62 = vld [vmem:[%s23612_s6 + $0x5a8] ss:$16 sps:$4 sm:$0xff]   ;;  %v21039_v63 = vld [vmem:[%s23612_s6 + $0x7ac] ss:$16 sps:$4 sm:$0xff]  }
 0x6dd   : > { %v24242_v13 = vadd.f32 %v8419_v21, %v8379_v52  ;;  %v8422_v26 = vpop.f32.mrb[31].mxu1  ;;  %8723 = vmatprep.subr.bf16.mxu1 %v20997_v0  ;;  %v21037_v0 = vld [vmem:[%s23612_s6 + $0x7a8] ss:$16 sps:$4 sm:$0xff]   ;;  %v21045_v14 = vld [vmem:[%s23612_s6 + $0x7cc] ss:$16 sps:$4 sm:$0xff]  }
 0x6de   : > { %v21040_v29 = vld [vmem:[%s23612_s6 + $0x5c8] ss:$16 sps:$4 sm:$0xff]   ;;  %v21051_v52 = vld [vmem:[%s23612_s6 + $0x7ec] ss:$16 sps:$4 sm:$0xff]  }
 0x6df   : > { %8683 = vmatpush1.bf16.msra.mxu0 %v20992_v34  ;;  %v21048_v34 = vld [vmem:[%s23612_s6 + $0x5ec] ss:$16 sps:$4 sm:$0xff]   ;;  %v21049_v21 = vld [vmem:[%s23612_s6 + $0x7e8] ss:$16 sps:$4 sm:$0xff]  }
 0x6e0   : > { %8724 = vmatpush1.bf16.msra.mxu1 %v20995_v2  ;;  %8684 = vmatprep.subr.bf16.mxu0 %v21000_v9  ;;  %v21046_v2 = vld [vmem:[%s23612_s6 + $0x5e8] ss:$16 sps:$4 sm:$0xff]   ;;  %v21054_v44 = vld [vmem:[%s23612_s6 + $0x80c] ss:$16 sps:$4 sm:$0xff]  }
 0x6e1   : > { %8725 = vmatprep.subr.bf16.mxu1 %v21003_v47  ;;  %v21057_v9 = vld [vmem:[%s23612_s6 + $0xa0c] ss:$16 sps:$4 sm:$0xff]   ;;  %v21052_v47 = vld [vmem:[%s23612_s6 + $0x808] ss:$16 sps:$4 sm:$0xff]  }
 0x6e2   : > { %v21055_v54 = vld [vmem:[%s23612_s6 + $0xa08] ss:$16 sps:$4 sm:$0xff]   ;;  %v21060_v7 = vld [vmem:[%s23612_s6 + $0x82c] ss:$16 sps:$4 sm:$0xff]  }
 0x6e3   : > { %8685 = vmatpush1.bf16.msra.mxu0 %v20998_v19  ;;  %v21063_v26 = vld [vmem:[%s23612_s6 + $0xa2c] ss:$16 sps:$4 sm:$0xff]   ;;  %v21058_v19 = vld [vmem:[%s23612_s6 + $0x828] ss:$16 sps:$4 sm:$0xff]  }
 0x6e4   : > { %8726 = vmatpush1.bf16.msra.mxu1 %v21001_v20  ;;  %8686 = vmatprep.subr.bf16.mxu0 %v21006_v22  ;;  %v21061_v20 = vld [vmem:[%s23612_s6 + $0xa28] ss:$16 sps:$4 sm:$0xff]   ;;  %v21066_v22 = vld [vmem:[%s23612_s6 + $0x84c] ss:$16 sps:$4 sm:$0xff]  }
 0x6e5   : > { %8727 = vmatprep.subr.bf16.mxu1 %v21009_v24  ;;  %v21067_v24 = vld [vmem:[%s23612_s6 + $0xa48] ss:$16 sps:$4 sm:$0xff]  }
 0x6e7   : > { %8687 = vmatpush1.bf16.msra.mxu0 %v21004_v23  ;;  %v21069_v23 = vld [vmem:[%s23612_s6 + $0xa4c] ss:$16 sps:$4 sm:$0xff]  }
 0x6e8   : > { %8728 = vmatpush1.bf16.msra.mxu1 %v21007_v27  ;;  %8688 = vmatprep.subr.bf16.mxu0 %v21012_v28  ;;  %v21075_v27 = vld [vmem:[%s23612_s6 + $0xa6c] ss:$16 sps:$4 sm:$0xff]  }
 0x6e9   : > { %8729 = vmatprep.subr.bf16.mxu1 %v21015_v41  ;;  %v21078_v28 = vld [vmem:[%s23612_s6 + $0x88c] ss:$16 sps:$4 sm:$0xff]   ;;  %v21076_v41 = vld [vmem:[%s23612_s6 + $0x888] ss:$16 sps:$4 sm:$0xff]  }
 0x6eb   : > { %8689 = vmatpush1.bf16.msra.mxu0 %v21010_v12  ;;  %v21081_v12 = vld [vmem:[%s23612_s6 + $0xa8c] ss:$16 sps:$4 sm:$0xff]  }
 0x6ec   : > { %8730 = vmatpush1.bf16.msra.mxu1 %v21013_v39  ;;  %8690 = vmatprep.subr.bf16.mxu0 %v21018_v30  ;;  %v21079_v39 = vld [vmem:[%s23612_s6 + $0xa88] ss:$16 sps:$4 sm:$0xff]   ;;  %v21084_v30 = vld [vmem:[%s23612_s6 + $0x8ac] ss:$16 sps:$4 sm:$0xff]  }
 0x6ed   : > { %8731 = vmatprep.subr.bf16.mxu1 %v21021_v32  ;;  %v21082_v32 = vld [vmem:[%s23612_s6 + $0x8a8] ss:$16 sps:$4 sm:$0xff]  }
 0x6ef   : > { %8691 = vmatpush1.bf16.msra.mxu0 %v21016_v48  ;;  %v21087_v48 = vld [vmem:[%s23612_s6 + $0xaac] ss:$16 sps:$4 sm:$0xff]  }
 0x6f0   : > { %8732 = vmatpush1.bf16.msra.mxu1 %v21019_v36  ;;  %8692 = vmatprep.subr.bf16.mxu0 %v21024_v31  ;;  %v21085_v36 = vld [vmem:[%s23612_s6 + $0xaa8] ss:$16 sps:$4 sm:$0xff]   ;;  %v21090_v31 = vld [vmem:[%s23612_s6 + $0x8cc] ss:$16 sps:$4 sm:$0xff]  }
 0x6f1   : > { %8733 = vmatprep.subr.bf16.mxu1 %v21027_v33  ;;  %v21093_v33 = vld [vmem:[%s23612_s6 + $0xacc] ss:$16 sps:$4 sm:$0xff]  }
 0x6f3   : > { %8693 = vmatpush1.bf16.msra.mxu0 %v21022_v15 }
 0x6f4   : > { %8734 = vmatpush1.bf16.msra.mxu1 %v21025_v42  ;;  %8694 = vmatprep.subr.bf16.mxu0 %v21030_v49 }
 0x6f5   : > { %8735 = vmatprep.subr.bf16.mxu1 %v21033_v57 }
 0x6f7   : > { %8695 = vmatpush1.bf16.msra.mxu0 %v21028_v55 }
 0x6f8   : > { %8736 = vmatpush1.bf16.msra.mxu1 %v21031_v61  ;;  %8696 = vmatprep.subr.bf16.mxu0 %v21036_v11 }
 0x6f9   : > { %8737 = vmatprep.subr.bf16.mxu1 %v21039_v63 }
 0x6fb   : > { %8697 = vmatpush1.bf16.msra.mxu0 %v21034_v62  ;;  %v21088_v62 = vld [vmem:[%s23612_s6 + $0x8c8] ss:$16 sps:$4 sm:$0xff]  }
 0x6fc   : > { %8738 = vmatpush1.bf16.msra.mxu1 %v21037_v0  ;;  %8698 = vmatprep.subr.bf16.mxu0 %v21042_v51 }
 0x6fd   : > { %8739 = vmatprep.subr.bf16.mxu1 %v21045_v14 }
 0x6ff   : > { %8699 = vmatpush1.bf16.msra.mxu0 %v21040_v29  ;;  %v21096_v29 = vld [vmem:[%s23612_s6 + $0x8ec] ss:$16 sps:$4 sm:$0xff]  }
 0x700   : > { %8740 = vmatpush1.bf16.msra.mxu1 %v21043_v8  ;;  %8700 = vmatprep.subr.bf16.mxu0 %v21048_v34  ;;  %v21099_v8 = vld [vmem:[%s23612_s6 + $0xaec] ss:$16 sps:$4 sm:$0xff]   ;;  %v21094_v34 = vld [vmem:[%s23612_s6 + $0x8e8] ss:$16 sps:$4 sm:$0xff]  }
 0x701   : > { %8741 = vmatprep.subr.bf16.mxu1 %v21051_v52  ;;  %v21102_v52 = vld [vmem:[%s23612_s6 + $0x90c] ss:$16 sps:$4 sm:$0xff]  }
 0x703   : > { %8701 = vmatpush1.bf16.msra.mxu0 %v21046_v2  ;;  %v21097_v2 = vld [vmem:[%s23612_s6 + $0xae8] ss:$16 sps:$4 sm:$0xff]  }
 0x704   : > { %8742 = vmatpush1.bf16.msra.mxu1 %v21049_v21  ;;  %8752 = vmatprep.subr.bf16.mxu0 %v21054_v44  ;;  %v21105_v21 = vld [vmem:[%s23612_s6 + $0xb0c] ss:$16 sps:$4 sm:$0xff]   ;;  %v21100_v44 = vld [vmem:[%s23612_s6 + $0x908] ss:$16 sps:$4 sm:$0xff]  }
 0x705   : > { %8793 = vmatprep.subr.bf16.mxu1 %v21057_v9  ;;  %v21103_v9 = vld [vmem:[%s23612_s6 + $0xb08] ss:$16 sps:$4 sm:$0xff]  }
 0x706   : > { %8703 = vmatmul.mubr.bf16.vlgmr.msra.gmra.mrb[44].mxu0 %v23956_v10  ;;  %v21064_v10 = vld [vmem:[%s23612_s6 + $0x848] ss:$16 sps:$4 sm:$0xff]  }
 0x707   : > { %8744 = vmatmul.mubr.bf16.vlgmr.msra.gmra.mrb[44].mxu1 %v23958_v59  ;;  %8753 = vmatpush1.bf16.msra.mxu0 %v21052_v47  ;;  %v21072_v59 = vld [vmem:[%s23612_s6 + $0x86c] ss:$16 sps:$4 sm:$0xff]  }
 0x708   : > { %8784 = vmatprep.mubr.bf16.mxu0 %v23960_v45  ;;  %8794 = vmatpush1.bf16.msra.mxu1 %v21055_v54  ;;  %v21070_v45 = vld [vmem:[%s23612_s6 + $0x868] ss:$16 sps:$4 sm:$0xff]   ;;  %v21108_v47 = vld [vmem:[%s23612_s6 + $0x92c] ss:$16 sps:$4 sm:$0xff]  }
 0x709   : > { %8825 = vmatprep.mubr.bf16.mxu1 %v23965_v17  ;;  %8754 = vmatprep.subr.bf16.mxu0 %v21060_v7  ;;  %v21073_v17 = vld [vmem:[%s23612_s6 + $0xa68] ss:$16 sps:$4 sm:$0xff]   ;;  %v21111_v54 = vld [vmem:[%s23612_s6 + $0xb2c] ss:$16 sps:$4 sm:$0xff]  }
 0x70a   : > { %8795 = vmatprep.subr.bf16.mxu1 %v21063_v26  ;;  %v21106_v7 = vld [vmem:[%s23612_s6 + $0x928] ss:$16 sps:$4 sm:$0xff]  }
 0x70b   : > { %8755 = vmatpush1.bf16.msra.mxu0 %v21058_v19  ;;  %v21109_v26 = vld [vmem:[%s23612_s6 + $0xb28] ss:$16 sps:$4 sm:$0xff]   ;;  %v21114_v19 = vld [vmem:[%s23612_s6 + $0x94c] ss:$16 sps:$4 sm:$0xff]  }
 0x70c   : > { %8796 = vmatpush1.bf16.msra.mxu1 %v21061_v20  ;;  %8756 = vmatprep.subr.bf16.mxu0 %v21066_v22  ;;  %v21117_v20 = vld [vmem:[%s23612_s6 + $0xb4c] ss:$16 sps:$4 sm:$0xff]   ;;  %v21112_v22 = vld [vmem:[%s23612_s6 + $0x948] ss:$16 sps:$4 sm:$0xff]  }
 0x70d   : > { %8797 = vmatprep.subr.bf16.mxu1 %v21069_v23  ;;  %v21115_v23 = vld [vmem:[%s23612_s6 + $0xb48] ss:$16 sps:$4 sm:$0xff]  }
 0x70f   : > { %8757 = vmatpush1.bf16.msra.mxu0 %v21064_v10  ;;  %v21120_v10 = vld [vmem:[%s23612_s6 + $0x96c] ss:$16 sps:$4 sm:$0xff]  }
 0x710   : > { %8798 = vmatpush1.bf16.msra.mxu1 %v21067_v24  ;;  %8758 = vmatprep.subr.bf16.mxu0 %v21072_v59  ;;  %v21123_v24 = vld [vmem:[%s23612_s6 + $0xb6c] ss:$16 sps:$4 sm:$0xff]   ;;  %v21118_v59 = vld [vmem:[%s23612_s6 + $0x968] ss:$16 sps:$4 sm:$0xff]  }
 0x711   : > { %8799 = vmatprep.subr.bf16.mxu1 %v21075_v27  ;;  %v21121_v27 = vld [vmem:[%s23612_s6 + $0xb68] ss:$16 sps:$4 sm:$0xff]  }
 0x713   : > { %8759 = vmatpush1.bf16.msra.mxu0 %v21070_v45  ;;  %v21126_v45 = vld [vmem:[%s23612_s6 + $0x98c] ss:$16 sps:$4 sm:$0xff]  }
 0x714   : > { %8800 = vmatpush1.bf16.msra.mxu1 %v21073_v17  ;;  %8760 = vmatprep.subr.bf16.mxu0 %v21078_v28  ;;  %v21129_v17 = vld [vmem:[%s23612_s6 + $0xb8c] ss:$16 sps:$4 sm:$0xff]   ;;  %v21124_v28 = vld [vmem:[%s23612_s6 + $0x988] ss:$16 sps:$4 sm:$0xff]  }
 0x715   : > { %8801 = vmatprep.subr.bf16.mxu1 %v21081_v12  ;;  %v21127_v12 = vld [vmem:[%s23612_s6 + $0xb88] ss:$16 sps:$4 sm:$0xff]  }
 0x717   : > { %8761 = vmatpush1.bf16.msra.mxu0 %v21076_v41  ;;  %v21132_v41 = vld [vmem:[%s23612_s6 + $0x9ac] ss:$16 sps:$4 sm:$0xff]  }
 0x718   : > { %8802 = vmatpush1.bf16.msra.mxu1 %v21079_v39  ;;  %8762 = vmatprep.subr.bf16.mxu0 %v21084_v30  ;;  %v21135_v39 = vld [vmem:[%s23612_s6 + $0xbac] ss:$16 sps:$4 sm:$0xff]   ;;  %v21130_v30 = vld [vmem:[%s23612_s6 + $0x9a8] ss:$16 sps:$4 sm:$0xff]  }
 0x719   : > { %v8458_v15 = vpop.f32.mrb[32].mxu0  ;;  %8803 = vmatprep.subr.bf16.mxu1 %v21087_v48  ;;  %v21133_v48 = vld [vmem:[%s23612_s6 + $0xba8] ss:$16 sps:$4 sm:$0xff]  }
 0x71a   : > { %v8459_v42 = vadd.f32 %v8458_v15, %v24240_v6  ;;  %v8499_v49 = vpop.f32.mrb[32].mxu1  ;;  %v8460_v55 = vpop.f32.mrb[33].mxu0  ;;  %v21091_v6 = vld [vmem:[%s23612_s6 + $0xac8] ss:$16 sps:$4 sm:$0xff]  }
 0x71b   : > { %v8461_v57 = vadd.f32 %v8460_v55, %v24242_v13  ;;  %v8501_v61 = vpop.f32.mrb[33].mxu1  ;;  %v8462_v11 = vpop.f32.mrb[34].mxu0  ;;  %8763 = vmatpush1.bf16.msra.mxu0 %v21082_v32  ;;  %v21138_v32 = vld [vmem:[%s23612_s6 + $0x9cc] ss:$16 sps:$4 sm:$0xff]   ;;  %v21139_v15 = vld [vmem:[%s23612_s6 + $0xbc8] ss:$16 sps:$4 sm:$0xff]  }
 0x71c   : > { %v24311_v63 = vadd.f32 %v8499_v49, %v8459_v42  ;;  %v8503_v0 = vpop.f32.mrb[34].mxu1  ;;  %8804 = vmatpush1.bf16.msra.mxu1 %v21085_v36  ;;  %v8463_v51 = vpop.f32.mrb[35].mxu0  ;;  %8764 = vmatprep.subr.bf16.mxu0 %v21090_v31  ;;  %v21141_v36 = vld [vmem:[%s23612_s6 + $0xbcc] ss:$16 sps:$4 sm:$0xff]   ;;  %v21136_v31 = vld [vmem:[%s23612_s6 + $0x9c8] ss:$16 sps:$4 sm:$0xff]  }
 0x71d   : > { %v24315_v14 = vadd.f32 %v8501_v61, %v8461_v57  ;;  %v8504_v13 = vpop.f32.mrb[35].mxu1  ;;  %8805 = vmatprep.subr.bf16.mxu1 %v21093_v33  ;;  %v21144_v33 = vld [vmem:[%s23612_s6 + $0x9ec] ss:$16 sps:$4 sm:$0xff]   ;;  %v21142_v49 = vld [vmem:[%s23612_s6 + $0x9e8] ss:$16 sps:$4 sm:$0xff]  }
 0x71e   : > { %v21147_v42 = vld [vmem:[%s23612_s6 + $0xbec] ss:$16 sps:$4 sm:$0xff]   ;;  %v21145_v55 = vld [vmem:[%s23612_s6 + $0xbe8] ss:$16 sps:$4 sm:$0xff]  }
 0x71f   : > { %8765 = vmatpush1.bf16.msra.mxu0 %v21088_v62  ;;  %v21150_v57 = vld [vmem:[%s23612_s6 + $0xc0c] ss:$16 sps:$4 sm:$0xff]   ;;  %v21148_v11 = vld [vmem:[%s23612_s6 + $0xc08] ss:$16 sps:$4 sm:$0xff]  }
 0x720   : > { %8806 = vmatpush1.bf16.msra.mxu1 %v21091_v6  ;;  %8766 = vmatprep.subr.bf16.mxu0 %v21096_v29  ;;  %v21153_v61 = vld [vmem:[%s23612_s6 + $0xe0c] ss:$16 sps:$4 sm:$0xff]   ;;  %v21151_v62 = vld [vmem:[%s23612_s6 + $0xe08] ss:$16 sps:$4 sm:$0xff]  }
 0x721   : > { %8807 = vmatprep.subr.bf16.mxu1 %v21099_v8  ;;  %v21156_v0 = vld [vmem:[%s23612_s6 + $0xc2c] ss:$16 sps:$4 sm:$0xff]   ;;  %v21154_v6 = vld [vmem:[%s23612_s6 + $0xc28] ss:$16 sps:$4 sm:$0xff]  }
 0x722   : > { %v21159_v51 = vld [vmem:[%s23612_s6 + $0xe2c] ss:$16 sps:$4 sm:$0xff]   ;;  %v21157_v29 = vld [vmem:[%s23612_s6 + $0xe28] ss:$16 sps:$4 sm:$0xff]  }
 0x723   : > { %8767 = vmatpush1.bf16.msra.mxu0 %v21094_v34  ;;  %v21162_v13 = vld [vmem:[%s23612_s6 + $0xc4c] ss:$16 sps:$4 sm:$0xff]   ;;  %v21163_v8 = vld [vmem:[%s23612_s6 + $0xe48] ss:$16 sps:$4 sm:$0xff]  }
 0x724   : > { %8808 = vmatpush1.bf16.msra.mxu1 %v21097_v2  ;;  %8768 = vmatprep.subr.bf16.mxu0 %v21102_v52  ;;  %v21171_v34 = vld [vmem:[%s23612_s6 + $0xe6c] ss:$16 sps:$4 sm:$0xff]   ;;  %v21169_v2 = vld [vmem:[%s23612_s6 + $0xe68] ss:$16 sps:$4 sm:$0xff]  }
 0x725   : > { %8809 = vmatprep.subr.bf16.mxu1 %v21105_v21  ;;  %v21174_v52 = vld [vmem:[%s23612_s6 + $0xc8c] ss:$16 sps:$4 sm:$0xff]  }
 0x726   : > { %v21177_v21 = vld [vmem:[%s23612_s6 + $0xe8c] ss:$16 sps:$4 sm:$0xff]  }
 0x727   : > { %8769 = vmatpush1.bf16.msra.mxu0 %v21100_v44  ;;  %v21172_v44 = vld [vmem:[%s23612_s6 + $0xc88] ss:$16 sps:$4 sm:$0xff]  }
 0x728   : > { %8810 = vmatpush1.bf16.msra.mxu1 %v21103_v9  ;;  %8770 = vmatprep.subr.bf16.mxu0 %v21108_v47  ;;  %v21175_v9 = vld [vmem:[%s23612_s6 + $0xe88] ss:$16 sps:$4 sm:$0xff]   ;;  %v21180_v47 = vld [vmem:[%s23612_s6 + $0xcac] ss:$16 sps:$4 sm:$0xff]  }
 0x729   : > { %8811 = vmatprep.subr.bf16.mxu1 %v21111_v54  ;;  %v21183_v54 = vld [vmem:[%s23612_s6 + $0xeac] ss:$16 sps:$4 sm:$0xff]  }
 0x72b   : > { %8771 = vmatpush1.bf16.msra.mxu0 %v21106_v7  ;;  %v21178_v7 = vld [vmem:[%s23612_s6 + $0xca8] ss:$16 sps:$4 sm:$0xff]  }
 0x72c   : > { %8812 = vmatpush1.bf16.msra.mxu1 %v21109_v26  ;;  %8772 = vmatprep.subr.bf16.mxu0 %v21114_v19  ;;  %v21181_v26 = vld [vmem:[%s23612_s6 + $0xea8] ss:$16 sps:$4 sm:$0xff]   ;;  %v21186_v19 = vld [vmem:[%s23612_s6 + $0xccc] ss:$16 sps:$4 sm:$0xff]  }
 0x72d   : > { %8813 = vmatprep.subr.bf16.mxu1 %v21117_v20 }
 0x72f   : > { %8773 = vmatpush1.bf16.msra.mxu0 %v21112_v22  ;;  %v21189_v22 = vld [vmem:[%s23612_s6 + $0xecc] ss:$16 sps:$4 sm:$0xff]  }
 0x730   : > { %8814 = vmatpush1.bf16.msra.mxu1 %v21115_v23  ;;  %8774 = vmatprep.subr.bf16.mxu0 %v21120_v10 }
 0x731   : > { %8815 = vmatprep.subr.bf16.mxu1 %v21123_v24 }
 0x733   : > { %8775 = vmatpush1.bf16.msra.mxu0 %v21118_v59 }
 0x734   : > { %8816 = vmatpush1.bf16.msra.mxu1 %v21121_v27  ;;  %8776 = vmatprep.subr.bf16.mxu0 %v21126_v45 }
 0x735   : > { %8817 = vmatprep.subr.bf16.mxu1 %v21129_v17  ;;  %v21184_v17 = vld [vmem:[%s23612_s6 + $0xcc8] ss:$16 sps:$4 sm:$0xff]  }
 0x737   : > { %8777 = vmatpush1.bf16.msra.mxu0 %v21124_v28 }
 0x738   : > { %8818 = vmatpush1.bf16.msra.mxu1 %v21127_v12  ;;  %8778 = vmatprep.subr.bf16.mxu0 %v21132_v41 }
 0x739   : > { %8819 = vmatprep.subr.bf16.mxu1 %v21135_v39  ;;  %v21192_v39 = vld [vmem:[%s23612_s6 + $0xcec] ss:$16 sps:$4 sm:$0xff]  }
 0x73b   : > { %8779 = vmatpush1.bf16.msra.mxu0 %v21130_v30 }
 0x73c   : > { %8820 = vmatpush1.bf16.msra.mxu1 %v21133_v48  ;;  %8780 = vmatprep.subr.bf16.mxu0 %v21138_v32  ;;  %v21195_v48 = vld [vmem:[%s23612_s6 + $0xeec] ss:$16 sps:$4 sm:$0xff]   ;;  %v21190_v32 = vld [vmem:[%s23612_s6 + $0xce8] ss:$16 sps:$4 sm:$0xff]  }
 0x73d   : > { %8821 = vmatprep.subr.bf16.mxu1 %v21141_v36  ;;  %v21193_v36 = vld [vmem:[%s23612_s6 + $0xee8] ss:$16 sps:$4 sm:$0xff]  }
 0x73f   : > { %8781 = vmatpush1.bf16.msra.mxu0 %v21136_v31  ;;  %v21198_v31 = vld [vmem:[%s23612_s6 + $0xd0c] ss:$16 sps:$4 sm:$0xff]  }
 0x740   : > { %8822 = vmatpush1.bf16.msra.mxu1 %v21139_v15  ;;  %8782 = vmatprep.subr.bf16.mxu0 %v21144_v33  ;;  %v21201_v15 = vld [vmem:[%s23612_s6 + $0xf0c] ss:$16 sps:$4 sm:$0xff]   ;;  %v21196_v33 = vld [vmem:[%s23612_s6 + $0xd08] ss:$16 sps:$4 sm:$0xff]  }
 0x741   : > { %8823 = vmatprep.subr.bf16.mxu1 %v21147_v42  ;;  %v21199_v42 = vld [vmem:[%s23612_s6 + $0xf08] ss:$16 sps:$4 sm:$0xff]  }
 0x743   : > { %8783 = vmatpush1.bf16.msra.mxu0 %v21142_v49  ;;  %v21204_v49 = vld [vmem:[%s23612_s6 + $0xd2c] ss:$16 sps:$4 sm:$0xff]  }
 0x744   : > { %8824 = vmatpush1.bf16.msra.mxu1 %v21145_v55  ;;  %8834 = vmatprep.subr.bf16.mxu0 %v21150_v57  ;;  %v21207_v55 = vld [vmem:[%s23612_s6 + $0xf2c] ss:$16 sps:$4 sm:$0xff]   ;;  %v21202_v57 = vld [vmem:[%s23612_s6 + $0xd28] ss:$16 sps:$4 sm:$0xff]  }
 0x745   : > { %8875 = vmatprep.subr.bf16.mxu1 %v21153_v61  ;;  %v21205_v61 = vld [vmem:[%s23612_s6 + $0xf28] ss:$16 sps:$4 sm:$0xff]  }
 0x746   : > { %8785 = vmatmul.mubr.bf16.vlgmr.msra.gmra.mrb[48].mxu0 %v24039_v3  ;;  %v21165_v3 = vld [vmem:[%s23612_s6 + $0xe4c] ss:$16 sps:$4 sm:$0xff]  }
 0x747   : > { %8826 = vmatmul.mubr.bf16.vlgmr.msra.gmra.mrb[48].mxu1 %v24041_v4  ;;  %8835 = vmatpush1.bf16.msra.mxu0 %v21148_v11  ;;  %v21160_v4 = vld [vmem:[%s23612_s6 + $0xc48] ss:$16 sps:$4 sm:$0xff]   ;;  %v21210_v11 = vld [vmem:[%s23612_s6 + $0xd4c] ss:$16 sps:$4 sm:$0xff]  }
 0x748   : > { %8866 = vmatprep.mubr.bf16.mxu0 %v24077_v1  ;;  %8876 = vmatpush1.bf16.msra.mxu1 %v21151_v62  ;;  %v21168_v1 = vld [vmem:[%s23612_s6 + $0xc6c] ss:$16 sps:$4 sm:$0xff]  }
 0x749   : > { %8907 = vmatprep.mubr.bf16.mxu1 %v24080_v5  ;;  %8836 = vmatprep.subr.bf16.mxu0 %v21156_v0  ;;  %v21166_v5 = vld [vmem:[%s23612_s6 + $0xc68] ss:$16 sps:$4 sm:$0xff]   ;;  %v21213_v62 = vld [vmem:[%s23612_s6 + $0xf4c] ss:$16 sps:$4 sm:$0xff]  }
 0x74a   : > { %8877 = vmatprep.subr.bf16.mxu1 %v21159_v51  ;;  %v21208_v0 = vld [vmem:[%s23612_s6 + $0xd48] ss:$16 sps:$4 sm:$0xff]  }
 0x74b   : > { %8837 = vmatpush1.bf16.msra.mxu0 %v21154_v6  ;;  %v21211_v51 = vld [vmem:[%s23612_s6 + $0xf48] ss:$16 sps:$4 sm:$0xff]   ;;  %v21216_v6 = vld [vmem:[%s23612_s6 + $0xd6c] ss:$16 sps:$4 sm:$0xff]  }
 0x74c   : > { %8878 = vmatpush1.bf16.msra.mxu1 %v21157_v29  ;;  %8838 = vmatprep.subr.bf16.mxu0 %v21162_v13  ;;  %v21219_v29 = vld [vmem:[%s23612_s6 + $0xf6c] ss:$16 sps:$4 sm:$0xff]   ;;  %v21214_v13 = vld [vmem:[%s23612_s6 + $0xd68] ss:$16 sps:$4 sm:$0xff]  }
 0x74d   : > { %8879 = vmatprep.subr.bf16.mxu1 %v21165_v3  ;;  %v21217_v3 = vld [vmem:[%s23612_s6 + $0xf68] ss:$16 sps:$4 sm:$0xff]  }
 0x74f   : > { %8839 = vmatpush1.bf16.msra.mxu0 %v21160_v4  ;;  %v21222_v4 = vld [vmem:[%s23612_s6 + $0xd8c] ss:$16 sps:$4 sm:$0xff]  }
 0x750   : > { %8880 = vmatpush1.bf16.msra.mxu1 %v21163_v8  ;;  %8840 = vmatprep.subr.bf16.mxu0 %v21168_v1  ;;  %v21225_v8 = vld [vmem:[%s23612_s6 + $0xf8c] ss:$16 sps:$4 sm:$0xff]   ;;  %v21220_v1 = vld [vmem:[%s23612_s6 + $0xd88] ss:$16 sps:$4 sm:$0xff]  }
 0x751   : > { %8881 = vmatprep.subr.bf16.mxu1 %v21171_v34  ;;  %v21223_v34 = vld [vmem:[%s23612_s6 + $0xf88] ss:$16 sps:$4 sm:$0xff]  }
 0x753   : > { %8841 = vmatpush1.bf16.msra.mxu0 %v21166_v5  ;;  %v21228_v5 = vld [vmem:[%s23612_s6 + $0xdac] ss:$16 sps:$4 sm:$0xff]  }
 0x754   : > { %8882 = vmatpush1.bf16.msra.mxu1 %v21169_v2  ;;  %8842 = vmatprep.subr.bf16.mxu0 %v21174_v52  ;;  %v21231_v2 = vld [vmem:[%s23612_s6 + $0xfac] ss:$16 sps:$4 sm:$0xff]   ;;  %v21226_v52 = vld [vmem:[%s23612_s6 + $0xda8] ss:$16 sps:$4 sm:$0xff]  }
 0x755   : > { %8883 = vmatprep.subr.bf16.mxu1 %v21177_v21  ;;  %v21229_v21 = vld [vmem:[%s23612_s6 + $0xfa8] ss:$16 sps:$4 sm:$0xff]  }
 0x757   : > { %8843 = vmatpush1.bf16.msra.mxu0 %v21172_v44  ;;  %v21234_v44 = vld [vmem:[%s23612_s6 + $0xdcc] ss:$16 sps:$4 sm:$0xff]  }
 0x758   : > { %8884 = vmatpush1.bf16.msra.mxu1 %v21175_v9  ;;  %8844 = vmatprep.subr.bf16.mxu0 %v21180_v47  ;;  %v21237_v9 = vld [vmem:[%s23612_s6 + $0xfcc] ss:$16 sps:$4 sm:$0xff]   ;;  %v21232_v47 = vld [vmem:[%s23612_s6 + $0xdc8] ss:$16 sps:$4 sm:$0xff]  }
 0x759   : > { %v8540_v20 = vpop.f32.mrb[36].mxu0  ;;  %8885 = vmatprep.subr.bf16.mxu1 %v21183_v54  ;;  %v21235_v54 = vld [vmem:[%s23612_s6 + $0xfc8] ss:$16 sps:$4 sm:$0xff]  }
 0x75a   : > { %v8541_v23 = vadd.f32 %v8540_v20, %v24311_v63  ;;  %v8581_v10 = vpop.f32.mrb[36].mxu1  ;;  %v8542_v24 = vpop.f32.mrb[37].mxu0  ;;  %v21187_v63 = vld [vmem:[%s23612_s6 + $0xec8] ss:$16 sps:$4 sm:$0xff]  }
 0x75b   : > { %v8543_v59 = vadd.f32 %v8542_v24, %v24315_v14  ;;  %v8583_v27 = vpop.f32.mrb[37].mxu1  ;;  %v8544_v45 = vpop.f32.mrb[38].mxu0  ;;  %8845 = vmatpush1.bf16.msra.mxu0 %v21178_v7  ;;  %v21240_v7 = vld [vmem:[%s23612_s6 + $0xdec] ss:$16 sps:$4 sm:$0xff]   ;;  %v21241_v20 = vld [vmem:[%s23612_s6 + $0xfe8] ss:$16 sps:$4 sm:$0xff]  }
 0x75c   : > { %v24385_v28 = vadd.f32 %v8581_v10, %v8541_v23  ;;  %v8585_v12 = vpop.f32.mrb[38].mxu1  ;;  %8886 = vmatpush1.bf16.msra.mxu1 %v21181_v26  ;;  %v8545_v41 = vpop.f32.mrb[39].mxu0  ;;  %8846 = vmatprep.subr.bf16.mxu0 %v21186_v19  ;;  %v21243_v26 = vld [vmem:[%s23612_s6 + $0xfec] ss:$16 sps:$4 sm:$0xff]   ;;  %v21238_v19 = vld [vmem:[%s23612_s6 + $0xde8] ss:$16 sps:$4 sm:$0xff]  }
 0x75d   : > { %v24389_v30 = vadd.f32 %v8583_v27, %v8543_v59  ;;  %v8586_v14 = vpop.f32.mrb[39].mxu1  ;;  %8887 = vmatprep.subr.bf16.mxu1 %v21189_v22  ;;  %v22020_v22 = vld [vmem:[%s24150_s2] sm:$0xf] }
 0x75e   : > { %v5691_v23 = vrot.slane %v22020_v22, %v23104_v38  ;;  %v5695_v10 = vrot.slane %v22020_v22, %v23109_v43 }
 0x75f   : > { %8847 = vmatpush1.bf16.msra.mxu0 %v21184_v17 }
 0x760   : > { %8888 = vmatpush1.bf16.msra.mxu1 %v21187_v63  ;;  %8848 = vmatprep.subr.bf16.mxu0 %v21192_v39 }
 0x761   : > { %8889 = vmatprep.subr.bf16.mxu1 %v21195_v48 }
 0x763   : > { %8849 = vmatpush1.bf16.msra.mxu0 %v21190_v32 }
 0x764   : > { %8890 = vmatpush1.bf16.msra.mxu1 %v21193_v36  ;;  %8850 = vmatprep.subr.bf16.mxu0 %v21198_v31 }
 0x765   : > { %8891 = vmatprep.subr.bf16.mxu1 %v21201_v15 }
 0x767   : > { %8851 = vmatpush1.bf16.msra.mxu0 %v21196_v33 }
 0x768   : > { %8892 = vmatpush1.bf16.msra.mxu1 %v21199_v42  ;;  %8852 = vmatprep.subr.bf16.mxu0 %v21204_v49 }
 0x769   : > { %8893 = vmatprep.subr.bf16.mxu1 %v21207_v55 }
 0x76b   : > { %8853 = vmatpush1.bf16.msra.mxu0 %v21202_v57 }
 0x76c   : > { %8894 = vmatpush1.bf16.msra.mxu1 %v21205_v61  ;;  %8854 = vmatprep.subr.bf16.mxu0 %v21210_v11 }
 0x76d   : > { %8895 = vmatprep.subr.bf16.mxu1 %v21213_v62 }
 0x76f   : > { %8855 = vmatpush1.bf16.msra.mxu0 %v21208_v0 }
 0x770   : > { %8896 = vmatpush1.bf16.msra.mxu1 %v21211_v51  ;;  %8856 = vmatprep.subr.bf16.mxu0 %v21216_v6 }
 0x771   : > { %8897 = vmatprep.subr.bf16.mxu1 %v21219_v29 }
 0x773   : > { %8857 = vmatpush1.bf16.msra.mxu0 %v21214_v13 }
 0x774   : > { %8898 = vmatpush1.bf16.msra.mxu1 %v21217_v3  ;;  %8858 = vmatprep.subr.bf16.mxu0 %v21222_v4 }
 0x775   : > { %8899 = vmatprep.subr.bf16.mxu1 %v21225_v8 }
 0x777   : > { %8859 = vmatpush1.bf16.msra.mxu0 %v21220_v1 }
 0x778   : > { %8900 = vmatpush1.bf16.msra.mxu1 %v21223_v34  ;;  %8860 = vmatprep.subr.bf16.mxu0 %v21228_v5 }
 0x779   : > { %8901 = vmatprep.subr.bf16.mxu1 %v21231_v2 }
 0x77b   : > { %8861 = vmatpush1.bf16.msra.mxu0 %v21226_v52  ;;  %v24433_v52 = vadd.f32 %v24385_v28, %v23112_v53 }
 0x77c   : > { %8902 = vmatpush1.bf16.msra.mxu1 %v21229_v21  ;;  %8862 = vmatprep.subr.bf16.mxu0 %v21234_v44  ;;  %v24437_v21 = vadd.f32 %v24389_v30, %v23114_v56 }
 0x77d   : > { %8903 = vmatprep.subr.bf16.mxu1 %v21237_v9 }
 0x77e   : > { %v8924_v30 = vadd.f32 %v24437_v21, %v24433_v52 }
 0x77f   : > { %8863 = vmatpush1.bf16.msra.mxu0 %v21232_v47 }
 0x780   : > { %8904 = vmatpush1.bf16.msra.mxu1 %v21235_v54  ;;  %8864 = vmatprep.subr.bf16.mxu0 %v21240_v7 }
 0x781   : > { %8905 = vmatprep.subr.bf16.mxu1 %v21243_v26 }
 0x783   : > { %8865 = vmatpush1.bf16.msra.mxu0 %v21238_v19 }
 0x784   : > { %8906 = vmatpush1.bf16.msra.mxu1 %v21241_v20 }
 0x786   : > { %8867 = vmatmul.mubr.bf16.vlgmr.msra.gmra.mrb[52].mxu0 %v24127_v16 }
 0x787   : > { %8908 = vmatmul.mubr.bf16.vlgmr.msra.gmra.mrb[52].mxu1 %v24129_v18 }
 0x799   : > { %v8622_v24 = vpop.f32.mrb[40].mxu0 }
 0x79a   : > { %v8623_v59 = vadd.f32 %v8622_v24, %v5691_v23  ;;  %v8663_v27 = vpop.f32.mrb[40].mxu1  ;;  %v8624_v45 = vpop.f32.mrb[41].mxu0 }
 0x79b   : > { %v8625_v17 = vadd.f32 %v8624_v45, %v5695_v10  ;;  %v8665_v12 = vpop.f32.mrb[41].mxu1  ;;  %v8626_v41 = vpop.f32.mrb[42].mxu0 }
 0x79c   : > { %v8664_v63 = vadd.f32 %v8663_v27, %v8623_v59  ;;  %v8667_v39 = vpop.f32.mrb[42].mxu1  ;;  %v8627_v14 = vpop.f32.mrb[43].mxu0  ;;  %v18167_v59 = vld [vmem:[%s23128_s4 + $0x1000] sm:$0xff] }
 0x79d   : > { %v8666_v48 = vadd.f32 %v8665_v12, %v8625_v17  ;;  %v8668_v32 = vpop.f32.mrb[43].mxu1  ;;  %v18175_v27 = vld [vmem:[%s23128_s4 + $0x1040] sm:$0xff]  ;;  %v18176_v12 = vld [vmem:[%s23128_s4 + $0x1048] sm:$0xff] }
 0x79e   : > { %v18681_v45 = vcombine.low %v18167_v59, %v18175_v27  ;;  %v18682_v17 = vcombine.high %v18167_v59, %v18175_v27  ;;  %v18183_v41 = vld [vmem:[%s23128_s4 + $0x1080] sm:$0xff]  ;;  %v18192_v32 = vld [vmem:[%s23128_s4 + $0x10c8] sm:$0xff] }
 0x7a0   : > { %12162 = vmatprep.subr.bf16.mxu0 %v18682_v17  ;;  %v18280_v17 = vld [vmem:[%s23128_s4 + $0x1388] sm:$0xff] }
 0x7a1   : > { %12163 = vmatpush1.bf16.msra.mxu0 %v18681_v45  ;;  %v18287_v45 = vld [vmem:[%s23128_s4 + $0x13c0] sm:$0xff] }
 0x7d9   : > { %v8704_v16 = vpop.f32.mrb[44].mxu0 }
 0x7da   : > { %v8705_v36 = vadd.f32 %v8704_v16, %v8664_v63  ;;  %v8745_v18 = vpop.f32.mrb[44].mxu1  ;;  %v8706_v31 = vpop.f32.mrb[45].mxu0  ;;  %v18191_v63 = vld [vmem:[%s23128_s4 + $0x10c0] sm:$0xff] }
 0x7db   : > { %v8707_v15 = vadd.f32 %v8706_v31, %v8666_v48  ;;  %v8747_v33 = vpop.f32.mrb[45].mxu1  ;;  %v8708_v42 = vpop.f32.mrb[46].mxu0  ;;  %v18698_v14 = vcombine.high %v18183_v41, %v18191_v63  ;;  %v18184_v48 = vld [vmem:[%s23128_s4 + $0x1088] sm:$0xff]  ;;  %v18199_v16 = vld [vmem:[%s23128_s4 + $0x1100] sm:$0xff] }
 0x7dc   : > { %v8746_v49 = vadd.f32 %v8745_v18, %v8705_v36  ;;  %v8749_v55 = vpop.f32.mrb[46].mxu1  ;;  %v8709_v57 = vpop.f32.mrb[47].mxu0  ;;  %v18700_v36 = vcombine.high %v18184_v48, %v18192_v32  ;;  %v18207_v18 = vld [vmem:[%s23128_s4 + $0x1140] sm:$0xff]  ;;  %v18200_v31 = vld [vmem:[%s23128_s4 + $0x1108] sm:$0xff]  ;;  %v18699_v42 = vcombine.low %v18184_v48, %v18192_v32 }
 0x7dd   : > { %v8748_v61 = vadd.f32 %v8747_v33, %v8707_v15  ;;  %v8750_v11 = vpop.f32.mrb[47].mxu1  ;;  %v18208_v15 = vld [vmem:[%s23128_s4 + $0x1148] sm:$0xff]  ;;  %v18697_v33 = vcombine.low %v18183_v41, %v18191_v63  ;;  %12164 = vmatprep.subr.bf16.mxu0 %v18698_v14  ;;  %v18215_v57 = vld [vmem:[%s23128_s4 + $0x1180] sm:$0xff] }
 0x7de   : > { %v18716_v55 = vcombine.high %v18200_v31, %v18208_v15  ;;  %v18216_v11 = vld [vmem:[%s23128_s4 + $0x1188] sm:$0xff]  ;;  %v18295_v14 = vld [vmem:[%s23128_s4 + $0x1400] sm:$0xff] }
 0x7df   : > { %12165 = vmatpush1.bf16.msra.mxu0 %v18697_v33  ;;  %v18303_v48 = vld [vmem:[%s23128_s4 + $0x1440] sm:$0xff]  ;;  %v18296_v32 = vld [vmem:[%s23128_s4 + $0x1408] sm:$0xff] }
 0x7e0   : > { %v18311_v33 = vld [vmem:[%s23128_s4 + $0x1480] sm:$0xff] }
 0x819   : > { %v8786_v62 = vpop.f32.mrb[48].mxu0 }
 0x81a   : > { %v8787_v0 = vadd.f32 %v8786_v62, %v8746_v49  ;;  %v8827_v51 = vpop.f32.mrb[48].mxu1  ;;  %v8788_v6 = vpop.f32.mrb[49].mxu0  ;;  %v18714_v49 = vcombine.high %v18199_v16, %v18207_v18  ;;  %v18224_v62 = vld [vmem:[%s23128_s4 + $0x11c8] sm:$0xff] }
 0x81b   : > { %v8789_v29 = vadd.f32 %v8788_v6, %v8748_v61  ;;  %v8829_v13 = vpop.f32.mrb[49].mxu1  ;;  %v8790_v3 = vpop.f32.mrb[50].mxu0  ;;  %v18223_v61 = vld [vmem:[%s23128_s4 + $0x11c0] sm:$0xff] }
 0x81c   : > { %v8828_v4 = vadd.f32 %v8827_v51, %v8787_v0  ;;  %v8831_v8 = vpop.f32.mrb[50].mxu1  ;;  %v8791_v1 = vpop.f32.mrb[51].mxu0  ;;  %v18713_v0 = vcombine.low %v18199_v16, %v18207_v18  ;;  %12166 = vmatprep.subr.bf16.mxu0 %v18714_v49  ;;  %v18715_v51 = vcombine.low %v18200_v31, %v18208_v15  ;;  %v18730_v6 = vcombine.high %v18215_v57, %v18223_v61  ;;  %v18239_v3 = vld [vmem:[%s23128_s4 + $0x1240] sm:$0xff]  ;;  %v18304_v16 = vld [vmem:[%s23128_s4 + $0x1448] sm:$0xff] }
 0x81d   : > { %v8830_v34 = vadd.f32 %v8829_v13, %v8789_v29  ;;  %v8832_v5 = vpop.f32.mrb[51].mxu1  ;;  %v18732_v29 = vcombine.high %v18216_v11, %v18224_v62  ;;  %v18231_v13 = vld [vmem:[%s23128_s4 + $0x1200] sm:$0xff]  ;;  %v18240_v8 = vld [vmem:[%s23128_s4 + $0x1248] sm:$0xff]  ;;  %v18729_v1 = vcombine.low %v18215_v57, %v18223_v61  ;;  %v18810_v31 = vcombine.high %v18295_v14, %v18303_v48 }
 0x81e   : > { %12167 = vmatpush1.bf16.msra.mxu0 %v18713_v0  ;;  %v18746_v5 = vcombine.high %v18231_v13, %v18239_v3  ;;  %v18812_v15 = vcombine.high %v18296_v32, %v18304_v16  ;;  %v18312_v49 = vld [vmem:[%s23128_s4 + $0x1488] sm:$0xff]  ;;  %v18809_v57 = vcombine.low %v18295_v14, %v18303_v48  ;;  %v18811_v61 = vcombine.low %v18296_v32, %v18304_v16  ;;  %v18327_v0 = vld [vmem:[%s23128_s4 + $0x1500] sm:$0xff] }
 0x81f   : > { %12168 = vmatprep.subr.bf16.mxu0 %v18730_v6  ;;  %v18328_v6 = vld [vmem:[%s23128_s4 + $0x1508] sm:$0xff]  ;;  %v18375_v14 = vld [vmem:[%s23128_s4 + $0x1680] sm:$0xff] }
 0x820   : > { %v18383_v48 = vld [vmem:[%s23128_s4 + $0x16c0] sm:$0xff] }
 0x822   : > { %12169 = vmatpush1.bf16.msra.mxu0 %v18729_v1 }
 0x823   : > { %12170 = vmatprep.subr.bf16.mxu0 %v18746_v5 }
 0x859   : > { %v8868_v2 = vpop.f32.mrb[52].mxu0 }
 0x85a   : > { %v8869_v44 = vadd.f32 %v8868_v2, %v8828_v4  ;;  %v8909_v9 = vpop.f32.mrb[52].mxu1  ;;  %v8870_v47 = vpop.f32.mrb[53].mxu0  ;;  %v18232_v4 = vld [vmem:[%s23128_s4 + $0x1208] sm:$0xff] }
 0x85b   : > { %v8871_v54 = vadd.f32 %v8870_v47, %v8830_v34  ;;  %v8911_v7 = vpop.f32.mrb[53].mxu1  ;;  %v8872_v26 = vpop.f32.mrb[54].mxu0  ;;  %v18731_v34 = vcombine.low %v18216_v11, %v18224_v62  ;;  %v18748_v2 = vcombine.high %v18232_v4, %v18240_v8  ;;  %v18248_v47 = vld [vmem:[%s23128_s4 + $0x1288] sm:$0xff] }
 0x85c   : > { %v8910_v19 = vadd.f32 %v8909_v9, %v8869_v44  ;;  %v8913_v20 = vpop.f32.mrb[54].mxu1  ;;  %v8873_v22 = vpop.f32.mrb[55].mxu0  ;;  %v18247_v44 = vld [vmem:[%s23128_s4 + $0x1280] sm:$0xff]  ;;  %v18747_v26 = vcombine.low %v18232_v4, %v18240_v8 }
 0x85d   : > { %v8912_v53 = vadd.f32 %v8911_v7, %v8871_v54  ;;  %v8914_v28 = vpop.f32.mrb[55].mxu1  ;;  %v18255_v9 = vld [vmem:[%s23128_s4 + $0x12c0] sm:$0xff]  ;;  %v18256_v54 = vld [vmem:[%s23128_s4 + $0x12c8] sm:$0xff]  ;;  %v18745_v7 = vcombine.low %v18231_v13, %v18239_v3 }
 0x85e   : > { %v24440_v56 = vadd.f32 %v8910_v19, %v23117_v58  ;;  %v18168_v58 = vld [vmem:[%s23128_s4 + $0x1008] sm:$0xff]  ;;  %v18762_v19 = vcombine.high %v18247_v44, %v18255_v9  ;;  %v18764_v20 = vcombine.high %v18248_v47, %v18256_v54  ;;  %v18263_v22 = vld [vmem:[%s23128_s4 + $0x1300] sm:$0xff] }
 0x85f   : > { %v24445_v23 = vadd.f32 %v8912_v53, %v23121_v60  ;;  %v18683_v60 = vcombine.low %v18168_v58, %v18176_v12  ;;  %v18684_v39 = vcombine.high %v18168_v58, %v18176_v12  ;;  %v18271_v53 = vld [vmem:[%s23128_s4 + $0x1340] sm:$0xff]  ;;  %v18264_v28 = vld [vmem:[%s23128_s4 + $0x1308] sm:$0xff]  ;;  %12171 = vmatpush1.bf16.msra.mxu0 %v18745_v7 }
 0x860   : > { %v8925_v10 = vadd.f32 %v8924_v30, %v24440_v56  ;;  %v18272_v30 = vld [vmem:[%s23128_s4 + $0x1348] sm:$0xff]  ;;  %12172 = vmatprep.subr.bf16.mxu0 %v18762_v19  ;;  %v18778_v59 = vcombine.high %v18263_v22, %v18271_v53  ;;  %v18279_v58 = vld [vmem:[%s23128_s4 + $0x1380] sm:$0xff]  ;;  %v18777_v41 = vcombine.low %v18263_v22, %v18271_v53 }
 0x861   : > { %12244 = vmatprep.subr.bf16.mxu1 %v18684_v39  ;;  %v18780_v27 = vcombine.high %v18264_v28, %v18272_v30  ;;  %v18288_v12 = vld [vmem:[%s23128_s4 + $0x13c8] sm:$0xff]  ;;  %v18779_v63 = vcombine.low %v18264_v28, %v18272_v30  ;;  %v18343_v30 = vld [vmem:[%s23128_s4 + $0x1580] sm:$0xff] }
 0x862   : > { %v8926_v24 = vadd.f32 %v8925_v10, %v24445_v23  ;;  %12245 = vmatpush1.bf16.msra.mxu1 %v18683_v60  ;;  %v18761_v10 = vcombine.low %v18247_v44, %v18255_v9  ;;  %v18794_v60 = vcombine.high %v18279_v58, %v18287_v45  ;;  %v18796_v39 = vcombine.high %v18280_v17, %v18288_v12 }
 0x863   : > { %12246 = vmatprep.subr.bf16.mxu1 %v18700_v36  ;;  %v18793_v36 = vcombine.low %v18279_v58, %v18287_v45  ;;  %v18795_v18 = vcombine.low %v18280_v17, %v18288_v12  ;;  %v18359_v12 = vld [vmem:[%s23128_s4 + $0x1600] sm:$0xff] }
 0x864   : > { %8927 = vadd.xlane.f32.xlu1 %v8926_v24  ;;  %v18763_v24 = vcombine.low %v18248_v47, %v18256_v54  ;;  %12173 = vmatpush1.bf16.msra.mxu0 %v18761_v10  ;;  %v18351_v10 = vld [vmem:[%s23128_s4 + $0x15c0] sm:$0xff] }
 0x865   : > { %12174 = vmatprep.subr.bf16.mxu0 %v18778_v59  ;;  %v18858_v59 = vcombine.high %v18343_v30, %v18351_v10  ;;  %v18857_v58 = vcombine.low %v18343_v30, %v18351_v10 }
 0x866   : > { %12247 = vmatpush1.bf16.msra.mxu1 %v18699_v42  ;;  %v18319_v42 = vld [vmem:[%s23128_s4 + $0x14c0] sm:$0xff] }
 0x867   : > { %12248 = vmatprep.subr.bf16.mxu1 %v18716_v55  ;;  %v18320_v55 = vld [vmem:[%s23128_s4 + $0x14c8] sm:$0xff]  ;;  %v18826_v11 = vcombine.high %v18311_v33, %v18319_v42  ;;  %v18825_v13 = vcombine.low %v18311_v33, %v18319_v42  ;;  %v18391_v42 = vld [vmem:[%s23128_s4 + $0x1700] sm:$0xff] }
 0x868   : > { %12175 = vmatpush1.bf16.msra.mxu0 %v18777_v41  ;;  %v18828_v62 = vcombine.high %v18312_v49, %v18320_v55  ;;  %v18827_v3 = vcombine.low %v18312_v49, %v18320_v55  ;;  %v18367_v41 = vld [vmem:[%s23128_s4 + $0x1640] sm:$0xff]  ;;  %v18392_v55 = vld [vmem:[%s23128_s4 + $0x1708] sm:$0xff] }
 0x869   : > { %12176 = vmatprep.subr.bf16.mxu0 %v18794_v60  ;;  %v18874_v60 = vcombine.high %v18359_v12, %v18367_v41  ;;  %v18873_v32 = vcombine.low %v18359_v12, %v18367_v41  ;;  %v18399_v49 = vld [vmem:[%s23128_s4 + $0x1740] sm:$0xff] }
 0x86a   : > { %12249 = vmatpush1.bf16.msra.mxu1 %v18715_v51  ;;  %v18335_v51 = vld [vmem:[%s23128_s4 + $0x1540] sm:$0xff] }
 0x86b   : > { %12250 = vmatprep.subr.bf16.mxu1 %v18732_v29  ;;  %v18336_v29 = vld [vmem:[%s23128_s4 + $0x1548] sm:$0xff]  ;;  %v18842_v4 = vcombine.high %v18327_v0, %v18335_v51  ;;  %v18841_v1 = vcombine.low %v18327_v0, %v18335_v51  ;;  %v18407_v51 = vld [vmem:[%s23128_s4 + $0x1780] sm:$0xff] }
 0x86c   : > { %12177 = vmatpush1.bf16.msra.mxu0 %v18793_v36  ;;  %v18844_v8 = vcombine.high %v18328_v6, %v18336_v29  ;;  %v18376_v36 = vld [vmem:[%s23128_s4 + $0x1688] sm:$0xff] }
 0x86d   : > { %12178 = vmatprep.subr.bf16.mxu0 %v18810_v31 }
 0x86e   : > { %12251 = vmatpush1.bf16.msra.mxu1 %v18731_v34  ;;  %v18843_v34 = vcombine.low %v18328_v6, %v18336_v29  ;;  %v18415_v6 = vld [vmem:[%s23128_s4 + $0x17c0] sm:$0xff]  ;;  %v18408_v29 = vld [vmem:[%s23128_s4 + $0x1788] sm:$0xff] }
 0x86f   : > { %12252 = vmatprep.subr.bf16.mxu1 %v18748_v2 }
 0x870   : > { %12179 = vmatpush1.bf16.msra.mxu0 %v18809_v57  ;;  %v18400_v57 = vld [vmem:[%s23128_s4 + $0x1748] sm:$0xff] }
 0x871   : > { %12180 = vmatprep.subr.bf16.mxu0 %v18826_v11  ;;  %v18908_v0 = vcombine.high %v18392_v55, %v18400_v57 }
 0x872   : > { %12253 = vmatpush1.bf16.msra.mxu1 %v18747_v26 }
 0x873   : > { %12254 = vmatprep.subr.bf16.mxu1 %v18764_v20 }
 0x874   : > { %12181 = vmatpush1.bf16.msra.mxu0 %v18825_v13  ;;  %v18416_v13 = vld [vmem:[%s23128_s4 + $0x17c8] sm:$0xff] }
 0x875   : > { %12182 = vmatprep.subr.bf16.mxu0 %v18842_v4  ;;  %v18907_v4 = vcombine.low %v18392_v55, %v18400_v57  ;;  %v18447_v57 = vld [vmem:[%s23128_s4 + $0x18c0] sm:$0xff] }
 0x876   : > { %12255 = vmatpush1.bf16.msra.mxu1 %v18763_v24  ;;  %v18344_v24 = vld [vmem:[%s23128_s4 + $0x1588] sm:$0xff] }
 0x877   : > { %12256 = vmatprep.subr.bf16.mxu1 %v18780_v27  ;;  %v18352_v27 = vld [vmem:[%s23128_s4 + $0x15c8] sm:$0xff] }
 0x878   : > { %12183 = vmatpush1.bf16.msra.mxu0 %v18841_v1  ;;  %v18859_v45 = vcombine.low %v18344_v24, %v18352_v27  ;;  %v18860_v17 = vcombine.high %v18344_v24, %v18352_v27  ;;  %v18924_v1 = vcombine.high %v18408_v29, %v18416_v13  ;;  %v18166_v27 = vld [vmem:[%s789_s15 + $0x4] sm:$0xf] }
 0x879   : > { %12184 = vmatprep.subr.bf16.mxu0 %v18858_v59  ;;  %v18165_v59 = vld [vmem:[%s780_s7 + $0x4] sm:$0xf] }
 0x87a   : > { %12257 = vmatpush1.bf16.msra.mxu1 %v18779_v63  ;;  %v18360_v63 = vld [vmem:[%s23128_s4 + $0x1608] sm:$0xff]  ;;  %v8962_v12 = vrot.slane %v18165_v59, %v23104_v38 }
 0x87b   : > { %12258 = vmatprep.subr.bf16.mxu1 %v18796_v39  ;;  %v18368_v39 = vld [vmem:[%s23128_s4 + $0x1648] sm:$0xff] }
 0x87c   : > { %12185 = vmatpush1.bf16.msra.mxu0 %v18857_v58  ;;  %v18876_v16 = vcombine.high %v18360_v63, %v18368_v39  ;;  %v18875_v31 = vcombine.low %v18360_v63, %v18368_v39  ;;  %v8958_v58 = vrot.slane %v18165_v59, %v23101_v37  ;;  %v8983_v63 = vrot.slane %v18166_v27, %v23101_v37 }
 0x87d   : > { %12186 = vmatprep.subr.bf16.mxu0 %v18874_v60  ;;  %v8979_v60 = vrot.slane %v18166_v27, %v23097_v35  ;;  %v8987_v39 = vrot.slane %v18166_v27, %v23104_v38 }
 0x87e   : > { %12259 = vmatpush1.bf16.msra.mxu1 %v18795_v18  ;;  %v18384_v18 = vld [vmem:[%s23128_s4 + $0x16c8] sm:$0xff] }
 0x87f   : > { %12260 = vmatprep.subr.bf16.mxu1 %v18812_v15  ;;  %v18890_v15 = vcombine.high %v18375_v14, %v18383_v48  ;;  %v18892_v33 = vcombine.high %v18376_v36, %v18384_v18  ;;  %v18891_v11 = vcombine.low %v18376_v36, %v18384_v18  ;;  %v8991_v36 = vrot.slane %v18166_v27, %v23109_v43 }
 0x880   : > { %12187 = vmatpush1.bf16.msra.mxu0 %v18873_v32 }
 0x881   : > { %12188 = vmatprep.subr.bf16.mxu0 %v18890_v15 }
 0x882   : > { %12261 = vmatpush1.bf16.msra.mxu1 %v18811_v61  ;;  %v18889_v61 = vcombine.low %v18375_v14, %v18383_v48 }
 0x883   : > { %12262 = vmatprep.subr.bf16.mxu1 %v18828_v62  ;;  %v18906_v62 = vcombine.high %v18391_v42, %v18399_v49 }
 0x884   : > { %12189 = vmatpush1.bf16.msra.mxu0 %v18889_v61  ;;  %v18448_v61 = vld [vmem:[%s23128_s4 + $0x18c8] sm:$0xff] }
 0x885   : > { %12190 = vmatprep.subr.bf16.mxu0 %v18906_v62  ;;  %v18455_v62 = vld [vmem:[%s23128_s4 + $0x1900] sm:$0xff] }
 0x886   : > { %12263 = vmatpush1.bf16.msra.mxu1 %v18827_v3  ;;  %v18905_v3 = vcombine.low %v18391_v42, %v18399_v49 }
 0x887   : > { %12264 = vmatprep.subr.bf16.mxu1 %v18844_v8  ;;  %v18922_v8 = vcombine.high %v18407_v51, %v18415_v6 }
 0x888   : > { %12191 = vmatpush1.bf16.msra.mxu0 %v18905_v3 }
 0x889   : > { %12192 = vmatprep.subr.bf16.mxu0 %v18922_v8 }
 0x88a   : > { %12265 = vmatpush1.bf16.msra.mxu1 %v18843_v34  ;;  %v18921_v34 = vcombine.low %v18407_v51, %v18415_v6  ;;  %v18463_v6 = vld [vmem:[%s23128_s4 + $0x1940] sm:$0xff] }
 0x88b   : > { %12266 = vmatprep.subr.bf16.mxu1 %v18860_v17  ;;  %v8966_v17 = vrot.slane %v18165_v59, %v23109_v43 }
 0x88c   : > { %12193 = vmatpush1.bf16.msra.mxu0 %v18921_v34 }
 0x88e   : > { %12267 = vmatpush1.bf16.msra.mxu1 %v18859_v45  ;;  %v8954_v45 = vrot.slane %v18165_v59, %v23097_v35 }
 0x88f   : > { %12268 = vmatprep.subr.bf16.mxu1 %v18876_v16 }
 0x892   : > { %12269 = vmatpush1.bf16.msra.mxu1 %v18875_v31 }
 0x893   : > { %12270 = vmatprep.subr.bf16.mxu1 %v18892_v33 }
 0x896   : > { %12271 = vmatpush1.bf16.msra.mxu1 %v18891_v11 }
 0x897   : > { %12272 = vmatprep.subr.bf16.mxu1 %v18908_v0 }
 0x89a   : > { %12273 = vmatpush1.bf16.msra.mxu1 %v18907_v4 }
 0x89b   : > { %12274 = vmatprep.subr.bf16.mxu1 %v18924_v1  ;;  %v18970_v1 = vcombine.high %v18455_v62, %v18463_v6 }
 0x8f1   : > { %v8928_v5 = vpop.xlane.xlu1 %8927 }
 0x8f2   : > { %v8929_v2 = vmul.f32 0.001953125, %v8928_v5  ;;  %v18923_v5 = vcombine.low %v18408_v29, %v18416_v13  ;;  %v18456_v29 = vld [vmem:[%s23128_s4 + $0x1908] sm:$0xff] }
 0x8f3   : > { %v18464_v13 = vld [vmem:[%s23128_s4 + $0x1948] sm:$0xff] }
 0x8f4   : > { %v24494_v44 = vsub.f32 %v24433_v52, %v8929_v2  ;;  %v24497_v9 = vsub.f32 %v24437_v21, %v8929_v2  ;;  %v24500_v47 = vsub.f32 %v24440_v56, %v8929_v2  ;;  %v24503_v54 = vsub.f32 %v24445_v23, %v8929_v2  ;;  %v18423_v2 = vld [vmem:[%s23128_s4 + $0x1800] sm:$0xff]  ;;  %12275 = vmatpush1.bf16.msra.mxu1 %v18923_v5 }
 0x8f5   : > { %v18972_v34 = vcombine.high %v18456_v29, %v18464_v13  ;;  %v18471_v5 = vld [vmem:[%s23128_s4 + $0x1980] sm:$0xff] }
 0x8f6   : > { %v8934_v7 = vmul.f32 %v24494_v44, %v24494_v44  ;;  %v8935_v26 = vmul.f32 %v24497_v9, %v24497_v9  ;;  %v8936_v19 = vmul.f32 %v24500_v47, %v24500_v47  ;;  %v8937_v22 = vmul.f32 %v24503_v54, %v24503_v54 }
 0x8f8   : > { %v8938_v20 = vadd.f32 %v8935_v26, %v8934_v7  ;;  %v18431_v7 = vld [vmem:[%s23128_s4 + $0x1840] sm:$0xff]  ;;  %v18424_v26 = vld [vmem:[%s23128_s4 + $0x1808] sm:$0xff] }
 0x8fa   : > { %v8939_v53 = vadd.f32 %v8938_v20, %v8936_v19  ;;  %v18937_v19 = vcombine.low %v18423_v2, %v18431_v7  ;;  %v18938_v20 = vcombine.high %v18423_v2, %v18431_v7  ;;  %v18479_v2 = vld [vmem:[%s23128_s4 + $0x19c0] sm:$0xff]  ;;  %v18472_v7 = vld [vmem:[%s23128_s4 + $0x1988] sm:$0xff] }
 0x8fb   : > { %v18985_v59 = vcombine.low %v18471_v5, %v18479_v2 }
 0x8fc   : > { %v8940_v28 = vadd.f32 %v8939_v53, %v8937_v22  ;;  %v18432_v22 = vld [vmem:[%s23128_s4 + $0x1848] sm:$0xff]  ;;  %12203 = vmatprep.subr.bf16.mxu0 %v18938_v20  ;;  %v18971_v20 = vcombine.low %v18456_v29, %v18464_v13 }
 0x8fd   : > { %v18939_v53 = vcombine.low %v18424_v26, %v18432_v22  ;;  %v18552_v29 = vld [vmem:[%s23128_s4 + $0x1c08] sm:$0xff] }
 0x8fe   : > { %8941 = vadd.xlane.f32.xlu1 %v8940_v28  ;;  %v18940_v28 = vcombine.high %v18424_v26, %v18432_v22  ;;  %v18480_v26 = vld [vmem:[%s23128_s4 + $0x19c8] sm:$0xff]  ;;  %v18986_v22 = vcombine.high %v18471_v5, %v18479_v2  ;;  %v18567_v5 = vld [vmem:[%s23128_s4 + $0x1c80] sm:$0xff] }
 0x8ff   : > { %v18987_v27 = vcombine.low %v18472_v7, %v18480_v26  ;;  %v18560_v13 = vld [vmem:[%s23128_s4 + $0x1c48] sm:$0xff]  ;;  %v18575_v2 = vld [vmem:[%s23128_s4 + $0x1cc0] sm:$0xff] }
 0x900   : > { %12285 = vmatprep.subr.bf16.mxu1 %v18940_v28  ;;  %v18487_v28 = vld [vmem:[%s23128_s4 + $0x1a00] sm:$0xff] }
 0x98b   : > { %v8942_v30 = vpop.xlane.xlu1 %8941 }
 0x98c   : > { %v8943_v10 = vmul.f32 0.001953125, %v8942_v30  ;;  %v18495_v30 = vld [vmem:[%s23128_s4 + $0x1a40] sm:$0xff] }
 0x98e   : > { %v8944_v24 = vadd.f32 1e-05, %v8943_v10  ;;  %v18488_v10 = vld [vmem:[%s23128_s4 + $0x1a08] sm:$0xff] }
 0x990   : > { %22014 = vrsqrt.f32 %v8944_v24  ;;  %v18496_v24 = vld [vmem:[%s23128_s4 + $0x1a48] sm:$0xff] }
 0x99a   : > { %v22015_v41 = vpop.eup %22014 }
 0x99b   : > { %v8947_v14 = vmul.f32 %v22015_v41, %v24497_v9  ;;  %v8946_v48 = vmul.f32 %v22015_v41, %v24494_v44  ;;  %v8949_v32 = vmul.f32 %v22015_v41, %v24503_v54  ;;  %v8948_v16 = vmul.f32 %v22015_v41, %v24500_v47  ;;  %v18439_v9 = vld [vmem:[%s23128_s4 + $0x1880] sm:$0xff]  ;;  %v18440_v54 = vld [vmem:[%s23128_s4 + $0x1888] sm:$0xff] }
 0x99c   : > { %v18954_v0 = vcombine.high %v18439_v9, %v18447_v57  ;;  %v18956_v51 = vcombine.high %v18440_v54, %v18448_v61  ;;  %v18953_v4 = vcombine.low %v18439_v9, %v18447_v57  ;;  %v18955_v8 = vcombine.low %v18440_v54, %v18448_v61  ;;  %v18504_v41 = vld [vmem:[%s23128_s4 + $0x1a88] sm:$0xff]  ;;  %v18543_v9 = vld [vmem:[%s23128_s4 + $0x1bc0] sm:$0xff] }
 0x99d   : > { %v8972_v18 = vmul.f32 %v8958_v58, %v8947_v14  ;;  %v8971_v31 = vmul.f32 %v8954_v45, %v8946_v48  ;;  %v8974_v15 = vmul.f32 %v8966_v17, %v8949_v32  ;;  %v8973_v33 = vmul.f32 %v8962_v12, %v8948_v16  ;;  %v18503_v17 = vld [vmem:[%s23128_s4 + $0x1a80] sm:$0xff]  ;;  %v18544_v57 = vld [vmem:[%s23128_s4 + $0x1bc8] sm:$0xff] }
 0x99e   : > { %v19002_v58 = vcombine.high %v18487_v28, %v18495_v30  ;;  %v19004_v45 = vcombine.high %v18488_v10, %v18496_v24  ;;  %v18511_v12 = vld [vmem:[%s23128_s4 + $0x1ac0] sm:$0xff] }
 0x99f   : > { %v8997_v42 = vadd.f32 %v8983_v63, %v8972_v18  ;;  %v8996_v49 = vadd.f32 %v8979_v60, %v8971_v31  ;;  %v24554_v55 = vadd.f32 %v8987_v39, %v8973_v33  ;;  %v8999_v44 = vadd.f32 %v8991_v36, %v8974_v15  ;;  %v18512_v63 = vld [vmem:[%s23128_s4 + $0x1ac8] sm:$0xff]  ;;  %v18519_v32 = vld [vmem:[%s23128_s4 + $0x1b00] sm:$0xff] }
 0x9a0   : > { %v19001_v60 = vcombine.low %v18487_v28, %v18495_v30  ;;  %v19003_v39 = vcombine.low %v18488_v10, %v18496_v24  ;;  %v19018_v14 = vcombine.high %v18503_v17, %v18511_v12  ;;  %v19020_v48 = vcombine.high %v18504_v41, %v18512_v63  ;;  %v18527_v16 = vld [vmem:[%s23128_s4 + $0x1b40] sm:$0xff]  ;;  %v18520_v36 = vld [vmem:[%s23128_s4 + $0x1b08] sm:$0xff] }
 0x9a1   : > { %v24559_v47 = vpack.c.bf16 %v8997_v42, %v8997_v42  ;;  %v24561_v11 = vpack.c.bf16 %v8996_v49, %v8996_v49  ;;  %v24571_v3 = vpack.c.bf16 %v8999_v44, %v8999_v44  ;;  %v18528_v18 = vld [vmem:[%s23128_s4 + $0x1b48] sm:$0xff]  ;;  %v19017_v31 = vcombine.low %v18503_v17, %v18511_v12  ;;  %v18535_v49 = vld [vmem:[%s23128_s4 + $0x1b80] sm:$0xff] }
 0x9a2   : > { %v19019_v15 = vcombine.low %v18504_v41, %v18512_v63  ;;  %v19034_v33 = vcombine.high %v18519_v32, %v18527_v16  ;;  %v19036_v42 = vcombine.high %v18520_v36, %v18528_v18  ;;  %v18536_v44 = vld [vmem:[%s23128_s4 + $0x1b88] sm:$0xff]  ;;  %v19033_v54 = vcombine.low %v18519_v32, %v18527_v16  ;;  %v18583_v28 = vld [vmem:[%s23128_s4 + $0x1d00] sm:$0xff] }
 0x9a3   : > { %12194 = vmatprep.mubr.bf16.mxu0 %v24559_v47  ;;  %12276 = vmatprep.mubr.bf16.mxu1 %v24559_v47  ;;  %v19035_v61 = vcombine.low %v18520_v36, %v18528_v18  ;;  %v18591_v30 = vld [vmem:[%s23128_s4 + $0x1d40] sm:$0xff]  ;;  %v18584_v10 = vld [vmem:[%s23128_s4 + $0x1d08] sm:$0xff] }
 0x9a4   : > { %12195 = vmatmul.mubr.bf16.vlgmr.msra.gmra.mrb[56].mxu0 %v24561_v11  ;;  %12277 = vmatmul.mubr.bf16.vlgmr.msra.gmra.mrb[56].mxu1 %v24561_v11  ;;  %v18592_v24 = vld [vmem:[%s23128_s4 + $0x1d48] sm:$0xff]  ;;  %v18599_v17 = vld [vmem:[%s23128_s4 + $0x1d80] sm:$0xff] }
 0x9a5   : > { %12204 = vmatpush1.bf16.msra.mxu0 %v18937_v19  ;;  %12286 = vmatpush1.bf16.msra.mxu1 %v18939_v53  ;;  %v18969_v19 = vcombine.low %v18455_v62, %v18463_v6  ;;  %v18988_v53 = vcombine.high %v18472_v7, %v18480_v26  ;;  %v19050_v62 = vcombine.high %v18535_v49, %v18543_v9  ;;  %v18559_v6 = vld [vmem:[%s23128_s4 + $0x1c40] sm:$0xff]  ;;  %v18568_v7 = vld [vmem:[%s23128_s4 + $0x1c88] sm:$0xff] }
 0x9a6   : > { %12235 = vmatprep.mubr.bf16.mxu0 %v24571_v3  ;;  %12317 = vmatprep.mubr.bf16.mxu1 %v24571_v3  ;;  %v18576_v26 = vld [vmem:[%s23128_s4 + $0x1cc8] sm:$0xff]  ;;  %v18607_v12 = vld [vmem:[%s23128_s4 + $0x1dc0] sm:$0xff] }
 0x9a7   : > { %12205 = vmatprep.subr.bf16.mxu0 %v18954_v0  ;;  %12287 = vmatprep.subr.bf16.mxu1 %v18956_v51  ;;  %v19052_v0 = vcombine.high %v18536_v44, %v18544_v57  ;;  %v18551_v51 = vld [vmem:[%s23128_s4 + $0x1c00] sm:$0xff]  ;;  %v18600_v41 = vld [vmem:[%s23128_s4 + $0x1d88] sm:$0xff] }
 0x9a8   : > { %v18608_v63 = vld [vmem:[%s23128_s4 + $0x1dc8] sm:$0xff]  ;;  %v18615_v32 = vld [vmem:[%s23128_s4 + $0x1e00] sm:$0xff] }
 0x9a9   : > { %12206 = vmatpush1.bf16.msra.mxu0 %v18953_v4  ;;  %12288 = vmatpush1.bf16.msra.mxu1 %v18955_v8  ;;  %v19049_v4 = vcombine.low %v18535_v49, %v18543_v9  ;;  %v19051_v8 = vcombine.low %v18536_v44, %v18544_v57  ;;  %v18623_v16 = vld [vmem:[%s23128_s4 + $0x1e40] sm:$0xff]  ;;  %v18616_v36 = vld [vmem:[%s23128_s4 + $0x1e08] sm:$0xff] }
 0x9aa   : > { %12207 = vmatprep.subr.bf16.mxu0 %v18970_v1  ;;  %12289 = vmatprep.subr.bf16.mxu1 %v18972_v34  ;;  %v19066_v1 = vcombine.high %v18551_v51, %v18559_v6  ;;  %v19068_v34 = vcombine.high %v18552_v29, %v18560_v13  ;;  %v18624_v18 = vld [vmem:[%s23128_s4 + $0x1e48] sm:$0xff]  ;;  %v18631_v49 = vld [vmem:[%s23128_s4 + $0x1e80] sm:$0xff] }
 0x9ab   : > { %v18639_v9 = vld [vmem:[%s23128_s4 + $0x1ec0] sm:$0xff]  ;;  %v18632_v44 = vld [vmem:[%s23128_s4 + $0x1e88] sm:$0xff] }
 0x9ac   : > { %v18640_v57 = vld [vmem:[%s23128_s4 + $0x1ec8] sm:$0xff] }
 0x9ad   : > { %12208 = vmatpush1.bf16.msra.mxu0 %v18969_v19  ;;  %12290 = vmatpush1.bf16.msra.mxu1 %v18971_v20  ;;  %v19065_v19 = vcombine.low %v18551_v51, %v18559_v6  ;;  %v19067_v20 = vcombine.low %v18552_v29, %v18560_v13  ;;  %v18647_v51 = vld [vmem:[%s23128_s4 + $0x1f00] sm:$0xff]  ;;  %v18648_v29 = vld [vmem:[%s23128_s4 + $0x1f08] sm:$0xff] }
 0x9ae   : > { %12209 = vmatprep.subr.bf16.mxu0 %v18986_v22  ;;  %12291 = vmatprep.subr.bf16.mxu1 %v18988_v53  ;;  %v19082_v22 = vcombine.high %v18567_v5, %v18575_v2  ;;  %v19084_v53 = vcombine.high %v18568_v7, %v18576_v26  ;;  %v18655_v6 = vld [vmem:[%s23128_s4 + $0x1f40] sm:$0xff]  ;;  %v18656_v13 = vld [vmem:[%s23128_s4 + $0x1f48] sm:$0xff] }
 0x9b1   : > { %12210 = vmatpush1.bf16.msra.mxu0 %v18985_v59  ;;  %12292 = vmatpush1.bf16.msra.mxu1 %v18987_v27  ;;  %v19081_v59 = vcombine.low %v18567_v5, %v18575_v2  ;;  %v19083_v27 = vcombine.low %v18568_v7, %v18576_v26  ;;  %v18663_v5 = vld [vmem:[%s23128_s4 + $0x1f80] sm:$0xff]  ;;  %v18664_v7 = vld [vmem:[%s23128_s4 + $0x1f88] sm:$0xff] }
 0x9b2   : > { %12211 = vmatprep.subr.bf16.mxu0 %v19002_v58  ;;  %12293 = vmatprep.subr.bf16.mxu1 %v19004_v45  ;;  %v19098_v58 = vcombine.high %v18583_v28, %v18591_v30  ;;  %v19100_v45 = vcombine.high %v18584_v10, %v18592_v24  ;;  %v18671_v2 = vld [vmem:[%s23128_s4 + $0x1fc0] sm:$0xff]  ;;  %v18672_v26 = vld [vmem:[%s23128_s4 + $0x1fc8] sm:$0xff] }
 0x9b5   : > { %12212 = vmatpush1.bf16.msra.mxu0 %v19001_v60  ;;  %12294 = vmatpush1.bf16.msra.mxu1 %v19003_v39  ;;  %v19097_v60 = vcombine.low %v18583_v28, %v18591_v30  ;;  %v19099_v39 = vcombine.low %v18584_v10, %v18592_v24  ;;  %v18169_v28 = vld [vmem:[%s23128_s4 + $0x1010] sm:$0xff]  ;;  %v18170_v10 = vld [vmem:[%s23128_s4 + $0x1018] sm:$0xff] }
 0x9b6   : > { %12213 = vmatprep.subr.bf16.mxu0 %v19018_v14  ;;  %12295 = vmatprep.subr.bf16.mxu1 %v19020_v48  ;;  %v19114_v14 = vcombine.high %v18599_v17, %v18607_v12  ;;  %v19116_v48 = vcombine.high %v18600_v41, %v18608_v63  ;;  %v18177_v30 = vld [vmem:[%s23128_s4 + $0x1050] sm:$0xff]  ;;  %v18178_v24 = vld [vmem:[%s23128_s4 + $0x1058] sm:$0xff] }
 0x9b9   : > { %12214 = vmatpush1.bf16.msra.mxu0 %v19017_v31  ;;  %12296 = vmatpush1.bf16.msra.mxu1 %v19019_v15  ;;  %v19113_v31 = vcombine.low %v18599_v17, %v18607_v12  ;;  %v19115_v15 = vcombine.low %v18600_v41, %v18608_v63  ;;  %v18185_v17 = vld [vmem:[%s23128_s4 + $0x1090] sm:$0xff]  ;;  %v18186_v41 = vld [vmem:[%s23128_s4 + $0x1098] sm:$0xff] }
 0x9ba   : > { %12215 = vmatprep.subr.bf16.mxu0 %v19034_v33  ;;  %12297 = vmatprep.subr.bf16.mxu1 %v19036_v42  ;;  %v19130_v33 = vcombine.high %v18615_v32, %v18623_v16  ;;  %v19132_v42 = vcombine.high %v18616_v36, %v18624_v18  ;;  %v18193_v12 = vld [vmem:[%s23128_s4 + $0x10d0] sm:$0xff]  ;;  %v18194_v63 = vld [vmem:[%s23128_s4 + $0x10d8] sm:$0xff] }
 0x9bd   : > { %12216 = vmatpush1.bf16.msra.mxu0 %v19033_v54  ;;  %12298 = vmatpush1.bf16.msra.mxu1 %v19035_v61  ;;  %v19129_v54 = vcombine.low %v18615_v32, %v18623_v16  ;;  %v19131_v61 = vcombine.low %v18616_v36, %v18624_v18  ;;  %v18704_v32 = vcombine.high %v18186_v41, %v18194_v63  ;;  %v18201_v16 = vld [vmem:[%s23128_s4 + $0x1110] sm:$0xff]  ;;  %v18202_v18 = vld [vmem:[%s23128_s4 + $0x1118] sm:$0xff] }
 0x9be   : > { %12217 = vmatprep.subr.bf16.mxu0 %v19050_v62  ;;  %12299 = vmatprep.subr.bf16.mxu1 %v19052_v0  ;;  %v19146_v62 = vcombine.high %v18631_v49, %v18639_v9  ;;  %v19148_v0 = vcombine.high %v18632_v44, %v18640_v57  ;;  %v18209_v36 = vld [vmem:[%s23128_s4 + $0x1150] sm:$0xff] }
 0x9c1   : > { %12218 = vmatpush1.bf16.msra.mxu0 %v19049_v4  ;;  %12300 = vmatpush1.bf16.msra.mxu1 %v19051_v8  ;;  %v19145_v4 = vcombine.low %v18631_v49, %v18639_v9  ;;  %v19147_v8 = vcombine.low %v18632_v44, %v18640_v57  ;;  %v18217_v49 = vld [vmem:[%s23128_s4 + $0x1190] sm:$0xff]  ;;  %v18218_v44 = vld [vmem:[%s23128_s4 + $0x1198] sm:$0xff] }
 0x9c2   : > { %12219 = vmatprep.subr.bf16.mxu0 %v19066_v1  ;;  %12301 = vmatprep.subr.bf16.mxu1 %v19068_v34  ;;  %v19162_v1 = vcombine.high %v18647_v51, %v18655_v6  ;;  %v19164_v34 = vcombine.high %v18648_v29, %v18656_v13  ;;  %v18225_v9 = vld [vmem:[%s23128_s4 + $0x11d0] sm:$0xff]  ;;  %v18226_v57 = vld [vmem:[%s23128_s4 + $0x11d8] sm:$0xff] }
 0x9c5   : > { %12220 = vmatpush1.bf16.msra.mxu0 %v19065_v19  ;;  %12302 = vmatpush1.bf16.msra.mxu1 %v19067_v20  ;;  %v19161_v19 = vcombine.low %v18647_v51, %v18655_v6  ;;  %v19163_v20 = vcombine.low %v18648_v29, %v18656_v13  ;;  %v18233_v51 = vld [vmem:[%s23128_s4 + $0x1210] sm:$0xff]  ;;  %v18234_v29 = vld [vmem:[%s23128_s4 + $0x1218] sm:$0xff] }
 0x9c6   : > { %12221 = vmatprep.subr.bf16.mxu0 %v19082_v22  ;;  %12303 = vmatprep.subr.bf16.mxu1 %v19084_v53  ;;  %v19178_v22 = vcombine.high %v18663_v5, %v18671_v2  ;;  %v19180_v53 = vcombine.high %v18664_v7, %v18672_v26  ;;  %v18241_v6 = vld [vmem:[%s23128_s4 + $0x1250] sm:$0xff]  ;;  %v18242_v13 = vld [vmem:[%s23128_s4 + $0x1258] sm:$0xff] }
 0x9c9   : > { %12222 = vmatpush1.bf16.msra.mxu0 %v19081_v59  ;;  %12304 = vmatpush1.bf16.msra.mxu1 %v19083_v27  ;;  %v19177_v59 = vcombine.low %v18663_v5, %v18671_v2  ;;  %v19179_v27 = vcombine.low %v18664_v7, %v18672_v26  ;;  %v18249_v5 = vld [vmem:[%s23128_s4 + $0x1290] sm:$0xff]  ;;  %v18250_v7 = vld [vmem:[%s23128_s4 + $0x1298] sm:$0xff] }
 0x9ca   : > { %12223 = vmatprep.subr.bf16.mxu0 %v19098_v58  ;;  %12305 = vmatprep.subr.bf16.mxu1 %v19100_v45  ;;  %v18686_v58 = vcombine.high %v18169_v28, %v18177_v30  ;;  %v18688_v45 = vcombine.high %v18170_v10, %v18178_v24  ;;  %v18257_v2 = vld [vmem:[%s23128_s4 + $0x12d0] sm:$0xff]  ;;  %v18258_v26 = vld [vmem:[%s23128_s4 + $0x12d8] sm:$0xff] }
 0x9cd   : > { %12224 = vmatpush1.bf16.msra.mxu0 %v19097_v60  ;;  %12306 = vmatpush1.bf16.msra.mxu1 %v19099_v39  ;;  %v18685_v60 = vcombine.low %v18169_v28, %v18177_v30  ;;  %v24637_v39 = vpack.c.bf16 %v24554_v55, %v24554_v55  ;;  %v18701_v55 = vcombine.low %v18185_v17, %v18193_v12  ;;  %v18265_v28 = vld [vmem:[%s23128_s4 + $0x1310] sm:$0xff] }
 0x9ce   : > { %12225 = vmatprep.subr.bf16.mxu0 %v19114_v14  ;;  %12307 = vmatprep.subr.bf16.mxu1 %v19116_v48  ;;  %v18687_v14 = vcombine.low %v18170_v10, %v18178_v24  ;;  %v18702_v48 = vcombine.high %v18185_v17, %v18193_v12  ;;  %v18273_v30 = vld [vmem:[%s23128_s4 + $0x1350] sm:$0xff]  ;;  %v18266_v10 = vld [vmem:[%s23128_s4 + $0x1318] sm:$0xff] }
 0x9cf   : > { %v18274_v24 = vld [vmem:[%s23128_s4 + $0x1358] sm:$0xff]  ;;  %v18281_v17 = vld [vmem:[%s23128_s4 + $0x1390] sm:$0xff] }
 0x9d0   : > { %v18289_v12 = vld [vmem:[%s23128_s4 + $0x13d0] sm:$0xff] }
 0x9d1   : > { %12226 = vmatpush1.bf16.msra.mxu0 %v19113_v31  ;;  %12308 = vmatpush1.bf16.msra.mxu1 %v19115_v15  ;;  %v18210_v31 = vld [vmem:[%s23128_s4 + $0x1158] sm:$0xff]  ;;  %v18703_v15 = vcombine.low %v18186_v41, %v18194_v63 }
 0x9d2   : > { %12227 = vmatprep.subr.bf16.mxu0 %v19130_v33  ;;  %12309 = vmatprep.subr.bf16.mxu1 %v19132_v42  ;;  %v18718_v33 = vcombine.high %v18201_v16, %v18209_v36  ;;  %v18720_v42 = vcombine.high %v18202_v18, %v18210_v31  ;;  %v18282_v41 = vld [vmem:[%s23128_s4 + $0x1398] sm:$0xff] }
 0x9d3   : > { %v18290_v63 = vld [vmem:[%s23128_s4 + $0x13d8] sm:$0xff] }
 0x9d5   : > { %12228 = vmatpush1.bf16.msra.mxu0 %v19129_v54  ;;  %12310 = vmatpush1.bf16.msra.mxu1 %v19131_v61  ;;  %v18717_v54 = vcombine.low %v18201_v16, %v18209_v36  ;;  %v18719_v61 = vcombine.low %v18202_v18, %v18210_v31  ;;  %v18297_v16 = vld [vmem:[%s23128_s4 + $0x1410] sm:$0xff]  ;;  %v18298_v18 = vld [vmem:[%s23128_s4 + $0x1418] sm:$0xff] }
 0x9d6   : > { %12229 = vmatprep.subr.bf16.mxu0 %v19146_v62  ;;  %12311 = vmatprep.subr.bf16.mxu1 %v19148_v0  ;;  %v18734_v62 = vcombine.high %v18217_v49, %v18225_v9  ;;  %v18736_v0 = vcombine.high %v18218_v44, %v18226_v57  ;;  %v18305_v36 = vld [vmem:[%s23128_s4 + $0x1450] sm:$0xff]  ;;  %v18306_v31 = vld [vmem:[%s23128_s4 + $0x1458] sm:$0xff] }
 0x9d9   : > { %12230 = vmatpush1.bf16.msra.mxu0 %v19145_v4  ;;  %12312 = vmatpush1.bf16.msra.mxu1 %v19147_v8  ;;  %v18733_v4 = vcombine.low %v18217_v49, %v18225_v9  ;;  %v18735_v8 = vcombine.low %v18218_v44, %v18226_v57  ;;  %v18313_v49 = vld [vmem:[%s23128_s4 + $0x1490] sm:$0xff]  ;;  %v18314_v44 = vld [vmem:[%s23128_s4 + $0x1498] sm:$0xff] }
 0x9da   : > { %12231 = vmatprep.subr.bf16.mxu0 %v19162_v1  ;;  %12313 = vmatprep.subr.bf16.mxu1 %v19164_v34  ;;  %v18750_v1 = vcombine.high %v18233_v51, %v18241_v6  ;;  %v18752_v34 = vcombine.high %v18234_v29, %v18242_v13  ;;  %v18321_v9 = vld [vmem:[%s23128_s4 + $0x14d0] sm:$0xff]  ;;  %v18322_v57 = vld [vmem:[%s23128_s4 + $0x14d8] sm:$0xff] }
 0x9dd   : > { %12232 = vmatpush1.bf16.msra.mxu0 %v19161_v19  ;;  %12314 = vmatpush1.bf16.msra.mxu1 %v19163_v20  ;;  %v18749_v19 = vcombine.low %v18233_v51, %v18241_v6  ;;  %v18751_v20 = vcombine.low %v18234_v29, %v18242_v13  ;;  %v18329_v51 = vld [vmem:[%s23128_s4 + $0x1510] sm:$0xff]  ;;  %v18330_v29 = vld [vmem:[%s23128_s4 + $0x1518] sm:$0xff] }
 0x9de   : > { %12233 = vmatprep.subr.bf16.mxu0 %v19178_v22  ;;  %12315 = vmatprep.subr.bf16.mxu1 %v19180_v53  ;;  %v18766_v22 = vcombine.high %v18249_v5, %v18257_v2  ;;  %v18768_v53 = vcombine.high %v18250_v7, %v18258_v26  ;;  %v18337_v6 = vld [vmem:[%s23128_s4 + $0x1550] sm:$0xff]  ;;  %v18338_v13 = vld [vmem:[%s23128_s4 + $0x1558] sm:$0xff] }
 0x9e1   : > { %12234 = vmatpush1.bf16.msra.mxu0 %v19177_v59  ;;  %12316 = vmatpush1.bf16.msra.mxu1 %v19179_v27  ;;  %v18765_v59 = vcombine.low %v18249_v5, %v18257_v2  ;;  %v18767_v27 = vcombine.low %v18250_v7, %v18258_v26  ;;  %v18345_v5 = vld [vmem:[%s23128_s4 + $0x1590] sm:$0xff]  ;;  %v18346_v7 = vld [vmem:[%s23128_s4 + $0x1598] sm:$0xff] }
 0x9e2   : > { %12326 = vmatprep.subr.bf16.mxu0 %v18686_v58  ;;  %12408 = vmatprep.subr.bf16.mxu1 %v18688_v45  ;;  %v18782_v58 = vcombine.high %v18265_v28, %v18273_v30  ;;  %v18784_v45 = vcombine.high %v18266_v10, %v18274_v24  ;;  %v18353_v2 = vld [vmem:[%s23128_s4 + $0x15d0] sm:$0xff]  ;;  %v18354_v26 = vld [vmem:[%s23128_s4 + $0x15d8] sm:$0xff] }
 0x9e4   : > { %12236 = vmatmul.mubr.bf16.vlgmr.msra.gmra.mrb[56].mxu0 %v24637_v39  ;;  %12318 = vmatmul.mubr.bf16.vlgmr.msra.gmra.mrb[56].mxu1 %v24637_v39 }
 0x9e5   : > { %12327 = vmatpush1.bf16.msra.mxu0 %v18685_v60  ;;  %12358 = vmatprep.mubr.bf16.mxu0 %v24559_v47  ;;  %v18781_v60 = vcombine.low %v18265_v28, %v18273_v30  ;;  %v18361_v28 = vld [vmem:[%s23128_s4 + $0x1610] sm:$0xff] }
 0x9e6   : > { %12409 = vmatpush1.bf16.msra.mxu1 %v18687_v14  ;;  %12440 = vmatprep.mubr.bf16.mxu1 %v24559_v47  ;;  %v18783_v14 = vcombine.low %v18266_v10, %v18274_v24  ;;  %v18369_v30 = vld [vmem:[%s23128_s4 + $0x1650] sm:$0xff]  ;;  %v18362_v10 = vld [vmem:[%s23128_s4 + $0x1618] sm:$0xff] }
 0x9e7   : > { %12328 = vmatprep.subr.bf16.mxu0 %v18702_v48  ;;  %12410 = vmatprep.subr.bf16.mxu1 %v18704_v32  ;;  %v18798_v48 = vcombine.high %v18281_v17, %v18289_v12  ;;  %v18800_v32 = vcombine.high %v18282_v41, %v18290_v63  ;;  %v18370_v24 = vld [vmem:[%s23128_s4 + $0x1658] sm:$0xff] }
 0x9e9   : > { %12329 = vmatpush1.bf16.msra.mxu0 %v18701_v55  ;;  %v18797_v55 = vcombine.low %v18281_v17, %v18289_v12  ;;  %v18377_v17 = vld [vmem:[%s23128_s4 + $0x1690] sm:$0xff] }
 0x9ea   : > { %12411 = vmatpush1.bf16.msra.mxu1 %v18703_v15  ;;  %12330 = vmatprep.subr.bf16.mxu0 %v18718_v33  ;;  %v18799_v15 = vcombine.low %v18282_v41, %v18290_v63  ;;  %v18814_v33 = vcombine.high %v18297_v16, %v18305_v36  ;;  %v18385_v12 = vld [vmem:[%s23128_s4 + $0x16d0] sm:$0xff]  ;;  %v18378_v41 = vld [vmem:[%s23128_s4 + $0x1698] sm:$0xff] }
 0x9eb   : > { %12412 = vmatprep.subr.bf16.mxu1 %v18720_v42  ;;  %v18816_v42 = vcombine.high %v18298_v18, %v18306_v31  ;;  %v18386_v63 = vld [vmem:[%s23128_s4 + $0x16d8] sm:$0xff] }
 0x9ed   : > { %12331 = vmatpush1.bf16.msra.mxu0 %v18717_v54  ;;  %v18813_v54 = vcombine.low %v18297_v16, %v18305_v36  ;;  %v18393_v16 = vld [vmem:[%s23128_s4 + $0x1710] sm:$0xff] }
 0x9ee   : > { %12413 = vmatpush1.bf16.msra.mxu1 %v18719_v61  ;;  %12332 = vmatprep.subr.bf16.mxu0 %v18734_v62  ;;  %v18815_v61 = vcombine.low %v18298_v18, %v18306_v31  ;;  %v18830_v62 = vcombine.high %v18313_v49, %v18321_v9  ;;  %v18401_v36 = vld [vmem:[%s23128_s4 + $0x1750] sm:$0xff]  ;;  %v18394_v18 = vld [vmem:[%s23128_s4 + $0x1718] sm:$0xff] }
 0x9ef   : > { %12414 = vmatprep.subr.bf16.mxu1 %v18736_v0  ;;  %v18832_v0 = vcombine.high %v18314_v44, %v18322_v57  ;;  %v18402_v31 = vld [vmem:[%s23128_s4 + $0x1758] sm:$0xff] }
 0x9f1   : > { %12333 = vmatpush1.bf16.msra.mxu0 %v18733_v4  ;;  %v18829_v4 = vcombine.low %v18313_v49, %v18321_v9  ;;  %v18409_v49 = vld [vmem:[%s23128_s4 + $0x1790] sm:$0xff] }
 0x9f2   : > { %12415 = vmatpush1.bf16.msra.mxu1 %v18735_v8  ;;  %12334 = vmatprep.subr.bf16.mxu0 %v18750_v1  ;;  %v18831_v8 = vcombine.low %v18314_v44, %v18322_v57  ;;  %v18846_v1 = vcombine.high %v18329_v51, %v18337_v6  ;;  %v18417_v9 = vld [vmem:[%s23128_s4 + $0x17d0] sm:$0xff]  ;;  %v18410_v44 = vld [vmem:[%s23128_s4 + $0x1798] sm:$0xff] }
 0x9f3   : > { %12416 = vmatprep.subr.bf16.mxu1 %v18752_v34  ;;  %v18848_v34 = vcombine.high %v18330_v29, %v18338_v13  ;;  %v18418_v57 = vld [vmem:[%s23128_s4 + $0x17d8] sm:$0xff] }
 0x9f5   : > { %12335 = vmatpush1.bf16.msra.mxu0 %v18749_v19  ;;  %v18845_v19 = vcombine.low %v18329_v51, %v18337_v6  ;;  %v18425_v51 = vld [vmem:[%s23128_s4 + $0x1810] sm:$0xff] }
 0x9f6   : > { %12417 = vmatpush1.bf16.msra.mxu1 %v18751_v20  ;;  %12336 = vmatprep.subr.bf16.mxu0 %v18766_v22  ;;  %v18847_v20 = vcombine.low %v18330_v29, %v18338_v13  ;;  %v18862_v22 = vcombine.high %v18345_v5, %v18353_v2  ;;  %v18433_v6 = vld [vmem:[%s23128_s4 + $0x1850] sm:$0xff]  ;;  %v18426_v29 = vld [vmem:[%s23128_s4 + $0x1818] sm:$0xff] }
 0x9f7   : > { %12418 = vmatprep.subr.bf16.mxu1 %v18768_v53  ;;  %v18864_v53 = vcombine.high %v18346_v7, %v18354_v26  ;;  %v18434_v13 = vld [vmem:[%s23128_s4 + $0x1858] sm:$0xff] }
 0x9f9   : > { %12337 = vmatpush1.bf16.msra.mxu0 %v18765_v59  ;;  %v18861_v59 = vcombine.low %v18345_v5, %v18353_v2  ;;  %v18441_v5 = vld [vmem:[%s23128_s4 + $0x1890] sm:$0xff] }
 0x9fa   : > { %12419 = vmatpush1.bf16.msra.mxu1 %v18767_v27  ;;  %12338 = vmatprep.subr.bf16.mxu0 %v18782_v58  ;;  %v18863_v27 = vcombine.low %v18346_v7, %v18354_v26  ;;  %v18878_v58 = vcombine.high %v18361_v28, %v18369_v30  ;;  %v18449_v2 = vld [vmem:[%s23128_s4 + $0x18d0] sm:$0xff]  ;;  %v18941_v7 = vcombine.low %v18425_v51, %v18433_v6  ;;  %v18442_v26 = vld [vmem:[%s23128_s4 + $0x1898] sm:$0xff] }
 0x9fb   : > { %12420 = vmatprep.subr.bf16.mxu1 %v18784_v45  ;;  %v18880_v45 = vcombine.high %v18362_v10, %v18370_v24 }
 0x9fd   : > { %12339 = vmatpush1.bf16.msra.mxu0 %v18781_v60  ;;  %v18877_v60 = vcombine.low %v18361_v28, %v18369_v30  ;;  %v18465_v28 = vld [vmem:[%s23128_s4 + $0x1950] sm:$0xff] }
 0x9fe   : > { %12421 = vmatpush1.bf16.msra.mxu1 %v18783_v14  ;;  %12340 = vmatprep.subr.bf16.mxu0 %v18798_v48  ;;  %v18879_v14 = vcombine.low %v18362_v10, %v18370_v24  ;;  %v18894_v48 = vcombine.high %v18377_v17, %v18385_v12  ;;  %v18458_v10 = vld [vmem:[%s23128_s4 + $0x1918] sm:$0xff] }
 0x9ff   : > { %12422 = vmatprep.subr.bf16.mxu1 %v18800_v32  ;;  %v18896_v32 = vcombine.high %v18378_v41, %v18386_v63  ;;  %v18466_v24 = vld [vmem:[%s23128_s4 + $0x1958] sm:$0xff] }
 0xa01   : > { %12341 = vmatpush1.bf16.msra.mxu0 %v18797_v55  ;;  %v18893_v55 = vcombine.low %v18377_v17, %v18385_v12  ;;  %v18473_v17 = vld [vmem:[%s23128_s4 + $0x1990] sm:$0xff] }
 0xa02   : > { %12423 = vmatpush1.bf16.msra.mxu1 %v18799_v15  ;;  %12342 = vmatprep.subr.bf16.mxu0 %v18814_v33  ;;  %v18895_v15 = vcombine.low %v18378_v41, %v18386_v63  ;;  %v18910_v33 = vcombine.high %v18393_v16, %v18401_v36  ;;  %v18481_v12 = vld [vmem:[%s23128_s4 + $0x19d0] sm:$0xff]  ;;  %v18474_v41 = vld [vmem:[%s23128_s4 + $0x1998] sm:$0xff] }
 0xa03   : > { %12424 = vmatprep.subr.bf16.mxu1 %v18816_v42  ;;  %v18912_v42 = vcombine.high %v18394_v18, %v18402_v31  ;;  %v18482_v63 = vld [vmem:[%s23128_s4 + $0x19d8] sm:$0xff] }
 0xa05   : > { %12343 = vmatpush1.bf16.msra.mxu0 %v18813_v54  ;;  %v18909_v54 = vcombine.low %v18393_v16, %v18401_v36  ;;  %v18489_v16 = vld [vmem:[%s23128_s4 + $0x1a10] sm:$0xff] }
 0xa06   : > { %12425 = vmatpush1.bf16.msra.mxu1 %v18815_v61  ;;  %12344 = vmatprep.subr.bf16.mxu0 %v18830_v62  ;;  %v18911_v61 = vcombine.low %v18394_v18, %v18402_v31  ;;  %v18926_v62 = vcombine.high %v18409_v49, %v18417_v9  ;;  %v18497_v36 = vld [vmem:[%s23128_s4 + $0x1a50] sm:$0xff]  ;;  %v18490_v18 = vld [vmem:[%s23128_s4 + $0x1a18] sm:$0xff] }
 0xa07   : > { %12426 = vmatprep.subr.bf16.mxu1 %v18832_v0  ;;  %v18928_v0 = vcombine.high %v18410_v44, %v18418_v57  ;;  %v18498_v31 = vld [vmem:[%s23128_s4 + $0x1a58] sm:$0xff] }
 0xa09   : > { %12345 = vmatpush1.bf16.msra.mxu0 %v18829_v4  ;;  %v18925_v4 = vcombine.low %v18409_v49, %v18417_v9  ;;  %v18505_v49 = vld [vmem:[%s23128_s4 + $0x1a90] sm:$0xff] }
 0xa0a   : > { %12427 = vmatpush1.bf16.msra.mxu1 %v18831_v8  ;;  %12346 = vmatprep.subr.bf16.mxu0 %v18846_v1  ;;  %v18927_v8 = vcombine.low %v18410_v44, %v18418_v57  ;;  %v18942_v1 = vcombine.high %v18425_v51, %v18433_v6  ;;  %v18513_v9 = vld [vmem:[%s23128_s4 + $0x1ad0] sm:$0xff]  ;;  %v18506_v44 = vld [vmem:[%s23128_s4 + $0x1a98] sm:$0xff] }
 0xa0b   : > { %12428 = vmatprep.subr.bf16.mxu1 %v18848_v34  ;;  %v18944_v34 = vcombine.high %v18426_v29, %v18434_v13  ;;  %v18514_v57 = vld [vmem:[%s23128_s4 + $0x1ad8] sm:$0xff]  ;;  %v18521_v51 = vld [vmem:[%s23128_s4 + $0x1b10] sm:$0xff] }
 0xa0c   : > { %v18529_v6 = vld [vmem:[%s23128_s4 + $0x1b50] sm:$0xff] }
 0xa0d   : > { %12347 = vmatpush1.bf16.msra.mxu0 %v18845_v19  ;;  %v18450_v19 = vld [vmem:[%s23128_s4 + $0x18d8] sm:$0xff] }
 0xa0e   : > { %12429 = vmatpush1.bf16.msra.mxu1 %v18847_v20  ;;  %12348 = vmatprep.subr.bf16.mxu0 %v18862_v22  ;;  %v18943_v20 = vcombine.low %v18426_v29, %v18434_v13  ;;  %v18958_v22 = vcombine.high %v18441_v5, %v18449_v2  ;;  %v18960_v30 = vcombine.high %v18442_v26, %v18450_v19  ;;  %v18522_v29 = vld [vmem:[%s23128_s4 + $0x1b18] sm:$0xff] }
 0xa0f   : > { %12430 = vmatprep.subr.bf16.mxu1 %v18864_v53  ;;  %v18457_v53 = vld [vmem:[%s23128_s4 + $0x1910] sm:$0xff]  ;;  %v18530_v13 = vld [vmem:[%s23128_s4 + $0x1b58] sm:$0xff] }
 0xa11   : > { %12349 = vmatpush1.bf16.msra.mxu0 %v18861_v59  ;;  %v18957_v59 = vcombine.low %v18441_v5, %v18449_v2  ;;  %v18537_v5 = vld [vmem:[%s23128_s4 + $0x1b90] sm:$0xff] }
 0xa12   : > { %12431 = vmatpush1.bf16.msra.mxu1 %v18863_v27  ;;  %12350 = vmatprep.subr.bf16.mxu0 %v18878_v58  ;;  %v18959_v27 = vcombine.low %v18442_v26, %v18450_v19  ;;  %v18974_v58 = vcombine.high %v18457_v53, %v18465_v28  ;;  %v18545_v2 = vld [vmem:[%s23128_s4 + $0x1bd0] sm:$0xff]  ;;  %v18546_v26 = vld [vmem:[%s23128_s4 + $0x1bd8] sm:$0xff]  ;;  %v19037_v19 = vcombine.low %v18521_v51, %v18529_v6 }
 0xa13   : > { %12432 = vmatprep.subr.bf16.mxu1 %v18880_v45  ;;  %v18976_v45 = vcombine.high %v18458_v10, %v18466_v24 }
 0xa15   : > { %12351 = vmatpush1.bf16.msra.mxu0 %v18877_v60  ;;  %v18973_v60 = vcombine.low %v18457_v53, %v18465_v28  ;;  %v18553_v28 = vld [vmem:[%s23128_s4 + $0x1c10] sm:$0xff] }
 0xa16   : > { %12433 = vmatpush1.bf16.msra.mxu1 %v18879_v14  ;;  %12352 = vmatprep.subr.bf16.mxu0 %v18894_v48  ;;  %v18975_v14 = vcombine.low %v18458_v10, %v18466_v24  ;;  %v18990_v48 = vcombine.high %v18473_v17, %v18481_v12  ;;  %v18554_v10 = vld [vmem:[%s23128_s4 + $0x1c18] sm:$0xff] }
 0xa17   : > { %12434 = vmatprep.subr.bf16.mxu1 %v18896_v32  ;;  %v18992_v32 = vcombine.high %v18474_v41, %v18482_v63  ;;  %v18562_v24 = vld [vmem:[%s23128_s4 + $0x1c58] sm:$0xff] }
 0xa19   : > { %12353 = vmatpush1.bf16.msra.mxu0 %v18893_v55  ;;  %v18989_v55 = vcombine.low %v18473_v17, %v18481_v12  ;;  %v18569_v17 = vld [vmem:[%s23128_s4 + $0x1c90] sm:$0xff] }
 0xa1a   : > { %12435 = vmatpush1.bf16.msra.mxu1 %v18895_v15  ;;  %12354 = vmatprep.subr.bf16.mxu0 %v18910_v33  ;;  %v18991_v15 = vcombine.low %v18474_v41, %v18482_v63  ;;  %v19006_v33 = vcombine.high %v18489_v16, %v18497_v36  ;;  %v18577_v12 = vld [vmem:[%s23128_s4 + $0x1cd0] sm:$0xff]  ;;  %v18570_v41 = vld [vmem:[%s23128_s4 + $0x1c98] sm:$0xff] }
 0xa1b   : > { %12436 = vmatprep.subr.bf16.mxu1 %v18912_v42  ;;  %v19008_v42 = vcombine.high %v18490_v18, %v18498_v31  ;;  %v18578_v63 = vld [vmem:[%s23128_s4 + $0x1cd8] sm:$0xff] }
 0xa1d   : > { %12355 = vmatpush1.bf16.msra.mxu0 %v18909_v54  ;;  %v19005_v54 = vcombine.low %v18489_v16, %v18497_v36  ;;  %v18585_v16 = vld [vmem:[%s23128_s4 + $0x1d10] sm:$0xff] }
 0xa1e   : > { %12437 = vmatpush1.bf16.msra.mxu1 %v18911_v61  ;;  %12356 = vmatprep.subr.bf16.mxu0 %v18926_v62  ;;  %v19007_v61 = vcombine.low %v18490_v18, %v18498_v31  ;;  %v19022_v62 = vcombine.high %v18505_v49, %v18513_v9  ;;  %v18593_v36 = vld [vmem:[%s23128_s4 + $0x1d50] sm:$0xff]  ;;  %v18586_v18 = vld [vmem:[%s23128_s4 + $0x1d18] sm:$0xff] }
 0xa1f   : > { %12438 = vmatprep.subr.bf16.mxu1 %v18928_v0  ;;  %v19024_v0 = vcombine.high %v18506_v44, %v18514_v57  ;;  %v18594_v31 = vld [vmem:[%s23128_s4 + $0x1d58] sm:$0xff] }
 0xa21   : > { %12357 = vmatpush1.bf16.msra.mxu0 %v18925_v4  ;;  %v19021_v4 = vcombine.low %v18505_v49, %v18513_v9  ;;  %v18601_v49 = vld [vmem:[%s23128_s4 + $0x1d90] sm:$0xff] }
 0xa22   : > { %12439 = vmatpush1.bf16.msra.mxu1 %v18927_v8  ;;  %12367 = vmatprep.subr.bf16.mxu0 %v18942_v1  ;;  %v19023_v8 = vcombine.low %v18506_v44, %v18514_v57  ;;  %v19038_v1 = vcombine.high %v18521_v51, %v18529_v6  ;;  %v18609_v9 = vld [vmem:[%s23128_s4 + $0x1dd0] sm:$0xff]  ;;  %v18602_v44 = vld [vmem:[%s23128_s4 + $0x1d98] sm:$0xff] }
 0xa23   : > { %12449 = vmatprep.subr.bf16.mxu1 %v18944_v34  ;;  %v19040_v34 = vcombine.high %v18522_v29, %v18530_v13  ;;  %v18610_v57 = vld [vmem:[%s23128_s4 + $0x1dd8] sm:$0xff]  ;;  %v18617_v51 = vld [vmem:[%s23128_s4 + $0x1e10] sm:$0xff] }
 0xa24   : > { %12359 = vmatmul.mubr.bf16.vlgmr.msra.gmra.mrb[60].mxu0 %v24561_v11  ;;  %v18625_v6 = vld [vmem:[%s23128_s4 + $0x1e50] sm:$0xff] }
 0xa25   : > { %12441 = vmatmul.mubr.bf16.vlgmr.msra.gmra.mrb[60].mxu1 %v24561_v11  ;;  %12368 = vmatpush1.bf16.msra.mxu0 %v18941_v7  ;;  %v18538_v7 = vld [vmem:[%s23128_s4 + $0x1b98] sm:$0xff] }
 0xa26   : > { %12399 = vmatprep.mubr.bf16.mxu0 %v24571_v3  ;;  %12450 = vmatpush1.bf16.msra.mxu1 %v18943_v20  ;;  %v19039_v20 = vcombine.low %v18522_v29, %v18530_v13  ;;  %v19056_v53 = vcombine.high %v18538_v7, %v18546_v26  ;;  %v18618_v29 = vld [vmem:[%s23128_s4 + $0x1e18] sm:$0xff] }
 0xa27   : > { %12481 = vmatprep.mubr.bf16.mxu1 %v24571_v3  ;;  %12369 = vmatprep.subr.bf16.mxu0 %v18958_v22  ;;  %v19054_v22 = vcombine.high %v18537_v5, %v18545_v2  ;;  %v18626_v13 = vld [vmem:[%s23128_s4 + $0x1e58] sm:$0xff] }
 0xa28   : > { %12451 = vmatprep.subr.bf16.mxu1 %v18960_v30  ;;  %v18561_v30 = vld [vmem:[%s23128_s4 + $0x1c50] sm:$0xff] }
 0xa29   : > { %12370 = vmatpush1.bf16.msra.mxu0 %v18957_v59  ;;  %v19053_v59 = vcombine.low %v18537_v5, %v18545_v2  ;;  %v18633_v5 = vld [vmem:[%s23128_s4 + $0x1e90] sm:$0xff] }
 0xa2a   : > { %12452 = vmatpush1.bf16.msra.mxu1 %v18959_v27  ;;  %12371 = vmatprep.subr.bf16.mxu0 %v18974_v58  ;;  %v19055_v27 = vcombine.low %v18538_v7, %v18546_v26  ;;  %v19070_v58 = vcombine.high %v18553_v28, %v18561_v30  ;;  %v18641_v2 = vld [vmem:[%s23128_s4 + $0x1ed0] sm:$0xff]  ;;  %v18634_v7 = vld [vmem:[%s23128_s4 + $0x1e98] sm:$0xff] }
 0xa2b   : > { %12453 = vmatprep.subr.bf16.mxu1 %v18976_v45  ;;  %v19072_v45 = vcombine.high %v18554_v10, %v18562_v24  ;;  %v18642_v26 = vld [vmem:[%s23128_s4 + $0x1ed8] sm:$0xff] }
 0xa2d   : > { %12372 = vmatpush1.bf16.msra.mxu0 %v18973_v60  ;;  %v19069_v60 = vcombine.low %v18553_v28, %v18561_v30  ;;  %v18649_v28 = vld [vmem:[%s23128_s4 + $0x1f10] sm:$0xff] }
 0xa2e   : > { %12454 = vmatpush1.bf16.msra.mxu1 %v18975_v14  ;;  %12373 = vmatprep.subr.bf16.mxu0 %v18990_v48  ;;  %v19071_v14 = vcombine.low %v18554_v10, %v18562_v24  ;;  %v19086_v48 = vcombine.high %v18569_v17, %v18577_v12  ;;  %v18657_v30 = vld [vmem:[%s23128_s4 + $0x1f50] sm:$0xff]  ;;  %v18650_v10 = vld [vmem:[%s23128_s4 + $0x1f18] sm:$0xff] }
 0xa2f   : > { %12455 = vmatprep.subr.bf16.mxu1 %v18992_v32  ;;  %v19088_v32 = vcombine.high %v18570_v41, %v18578_v63  ;;  %v18658_v24 = vld [vmem:[%s23128_s4 + $0x1f58] sm:$0xff] }
 0xa31   : > { %12374 = vmatpush1.bf16.msra.mxu0 %v18989_v55  ;;  %v19085_v55 = vcombine.low %v18569_v17, %v18577_v12  ;;  %v18665_v17 = vld [vmem:[%s23128_s4 + $0x1f90] sm:$0xff] }
 0xa32   : > { %12456 = vmatpush1.bf16.msra.mxu1 %v18991_v15  ;;  %12375 = vmatprep.subr.bf16.mxu0 %v19006_v33  ;;  %v19087_v15 = vcombine.low %v18570_v41, %v18578_v63  ;;  %v19102_v33 = vcombine.high %v18585_v16, %v18593_v36  ;;  %v18673_v12 = vld [vmem:[%s23128_s4 + $0x1fd0] sm:$0xff]  ;;  %v18666_v41 = vld [vmem:[%s23128_s4 + $0x1f98] sm:$0xff] }
 0xa33   : > { %12457 = vmatprep.subr.bf16.mxu1 %v19008_v42  ;;  %v19104_v42 = vcombine.high %v18586_v18, %v18594_v31  ;;  %v18674_v63 = vld [vmem:[%s23128_s4 + $0x1fd8] sm:$0xff] }
 0xa35   : > { %12376 = vmatpush1.bf16.msra.mxu0 %v19005_v54  ;;  %v19101_v54 = vcombine.low %v18585_v16, %v18593_v36  ;;  %v18171_v16 = vld [vmem:[%s23128_s4 + $0x1020] sm:$0xff] }
 0xa36   : > { %12458 = vmatpush1.bf16.msra.mxu1 %v19007_v61  ;;  %12377 = vmatprep.subr.bf16.mxu0 %v19022_v62  ;;  %v19103_v61 = vcombine.low %v18586_v18, %v18594_v31  ;;  %v19118_v62 = vcombine.high %v18601_v49, %v18609_v9  ;;  %v18179_v36 = vld [vmem:[%s23128_s4 + $0x1060] sm:$0xff]  ;;  %v18172_v18 = vld [vmem:[%s23128_s4 + $0x1028] sm:$0xff] }
 0xa37   : > { %12459 = vmatprep.subr.bf16.mxu1 %v19024_v0  ;;  %v19120_v0 = vcombine.high %v18602_v44, %v18610_v57  ;;  %v18180_v31 = vld [vmem:[%s23128_s4 + $0x1068] sm:$0xff] }
 0xa39   : > { %12378 = vmatpush1.bf16.msra.mxu0 %v19021_v4  ;;  %v19117_v4 = vcombine.low %v18601_v49, %v18609_v9  ;;  %v18187_v49 = vld [vmem:[%s23128_s4 + $0x10a0] sm:$0xff] }
 0xa3a   : > { %12460 = vmatpush1.bf16.msra.mxu1 %v19023_v8  ;;  %12379 = vmatprep.subr.bf16.mxu0 %v19038_v1  ;;  %v19119_v8 = vcombine.low %v18602_v44, %v18610_v57  ;;  %v19134_v1 = vcombine.high %v18617_v51, %v18625_v6  ;;  %v18195_v9 = vld [vmem:[%s23128_s4 + $0x10e0] sm:$0xff]  ;;  %v18689_v44 = vcombine.low %v18171_v16, %v18179_v36  ;;  %v18188_v57 = vld [vmem:[%s23128_s4 + $0x10a8] sm:$0xff] }
 0xa3b   : > { %12461 = vmatprep.subr.bf16.mxu1 %v19040_v34  ;;  %v19136_v34 = vcombine.high %v18618_v29, %v18626_v13 }
 0xa3d   : > { %12380 = vmatpush1.bf16.msra.mxu0 %v19037_v19  ;;  %v19133_v19 = vcombine.low %v18617_v51, %v18625_v6  ;;  %v18211_v51 = vld [vmem:[%s23128_s4 + $0x1160] sm:$0xff] }
 0xa3e   : > { %12462 = vmatpush1.bf16.msra.mxu1 %v19039_v20  ;;  %12381 = vmatprep.subr.bf16.mxu0 %v19054_v22  ;;  %v19135_v20 = vcombine.low %v18618_v29, %v18626_v13  ;;  %v19150_v22 = vcombine.high %v18633_v5, %v18641_v2  ;;  %v18204_v29 = vld [vmem:[%s23128_s4 + $0x1128] sm:$0xff] }
 0xa3f   : > { %12463 = vmatprep.subr.bf16.mxu1 %v19056_v53  ;;  %v19152_v53 = vcombine.high %v18634_v7, %v18642_v26  ;;  %v18212_v13 = vld [vmem:[%s23128_s4 + $0x1168] sm:$0xff] }
 0xa41   : > { %12382 = vmatpush1.bf16.msra.mxu0 %v19053_v59  ;;  %v19149_v59 = vcombine.low %v18633_v5, %v18641_v2  ;;  %v18219_v5 = vld [vmem:[%s23128_s4 + $0x11a0] sm:$0xff] }
 0xa42   : > { %12464 = vmatpush1.bf16.msra.mxu1 %v19055_v27  ;;  %12383 = vmatprep.subr.bf16.mxu0 %v19070_v58  ;;  %v19151_v27 = vcombine.low %v18634_v7, %v18642_v26  ;;  %v19166_v58 = vcombine.high %v18649_v28, %v18657_v30  ;;  %v18227_v2 = vld [vmem:[%s23128_s4 + $0x11e0] sm:$0xff]  ;;  %v18220_v7 = vld [vmem:[%s23128_s4 + $0x11a8] sm:$0xff] }
 0xa43   : > { %12465 = vmatprep.subr.bf16.mxu1 %v19072_v45  ;;  %v19168_v45 = vcombine.high %v18650_v10, %v18658_v24  ;;  %v18228_v26 = vld [vmem:[%s23128_s4 + $0x11e8] sm:$0xff] }
 0xa45   : > { %12384 = vmatpush1.bf16.msra.mxu0 %v19069_v60  ;;  %v19165_v60 = vcombine.low %v18649_v28, %v18657_v30  ;;  %v18235_v28 = vld [vmem:[%s23128_s4 + $0x1220] sm:$0xff] }
 0xa46   : > { %12466 = vmatpush1.bf16.msra.mxu1 %v19071_v14  ;;  %12385 = vmatprep.subr.bf16.mxu0 %v19086_v48  ;;  %v19167_v14 = vcombine.low %v18650_v10, %v18658_v24  ;;  %v19182_v48 = vcombine.high %v18665_v17, %v18673_v12  ;;  %v18243_v30 = vld [vmem:[%s23128_s4 + $0x1260] sm:$0xff]  ;;  %v18236_v10 = vld [vmem:[%s23128_s4 + $0x1228] sm:$0xff] }
 0xa47   : > { %12467 = vmatprep.subr.bf16.mxu1 %v19088_v32  ;;  %v19184_v32 = vcombine.high %v18666_v41, %v18674_v63  ;;  %v18244_v24 = vld [vmem:[%s23128_s4 + $0x1268] sm:$0xff] }
 0xa49   : > { %12386 = vmatpush1.bf16.msra.mxu0 %v19085_v55  ;;  %v19181_v55 = vcombine.low %v18665_v17, %v18673_v12  ;;  %v18251_v17 = vld [vmem:[%s23128_s4 + $0x12a0] sm:$0xff] }
 0xa4a   : > { %12468 = vmatpush1.bf16.msra.mxu1 %v19087_v15  ;;  %12387 = vmatprep.subr.bf16.mxu0 %v19102_v33  ;;  %v19183_v15 = vcombine.low %v18666_v41, %v18674_v63  ;;  %v18690_v33 = vcombine.high %v18171_v16, %v18179_v36  ;;  %v18259_v12 = vld [vmem:[%s23128_s4 + $0x12e0] sm:$0xff]  ;;  %v18252_v41 = vld [vmem:[%s23128_s4 + $0x12a8] sm:$0xff] }
 0xa4b   : > { %12469 = vmatprep.subr.bf16.mxu1 %v19104_v42  ;;  %v18692_v42 = vcombine.high %v18172_v18, %v18180_v31  ;;  %v18260_v63 = vld [vmem:[%s23128_s4 + $0x12e8] sm:$0xff]  ;;  %v18267_v16 = vld [vmem:[%s23128_s4 + $0x1320] sm:$0xff] }
 0xa4c   : > { %v18275_v36 = vld [vmem:[%s23128_s4 + $0x1360] sm:$0xff] }
 0xa4d   : > { %12388 = vmatpush1.bf16.msra.mxu0 %v19101_v54  ;;  %v18196_v54 = vld [vmem:[%s23128_s4 + $0x10e8] sm:$0xff] }
 0xa4e   : > { %12470 = vmatpush1.bf16.msra.mxu1 %v19103_v61  ;;  %12389 = vmatprep.subr.bf16.mxu0 %v19118_v62  ;;  %v18691_v61 = vcombine.low %v18172_v18, %v18180_v31  ;;  %v18706_v62 = vcombine.high %v18187_v49, %v18195_v9  ;;  %v18708_v6 = vcombine.high %v18188_v57, %v18196_v54  ;;  %v18268_v18 = vld [vmem:[%s23128_s4 + $0x1328] sm:$0xff] }
 0xa4f   : > { %12471 = vmatprep.subr.bf16.mxu1 %v19120_v0  ;;  %v18203_v0 = vld [vmem:[%s23128_s4 + $0x1120] sm:$0xff]  ;;  %v18276_v31 = vld [vmem:[%s23128_s4 + $0x1368] sm:$0xff] }
 0xa51   : > { %12390 = vmatpush1.bf16.msra.mxu0 %v19117_v4  ;;  %v18705_v4 = vcombine.low %v18187_v49, %v18195_v9  ;;  %v18283_v49 = vld [vmem:[%s23128_s4 + $0x13a0] sm:$0xff] }
 0xa52   : > { %12472 = vmatpush1.bf16.msra.mxu1 %v19119_v8  ;;  %12391 = vmatprep.subr.bf16.mxu0 %v19134_v1  ;;  %v18707_v8 = vcombine.low %v18188_v57, %v18196_v54  ;;  %v18722_v1 = vcombine.high %v18203_v0, %v18211_v51  ;;  %v18291_v9 = vld [vmem:[%s23128_s4 + $0x13e0] sm:$0xff]  ;;  %v18292_v57 = vld [vmem:[%s23128_s4 + $0x13e8] sm:$0xff]  ;;  %v18785_v54 = vcombine.low %v18267_v16, %v18275_v36 }
 0xa53   : > { %12473 = vmatprep.subr.bf16.mxu1 %v19136_v34  ;;  %v18724_v34 = vcombine.high %v18204_v29, %v18212_v13 }
 0xa55   : > { %12392 = vmatpush1.bf16.msra.mxu0 %v19133_v19  ;;  %v18721_v19 = vcombine.low %v18203_v0, %v18211_v51  ;;  %v18299_v51 = vld [vmem:[%s23128_s4 + $0x1420] sm:$0xff] }
 0xa56   : > { %12474 = vmatpush1.bf16.msra.mxu1 %v19135_v20  ;;  %12393 = vmatprep.subr.bf16.mxu0 %v19150_v22  ;;  %v18723_v20 = vcombine.low %v18204_v29, %v18212_v13  ;;  %v18738_v22 = vcombine.high %v18219_v5, %v18227_v2  ;;  %v18300_v29 = vld [vmem:[%s23128_s4 + $0x1428] sm:$0xff] }
 0xa57   : > { %12475 = vmatprep.subr.bf16.mxu1 %v19152_v53  ;;  %v18740_v53 = vcombine.high %v18220_v7, %v18228_v26  ;;  %v18308_v13 = vld [vmem:[%s23128_s4 + $0x1468] sm:$0xff] }
 0xa59   : > { %12394 = vmatpush1.bf16.msra.mxu0 %v19149_v59  ;;  %v18737_v59 = vcombine.low %v18219_v5, %v18227_v2  ;;  %v18315_v5 = vld [vmem:[%s23128_s4 + $0x14a0] sm:$0xff] }
 0xa5a   : > { %12476 = vmatpush1.bf16.msra.mxu1 %v19151_v27  ;;  %12395 = vmatprep.subr.bf16.mxu0 %v19166_v58  ;;  %v18739_v27 = vcombine.low %v18220_v7, %v18228_v26  ;;  %v18754_v58 = vcombine.high %v18235_v28, %v18243_v30  ;;  %v18323_v2 = vld [vmem:[%s23128_s4 + $0x14e0] sm:$0xff]  ;;  %v18316_v7 = vld [vmem:[%s23128_s4 + $0x14a8] sm:$0xff] }
 0xa5b   : > { %12477 = vmatprep.subr.bf16.mxu1 %v19168_v45  ;;  %v18756_v45 = vcombine.high %v18236_v10, %v18244_v24  ;;  %v18324_v26 = vld [vmem:[%s23128_s4 + $0x14e8] sm:$0xff] }
 0xa5d   : > { %12396 = vmatpush1.bf16.msra.mxu0 %v19165_v60  ;;  %v18753_v60 = vcombine.low %v18235_v28, %v18243_v30  ;;  %v18331_v28 = vld [vmem:[%s23128_s4 + $0x1520] sm:$0xff] }
 0xa5e   : > { %12478 = vmatpush1.bf16.msra.mxu1 %v19167_v14  ;;  %12397 = vmatprep.subr.bf16.mxu0 %v19182_v48  ;;  %v18755_v14 = vcombine.low %v18236_v10, %v18244_v24  ;;  %v18770_v48 = vcombine.high %v18251_v17, %v18259_v12  ;;  %v18339_v30 = vld [vmem:[%s23128_s4 + $0x1560] sm:$0xff]  ;;  %v18332_v10 = vld [vmem:[%s23128_s4 + $0x1528] sm:$0xff] }
 0xa5f   : > { %12479 = vmatprep.subr.bf16.mxu1 %v19184_v32  ;;  %v18772_v32 = vcombine.high %v18252_v41, %v18260_v63  ;;  %v18340_v24 = vld [vmem:[%s23128_s4 + $0x1568] sm:$0xff] }
 0xa61   : > { %12398 = vmatpush1.bf16.msra.mxu0 %v19181_v55  ;;  %v18769_v55 = vcombine.low %v18251_v17, %v18259_v12  ;;  %v18347_v17 = vld [vmem:[%s23128_s4 + $0x15a0] sm:$0xff] }
 0xa62   : > { %12480 = vmatpush1.bf16.msra.mxu1 %v19183_v15  ;;  %12490 = vmatprep.subr.bf16.mxu0 %v18690_v33  ;;  %v18771_v15 = vcombine.low %v18252_v41, %v18260_v63  ;;  %v18786_v33 = vcombine.high %v18267_v16, %v18275_v36  ;;  %v18355_v12 = vld [vmem:[%s23128_s4 + $0x15e0] sm:$0xff]  ;;  %v18348_v41 = vld [vmem:[%s23128_s4 + $0x15a8] sm:$0xff] }
 0xa63   : > { %12572 = vmatprep.subr.bf16.mxu1 %v18692_v42  ;;  %v18788_v42 = vcombine.high %v18268_v18, %v18276_v31  ;;  %v18356_v63 = vld [vmem:[%s23128_s4 + $0x15e8] sm:$0xff]  ;;  %v18363_v16 = vld [vmem:[%s23128_s4 + $0x1620] sm:$0xff] }
 0xa64   : > { %12400 = vmatmul.mubr.bf16.vlgmr.msra.gmra.mrb[60].mxu0 %v24637_v39  ;;  %v18371_v36 = vld [vmem:[%s23128_s4 + $0x1660] sm:$0xff] }
 0xa65   : > { %12482 = vmatmul.mubr.bf16.vlgmr.msra.gmra.mrb[60].mxu1 %v24637_v39  ;;  %12491 = vmatpush1.bf16.msra.mxu0 %v18689_v44  ;;  %v18284_v44 = vld [vmem:[%s23128_s4 + $0x13a8] sm:$0xff] }
 0xa66   : > { %12522 = vmatprep.mubr.bf16.mxu0 %v24559_v47  ;;  %12573 = vmatpush1.bf16.msra.mxu1 %v18691_v61  ;;  %v18787_v61 = vcombine.low %v18268_v18, %v18276_v31  ;;  %v18804_v0 = vcombine.high %v18284_v44, %v18292_v57  ;;  %v18364_v18 = vld [vmem:[%s23128_s4 + $0x1628] sm:$0xff] }
 0xa67   : > { %12604 = vmatprep.mubr.bf16.mxu1 %v24559_v47  ;;  %12492 = vmatprep.subr.bf16.mxu0 %v18706_v62  ;;  %v18802_v62 = vcombine.high %v18283_v49, %v18291_v9  ;;  %v18372_v31 = vld [vmem:[%s23128_s4 + $0x1668] sm:$0xff] }
 0xa68   : > { %12574 = vmatprep.subr.bf16.mxu1 %v18708_v6  ;;  %v18307_v6 = vld [vmem:[%s23128_s4 + $0x1460] sm:$0xff] }
 0xa69   : > { %12493 = vmatpush1.bf16.msra.mxu0 %v18705_v4  ;;  %v18801_v4 = vcombine.low %v18283_v49, %v18291_v9  ;;  %v18379_v49 = vld [vmem:[%s23128_s4 + $0x16a0] sm:$0xff] }
 0xa6a   : > { %12575 = vmatpush1.bf16.msra.mxu1 %v18707_v8  ;;  %12494 = vmatprep.subr.bf16.mxu0 %v18722_v1  ;;  %v18803_v8 = vcombine.low %v18284_v44, %v18292_v57  ;;  %v18818_v1 = vcombine.high %v18299_v51, %v18307_v6  ;;  %v18387_v9 = vld [vmem:[%s23128_s4 + $0x16e0] sm:$0xff]  ;;  %v18380_v44 = vld [vmem:[%s23128_s4 + $0x16a8] sm:$0xff] }
 0xa6b   : > { %12576 = vmatprep.subr.bf16.mxu1 %v18724_v34  ;;  %v18820_v34 = vcombine.high %v18300_v29, %v18308_v13  ;;  %v18388_v57 = vld [vmem:[%s23128_s4 + $0x16e8] sm:$0xff] }
 0xa6d   : > { %12495 = vmatpush1.bf16.msra.mxu0 %v18721_v19  ;;  %v18817_v19 = vcombine.low %v18299_v51, %v18307_v6  ;;  %v18395_v51 = vld [vmem:[%s23128_s4 + $0x1720] sm:$0xff] }
 0xa6e   : > { %12577 = vmatpush1.bf16.msra.mxu1 %v18723_v20  ;;  %12496 = vmatprep.subr.bf16.mxu0 %v18738_v22  ;;  %v18819_v20 = vcombine.low %v18300_v29, %v18308_v13  ;;  %v18834_v22 = vcombine.high %v18315_v5, %v18323_v2  ;;  %v18403_v6 = vld [vmem:[%s23128_s4 + $0x1760] sm:$0xff]  ;;  %v18396_v29 = vld [vmem:[%s23128_s4 + $0x1728] sm:$0xff] }
 0xa6f   : > { %12578 = vmatprep.subr.bf16.mxu1 %v18740_v53  ;;  %v18836_v53 = vcombine.high %v18316_v7, %v18324_v26  ;;  %v18404_v13 = vld [vmem:[%s23128_s4 + $0x1768] sm:$0xff] }
 0xa71   : > { %12497 = vmatpush1.bf16.msra.mxu0 %v18737_v59  ;;  %v18833_v59 = vcombine.low %v18315_v5, %v18323_v2  ;;  %v18411_v5 = vld [vmem:[%s23128_s4 + $0x17a0] sm:$0xff] }
 0xa72   : > { %12579 = vmatpush1.bf16.msra.mxu1 %v18739_v27  ;;  %12498 = vmatprep.subr.bf16.mxu0 %v18754_v58  ;;  %v18835_v27 = vcombine.low %v18316_v7, %v18324_v26  ;;  %v18850_v58 = vcombine.high %v18331_v28, %v18339_v30  ;;  %v18419_v2 = vld [vmem:[%s23128_s4 + $0x17e0] sm:$0xff]  ;;  %v18412_v7 = vld [vmem:[%s23128_s4 + $0x17a8] sm:$0xff] }
 0xa73   : > { %12580 = vmatprep.subr.bf16.mxu1 %v18756_v45  ;;  %v18852_v45 = vcombine.high %v18332_v10, %v18340_v24  ;;  %v18420_v26 = vld [vmem:[%s23128_s4 + $0x17e8] sm:$0xff] }
 0xa75   : > { %12499 = vmatpush1.bf16.msra.mxu0 %v18753_v60  ;;  %v18849_v60 = vcombine.low %v18331_v28, %v18339_v30  ;;  %v18427_v28 = vld [vmem:[%s23128_s4 + $0x1820] sm:$0xff] }
 0xa76   : > { %12581 = vmatpush1.bf16.msra.mxu1 %v18755_v14  ;;  %12500 = vmatprep.subr.bf16.mxu0 %v18770_v48  ;;  %v18851_v14 = vcombine.low %v18332_v10, %v18340_v24  ;;  %v18866_v48 = vcombine.high %v18347_v17, %v18355_v12  ;;  %v18435_v30 = vld [vmem:[%s23128_s4 + $0x1860] sm:$0xff]  ;;  %v18428_v10 = vld [vmem:[%s23128_s4 + $0x1828] sm:$0xff] }
 0xa77   : > { %12582 = vmatprep.subr.bf16.mxu1 %v18772_v32  ;;  %v18868_v32 = vcombine.high %v18348_v41, %v18356_v63  ;;  %v18436_v24 = vld [vmem:[%s23128_s4 + $0x1868] sm:$0xff] }
 0xa79   : > { %12501 = vmatpush1.bf16.msra.mxu0 %v18769_v55  ;;  %v18865_v55 = vcombine.low %v18347_v17, %v18355_v12  ;;  %v18443_v17 = vld [vmem:[%s23128_s4 + $0x18a0] sm:$0xff] }
 0xa7a   : > { %12583 = vmatpush1.bf16.msra.mxu1 %v18771_v15  ;;  %12502 = vmatprep.subr.bf16.mxu0 %v18786_v33  ;;  %v18867_v15 = vcombine.low %v18348_v41, %v18356_v63  ;;  %v18882_v33 = vcombine.high %v18363_v16, %v18371_v36  ;;  %v18451_v12 = vld [vmem:[%s23128_s4 + $0x18e0] sm:$0xff]  ;;  %v18945_v41 = vcombine.low %v18427_v28, %v18435_v30  ;;  %v18444_v63 = vld [vmem:[%s23128_s4 + $0x18a8] sm:$0xff] }
 0xa7b   : > { %12584 = vmatprep.subr.bf16.mxu1 %v18788_v42  ;;  %v18884_v42 = vcombine.high %v18364_v18, %v18372_v31 }
 0xa7d   : > { %12503 = vmatpush1.bf16.msra.mxu0 %v18785_v54  ;;  %v18881_v54 = vcombine.low %v18363_v16, %v18371_v36  ;;  %v18467_v16 = vld [vmem:[%s23128_s4 + $0x1960] sm:$0xff] }
 0xa7e   : > { %12585 = vmatpush1.bf16.msra.mxu1 %v18787_v61  ;;  %12504 = vmatprep.subr.bf16.mxu0 %v18802_v62  ;;  %v18883_v61 = vcombine.low %v18364_v18, %v18372_v31  ;;  %v18898_v62 = vcombine.high %v18379_v49, %v18387_v9  ;;  %v18460_v18 = vld [vmem:[%s23128_s4 + $0x1928] sm:$0xff] }
 0xa7f   : > { %12586 = vmatprep.subr.bf16.mxu1 %v18804_v0  ;;  %v18900_v0 = vcombine.high %v18380_v44, %v18388_v57  ;;  %v18468_v31 = vld [vmem:[%s23128_s4 + $0x1968] sm:$0xff] }
 0xa81   : > { %12505 = vmatpush1.bf16.msra.mxu0 %v18801_v4  ;;  %v18897_v4 = vcombine.low %v18379_v49, %v18387_v9  ;;  %v18475_v49 = vld [vmem:[%s23128_s4 + $0x19a0] sm:$0xff] }
 0xa82   : > { %12587 = vmatpush1.bf16.msra.mxu1 %v18803_v8  ;;  %12506 = vmatprep.subr.bf16.mxu0 %v18818_v1  ;;  %v18899_v8 = vcombine.low %v18380_v44, %v18388_v57  ;;  %v18914_v1 = vcombine.high %v18395_v51, %v18403_v6  ;;  %v18483_v9 = vld [vmem:[%s23128_s4 + $0x19e0] sm:$0xff]  ;;  %v18476_v44 = vld [vmem:[%s23128_s4 + $0x19a8] sm:$0xff] }
 0xa83   : > { %12588 = vmatprep.subr.bf16.mxu1 %v18820_v34  ;;  %v18916_v34 = vcombine.high %v18396_v29, %v18404_v13  ;;  %v18484_v57 = vld [vmem:[%s23128_s4 + $0x19e8] sm:$0xff] }
 0xa85   : > { %12507 = vmatpush1.bf16.msra.mxu0 %v18817_v19  ;;  %v18913_v19 = vcombine.low %v18395_v51, %v18403_v6  ;;  %v18491_v51 = vld [vmem:[%s23128_s4 + $0x1a20] sm:$0xff] }
 0xa86   : > { %12589 = vmatpush1.bf16.msra.mxu1 %v18819_v20  ;;  %12508 = vmatprep.subr.bf16.mxu0 %v18834_v22  ;;  %v18915_v20 = vcombine.low %v18396_v29, %v18404_v13  ;;  %v18930_v22 = vcombine.high %v18411_v5, %v18419_v2  ;;  %v18499_v6 = vld [vmem:[%s23128_s4 + $0x1a60] sm:$0xff]  ;;  %v18492_v29 = vld [vmem:[%s23128_s4 + $0x1a28] sm:$0xff] }
 0xa87   : > { %12590 = vmatprep.subr.bf16.mxu1 %v18836_v53  ;;  %v18932_v53 = vcombine.high %v18412_v7, %v18420_v26  ;;  %v18500_v13 = vld [vmem:[%s23128_s4 + $0x1a68] sm:$0xff] }
 0xa89   : > { %12509 = vmatpush1.bf16.msra.mxu0 %v18833_v59  ;;  %v18929_v59 = vcombine.low %v18411_v5, %v18419_v2  ;;  %v18507_v5 = vld [vmem:[%s23128_s4 + $0x1aa0] sm:$0xff] }
 0xa8a   : > { %12591 = vmatpush1.bf16.msra.mxu1 %v18835_v27  ;;  %12510 = vmatprep.subr.bf16.mxu0 %v18850_v58  ;;  %v18931_v27 = vcombine.low %v18412_v7, %v18420_v26  ;;  %v18946_v58 = vcombine.high %v18427_v28, %v18435_v30  ;;  %v18515_v2 = vld [vmem:[%s23128_s4 + $0x1ae0] sm:$0xff]  ;;  %v18508_v7 = vld [vmem:[%s23128_s4 + $0x1aa8] sm:$0xff] }
 0xa8b   : > { %12592 = vmatprep.subr.bf16.mxu1 %v18852_v45  ;;  %v18948_v45 = vcombine.high %v18428_v10, %v18436_v24  ;;  %v18516_v26 = vld [vmem:[%s23128_s4 + $0x1ae8] sm:$0xff]  ;;  %v18523_v28 = vld [vmem:[%s23128_s4 + $0x1b20] sm:$0xff] }
 0xa8c   : > { %v18531_v30 = vld [vmem:[%s23128_s4 + $0x1b60] sm:$0xff] }
 0xa8d   : > { %12511 = vmatpush1.bf16.msra.mxu0 %v18849_v60  ;;  %v18452_v60 = vld [vmem:[%s23128_s4 + $0x18e8] sm:$0xff] }
 0xa8e   : > { %12593 = vmatpush1.bf16.msra.mxu1 %v18851_v14  ;;  %12512 = vmatprep.subr.bf16.mxu0 %v18866_v48  ;;  %v18947_v14 = vcombine.low %v18428_v10, %v18436_v24  ;;  %v18962_v48 = vcombine.high %v18443_v17, %v18451_v12  ;;  %v18964_v36 = vcombine.high %v18444_v63, %v18452_v60  ;;  %v18524_v10 = vld [vmem:[%s23128_s4 + $0x1b28] sm:$0xff] }
 0xa8f   : > { %12594 = vmatprep.subr.bf16.mxu1 %v18868_v32  ;;  %v18459_v32 = vld [vmem:[%s23128_s4 + $0x1920] sm:$0xff]  ;;  %v18532_v24 = vld [vmem:[%s23128_s4 + $0x1b68] sm:$0xff] }
 0xa91   : > { %12513 = vmatpush1.bf16.msra.mxu0 %v18865_v55  ;;  %v18961_v55 = vcombine.low %v18443_v17, %v18451_v12  ;;  %v19044_v12 = vcombine.high %v18524_v10, %v18532_v24 }
 0xa92   : > { %12595 = vmatpush1.bf16.msra.mxu1 %v18867_v15  ;;  %12514 = vmatprep.subr.bf16.mxu0 %v18882_v33  ;;  %v18963_v15 = vcombine.low %v18444_v63, %v18452_v60  ;;  %v18978_v33 = vcombine.high %v18459_v32, %v18467_v16  ;;  %v18547_v63 = vld [vmem:[%s23128_s4 + $0x1be0] sm:$0xff] }
 0xa93   : > { %12596 = vmatprep.subr.bf16.mxu1 %v18884_v42  ;;  %v18980_v42 = vcombine.high %v18460_v18, %v18468_v31 }
 0xa95   : > { %12515 = vmatpush1.bf16.msra.mxu0 %v18881_v54  ;;  %v18977_v54 = vcombine.low %v18459_v32, %v18467_v16  ;;  %v18548_v32 = vld [vmem:[%s23128_s4 + $0x1be8] sm:$0xff] }
 0xa96   : > { %12597 = vmatpush1.bf16.msra.mxu1 %v18883_v61  ;;  %12516 = vmatprep.subr.bf16.mxu0 %v18898_v62  ;;  %v18979_v61 = vcombine.low %v18460_v18, %v18468_v31  ;;  %v18994_v62 = vcombine.high %v18475_v49, %v18483_v9  ;;  %v19041_v18 = vcombine.low %v18523_v28, %v18531_v30 }
 0xa97   : > { %12598 = vmatprep.subr.bf16.mxu1 %v18900_v0  ;;  %v18996_v0 = vcombine.high %v18476_v44, %v18484_v57 }
 0xa99   : > { %12517 = vmatpush1.bf16.msra.mxu0 %v18897_v4  ;;  %v18993_v4 = vcombine.low %v18475_v49, %v18483_v9  ;;  %v18555_v49 = vld [vmem:[%s23128_s4 + $0x1c20] sm:$0xff] }
 0xa9a   : > { %12599 = vmatpush1.bf16.msra.mxu1 %v18899_v8  ;;  %12518 = vmatprep.subr.bf16.mxu0 %v18914_v1  ;;  %v18995_v8 = vcombine.low %v18476_v44, %v18484_v57  ;;  %v19010_v1 = vcombine.high %v18491_v51, %v18499_v6  ;;  %v18563_v9 = vld [vmem:[%s23128_s4 + $0x1c60] sm:$0xff]  ;;  %v18556_v44 = vld [vmem:[%s23128_s4 + $0x1c28] sm:$0xff] }
 0xa9b   : > { %12600 = vmatprep.subr.bf16.mxu1 %v18916_v34  ;;  %v19012_v34 = vcombine.high %v18492_v29, %v18500_v13  ;;  %v18564_v57 = vld [vmem:[%s23128_s4 + $0x1c68] sm:$0xff] }
 0xa9d   : > { %12519 = vmatpush1.bf16.msra.mxu0 %v18913_v19  ;;  %v19009_v19 = vcombine.low %v18491_v51, %v18499_v6  ;;  %v18571_v51 = vld [vmem:[%s23128_s4 + $0x1ca0] sm:$0xff] }
 0xa9e   : > { %12601 = vmatpush1.bf16.msra.mxu1 %v18915_v20  ;;  %12520 = vmatprep.subr.bf16.mxu0 %v18930_v22  ;;  %v19011_v20 = vcombine.low %v18492_v29, %v18500_v13  ;;  %v19026_v22 = vcombine.high %v18507_v5, %v18515_v2  ;;  %v18579_v6 = vld [vmem:[%s23128_s4 + $0x1ce0] sm:$0xff]  ;;  %v18572_v29 = vld [vmem:[%s23128_s4 + $0x1ca8] sm:$0xff] }
 0xa9f   : > { %12602 = vmatprep.subr.bf16.mxu1 %v18932_v53  ;;  %v19028_v53 = vcombine.high %v18508_v7, %v18516_v26  ;;  %v18580_v13 = vld [vmem:[%s23128_s4 + $0x1ce8] sm:$0xff] }
 0xaa1   : > { %12521 = vmatpush1.bf16.msra.mxu0 %v18929_v59  ;;  %v19025_v59 = vcombine.low %v18507_v5, %v18515_v2  ;;  %v18587_v5 = vld [vmem:[%s23128_s4 + $0x1d20] sm:$0xff] }
 0xaa2   : > { %12603 = vmatpush1.bf16.msra.mxu1 %v18931_v27  ;;  %12531 = vmatprep.subr.bf16.mxu0 %v18946_v58  ;;  %v19027_v27 = vcombine.low %v18508_v7, %v18516_v26  ;;  %v19042_v58 = vcombine.high %v18523_v28, %v18531_v30  ;;  %v18595_v2 = vld [vmem:[%s23128_s4 + $0x1d60] sm:$0xff]  ;;  %v18588_v7 = vld [vmem:[%s23128_s4 + $0x1d28] sm:$0xff] }
 0xaa3   : > { %12613 = vmatprep.subr.bf16.mxu1 %v18948_v45  ;;  %v18596_v26 = vld [vmem:[%s23128_s4 + $0x1d68] sm:$0xff]  ;;  %v18603_v28 = vld [vmem:[%s23128_s4 + $0x1da0] sm:$0xff] }
 0xaa4   : > { %12523 = vmatmul.mubr.bf16.vlgmr.msra.gmra.mrb[64].mxu0 %v24561_v11  ;;  %v18611_v30 = vld [vmem:[%s23128_s4 + $0x1de0] sm:$0xff] }
 0xaa5   : > { %12605 = vmatmul.mubr.bf16.vlgmr.msra.gmra.mrb[64].mxu1 %v24561_v11  ;;  %12532 = vmatpush1.bf16.msra.mxu0 %v18945_v41  ;;  %v18539_v41 = vld [vmem:[%s23128_s4 + $0x1ba0] sm:$0xff] }
 0xaa6   : > { %12563 = vmatprep.mubr.bf16.mxu0 %v24571_v3  ;;  %12614 = vmatpush1.bf16.msra.mxu1 %v18947_v14 }
 0xaa7   : > { %12645 = vmatprep.mubr.bf16.mxu1 %v24571_v3  ;;  %12533 = vmatprep.subr.bf16.mxu0 %v18962_v48  ;;  %v18540_v48 = vld [vmem:[%s23128_s4 + $0x1ba8] sm:$0xff] }
 0xaa8   : > { %12615 = vmatprep.subr.bf16.mxu1 %v18964_v36 }
 0xaa9   : > { %12534 = vmatpush1.bf16.msra.mxu0 %v18961_v55 }
 0xaaa   : > { %12616 = vmatpush1.bf16.msra.mxu1 %v18963_v15  ;;  %12535 = vmatprep.subr.bf16.mxu0 %v18978_v33  ;;  %v19043_v15 = vcombine.low %v18524_v10, %v18532_v24  ;;  %v19058_v33 = vcombine.high %v18539_v41, %v18547_v63  ;;  %v18604_v10 = vld [vmem:[%s23128_s4 + $0x1da8] sm:$0xff] }
 0xaab   : > { %12617 = vmatprep.subr.bf16.mxu1 %v18980_v42  ;;  %v19060_v42 = vcombine.high %v18540_v48, %v18548_v32  ;;  %v18612_v24 = vld [vmem:[%s23128_s4 + $0x1de8] sm:$0xff] }
 0xaad   : > { %12536 = vmatpush1.bf16.msra.mxu0 %v18977_v54  ;;  %v19057_v54 = vcombine.low %v18539_v41, %v18547_v63  ;;  %v18619_v41 = vld [vmem:[%s23128_s4 + $0x1e20] sm:$0xff] }
 0xaae   : > { %12618 = vmatpush1.bf16.msra.mxu1 %v18979_v61  ;;  %12537 = vmatprep.subr.bf16.mxu0 %v18994_v62  ;;  %v19059_v61 = vcombine.low %v18540_v48, %v18548_v32  ;;  %v19074_v62 = vcombine.high %v18555_v49, %v18563_v9  ;;  %v18627_v63 = vld [vmem:[%s23128_s4 + $0x1e60] sm:$0xff]  ;;  %v18620_v48 = vld [vmem:[%s23128_s4 + $0x1e28] sm:$0xff] }
 0xaaf   : > { %12619 = vmatprep.subr.bf16.mxu1 %v18996_v0  ;;  %v19076_v0 = vcombine.high %v18556_v44, %v18564_v57  ;;  %v18628_v32 = vld [vmem:[%s23128_s4 + $0x1e68] sm:$0xff] }
 0xab1   : > { %12538 = vmatpush1.bf16.msra.mxu0 %v18993_v4  ;;  %v19073_v4 = vcombine.low %v18555_v49, %v18563_v9  ;;  %v19137_v49 = vcombine.low %v18619_v41, %v18627_v63  ;;  %v19139_v9 = vcombine.low %v18620_v48, %v18628_v32 }
 0xab2   : > { %12620 = vmatpush1.bf16.msra.mxu1 %v18995_v8  ;;  %12539 = vmatprep.subr.bf16.mxu0 %v19010_v1  ;;  %v19075_v8 = vcombine.low %v18556_v44, %v18564_v57  ;;  %v19090_v1 = vcombine.high %v18571_v51, %v18579_v6 }
 0xab3   : > { %12621 = vmatprep.subr.bf16.mxu1 %v19012_v34  ;;  %v19092_v34 = vcombine.high %v18572_v29, %v18580_v13 }
 0xab5   : > { %12540 = vmatpush1.bf16.msra.mxu0 %v19009_v19  ;;  %v19089_v19 = vcombine.low %v18571_v51, %v18579_v6 }
 0xab6   : > { %12622 = vmatpush1.bf16.msra.mxu1 %v19011_v20  ;;  %12541 = vmatprep.subr.bf16.mxu0 %v19026_v22  ;;  %v19091_v20 = vcombine.low %v18572_v29, %v18580_v13  ;;  %v19106_v22 = vcombine.high %v18587_v5, %v18595_v2 }
 0xab7   : > { %v24867_v45 = vpop.f32.mrb[56].mxu0  ;;  %v24869_v17 = vpop.f32.mrb[56].mxu1  ;;  %12623 = vmatprep.subr.bf16.mxu1 %v19028_v53  ;;  %v19108_v53 = vcombine.high %v18588_v7, %v18596_v26 }
 0xab8   : > { %v24873_v60 = vpop.f32.mrb[57].mxu0  ;;  %v24875_v14 = vpop.f32.mrb[57].mxu1 }
 0xab9   : > { %v12241_v16 = vpop.f32.mrb[58].mxu0  ;;  %v12323_v36 = vpop.f32.mrb[58].mxu1  ;;  %12542 = vmatpush1.bf16.msra.mxu0 %v19025_v59  ;;  %v19105_v59 = vcombine.low %v18587_v5, %v18595_v2 }
 0xaba   : > { %12624 = vmatpush1.bf16.msra.mxu1 %v19027_v27  ;;  %v12242_v31 = vpop.f32.mrb[59].mxu0  ;;  %v12324_v55 = vpop.f32.mrb[59].mxu1  ;;  %12543 = vmatprep.subr.bf16.mxu0 %v19042_v58  ;;  %v19107_v27 = vcombine.low %v18588_v7, %v18596_v26  ;;  %v19122_v58 = vcombine.high %v18603_v28, %v18611_v30  ;;  %v19121_v16 = vcombine.low %v18603_v28, %v18611_v30 }
 0xabb   : > { %12625 = vmatprep.subr.bf16.mxu1 %v19044_v12  ;;  %v19124_v12 = vcombine.high %v18604_v10, %v18612_v24  ;;  %v19123_v36 = vcombine.low %v18604_v10, %v18612_v24  ;;  %v19140_v31 = vcombine.high %v18620_v48, %v18628_v32  ;;  %v18635_v55 = vld [vmem:[%s23128_s4 + $0x1ea0] sm:$0xff]  ;;  %v18205_v32 = vld [vmem:[%s23128_s4 + $0x1130] sm:$0xff] }
 0xabd   : > { %12544 = vmatpush1.bf16.msra.mxu0 %v19041_v18  ;;  %v19138_v18 = vcombine.high %v18619_v41, %v18627_v63  ;;  %v18198_v41 = vld [vmem:[%s23128_s4 + $0x10f8] sm:$0xff] }
 0xabe   : > { %12626 = vmatpush1.bf16.msra.mxu1 %v19043_v15  ;;  %12545 = vmatprep.subr.bf16.mxu0 %v19058_v33  ;;  %v18643_v15 = vld [vmem:[%s23128_s4 + $0x1ee0] sm:$0xff]  ;;  %v18636_v33 = vld [vmem:[%s23128_s4 + $0x1ea8] sm:$0xff] }
 0xabf   : > { %12627 = vmatprep.subr.bf16.mxu1 %v19060_v42  ;;  %v18644_v42 = vld [vmem:[%s23128_s4 + $0x1ee8] sm:$0xff]  ;;  %v19154_v44 = vcombine.high %v18635_v55, %v18643_v15  ;;  %v19153_v51 = vcombine.low %v18635_v55, %v18643_v15 }
 0xac0   : > { %v19156_v57 = vcombine.high %v18636_v33, %v18644_v42  ;;  %v19155_v6 = vcombine.low %v18636_v33, %v18644_v42 }
 0xac1   : > { %12546 = vmatpush1.bf16.msra.mxu0 %v19057_v54  ;;  %v18651_v54 = vld [vmem:[%s23128_s4 + $0x1f20] sm:$0xff] }
 0xac2   : > { %12628 = vmatpush1.bf16.msra.mxu1 %v19059_v61  ;;  %12547 = vmatprep.subr.bf16.mxu0 %v19074_v62  ;;  %v18659_v61 = vld [vmem:[%s23128_s4 + $0x1f60] sm:$0xff]  ;;  %v18652_v62 = vld [vmem:[%s23128_s4 + $0x1f28] sm:$0xff] }
 0xac3   : > { %12629 = vmatprep.subr.bf16.mxu1 %v19076_v0  ;;  %v18660_v0 = vld [vmem:[%s23128_s4 + $0x1f68] sm:$0xff]  ;;  %v19170_v29 = vcombine.high %v18651_v54, %v18659_v61  ;;  %v19169_v5 = vcombine.low %v18651_v54, %v18659_v61 }
 0xac4   : > { %v19172_v13 = vcombine.high %v18652_v62, %v18660_v0  ;;  %v19171_v2 = vcombine.low %v18652_v62, %v18660_v0  ;;  %v18237_v0 = vld [vmem:[%s23128_s4 + $0x1230] sm:$0xff] }
 0xac5   : > { %12548 = vmatpush1.bf16.msra.mxu0 %v19073_v4  ;;  %v18667_v4 = vld [vmem:[%s23128_s4 + $0x1fa0] sm:$0xff] }
 0xac6   : > { %12630 = vmatpush1.bf16.msra.mxu1 %v19075_v8  ;;  %12549 = vmatprep.subr.bf16.mxu0 %v19090_v1  ;;  %v18675_v8 = vld [vmem:[%s23128_s4 + $0x1fe0] sm:$0xff]  ;;  %v18668_v1 = vld [vmem:[%s23128_s4 + $0x1fa8] sm:$0xff] }
 0xac7   : > { %12631 = vmatprep.subr.bf16.mxu1 %v19092_v34  ;;  %v18676_v34 = vld [vmem:[%s23128_s4 + $0x1fe8] sm:$0xff]  ;;  %v19186_v7 = vcombine.high %v18667_v4, %v18675_v8  ;;  %v19185_v28 = vcombine.low %v18667_v4, %v18675_v8 }
 0xac8   : > { %v19188_v26 = vcombine.high %v18668_v1, %v18676_v34  ;;  %v19187_v30 = vcombine.low %v18668_v1, %v18676_v34  ;;  %v18253_v34 = vld [vmem:[%s23128_s4 + $0x12b0] sm:$0xff] }
 0xac9   : > { %12550 = vmatpush1.bf16.msra.mxu0 %v19089_v19  ;;  %v18173_v19 = vld [vmem:[%s23128_s4 + $0x1030] sm:$0xff] }
 0xaca   : > { %12632 = vmatpush1.bf16.msra.mxu1 %v19091_v20  ;;  %12551 = vmatprep.subr.bf16.mxu0 %v19106_v22  ;;  %v18181_v20 = vld [vmem:[%s23128_s4 + $0x1070] sm:$0xff]  ;;  %v18174_v22 = vld [vmem:[%s23128_s4 + $0x1038] sm:$0xff] }
 0xacb   : > { %12633 = vmatprep.subr.bf16.mxu1 %v19108_v53  ;;  %v18182_v53 = vld [vmem:[%s23128_s4 + $0x1078] sm:$0xff]  ;;  %v18694_v10 = vcombine.high %v18173_v19, %v18181_v20 }
 0xacc   : > { %v18696_v24 = vcombine.high %v18174_v22, %v18182_v53  ;;  %v18695_v63 = vcombine.low %v18174_v22, %v18182_v53  ;;  %v18269_v53 = vld [vmem:[%s23128_s4 + $0x1330] sm:$0xff] }
 0xacd   : > { %12552 = vmatpush1.bf16.msra.mxu0 %v19105_v59  ;;  %v18189_v59 = vld [vmem:[%s23128_s4 + $0x10b0] sm:$0xff] }
 0xace   : > { %12634 = vmatpush1.bf16.msra.mxu1 %v19107_v27  ;;  %12553 = vmatprep.subr.bf16.mxu0 %v19122_v58  ;;  %v18197_v27 = vld [vmem:[%s23128_s4 + $0x10f0] sm:$0xff]  ;;  %v18693_v58 = vcombine.low %v18173_v19, %v18181_v20 }
 0xacf   : > { %12635 = vmatprep.subr.bf16.mxu1 %v19124_v12  ;;  %v18190_v12 = vld [vmem:[%s23128_s4 + $0x10b8] sm:$0xff]  ;;  %v18710_v48 = vcombine.high %v18189_v59, %v18197_v27  ;;  %v18709_v55 = vcombine.low %v18189_v59, %v18197_v27 }
 0xad0   : > { %v18711_v15 = vcombine.low %v18190_v12, %v18198_v41 }
 0xad1   : > { %12554 = vmatpush1.bf16.msra.mxu0 %v19121_v16  ;;  %v18213_v16 = vld [vmem:[%s23128_s4 + $0x1170] sm:$0xff] }
 0xad2   : > { %12636 = vmatpush1.bf16.msra.mxu1 %v19123_v36  ;;  %12555 = vmatprep.subr.bf16.mxu0 %v19138_v18  ;;  %v18712_v36 = vcombine.high %v18190_v12, %v18198_v41  ;;  %v18206_v18 = vld [vmem:[%s23128_s4 + $0x1138] sm:$0xff]  ;;  %v18726_v33 = vcombine.high %v18205_v32, %v18213_v16  ;;  %v18725_v54 = vcombine.low %v18205_v32, %v18213_v16  ;;  %v18285_v12 = vld [vmem:[%s23128_s4 + $0x13b0] sm:$0xff] }
 0xad3   : > { %12637 = vmatprep.subr.bf16.mxu1 %v19140_v31  ;;  %v18214_v31 = vld [vmem:[%s23128_s4 + $0x1178] sm:$0xff]  ;;  %v18293_v41 = vld [vmem:[%s23128_s4 + $0x13f0] sm:$0xff] }
 0xad4   : > { %v18728_v42 = vcombine.high %v18206_v18, %v18214_v31  ;;  %v18727_v61 = vcombine.low %v18206_v18, %v18214_v31  ;;  %v18301_v31 = vld [vmem:[%s23128_s4 + $0x1430] sm:$0xff] }
 0xad5   : > { %12556 = vmatpush1.bf16.msra.mxu0 %v19137_v49  ;;  %v18221_v49 = vld [vmem:[%s23128_s4 + $0x11b0] sm:$0xff] }
 0xad6   : > { %12638 = vmatpush1.bf16.msra.mxu1 %v19139_v9  ;;  %12557 = vmatprep.subr.bf16.mxu0 %v19154_v44  ;;  %v18229_v9 = vld [vmem:[%s23128_s4 + $0x11f0] sm:$0xff]  ;;  %v18222_v44 = vld [vmem:[%s23128_s4 + $0x11b8] sm:$0xff] }
 0xad7   : > { %12639 = vmatprep.subr.bf16.mxu1 %v19156_v57  ;;  %v18230_v57 = vld [vmem:[%s23128_s4 + $0x11f8] sm:$0xff]  ;;  %v18742_v62 = vcombine.high %v18221_v49, %v18229_v9 }
 0xad8   : > { %v18743_v4 = vcombine.low %v18222_v44, %v18230_v57 }
 0xad9   : > { %12558 = vmatpush1.bf16.msra.mxu0 %v19153_v51  ;;  %v18245_v51 = vld [vmem:[%s23128_s4 + $0x1270] sm:$0xff] }
 0xada   : > { %12640 = vmatpush1.bf16.msra.mxu1 %v19155_v6  ;;  %12559 = vmatprep.subr.bf16.mxu0 %v19170_v29  ;;  %v18238_v6 = vld [vmem:[%s23128_s4 + $0x1238] sm:$0xff]  ;;  %v18758_v8 = vcombine.high %v18237_v0, %v18245_v51 }
 0xadb   : > { %12641 = vmatprep.subr.bf16.mxu1 %v19172_v13  ;;  %v18246_v29 = vld [vmem:[%s23128_s4 + $0x1278] sm:$0xff]  ;;  %v18741_v13 = vcombine.low %v18221_v49, %v18229_v9 }
 0xadc   : > { %v18760_v1 = vcombine.high %v18238_v6, %v18246_v29  ;;  %v18759_v19 = vcombine.low %v18238_v6, %v18246_v29  ;;  %v18333_v29 = vld [vmem:[%s23128_s4 + $0x1530] sm:$0xff] }
 0xadd   : > { %12560 = vmatpush1.bf16.msra.mxu0 %v19169_v5  ;;  %v18261_v5 = vld [vmem:[%s23128_s4 + $0x12f0] sm:$0xff] }
 0xade   : > { %12642 = vmatpush1.bf16.msra.mxu1 %v19171_v2  ;;  %12561 = vmatprep.subr.bf16.mxu0 %v19186_v7  ;;  %v18254_v2 = vld [vmem:[%s23128_s4 + $0x12b8] sm:$0xff]  ;;  %v18774_v20 = vcombine.high %v18253_v34, %v18261_v5 }
 0xadf   : > { %12643 = vmatprep.subr.bf16.mxu1 %v19188_v26  ;;  %v18262_v7 = vld [vmem:[%s23128_s4 + $0x12f8] sm:$0xff]  ;;  %v18757_v26 = vcombine.low %v18237_v0, %v18245_v51 }
 0xae0   : > { %v18776_v22 = vcombine.high %v18254_v2, %v18262_v7  ;;  %v18775_v59 = vcombine.low %v18254_v2, %v18262_v7  ;;  %v18349_v7 = vld [vmem:[%s23128_s4 + $0x15b0] sm:$0xff] }
 0xae1   : > { %12562 = vmatpush1.bf16.msra.mxu0 %v19185_v28  ;;  %v18277_v28 = vld [vmem:[%s23128_s4 + $0x1370] sm:$0xff] }
 0xae2   : > { %12644 = vmatpush1.bf16.msra.mxu1 %v19187_v30  ;;  %12654 = vmatprep.subr.bf16.mxu0 %v18694_v10  ;;  %v18270_v30 = vld [vmem:[%s23128_s4 + $0x1338] sm:$0xff]  ;;  %v18790_v27 = vcombine.high %v18269_v53, %v18277_v28  ;;  %v18789_v32 = vcombine.low %v18269_v53, %v18277_v28 }
 0xae3   : > { %12736 = vmatprep.subr.bf16.mxu1 %v18696_v24  ;;  %v18278_v10 = vld [vmem:[%s23128_s4 + $0x1378] sm:$0xff]  ;;  %v18773_v24 = vcombine.low %v18253_v34, %v18261_v5 }
 0xae4   : > { %12564 = vmatmul.mubr.bf16.vlgmr.msra.gmra.mrb[64].mxu0 %v24637_v39  ;;  %v18791_v16 = vcombine.low %v18270_v30, %v18278_v10 }
 0xae5   : > { %12646 = vmatmul.mubr.bf16.vlgmr.msra.gmra.mrb[64].mxu1 %v24637_v39  ;;  %12655 = vmatpush1.bf16.msra.mxu0 %v18693_v58  ;;  %v18792_v58 = vcombine.high %v18270_v30, %v18278_v10  ;;  %v18365_v10 = vld [vmem:[%s23128_s4 + $0x1630] sm:$0xff] }
 0xae6   : > { %12686 = vmatprep.mubr.bf16.mxu0 %v24559_v47  ;;  %12737 = vmatpush1.bf16.msra.mxu1 %v18695_v63  ;;  %v18286_v63 = vld [vmem:[%s23128_s4 + $0x13b8] sm:$0xff] }
 0xae7   : > { %12768 = vmatprep.mubr.bf16.mxu1 %v24559_v47  ;;  %12656 = vmatprep.subr.bf16.mxu0 %v18710_v48  ;;  %v18744_v47 = vcombine.high %v18222_v44, %v18230_v57  ;;  %v18294_v48 = vld [vmem:[%s23128_s4 + $0x13f8] sm:$0xff]  ;;  %v18317_v57 = vld [vmem:[%s23128_s4 + $0x14b0] sm:$0xff] }
 0xae8   : > { %12738 = vmatprep.subr.bf16.mxu1 %v18712_v36  ;;  %v18806_v36 = vcombine.high %v18285_v12, %v18293_v41  ;;  %v18808_v18 = vcombine.high %v18286_v63, %v18294_v48  ;;  %v18807_v49 = vcombine.low %v18286_v63, %v18294_v48  ;;  %v18381_v48 = vld [vmem:[%s23128_s4 + $0x16b0] sm:$0xff] }
 0xae9   : > { %12657 = vmatpush1.bf16.msra.mxu0 %v18709_v55  ;;  %v18309_v55 = vld [vmem:[%s23128_s4 + $0x1470] sm:$0xff] }
 0xaea   : > { %12739 = vmatpush1.bf16.msra.mxu1 %v18711_v15  ;;  %12658 = vmatprep.subr.bf16.mxu0 %v18726_v33  ;;  %v18302_v15 = vld [vmem:[%s23128_s4 + $0x1438] sm:$0xff]  ;;  %v18822_v9 = vcombine.high %v18301_v31, %v18309_v55 }
 0xaeb   : > { %12740 = vmatprep.subr.bf16.mxu1 %v18728_v42  ;;  %v18310_v33 = vld [vmem:[%s23128_s4 + $0x1478] sm:$0xff]  ;;  %v18805_v42 = vcombine.low %v18285_v12, %v18293_v41 }
 0xaec   : > { %v18824_v44 = vcombine.high %v18302_v15, %v18310_v33  ;;  %v18823_v0 = vcombine.low %v18302_v15, %v18310_v33  ;;  %v18397_v33 = vld [vmem:[%s23128_s4 + $0x1730] sm:$0xff] }
 0xaed   : > { %12659 = vmatpush1.bf16.msra.mxu0 %v18725_v54  ;;  %v18325_v54 = vld [vmem:[%s23128_s4 + $0x14f0] sm:$0xff] }
 0xaee   : > { %12741 = vmatpush1.bf16.msra.mxu1 %v18727_v61  ;;  %12660 = vmatprep.subr.bf16.mxu0 %v18742_v62  ;;  %v18318_v61 = vld [vmem:[%s23128_s4 + $0x14b8] sm:$0xff]  ;;  %v18838_v51 = vcombine.high %v18317_v57, %v18325_v54 }
 0xaef   : > { %12742 = vmatprep.subr.bf16.mxu1 %v18744_v47  ;;  %v18326_v62 = vld [vmem:[%s23128_s4 + $0x14f8] sm:$0xff]  ;;  %v18821_v47 = vcombine.low %v18301_v31, %v18309_v55 }
 0xaf0   : > { %v18840_v6 = vcombine.high %v18318_v61, %v18326_v62  ;;  %v18839_v34 = vcombine.low %v18318_v61, %v18326_v62  ;;  %v18413_v62 = vld [vmem:[%s23128_s4 + $0x17b0] sm:$0xff] }
 0xaf1   : > { %12661 = vmatpush1.bf16.msra.mxu0 %v18741_v13  ;;  %v18341_v13 = vld [vmem:[%s23128_s4 + $0x1570] sm:$0xff] }
 0xaf2   : > { %12743 = vmatpush1.bf16.msra.mxu1 %v18743_v4  ;;  %12662 = vmatprep.subr.bf16.mxu0 %v18758_v8  ;;  %v18334_v4 = vld [vmem:[%s23128_s4 + $0x1538] sm:$0xff]  ;;  %v18854_v5 = vcombine.high %v18333_v29, %v18341_v13 }
 0xaf3   : > { %12744 = vmatprep.subr.bf16.mxu1 %v18760_v1  ;;  %v18342_v8 = vld [vmem:[%s23128_s4 + $0x1578] sm:$0xff]  ;;  %v18837_v1 = vcombine.low %v18317_v57, %v18325_v54 }
 0xaf4   : > { %v18856_v2 = vcombine.high %v18334_v4, %v18342_v8  ;;  %v18855_v53 = vcombine.low %v18334_v4, %v18342_v8  ;;  %v18429_v8 = vld [vmem:[%s23128_s4 + $0x1830] sm:$0xff] }
 0xaf5   : > { %12663 = vmatpush1.bf16.msra.mxu0 %v18757_v26  ;;  %v18357_v26 = vld [vmem:[%s23128_s4 + $0x15f0] sm:$0xff] }
 0xaf6   : > { %12745 = vmatpush1.bf16.msra.mxu1 %v18759_v19  ;;  %12664 = vmatprep.subr.bf16.mxu0 %v18774_v20  ;;  %v18350_v19 = vld [vmem:[%s23128_s4 + $0x15b8] sm:$0xff]  ;;  %v18870_v28 = vcombine.high %v18349_v7, %v18357_v26 }
 0xaf7   : > { %12746 = vmatprep.subr.bf16.mxu1 %v18776_v22  ;;  %v18358_v20 = vld [vmem:[%s23128_s4 + $0x15f8] sm:$0xff]  ;;  %v18853_v22 = vcombine.low %v18333_v29, %v18341_v13 }
 0xaf8   : > { %v18872_v30 = vcombine.high %v18350_v19, %v18358_v20  ;;  %v18871_v12 = vcombine.low %v18350_v19, %v18358_v20  ;;  %v18445_v20 = vld [vmem:[%s23128_s4 + $0x18b0] sm:$0xff] }
 0xaf9   : > { %12665 = vmatpush1.bf16.msra.mxu0 %v18773_v24  ;;  %v18373_v24 = vld [vmem:[%s23128_s4 + $0x1670] sm:$0xff] }
 0xafa   : > { %12747 = vmatpush1.bf16.msra.mxu1 %v18775_v59  ;;  %12666 = vmatprep.subr.bf16.mxu0 %v18790_v27  ;;  %v18366_v59 = vld [vmem:[%s23128_s4 + $0x1638] sm:$0xff]  ;;  %v18886_v41 = vcombine.high %v18365_v10, %v18373_v24 }
 0xafb   : > { %12748 = vmatprep.subr.bf16.mxu1 %v18792_v58  ;;  %v18374_v27 = vld [vmem:[%s23128_s4 + $0x1678] sm:$0xff]  ;;  %v18869_v58 = vcombine.low %v18349_v7, %v18357_v26 }
 0xafc   : > { %v18888_v63 = vcombine.high %v18366_v59, %v18374_v27  ;;  %v18887_v31 = vcombine.low %v18366_v59, %v18374_v27  ;;  %v18461_v59 = vld [vmem:[%s23128_s4 + $0x1930] sm:$0xff] }
 0xafd   : > { %12667 = vmatpush1.bf16.msra.mxu0 %v18789_v32  ;;  %v18389_v32 = vld [vmem:[%s23128_s4 + $0x16f0] sm:$0xff] }
 0xafe   : > { %12749 = vmatpush1.bf16.msra.mxu1 %v18791_v16  ;;  %12668 = vmatprep.subr.bf16.mxu0 %v18806_v36  ;;  %v18382_v16 = vld [vmem:[%s23128_s4 + $0x16b8] sm:$0xff]  ;;  %v18902_v55 = vcombine.high %v18381_v48, %v18389_v32  ;;  %v18469_v27 = vld [vmem:[%s23128_s4 + $0x1970] sm:$0xff] }
 0xaff   : > { %12750 = vmatprep.subr.bf16.mxu1 %v18808_v18  ;;  %v18390_v36 = vld [vmem:[%s23128_s4 + $0x16f8] sm:$0xff]  ;;  %v18885_v18 = vcombine.low %v18365_v10, %v18373_v24 }
 0xb00   : > { %v18904_v15 = vcombine.high %v18382_v16, %v18390_v36  ;;  %v18903_v57 = vcombine.low %v18382_v16, %v18390_v36  ;;  %v18477_v36 = vld [vmem:[%s23128_s4 + $0x19b0] sm:$0xff] }
 0xb01   : > { %12669 = vmatpush1.bf16.msra.mxu0 %v18805_v42  ;;  %v18405_v42 = vld [vmem:[%s23128_s4 + $0x1770] sm:$0xff] }
 0xb02   : > { %12751 = vmatpush1.bf16.msra.mxu1 %v18807_v49  ;;  %12670 = vmatprep.subr.bf16.mxu0 %v18822_v9  ;;  %v18398_v49 = vld [vmem:[%s23128_s4 + $0x1738] sm:$0xff]  ;;  %v18918_v54 = vcombine.high %v18397_v33, %v18405_v42 }
 0xb03   : > { %12752 = vmatprep.subr.bf16.mxu1 %v18824_v44  ;;  %v18406_v9 = vld [vmem:[%s23128_s4 + $0x1778] sm:$0xff]  ;;  %v18901_v44 = vcombine.low %v18381_v48, %v18389_v32  ;;  %v18982_v32 = vcombine.high %v18461_v59, %v18469_v27 }
 0xb04   : > { %v18920_v61 = vcombine.high %v18398_v49, %v18406_v9  ;;  %v18919_v29 = vcombine.low %v18398_v49, %v18406_v9  ;;  %v18501_v49 = vld [vmem:[%s23128_s4 + $0x1a70] sm:$0xff]  ;;  %v18494_v9 = vld [vmem:[%s23128_s4 + $0x1a38] sm:$0xff] }
 0xb05   : > { %12671 = vmatpush1.bf16.msra.mxu0 %v18821_v47  ;;  %v18421_v47 = vld [vmem:[%s23128_s4 + $0x17f0] sm:$0xff] }
 0xb06   : > { %12753 = vmatpush1.bf16.msra.mxu1 %v18823_v0  ;;  %12672 = vmatprep.subr.bf16.mxu0 %v18838_v51  ;;  %v18414_v0 = vld [vmem:[%s23128_s4 + $0x17b8] sm:$0xff]  ;;  %v18934_v13 = vcombine.high %v18413_v62, %v18421_v47 }
 0xb07   : > { %12754 = vmatprep.subr.bf16.mxu1 %v18840_v6  ;;  %v18422_v51 = vld [vmem:[%s23128_s4 + $0x17f8] sm:$0xff]  ;;  %v18917_v6 = vcombine.low %v18397_v33, %v18405_v42  ;;  %v18493_v42 = vld [vmem:[%s23128_s4 + $0x1a30] sm:$0xff] }
 0xb08   : > { %v18936_v4 = vcombine.high %v18414_v0, %v18422_v51  ;;  %v18935_v7 = vcombine.low %v18414_v0, %v18422_v51  ;;  %v18517_v0 = vld [vmem:[%s23128_s4 + $0x1af0] sm:$0xff]  ;;  %v18510_v51 = vld [vmem:[%s23128_s4 + $0x1ab8] sm:$0xff] }
 0xb09   : > { %12673 = vmatpush1.bf16.msra.mxu0 %v18837_v1  ;;  %v18437_v1 = vld [vmem:[%s23128_s4 + $0x1870] sm:$0xff] }
 0xb0a   : > { %12755 = vmatpush1.bf16.msra.mxu1 %v18839_v34  ;;  %12674 = vmatprep.subr.bf16.mxu0 %v18854_v5  ;;  %v18430_v34 = vld [vmem:[%s23128_s4 + $0x1838] sm:$0xff]  ;;  %v18950_v26 = vcombine.high %v18429_v8, %v18437_v1 }
 0xb0b   : > { %12756 = vmatprep.subr.bf16.mxu1 %v18856_v2  ;;  %v18438_v5 = vld [vmem:[%s23128_s4 + $0x1878] sm:$0xff]  ;;  %v18933_v2 = vcombine.low %v18413_v62, %v18421_v47  ;;  %v18509_v47 = vld [vmem:[%s23128_s4 + $0x1ab0] sm:$0xff] }
 0xb0c   : > { %v18952_v19 = vcombine.high %v18430_v34, %v18438_v5  ;;  %v18951_v10 = vcombine.low %v18430_v34, %v18438_v5  ;;  %v18533_v34 = vld [vmem:[%s23128_s4 + $0x1b70] sm:$0xff]  ;;  %v18526_v5 = vld [vmem:[%s23128_s4 + $0x1b38] sm:$0xff] }
 0xb0d   : > { %12675 = vmatpush1.bf16.msra.mxu0 %v18853_v22  ;;  %v18453_v22 = vld [vmem:[%s23128_s4 + $0x18f0] sm:$0xff] }
 0xb0e   : > { %12757 = vmatpush1.bf16.msra.mxu1 %v18855_v53  ;;  %12676 = vmatprep.subr.bf16.mxu0 %v18870_v28  ;;  %v18949_v53 = vcombine.low %v18429_v8, %v18437_v1  ;;  %v18446_v28 = vld [vmem:[%s23128_s4 + $0x18b8] sm:$0xff]  ;;  %v18966_v24 = vcombine.high %v18445_v20, %v18453_v22  ;;  %v18525_v1 = vld [vmem:[%s23128_s4 + $0x1b30] sm:$0xff] }
 0xb0f   : > { %12758 = vmatprep.subr.bf16.mxu1 %v18872_v30  ;;  %v18454_v30 = vld [vmem:[%s23128_s4 + $0x18f8] sm:$0xff] }
 0xb10   : > { %v18967_v48 = vcombine.low %v18446_v28, %v18454_v30 }
 0xb11   : > { %12677 = vmatpush1.bf16.msra.mxu0 %v18869_v58  ;;  %v18968_v58 = vcombine.high %v18446_v28, %v18454_v30  ;;  %v18549_v28 = vld [vmem:[%s23128_s4 + $0x1bf0] sm:$0xff] }
 0xb12   : > { %12759 = vmatpush1.bf16.msra.mxu1 %v18871_v12  ;;  %12678 = vmatprep.subr.bf16.mxu0 %v18886_v41  ;;  %v18462_v12 = vld [vmem:[%s23128_s4 + $0x1938] sm:$0xff] }
 0xb13   : > { %12760 = vmatprep.subr.bf16.mxu1 %v18888_v63  ;;  %v18470_v41 = vld [vmem:[%s23128_s4 + $0x1978] sm:$0xff]  ;;  %v18965_v63 = vcombine.low %v18445_v20, %v18453_v22 }
 0xb14   : > { %v18984_v16 = vcombine.high %v18462_v12, %v18470_v41 }
 0xb15   : > { %12679 = vmatpush1.bf16.msra.mxu0 %v18885_v18  ;;  %v18485_v18 = vld [vmem:[%s23128_s4 + $0x19f0] sm:$0xff] }
 0xb16   : > { %12761 = vmatpush1.bf16.msra.mxu1 %v18887_v31  ;;  %12680 = vmatprep.subr.bf16.mxu0 %v18902_v55  ;;  %v18478_v31 = vld [vmem:[%s23128_s4 + $0x19b8] sm:$0xff]  ;;  %v18981_v55 = vcombine.low %v18461_v59, %v18469_v27  ;;  %v18998_v33 = vcombine.high %v18477_v36, %v18485_v18 }
 0xb17   : > { %12762 = vmatprep.subr.bf16.mxu1 %v18904_v15  ;;  %v18983_v15 = vcombine.low %v18462_v12, %v18470_v41  ;;  %v18550_v59 = vld [vmem:[%s23128_s4 + $0x1bf8] sm:$0xff]  ;;  %v19045_v12 = vcombine.low %v18525_v1, %v18533_v34 }
 0xb19   : > { %12681 = vmatpush1.bf16.msra.mxu0 %v18901_v44  ;;  %v18502_v44 = vld [vmem:[%s23128_s4 + $0x1a78] sm:$0xff] }
 0xb1a   : > { %12763 = vmatpush1.bf16.msra.mxu1 %v18903_v57  ;;  %12682 = vmatprep.subr.bf16.mxu0 %v18918_v54  ;;  %v18997_v57 = vcombine.low %v18477_v36, %v18485_v18  ;;  %v19016_v62 = vcombine.high %v18494_v9, %v18502_v44  ;;  %v18557_v18 = vld [vmem:[%s23128_s4 + $0x1c30] sm:$0xff] }
 0xb1b   : > { %12764 = vmatprep.subr.bf16.mxu1 %v18920_v61  ;;  %v19014_v61 = vcombine.high %v18493_v42, %v18501_v49 }
 0xb1d   : > { %12683 = vmatpush1.bf16.msra.mxu0 %v18917_v6  ;;  %v18518_v6 = vld [vmem:[%s23128_s4 + $0x1af8] sm:$0xff] }
 0xb1e   : > { %12765 = vmatpush1.bf16.msra.mxu1 %v18919_v29  ;;  %12684 = vmatprep.subr.bf16.mxu0 %v18934_v13  ;;  %v19013_v29 = vcombine.low %v18493_v42, %v18501_v49  ;;  %v19015_v13 = vcombine.low %v18494_v9, %v18502_v44  ;;  %v19032_v8 = vcombine.high %v18510_v51, %v18518_v6  ;;  %v18573_v49 = vld [vmem:[%s23128_s4 + $0x1cb0] sm:$0xff]  ;;  %v18574_v44 = vld [vmem:[%s23128_s4 + $0x1cb8] sm:$0xff] }
 0xb1f   : > { %12766 = vmatprep.subr.bf16.mxu1 %v18936_v4  ;;  %v19030_v4 = vcombine.high %v18509_v47, %v18517_v0  ;;  %v18581_v9 = vld [vmem:[%s23128_s4 + $0x1cf0] sm:$0xff] }
 0xb21   : > { %12685 = vmatpush1.bf16.msra.mxu0 %v18933_v2  ;;  %v18534_v2 = vld [vmem:[%s23128_s4 + $0x1b78] sm:$0xff] }
 0xb22   : > { %12767 = vmatpush1.bf16.msra.mxu1 %v18935_v7  ;;  %12695 = vmatprep.subr.bf16.mxu0 %v18950_v26  ;;  %v19029_v7 = vcombine.low %v18509_v47, %v18517_v0  ;;  %v19031_v26 = vcombine.low %v18510_v51, %v18518_v6  ;;  %v19048_v22 = vcombine.high %v18526_v5, %v18534_v2  ;;  %v18589_v0 = vld [vmem:[%s23128_s4 + $0x1d30] sm:$0xff]  ;;  %v18590_v6 = vld [vmem:[%s23128_s4 + $0x1d38] sm:$0xff] }
 0xb23   : > { %12777 = vmatprep.subr.bf16.mxu1 %v18952_v19  ;;  %v19046_v19 = vcombine.high %v18525_v1, %v18533_v34  ;;  %v18597_v51 = vld [vmem:[%s23128_s4 + $0x1d70] sm:$0xff] }
 0xb24   : > { %12687 = vmatmul.mubr.bf16.vlgmr.msra.gmra.mrb[68].mxu0 %v24561_v11  ;;  %v18605_v34 = vld [vmem:[%s23128_s4 + $0x1db0] sm:$0xff] }
 0xb25   : > { %12769 = vmatmul.mubr.bf16.vlgmr.msra.gmra.mrb[68].mxu1 %v24561_v11  ;;  %12696 = vmatpush1.bf16.msra.mxu0 %v18949_v53  ;;  %v18486_v11 = vld [vmem:[%s23128_s4 + $0x19f8] sm:$0xff]  ;;  %v18541_v53 = vld [vmem:[%s23128_s4 + $0x1bb0] sm:$0xff] }
 0xb26   : > { %12727 = vmatprep.mubr.bf16.mxu0 %v24571_v3  ;;  %12778 = vmatpush1.bf16.msra.mxu1 %v18951_v10  ;;  %v18999_v54 = vcombine.low %v18478_v31, %v18486_v11 }
 0xb27   : > { %12809 = vmatprep.mubr.bf16.mxu1 %v24571_v3  ;;  %12697 = vmatprep.subr.bf16.mxu0 %v18966_v24  ;;  %v19000_v3 = vcombine.high %v18478_v31, %v18486_v11  ;;  %v18542_v24 = vld [vmem:[%s23128_s4 + $0x1bb8] sm:$0xff]  ;;  %v18565_v31 = vld [vmem:[%s23128_s4 + $0x1c70] sm:$0xff] }
 0xb28   : > { %12779 = vmatprep.subr.bf16.mxu1 %v18968_v58  ;;  %v19064_v36 = vcombine.high %v18542_v24, %v18550_v59  ;;  %v18558_v11 = vld [vmem:[%s23128_s4 + $0x1c38] sm:$0xff] }
 0xb29   : > { %12698 = vmatpush1.bf16.msra.mxu0 %v18965_v63 }
 0xb2a   : > { %12780 = vmatpush1.bf16.msra.mxu1 %v18967_v48  ;;  %12699 = vmatprep.subr.bf16.mxu0 %v18982_v32  ;;  %v19047_v48 = vcombine.low %v18526_v5, %v18534_v2  ;;  %v19062_v32 = vcombine.high %v18541_v53, %v18549_v28  ;;  %v18613_v5 = vld [vmem:[%s23128_s4 + $0x1df0] sm:$0xff]  ;;  %v18606_v2 = vld [vmem:[%s23128_s4 + $0x1db8] sm:$0xff] }
 0xb2b   : > { %12781 = vmatprep.subr.bf16.mxu1 %v18984_v16 }
 0xb2d   : > { %12700 = vmatpush1.bf16.msra.mxu0 %v18981_v55  ;;  %v18566_v55 = vld [vmem:[%s23128_s4 + $0x1c78] sm:$0xff] }
 0xb2e   : > { %12782 = vmatpush1.bf16.msra.mxu1 %v18983_v15  ;;  %12701 = vmatprep.subr.bf16.mxu0 %v18998_v33  ;;  %v19061_v15 = vcombine.low %v18541_v53, %v18549_v28  ;;  %v19063_v33 = vcombine.low %v18542_v24, %v18550_v59  ;;  %v19080_v42 = vcombine.high %v18558_v11, %v18566_v55  ;;  %v18621_v28 = vld [vmem:[%s23128_s4 + $0x1e30] sm:$0xff]  ;;  %v18622_v59 = vld [vmem:[%s23128_s4 + $0x1e38] sm:$0xff] }
 0xb2f   : > { %12783 = vmatprep.subr.bf16.mxu1 %v19000_v3  ;;  %v19078_v3 = vcombine.high %v18557_v18, %v18565_v31  ;;  %v18629_v24 = vld [vmem:[%s23128_s4 + $0x1e70] sm:$0xff] }
 0xb31   : > { %12702 = vmatpush1.bf16.msra.mxu0 %v18997_v57  ;;  %v18582_v57 = vld [vmem:[%s23128_s4 + $0x1cf8] sm:$0xff] }
 0xb32   : > { %12784 = vmatpush1.bf16.msra.mxu1 %v18999_v54  ;;  %12703 = vmatprep.subr.bf16.mxu0 %v19014_v61  ;;  %v19077_v54 = vcombine.low %v18557_v18, %v18565_v31  ;;  %v19079_v61 = vcombine.low %v18558_v11, %v18566_v55  ;;  %v19096_v47 = vcombine.high %v18574_v44, %v18582_v57  ;;  %v18646_v18 = vld [vmem:[%s23128_s4 + $0x1ef8] sm:$0xff] }
 0xb33   : > { %12785 = vmatprep.subr.bf16.mxu1 %v19016_v62  ;;  %v19094_v62 = vcombine.high %v18573_v49, %v18581_v9  ;;  %v19141_v31 = vcombine.low %v18621_v28, %v18629_v24 }
 0xb35   : > { %12704 = vmatpush1.bf16.msra.mxu0 %v19013_v29  ;;  %v18598_v29 = vld [vmem:[%s23128_s4 + $0x1d78] sm:$0xff] }
 0xb36   : > { %12786 = vmatpush1.bf16.msra.mxu1 %v19015_v13  ;;  %12705 = vmatprep.subr.bf16.mxu0 %v19030_v4  ;;  %v19093_v13 = vcombine.low %v18573_v49, %v18581_v9  ;;  %v19095_v4 = vcombine.low %v18574_v44, %v18582_v57  ;;  %v19112_v1 = vcombine.high %v18590_v6, %v18598_v29  ;;  %v18662_v49 = vld [vmem:[%s23128_s4 + $0x1f78] sm:$0xff]  ;;  %v25052_v9 = vld [vmem:[%s23741_s30 + $0x10] sm:$0xff] }
 0xb37   : > { %v25011_v20 = vpop.f32.mrb[60].mxu0  ;;  %12787 = vmatprep.subr.bf16.mxu1 %v19032_v8  ;;  %v19110_v8 = vcombine.high %v18589_v0, %v18597_v51 }
 0xb38   : > { %v25015_v30 = vpop.f32.mrb[60].mxu1  ;;  %v25017_v10 = vpop.f32.mrb[61].mxu0 }
 0xb39   : > { %v25021_v27 = vpop.f32.mrb[61].mxu1  ;;  %v12405_v58 = vpop.f32.mrb[62].mxu0  ;;  %12706 = vmatpush1.bf16.msra.mxu0 %v19029_v7  ;;  %v18614_v7 = vld [vmem:[%s23128_s4 + $0x1df8] sm:$0xff] }
 0xb3a   : > { %v12487_v41 = vpop.f32.mrb[62].mxu1  ;;  %12788 = vmatpush1.bf16.msra.mxu1 %v19031_v26  ;;  %v12406_v63 = vpop.f32.mrb[63].mxu0  ;;  %12707 = vmatprep.subr.bf16.mxu0 %v19046_v19  ;;  %v19109_v26 = vcombine.low %v18589_v0, %v18597_v51  ;;  %v19111_v19 = vcombine.low %v18590_v6, %v18598_v29  ;;  %v19128_v53 = vcombine.high %v18606_v2, %v18614_v7  ;;  %v18630_v58 = vld [vmem:[%s23128_s4 + $0x1e78] sm:$0xff] }
 0xb3b   : > { %v12488_v16 = vpop.f32.mrb[63].mxu1  ;;  %12789 = vmatprep.subr.bf16.mxu1 %v19048_v22  ;;  %v19126_v22 = vcombine.high %v18605_v34, %v18613_v5  ;;  %v19127_v41 = vcombine.low %v18606_v2, %v18614_v7  ;;  %v19142_v63 = vcombine.high %v18621_v28, %v18629_v24  ;;  %v19143_v11 = vcombine.low %v18622_v59, %v18630_v58  ;;  %v18670_v51 = vld [vmem:[%s23128_s4 + $0x1fb8] sm:$0xff]  ;;  %v21244_v28 = vld [vmem:[%s23612_s6 + $0x1000] ss:$16 sps:$4 sm:$0xff]  }
 0xb3c   : > { %v18645_v16 = vld [vmem:[%s23128_s4 + $0x1ef0] sm:$0xff]  ;;  %v9529_v0 = vrot.slane %v25052_v9, %v23101_v37  ;;  %v18678_v6 = vld [vmem:[%s23128_s4 + $0x1ff8] sm:$0xff]  ;;  %v9537_v29 = vrot.slane %v25052_v9, %v23109_v43 }
 0xb3d   : > { %12708 = vmatpush1.bf16.msra.mxu0 %v19045_v12  ;;  %v19125_v12 = vcombine.low %v18605_v34, %v18613_v5  ;;  %v19191_v7 = vcombine.low %v18670_v51, %v18678_v6 }
 0xb3e   : > { %12790 = vmatpush1.bf16.msra.mxu1 %v19047_v48  ;;  %12709 = vmatprep.subr.bf16.mxu0 %v19062_v32  ;;  %v19144_v48 = vcombine.high %v18622_v59, %v18630_v58  ;;  %v18637_v32 = vld [vmem:[%s23128_s4 + $0x1eb0] sm:$0xff]  ;;  %v20248_v34 = vadd.f32 %v24873_v60, %v9529_v0  ;;  %v20250_v5 = vadd.f32 %v24875_v14, %v9537_v29 }
 0xb3f   : > { %12791 = vmatprep.subr.bf16.mxu1 %v19064_v36  ;;  %v18638_v36 = vld [vmem:[%s23128_s4 + $0x1eb8] sm:$0xff]  ;;  %v19158_v55 = vcombine.high %v18637_v32, %v18645_v16  ;;  %v19157_v44 = vcombine.low %v18637_v32, %v18645_v16  ;;  %v21247_v60 = vld [vmem:[%s23612_s6 + $0x1200] ss:$16 sps:$4 sm:$0xff]   ;;  %v21252_v14 = vld [vmem:[%s23612_s6 + $0x1024] ss:$16 sps:$4 sm:$0xff]  }
 0xb40   : > { %v19159_v57 = vcombine.low %v18638_v36, %v18646_v18  ;;  %v21255_v59 = vld [vmem:[%s23612_s6 + $0x1224] ss:$16 sps:$4 sm:$0xff]   ;;  %v21259_v32 = vld [vmem:[%s23612_s6 + $0x1240] ss:$16 sps:$4 sm:$0xff]  }
 0xb41   : > { %12710 = vmatpush1.bf16.msra.mxu0 %v19061_v15  ;;  %v19160_v15 = vcombine.high %v18638_v36, %v18646_v18  ;;  %v21264_v16 = vld [vmem:[%s23612_s6 + $0x1064] ss:$16 sps:$4 sm:$0xff]   ;;  %v21262_v18 = vld [vmem:[%s23612_s6 + $0x1060] ss:$16 sps:$4 sm:$0xff]  }
 0xb42   : > { %12792 = vmatpush1.bf16.msra.mxu1 %v19063_v33  ;;  %12711 = vmatprep.subr.bf16.mxu0 %v19078_v3  ;;  %v18653_v33 = vld [vmem:[%s23128_s4 + $0x1f30] sm:$0xff] }
 0xb43   : > { %12793 = vmatprep.subr.bf16.mxu1 %v19080_v42  ;;  %v18661_v3 = vld [vmem:[%s23128_s4 + $0x1f70] sm:$0xff]  ;;  %v18654_v42 = vld [vmem:[%s23128_s4 + $0x1f38] sm:$0xff] }
 0xb44   : > { %v21267_v36 = vld [vmem:[%s23612_s6 + $0x1264] ss:$16 sps:$4 sm:$0xff]  }
 0xb45   : > { %12712 = vmatpush1.bf16.msra.mxu0 %v19077_v54  ;;  %v19174_v54 = vcombine.high %v18653_v33, %v18661_v3  ;;  %v21291_v0 = vld [vmem:[%s23612_s6 + $0x12e4] ss:$16 sps:$4 sm:$0xff]  }
 0xb46   : > { %12794 = vmatpush1.bf16.msra.mxu1 %v19079_v61  ;;  %12713 = vmatprep.subr.bf16.mxu0 %v19094_v62  ;;  %v19176_v61 = vcombine.high %v18654_v42, %v18662_v49  ;;  %v18669_v62 = vld [vmem:[%s23128_s4 + $0x1fb0] sm:$0xff] }
 0xb47   : > { %12795 = vmatprep.subr.bf16.mxu1 %v19096_v47  ;;  %v18677_v47 = vld [vmem:[%s23128_s4 + $0x1ff0] sm:$0xff] }
 0xb48   : > { %v19189_v2 = vcombine.low %v18669_v62, %v18677_v47  ;;  %v21294_v29 = vld [vmem:[%s23612_s6 + $0x1104] ss:$16 sps:$4 sm:$0xff]  }
 0xb49   : > { %12714 = vmatpush1.bf16.msra.mxu0 %v19093_v13  ;;  %v19173_v13 = vcombine.low %v18653_v33, %v18661_v3  ;;  %v21271_v33 = vld [vmem:[%s23612_s6 + $0x1280] ss:$16 sps:$4 sm:$0xff]   ;;  %v21276_v3 = vld [vmem:[%s23612_s6 + $0x10a4] ss:$16 sps:$4 sm:$0xff]  }
 0xb4a   : > { %12796 = vmatpush1.bf16.msra.mxu1 %v19095_v4  ;;  %12715 = vmatprep.subr.bf16.mxu0 %v19110_v8  ;;  %v19175_v4 = vcombine.low %v18654_v42, %v18662_v49  ;;  %v19190_v8 = vcombine.high %v18669_v62, %v18677_v47  ;;  %v21279_v42 = vld [vmem:[%s23612_s6 + $0x12a4] ss:$16 sps:$4 sm:$0xff]   ;;  %v21274_v49 = vld [vmem:[%s23612_s6 + $0x10a0] ss:$16 sps:$4 sm:$0xff]  }
 0xb4b   : > { %12797 = vmatprep.subr.bf16.mxu1 %v19112_v1  ;;  %v19192_v1 = vcombine.high %v18670_v51, %v18678_v6  ;;  %v21283_v62 = vld [vmem:[%s23612_s6 + $0x12c0] ss:$16 sps:$4 sm:$0xff]   ;;  %v21288_v47 = vld [vmem:[%s23612_s6 + $0x10e4] ss:$16 sps:$4 sm:$0xff]  }
 0xb4c   : > { %v21286_v51 = vld [vmem:[%s23612_s6 + $0x10e0] ss:$16 sps:$4 sm:$0xff]  }
 0xb4d   : > { %12716 = vmatpush1.bf16.msra.mxu0 %v19109_v26  ;;  %v21246_v26 = vld [vmem:[%s23612_s6 + $0x1004] ss:$16 sps:$4 sm:$0xff]   ;;  %v21289_v6 = vld [vmem:[%s23612_s6 + $0x12e0] ss:$16 sps:$4 sm:$0xff]  }
 0xb4e   : > { %12798 = vmatpush1.bf16.msra.mxu1 %v19111_v19  ;;  %12717 = vmatprep.subr.bf16.mxu0 %v19126_v22  ;;  %v21249_v19 = vld [vmem:[%s23612_s6 + $0x1204] ss:$16 sps:$4 sm:$0xff]   ;;  %v12819_v22 = vmax.f32 %v20248_v34, 0.0 }
 0xb4f   : > { %12799 = vmatprep.subr.bf16.mxu1 %v19128_v53  ;;  %v12821_v53 = vmax.f32 %v20250_v5, 0.0  ;;  %v21303_v34 = vld [vmem:[%s23612_s6 + $0x1324] ss:$16 sps:$4 sm:$0xff]   ;;  %v21298_v5 = vld [vmem:[%s23612_s6 + $0x1120] ss:$16 sps:$4 sm:$0xff]  }
 0xb50   : > { %v25069_v24 = vpack.c.bf16 %v12819_v22, %v12819_v22  ;;  %v21307_v22 = vld [vmem:[%s23612_s6 + $0x1340] ss:$16 sps:$4 sm:$0xff]  }
 0xb51   : > { %12718 = vmatpush1.bf16.msra.mxu0 %v19125_v12  ;;  %v25073_v58 = vpack.c.bf16 %v12821_v53, %v12821_v53  ;;  %v21250_v12 = vld [vmem:[%s23612_s6 + $0x1020] ss:$16 sps:$4 sm:$0xff]   ;;  %v21312_v53 = vld [vmem:[%s23612_s6 + $0x1164] ss:$16 sps:$4 sm:$0xff]  }
 0xb52   : > { %12800 = vmatpush1.bf16.msra.mxu1 %v19127_v41  ;;  %12719 = vmatprep.subr.bf16.mxu0 %v19142_v63  ;;  %v21253_v41 = vld [vmem:[%s23612_s6 + $0x1220] ss:$16 sps:$4 sm:$0xff]   ;;  %v21258_v63 = vld [vmem:[%s23612_s6 + $0x1044] ss:$16 sps:$4 sm:$0xff]  }
 0xb53   : > { %12801 = vmatprep.subr.bf16.mxu1 %v19144_v48  ;;  %v21261_v48 = vld [vmem:[%s23612_s6 + $0x1244] ss:$16 sps:$4 sm:$0xff]  }
 0xb55   : > { %12720 = vmatpush1.bf16.msra.mxu0 %v19141_v31  ;;  %v21265_v31 = vld [vmem:[%s23612_s6 + $0x1260] ss:$16 sps:$4 sm:$0xff]  }
 0xb56   : > { %12802 = vmatpush1.bf16.msra.mxu1 %v19143_v11  ;;  %12721 = vmatprep.subr.bf16.mxu0 %v19158_v55  ;;  %v21270_v11 = vld [vmem:[%s23612_s6 + $0x1084] ss:$16 sps:$4 sm:$0xff]  }
 0xb57   : > { %12803 = vmatprep.subr.bf16.mxu1 %v19160_v15  ;;  %v21273_v55 = vld [vmem:[%s23612_s6 + $0x1284] ss:$16 sps:$4 sm:$0xff]   ;;  %v21268_v15 = vld [vmem:[%s23612_s6 + $0x1080] ss:$16 sps:$4 sm:$0xff]  }
 0xb59   : > { %12722 = vmatpush1.bf16.msra.mxu0 %v19157_v44  ;;  %v21277_v44 = vld [vmem:[%s23612_s6 + $0x12a0] ss:$16 sps:$4 sm:$0xff]  }
 0xb5a   : > { %12804 = vmatpush1.bf16.msra.mxu1 %v19159_v57  ;;  %12723 = vmatprep.subr.bf16.mxu0 %v19174_v54  ;;  %v21282_v57 = vld [vmem:[%s23612_s6 + $0x10c4] ss:$16 sps:$4 sm:$0xff]  }
 0xb5b   : > { %12805 = vmatprep.subr.bf16.mxu1 %v19176_v61  ;;  %v21285_v54 = vld [vmem:[%s23612_s6 + $0x12c4] ss:$16 sps:$4 sm:$0xff]   ;;  %v21280_v61 = vld [vmem:[%s23612_s6 + $0x10c0] ss:$16 sps:$4 sm:$0xff]  }
 0xb5d   : > { %12724 = vmatpush1.bf16.msra.mxu0 %v19173_v13  ;;  %v21297_v13 = vld [vmem:[%s23612_s6 + $0x1304] ss:$16 sps:$4 sm:$0xff]  }
 0xb5e   : > { %12806 = vmatpush1.bf16.msra.mxu1 %v19175_v4  ;;  %12725 = vmatprep.subr.bf16.mxu0 %v19190_v8  ;;  %v21292_v4 = vld [vmem:[%s23612_s6 + $0x1100] ss:$16 sps:$4 sm:$0xff]  }
 0xb5f   : > { %12807 = vmatprep.subr.bf16.mxu1 %v19192_v1  ;;  %v21295_v8 = vld [vmem:[%s23612_s6 + $0x1300] ss:$16 sps:$4 sm:$0xff]   ;;  %v21300_v1 = vld [vmem:[%s23612_s6 + $0x1124] ss:$16 sps:$4 sm:$0xff]  }
 0xb61   : > { %12726 = vmatpush1.bf16.msra.mxu0 %v19189_v2  ;;  %v21301_v2 = vld [vmem:[%s23612_s6 + $0x1320] ss:$16 sps:$4 sm:$0xff]  }
 0xb62   : > { %12808 = vmatpush1.bf16.msra.mxu1 %v19191_v7  ;;  %15946 = vmatprep.subr.bf16.mxu0 %v21246_v26  ;;  %v21306_v7 = vld [vmem:[%s23612_s6 + $0x1144] ss:$16 sps:$4 sm:$0xff]  }
 0xb63   : > { %15987 = vmatprep.subr.bf16.mxu1 %v21249_v19  ;;  %v21309_v26 = vld [vmem:[%s23612_s6 + $0x1344] ss:$16 sps:$4 sm:$0xff]   ;;  %v21304_v19 = vld [vmem:[%s23612_s6 + $0x1140] ss:$16 sps:$4 sm:$0xff]  }
 0xb64   : > { %12728 = vmatmul.mubr.bf16.vlgmr.msra.gmra.mrb[68].mxu0 %v24637_v39 }
 0xb65   : > { %12810 = vmatmul.mubr.bf16.vlgmr.msra.gmra.mrb[68].mxu1 %v24637_v39  ;;  %15947 = vmatpush1.bf16.msra.mxu0 %v21244_v28  ;;  %v21256_v39 = vld [vmem:[%s23612_s6 + $0x1040] ss:$16 sps:$4 sm:$0xff]   ;;  %v21315_v28 = vld [vmem:[%s23612_s6 + $0x1364] ss:$16 sps:$4 sm:$0xff]  }
 0xb66   : > { %15978 = vmatprep.mubr.bf16.mxu0 %v25069_v24  ;;  %15988 = vmatpush1.bf16.msra.mxu1 %v21247_v60  ;;  %v21310_v60 = vld [vmem:[%s23612_s6 + $0x1160] ss:$16 sps:$4 sm:$0xff]  }
 0xb67   : > { %16019 = vmatprep.mubr.bf16.mxu1 %v25073_v58  ;;  %15948 = vmatprep.subr.bf16.mxu0 %v21252_v14  ;;  %v21313_v14 = vld [vmem:[%s23612_s6 + $0x1360] ss:$16 sps:$4 sm:$0xff]  }
 0xb68   : > { %15989 = vmatprep.subr.bf16.mxu1 %v21255_v59  ;;  %v21318_v59 = vld [vmem:[%s23612_s6 + $0x1184] ss:$16 sps:$4 sm:$0xff]  }
 0xb69   : > { %15949 = vmatpush1.bf16.msra.mxu0 %v21250_v12  ;;  %v21321_v12 = vld [vmem:[%s23612_s6 + $0x1384] ss:$16 sps:$4 sm:$0xff]  }
 0xb6a   : > { %15990 = vmatpush1.bf16.msra.mxu1 %v21253_v41  ;;  %15950 = vmatprep.subr.bf16.mxu0 %v21258_v63  ;;  %v21316_v41 = vld [vmem:[%s23612_s6 + $0x1180] ss:$16 sps:$4 sm:$0xff]  }
 0xb6b   : > { %15991 = vmatprep.subr.bf16.mxu1 %v21261_v48  ;;  %v21319_v63 = vld [vmem:[%s23612_s6 + $0x1380] ss:$16 sps:$4 sm:$0xff]   ;;  %v21324_v48 = vld [vmem:[%s23612_s6 + $0x11a4] ss:$16 sps:$4 sm:$0xff]  }
 0xb6d   : > { %15951 = vmatpush1.bf16.msra.mxu0 %v21256_v39  ;;  %v21327_v39 = vld [vmem:[%s23612_s6 + $0x13a4] ss:$16 sps:$4 sm:$0xff]  }
 0xb6e   : > { %15992 = vmatpush1.bf16.msra.mxu1 %v21259_v32  ;;  %15952 = vmatprep.subr.bf16.mxu0 %v21264_v16  ;;  %v21322_v32 = vld [vmem:[%s23612_s6 + $0x11a0] ss:$16 sps:$4 sm:$0xff]   ;;  %v9525_v16 = vrot.slane %v25052_v9, %v23097_v35 }
 0xb6f   : > { %15993 = vmatprep.subr.bf16.mxu1 %v21267_v36  ;;  %v21325_v36 = vld [vmem:[%s23612_s6 + $0x13a0] ss:$16 sps:$4 sm:$0xff]  }
 0xb71   : > { %15953 = vmatpush1.bf16.msra.mxu0 %v21262_v18  ;;  %v21330_v18 = vld [vmem:[%s23612_s6 + $0x11c4] ss:$16 sps:$4 sm:$0xff]  }
 0xb72   : > { %15994 = vmatpush1.bf16.msra.mxu1 %v21265_v31  ;;  %15954 = vmatprep.subr.bf16.mxu0 %v21270_v11  ;;  %v9533_v31 = vrot.slane %v25052_v9, %v23104_v38  ;;  %v21333_v11 = vld [vmem:[%s23612_s6 + $0x13c4] ss:$16 sps:$4 sm:$0xff]  }
 0xb73   : > { %15995 = vmatprep.subr.bf16.mxu1 %v21273_v55  ;;  %v9545_v55 = vrot.slane %v25052_v9, %v23821_v46 }
 0xb75   : > { %15955 = vmatpush1.bf16.msra.mxu0 %v21268_v15  ;;  %v9553_v15 = vrot.slane %v25052_v9, %v23826_v50 }
 0xb76   : > { %15996 = vmatpush1.bf16.msra.mxu1 %v21271_v33  ;;  %15956 = vmatprep.subr.bf16.mxu0 %v21276_v3  ;;  %v21328_v33 = vld [vmem:[%s23612_s6 + $0x11c0] ss:$16 sps:$4 sm:$0xff]   ;;  %v20247_v3 = vadd.f32 %v24867_v45, %v9525_v16 }
 0xb77   : > { %15997 = vmatprep.subr.bf16.mxu1 %v21279_v42  ;;  %v21331_v42 = vld [vmem:[%s23612_s6 + $0x13c0] ss:$16 sps:$4 sm:$0xff]  }
 0xb78   : > { %v21337_v45 = vld [vmem:[%s23612_s6 + $0x13e0] ss:$16 sps:$4 sm:$0xff]  }
 0xb79   : > { %15957 = vmatpush1.bf16.msra.mxu0 %v21274_v49  ;;  %v21336_v49 = vld [vmem:[%s23612_s6 + $0x11e4] ss:$16 sps:$4 sm:$0xff]   ;;  %v21370_v16 = vld [vmem:[%s23612_s6 + $0x14a0] ss:$16 sps:$4 sm:$0xff]  }
 0xb7a   : > { %15998 = vmatpush1.bf16.msra.mxu1 %v21277_v44  ;;  %15958 = vmatprep.subr.bf16.mxu0 %v21282_v57  ;;  %v20249_v44 = vadd.f32 %v24869_v17, %v9533_v31  ;;  %v21339_v57 = vld [vmem:[%s23612_s6 + $0x13e4] ss:$16 sps:$4 sm:$0xff]  }
 0xb7b   : > { %15999 = vmatprep.subr.bf16.mxu1 %v21285_v54  ;;  %v20252_v54 = vadd.f32 %v25017_v10, %v9545_v55  ;;  %v21345_v17 = vld [vmem:[%s23612_s6 + $0x1604] ss:$16 sps:$4 sm:$0xff]   ;;  %v21340_v10 = vld [vmem:[%s23612_s6 + $0x1400] ss:$16 sps:$4 sm:$0xff]  }
 0xb7d   : > { %15959 = vmatpush1.bf16.msra.mxu0 %v21280_v61  ;;  %v20254_v61 = vadd.f32 %v25021_v27, %v9553_v15  ;;  %v21343_v27 = vld [vmem:[%s23612_s6 + $0x1600] ss:$16 sps:$4 sm:$0xff]  }
 0xb7e   : > { %16000 = vmatpush1.bf16.msra.mxu1 %v21283_v62  ;;  %15960 = vmatprep.subr.bf16.mxu0 %v21288_v47  ;;  %v21334_v62 = vld [vmem:[%s23612_s6 + $0x11e0] ss:$16 sps:$4 sm:$0xff]   ;;  %v12818_v47 = vmax.f32 %v20247_v3, 0.0 }
 0xb7f   : > { %16001 = vmatprep.subr.bf16.mxu1 %v21291_v0  ;;  %v21342_v0 = vld [vmem:[%s23612_s6 + $0x1404] ss:$16 sps:$4 sm:$0xff]  }
 0xb81   : > { %15961 = vmatpush1.bf16.msra.mxu0 %v21286_v51  ;;  %v12820_v51 = vmax.f32 %v20249_v44, 0.0 }
 0xb82   : > { %16002 = vmatpush1.bf16.msra.mxu1 %v21289_v6  ;;  %15962 = vmatprep.subr.bf16.mxu0 %v21294_v29  ;;  %v12823_v6 = vmax.f32 %v20252_v54, 0.0  ;;  %v12825_v29 = vmax.f32 %v20254_v61, 0.0  ;;  %v21384_v54 = vld [vmem:[%s23612_s6 + $0x14e4] ss:$16 sps:$4 sm:$0xff]  }
 0xb83   : > { %16003 = vmatprep.subr.bf16.mxu1 %v21297_v13  ;;  %v25151_v13 = vpack.c.bf16 %v12818_v47, %v12818_v47  ;;  %v21382_v47 = vld [vmem:[%s23612_s6 + $0x14e0] ss:$16 sps:$4 sm:$0xff]  }
 0xb85   : > { %15963 = vmatpush1.bf16.msra.mxu0 %v21292_v4  ;;  %v25154_v4 = vpack.c.bf16 %v12820_v51, %v12820_v51  ;;  %v21393_v51 = vld [vmem:[%s23612_s6 + $0x1704] ss:$16 sps:$4 sm:$0xff]  }
 0xb86   : > { %16004 = vmatpush1.bf16.msra.mxu1 %v21295_v8  ;;  %15964 = vmatprep.subr.bf16.mxu0 %v21300_v1  ;;  %v21348_v8 = vld [vmem:[%s23612_s6 + $0x1424] ss:$16 sps:$4 sm:$0xff]   ;;  %v25157_v1 = vpack.c.bf16 %v12823_v6, %v12823_v6  ;;  %v21391_v6 = vld [vmem:[%s23612_s6 + $0x1700] ss:$16 sps:$4 sm:$0xff]  }
 0xb87   : > { %16005 = vmatprep.subr.bf16.mxu1 %v21303_v34  ;;  %v21351_v34 = vld [vmem:[%s23612_s6 + $0x1624] ss:$16 sps:$4 sm:$0xff]  }
 0xb89   : > { %15965 = vmatpush1.bf16.msra.mxu0 %v21298_v5  ;;  %v25161_v5 = vpack.c.bf16 %v12825_v29, %v12825_v29  ;;  %v21396_v29 = vld [vmem:[%s23612_s6 + $0x1524] ss:$16 sps:$4 sm:$0xff]  }
 0xb8a   : > { %16006 = vmatpush1.bf16.msra.mxu1 %v21301_v2  ;;  %15966 = vmatprep.subr.bf16.mxu0 %v21306_v7  ;;  %v21346_v2 = vld [vmem:[%s23612_s6 + $0x1420] ss:$16 sps:$4 sm:$0xff]  }
 0xb8b   : > { %16007 = vmatprep.subr.bf16.mxu1 %v21309_v26  ;;  %v21349_v7 = vld [vmem:[%s23612_s6 + $0x1620] ss:$16 sps:$4 sm:$0xff]   ;;  %v21354_v26 = vld [vmem:[%s23612_s6 + $0x1444] ss:$16 sps:$4 sm:$0xff]  }
 0xb8d   : > { %15967 = vmatpush1.bf16.msra.mxu0 %v21304_v19  ;;  %v21357_v19 = vld [vmem:[%s23612_s6 + $0x1644] ss:$16 sps:$4 sm:$0xff]  }
 0xb8e   : > { %16008 = vmatpush1.bf16.msra.mxu1 %v21307_v22  ;;  %15968 = vmatprep.subr.bf16.mxu0 %v21312_v53  ;;  %v21352_v22 = vld [vmem:[%s23612_s6 + $0x1440] ss:$16 sps:$4 sm:$0xff]  }
 0xb8f   : > { %16009 = vmatprep.subr.bf16.mxu1 %v21315_v28  ;;  %v21355_v53 = vld [vmem:[%s23612_s6 + $0x1640] ss:$16 sps:$4 sm:$0xff]   ;;  %v21360_v28 = vld [vmem:[%s23612_s6 + $0x1464] ss:$16 sps:$4 sm:$0xff]  }
 0xb91   : > { %15969 = vmatpush1.bf16.msra.mxu0 %v21310_v60  ;;  %v21363_v60 = vld [vmem:[%s23612_s6 + $0x1664] ss:$16 sps:$4 sm:$0xff]  }
 0xb92   : > { %16010 = vmatpush1.bf16.msra.mxu1 %v21313_v14  ;;  %15970 = vmatprep.subr.bf16.mxu0 %v21318_v59  ;;  %v21358_v14 = vld [vmem:[%s23612_s6 + $0x1460] ss:$16 sps:$4 sm:$0xff]  }
 0xb93   : > { %16011 = vmatprep.subr.bf16.mxu1 %v21321_v12  ;;  %v21361_v59 = vld [vmem:[%s23612_s6 + $0x1660] ss:$16 sps:$4 sm:$0xff]   ;;  %v21366_v12 = vld [vmem:[%s23612_s6 + $0x1484] ss:$16 sps:$4 sm:$0xff]  }
 0xb95   : > { %15971 = vmatpush1.bf16.msra.mxu0 %v21316_v41  ;;  %v21369_v41 = vld [vmem:[%s23612_s6 + $0x1684] ss:$16 sps:$4 sm:$0xff]  }
 0xb96   : > { %16012 = vmatpush1.bf16.msra.mxu1 %v21319_v63  ;;  %15972 = vmatprep.subr.bf16.mxu0 %v21324_v48  ;;  %v21364_v63 = vld [vmem:[%s23612_s6 + $0x1480] ss:$16 sps:$4 sm:$0xff]  }
 0xb97   : > { %16013 = vmatprep.subr.bf16.mxu1 %v21327_v39  ;;  %v21367_v48 = vld [vmem:[%s23612_s6 + $0x1680] ss:$16 sps:$4 sm:$0xff]   ;;  %v21372_v39 = vld [vmem:[%s23612_s6 + $0x14a4] ss:$16 sps:$4 sm:$0xff]  }
 0xb99   : > { %15973 = vmatpush1.bf16.msra.mxu0 %v21322_v32  ;;  %v21375_v32 = vld [vmem:[%s23612_s6 + $0x16a4] ss:$16 sps:$4 sm:$0xff]  }
 0xb9a   : > { %16014 = vmatpush1.bf16.msra.mxu1 %v21325_v36  ;;  %15974 = vmatprep.subr.bf16.mxu0 %v21330_v18  ;;  %v21373_v36 = vld [vmem:[%s23612_s6 + $0x16a0] ss:$16 sps:$4 sm:$0xff]   ;;  %v21378_v18 = vld [vmem:[%s23612_s6 + $0x14c4] ss:$16 sps:$4 sm:$0xff]  }
 0xb9b   : > { %16015 = vmatprep.subr.bf16.mxu1 %v21333_v11  ;;  %v21381_v11 = vld [vmem:[%s23612_s6 + $0x16c4] ss:$16 sps:$4 sm:$0xff]  }
 0xb9d   : > { %15975 = vmatpush1.bf16.msra.mxu0 %v21328_v33 }
 0xb9e   : > { %16016 = vmatpush1.bf16.msra.mxu1 %v21331_v42  ;;  %15976 = vmatprep.subr.bf16.mxu0 %v21336_v49  ;;  %v21376_v42 = vld [vmem:[%s23612_s6 + $0x14c0] ss:$16 sps:$4 sm:$0xff]  }
 0xb9f   : > { %16017 = vmatprep.subr.bf16.mxu1 %v21339_v57  ;;  %v21379_v57 = vld [vmem:[%s23612_s6 + $0x16c0] ss:$16 sps:$4 sm:$0xff]  }
 0xba1   : > { %15977 = vmatpush1.bf16.msra.mxu0 %v21334_v62  ;;  %v21387_v62 = vld [vmem:[%s23612_s6 + $0x16e4] ss:$16 sps:$4 sm:$0xff]  }
 0xba2   : > { %16018 = vmatpush1.bf16.msra.mxu1 %v21337_v45  ;;  %16028 = vmatprep.subr.bf16.mxu0 %v21342_v0  ;;  %v21385_v45 = vld [vmem:[%s23612_s6 + $0x16e0] ss:$16 sps:$4 sm:$0xff]   ;;  %v21390_v0 = vld [vmem:[%s23612_s6 + $0x1504] ss:$16 sps:$4 sm:$0xff]  }
 0xba3   : > { %16069 = vmatprep.subr.bf16.mxu1 %v21345_v17  ;;  %v21388_v17 = vld [vmem:[%s23612_s6 + $0x1500] ss:$16 sps:$4 sm:$0xff]  }
 0xba4   : > { %15979 = vmatmul.mubr.bf16.vlgmr.msra.gmra.mrb[72].mxu0 %v25151_v13 }
 0xba5   : > { %16020 = vmatmul.mubr.bf16.vlgmr.msra.gmra.mrb[72].mxu1 %v25154_v4  ;;  %16029 = vmatpush1.bf16.msra.mxu0 %v21340_v10  ;;  %v21399_v10 = vld [vmem:[%s23612_s6 + $0x1724] ss:$16 sps:$4 sm:$0xff]  }
 0xba6   : > { %16060 = vmatprep.mubr.bf16.mxu0 %v25157_v1  ;;  %16070 = vmatpush1.bf16.msra.mxu1 %v21343_v27  ;;  %v21394_v27 = vld [vmem:[%s23612_s6 + $0x1520] ss:$16 sps:$4 sm:$0xff]  }
 0xba7   : > { %16101 = vmatprep.mubr.bf16.mxu1 %v25161_v5  ;;  %16030 = vmatprep.subr.bf16.mxu0 %v21348_v8  ;;  %v21397_v8 = vld [vmem:[%s23612_s6 + $0x1720] ss:$16 sps:$4 sm:$0xff]  }
 0xba8   : > { %16071 = vmatprep.subr.bf16.mxu1 %v21351_v34  ;;  %v21402_v34 = vld [vmem:[%s23612_s6 + $0x1544] ss:$16 sps:$4 sm:$0xff]  }
 0xba9   : > { %16031 = vmatpush1.bf16.msra.mxu0 %v21346_v2  ;;  %v21405_v2 = vld [vmem:[%s23612_s6 + $0x1744] ss:$16 sps:$4 sm:$0xff]  }
 0xbaa   : > { %16072 = vmatpush1.bf16.msra.mxu1 %v21349_v7  ;;  %16032 = vmatprep.subr.bf16.mxu0 %v21354_v26  ;;  %v21400_v7 = vld [vmem:[%s23612_s6 + $0x1540] ss:$16 sps:$4 sm:$0xff]  }
 0xbab   : > { %16073 = vmatprep.subr.bf16.mxu1 %v21357_v19  ;;  %v21403_v26 = vld [vmem:[%s23612_s6 + $0x1740] ss:$16 sps:$4 sm:$0xff]   ;;  %v21408_v19 = vld [vmem:[%s23612_s6 + $0x1564] ss:$16 sps:$4 sm:$0xff]  }
 0xbad   : > { %16033 = vmatpush1.bf16.msra.mxu0 %v21352_v22  ;;  %v21411_v22 = vld [vmem:[%s23612_s6 + $0x1764] ss:$16 sps:$4 sm:$0xff]  }
 0xbae   : > { %16074 = vmatpush1.bf16.msra.mxu1 %v21355_v53  ;;  %16034 = vmatprep.subr.bf16.mxu0 %v21360_v28  ;;  %v21406_v53 = vld [vmem:[%s23612_s6 + $0x1560] ss:$16 sps:$4 sm:$0xff]  }
 0xbaf   : > { %16075 = vmatprep.subr.bf16.mxu1 %v21363_v60  ;;  %v21409_v28 = vld [vmem:[%s23612_s6 + $0x1760] ss:$16 sps:$4 sm:$0xff]   ;;  %v21414_v60 = vld [vmem:[%s23612_s6 + $0x1584] ss:$16 sps:$4 sm:$0xff]  }
 0xbb1   : > { %16035 = vmatpush1.bf16.msra.mxu0 %v21358_v14  ;;  %v21417_v14 = vld [vmem:[%s23612_s6 + $0x1784] ss:$16 sps:$4 sm:$0xff]  }
 0xbb2   : > { %16076 = vmatpush1.bf16.msra.mxu1 %v21361_v59  ;;  %16036 = vmatprep.subr.bf16.mxu0 %v21366_v12  ;;  %v21412_v59 = vld [vmem:[%s23612_s6 + $0x1580] ss:$16 sps:$4 sm:$0xff]  }
 0xbb3   : > { %16077 = vmatprep.subr.bf16.mxu1 %v21369_v41  ;;  %v21415_v12 = vld [vmem:[%s23612_s6 + $0x1780] ss:$16 sps:$4 sm:$0xff]   ;;  %v21420_v41 = vld [vmem:[%s23612_s6 + $0x15a4] ss:$16 sps:$4 sm:$0xff]  }
 0xbb5   : > { %16037 = vmatpush1.bf16.msra.mxu0 %v21364_v63  ;;  %v21423_v63 = vld [vmem:[%s23612_s6 + $0x17a4] ss:$16 sps:$4 sm:$0xff]  }
 0xbb6   : > { %16078 = vmatpush1.bf16.msra.mxu1 %v21367_v48  ;;  %16038 = vmatprep.subr.bf16.mxu0 %v21372_v39  ;;  %v25223_v48 = vld [vmem:[%s23741_s30 + $0x18] sm:$0xff]  ;;  %v21418_v39 = vld [vmem:[%s23612_s6 + $0x15a0] ss:$16 sps:$4 sm:$0xff]  }
 0xbb7   : > { %v25185_v31 = vpop.f32.mrb[64].mxu0  ;;  %16079 = vmatprep.subr.bf16.mxu1 %v21375_v32  ;;  %v9541_v32 = vrot.slane %v25052_v9, %v23919_v25 }
 0xbb8   : > { %v25188_v55 = vpop.f32.mrb[64].mxu1  ;;  %v25190_v15 = vpop.f32.mrb[65].mxu0 }
 0xbb9   : > { %v25192_v33 = vpop.f32.mrb[65].mxu1  ;;  %v12569_v3 = vpop.f32.mrb[66].mxu0  ;;  %16039 = vmatpush1.bf16.msra.mxu0 %v21370_v16  ;;  %v21421_v16 = vld [vmem:[%s23612_s6 + $0x17a0] ss:$16 sps:$4 sm:$0xff]  }
 0xbba   : > { %v12651_v49 = vpop.f32.mrb[66].mxu1  ;;  %16080 = vmatpush1.bf16.msra.mxu1 %v21373_v36  ;;  %v12570_v44 = vpop.f32.mrb[67].mxu0  ;;  %16040 = vmatprep.subr.bf16.mxu0 %v21378_v18  ;;  %v21426_v36 = vld [vmem:[%s23612_s6 + $0x15c4] ss:$16 sps:$4 sm:$0xff]   ;;  %v9549_v18 = vrot.slane %v25052_v9, %v23924_v40  ;;  %v9561_v3 = vrot.slane %v25223_v48, %v23101_v37 }
 0xbbb   : > { %v12652_v61 = vpop.f32.mrb[67].mxu1  ;;  %16081 = vmatprep.subr.bf16.mxu1 %v21381_v11  ;;  %v21429_v11 = vld [vmem:[%s23612_s6 + $0x17c4] ss:$16 sps:$4 sm:$0xff]   ;;  %v21424_v49 = vld [vmem:[%s23612_s6 + $0x15c0] ss:$16 sps:$4 sm:$0xff]   ;;  %v20251_v44 = vadd.f32 %v25011_v20, %v9541_v32 }
 0xbbc   : > { %v21432_v9 = vld [vmem:[%s23612_s6 + $0x15e4] ss:$16 sps:$4 sm:$0xff]   ;;  %v21433_v20 = vld [vmem:[%s23612_s6 + $0x17e0] ss:$16 sps:$4 sm:$0xff]  }
 0xbbd   : > { %16041 = vmatpush1.bf16.msra.mxu0 %v21376_v42  ;;  %v9569_v42 = vrot.slane %v25223_v48, %v23109_v43  ;;  %v21435_v61 = vld [vmem:[%s23612_s6 + $0x17e4] ss:$16 sps:$4 sm:$0xff]   ;;  %v21460_v32 = vld [vmem:[%s23612_s6 + $0x1880] ss:$16 sps:$4 sm:$0xff]  }
 0xbbe   : > { %16082 = vmatpush1.bf16.msra.mxu1 %v21379_v57  ;;  %16042 = vmatprep.subr.bf16.mxu0 %v21384_v54  ;;  %v21427_v57 = vld [vmem:[%s23612_s6 + $0x17c0] ss:$16 sps:$4 sm:$0xff]   ;;  %v20253_v54 = vadd.f32 %v25015_v30, %v9549_v18  ;;  %v21441_v30 = vld [vmem:[%s23612_s6 + $0x1a04] ss:$16 sps:$4 sm:$0xff]  }
 0xbbf   : > { %16083 = vmatprep.subr.bf16.mxu1 %v21387_v62  ;;  %v20256_v62 = vadd.f32 %v25190_v15, %v9561_v3  ;;  %v21436_v15 = vld [vmem:[%s23612_s6 + $0x1800] ss:$16 sps:$4 sm:$0xff]   ;;  %v21471_v18 = vld [vmem:[%s23612_s6 + $0x1aa4] ss:$16 sps:$4 sm:$0xff]  }
 0xbc0   : > { %v21469_v3 = vld [vmem:[%s23612_s6 + $0x1aa0] ss:$16 sps:$4 sm:$0xff]  }
 0xbc1   : > { %16043 = vmatpush1.bf16.msra.mxu0 %v21382_v47  ;;  %v20258_v47 = vadd.f32 %v25192_v33, %v9569_v42  ;;  %v21439_v33 = vld [vmem:[%s23612_s6 + $0x1a00] ss:$16 sps:$4 sm:$0xff]   ;;  %v21474_v42 = vld [vmem:[%s23612_s6 + $0x18c4] ss:$16 sps:$4 sm:$0xff]  }
 0xbc2   : > { %16084 = vmatpush1.bf16.msra.mxu1 %v21385_v45  ;;  %16044 = vmatprep.subr.bf16.mxu0 %v21390_v0  ;;  %v21430_v45 = vld [vmem:[%s23612_s6 + $0x15e0] ss:$16 sps:$4 sm:$0xff]   ;;  %v12822_v0 = vmax.f32 %v20251_v44, 0.0 }
 0xbc3   : > { %16085 = vmatprep.subr.bf16.mxu1 %v21393_v51  ;;  %v21438_v51 = vld [vmem:[%s23612_s6 + $0x1804] ss:$16 sps:$4 sm:$0xff]   ;;  %v21472_v44 = vld [vmem:[%s23612_s6 + $0x18c0] ss:$16 sps:$4 sm:$0xff]  }
 0xbc5   : > { %16045 = vmatpush1.bf16.msra.mxu0 %v21388_v17  ;;  %v12824_v17 = vmax.f32 %v20253_v54, 0.0  ;;  %v21483_v54 = vld [vmem:[%s23612_s6 + $0x1ae4] ss:$16 sps:$4 sm:$0xff]  }
 0xbc6   : > { %16086 = vmatpush1.bf16.msra.mxu1 %v21391_v6  ;;  %16046 = vmatprep.subr.bf16.mxu0 %v21396_v29  ;;  %v12827_v6 = vmax.f32 %v20256_v62, 0.0  ;;  %v12829_v29 = vmax.f32 %v20258_v47, 0.0  ;;  %v21481_v62 = vld [vmem:[%s23612_s6 + $0x1ae0] ss:$16 sps:$4 sm:$0xff]   ;;  %v21486_v47 = vld [vmem:[%s23612_s6 + $0x1904] ss:$16 sps:$4 sm:$0xff]  }
 0xbc7   : > { %16087 = vmatprep.subr.bf16.mxu1 %v21399_v10  ;;  %v25250_v10 = vpack.c.bf16 %v12822_v0, %v12822_v0  ;;  %v21484_v0 = vld [vmem:[%s23612_s6 + $0x1900] ss:$16 sps:$4 sm:$0xff]  }
 0xbc9   : > { %16047 = vmatpush1.bf16.msra.mxu0 %v21394_v27  ;;  %v25253_v27 = vpack.c.bf16 %v12824_v17, %v12824_v17  ;;  %v21495_v17 = vld [vmem:[%s23612_s6 + $0x1b24] ss:$16 sps:$4 sm:$0xff]  }
 0xbca   : > { %16088 = vmatpush1.bf16.msra.mxu1 %v21397_v8  ;;  %16048 = vmatprep.subr.bf16.mxu0 %v21402_v34  ;;  %v21444_v8 = vld [vmem:[%s23612_s6 + $0x1824] ss:$16 sps:$4 sm:$0xff]   ;;  %v25256_v34 = vpack.c.bf16 %v12827_v6, %v12827_v6  ;;  %v21493_v6 = vld [vmem:[%s23612_s6 + $0x1b20] ss:$16 sps:$4 sm:$0xff]  }
 0xbcb   : > { %16089 = vmatprep.subr.bf16.mxu1 %v21405_v2  ;;  %v21447_v2 = vld [vmem:[%s23612_s6 + $0x1a24] ss:$16 sps:$4 sm:$0xff]  }
 0xbcd   : > { %16049 = vmatpush1.bf16.msra.mxu0 %v21400_v7  ;;  %v25260_v7 = vpack.c.bf16 %v12829_v29, %v12829_v29  ;;  %v21498_v29 = vld [vmem:[%s23612_s6 + $0x1944] ss:$16 sps:$4 sm:$0xff]  }
 0xbce   : > { %16090 = vmatpush1.bf16.msra.mxu1 %v21403_v26  ;;  %16050 = vmatprep.subr.bf16.mxu0 %v21408_v19  ;;  %v21442_v26 = vld [vmem:[%s23612_s6 + $0x1820] ss:$16 sps:$4 sm:$0xff]  }
 0xbcf   : > { %16091 = vmatprep.subr.bf16.mxu1 %v21411_v22  ;;  %v21445_v19 = vld [vmem:[%s23612_s6 + $0x1a20] ss:$16 sps:$4 sm:$0xff]   ;;  %v21450_v22 = vld [vmem:[%s23612_s6 + $0x1844] ss:$16 sps:$4 sm:$0xff]  }
 0xbd1   : > { %16051 = vmatpush1.bf16.msra.mxu0 %v21406_v53  ;;  %v21453_v53 = vld [vmem:[%s23612_s6 + $0x1a44] ss:$16 sps:$4 sm:$0xff]  }
 0xbd2   : > { %16092 = vmatpush1.bf16.msra.mxu1 %v21409_v28  ;;  %16052 = vmatprep.subr.bf16.mxu0 %v21414_v60  ;;  %v21448_v28 = vld [vmem:[%s23612_s6 + $0x1840] ss:$16 sps:$4 sm:$0xff]  }
 0xbd3   : > { %16093 = vmatprep.subr.bf16.mxu1 %v21417_v14  ;;  %v21451_v60 = vld [vmem:[%s23612_s6 + $0x1a40] ss:$16 sps:$4 sm:$0xff]   ;;  %v21456_v14 = vld [vmem:[%s23612_s6 + $0x1864] ss:$16 sps:$4 sm:$0xff]  }
 0xbd5   : > { %16053 = vmatpush1.bf16.msra.mxu0 %v21412_v59  ;;  %v21459_v59 = vld [vmem:[%s23612_s6 + $0x1a64] ss:$16 sps:$4 sm:$0xff]  }
 0xbd6   : > { %16094 = vmatpush1.bf16.msra.mxu1 %v21415_v12  ;;  %16054 = vmatprep.subr.bf16.mxu0 %v21420_v41  ;;  %v21454_v12 = vld [vmem:[%s23612_s6 + $0x1860] ss:$16 sps:$4 sm:$0xff]  }
 0xbd7   : > { %16095 = vmatprep.subr.bf16.mxu1 %v21423_v63  ;;  %v21457_v41 = vld [vmem:[%s23612_s6 + $0x1a60] ss:$16 sps:$4 sm:$0xff]   ;;  %v21462_v63 = vld [vmem:[%s23612_s6 + $0x1884] ss:$16 sps:$4 sm:$0xff]  }
 0xbd9   : > { %16055 = vmatpush1.bf16.msra.mxu0 %v21418_v39  ;;  %v21465_v39 = vld [vmem:[%s23612_s6 + $0x1a84] ss:$16 sps:$4 sm:$0xff]  }
 0xbda   : > { %16096 = vmatpush1.bf16.msra.mxu1 %v21421_v16  ;;  %16056 = vmatprep.subr.bf16.mxu0 %v21426_v36  ;;  %v21463_v16 = vld [vmem:[%s23612_s6 + $0x1a80] ss:$16 sps:$4 sm:$0xff]   ;;  %v21468_v36 = vld [vmem:[%s23612_s6 + $0x18a4] ss:$16 sps:$4 sm:$0xff]  }
 0xbdb   : > { %16097 = vmatprep.subr.bf16.mxu1 %v21429_v11  ;;  %v21466_v11 = vld [vmem:[%s23612_s6 + $0x18a0] ss:$16 sps:$4 sm:$0xff]  }
 0xbdd   : > { %16057 = vmatpush1.bf16.msra.mxu0 %v21424_v49  ;;  %v21477_v49 = vld [vmem:[%s23612_s6 + $0x1ac4] ss:$16 sps:$4 sm:$0xff]  }
 0xbde   : > { %16098 = vmatpush1.bf16.msra.mxu1 %v21427_v57  ;;  %16058 = vmatprep.subr.bf16.mxu0 %v21432_v9  ;;  %v21475_v57 = vld [vmem:[%s23612_s6 + $0x1ac0] ss:$16 sps:$4 sm:$0xff]   ;;  %v21480_v9 = vld [vmem:[%s23612_s6 + $0x18e4] ss:$16 sps:$4 sm:$0xff]  }
 0xbdf   : > { %16099 = vmatprep.subr.bf16.mxu1 %v21435_v61  ;;  %v21478_v61 = vld [vmem:[%s23612_s6 + $0x18e0] ss:$16 sps:$4 sm:$0xff]  }
 0xbe1   : > { %16059 = vmatpush1.bf16.msra.mxu0 %v21430_v45  ;;  %v21489_v45 = vld [vmem:[%s23612_s6 + $0x1b04] ss:$16 sps:$4 sm:$0xff]  }
 0xbe2   : > { %16100 = vmatpush1.bf16.msra.mxu1 %v21433_v20  ;;  %16110 = vmatprep.subr.bf16.mxu0 %v21438_v51  ;;  %v21487_v20 = vld [vmem:[%s23612_s6 + $0x1b00] ss:$16 sps:$4 sm:$0xff]   ;;  %v21492_v51 = vld [vmem:[%s23612_s6 + $0x1924] ss:$16 sps:$4 sm:$0xff]  }
 0xbe3   : > { %16151 = vmatprep.subr.bf16.mxu1 %v21441_v30  ;;  %v21490_v30 = vld [vmem:[%s23612_s6 + $0x1920] ss:$16 sps:$4 sm:$0xff]  }
 0xbe4   : > { %16061 = vmatmul.mubr.bf16.vlgmr.msra.gmra.mrb[76].mxu0 %v25250_v10 }
 0xbe5   : > { %16102 = vmatmul.mubr.bf16.vlgmr.msra.gmra.mrb[76].mxu1 %v25253_v27  ;;  %16111 = vmatpush1.bf16.msra.mxu0 %v21436_v15  ;;  %v21501_v15 = vld [vmem:[%s23612_s6 + $0x1b44] ss:$16 sps:$4 sm:$0xff]  }
 0xbe6   : > { %16142 = vmatprep.mubr.bf16.mxu0 %v25256_v34  ;;  %16152 = vmatpush1.bf16.msra.mxu1 %v21439_v33  ;;  %v21496_v33 = vld [vmem:[%s23612_s6 + $0x1940] ss:$16 sps:$4 sm:$0xff]  }
 0xbe7   : > { %16183 = vmatprep.mubr.bf16.mxu1 %v25260_v7  ;;  %16112 = vmatprep.subr.bf16.mxu0 %v21444_v8  ;;  %v21499_v8 = vld [vmem:[%s23612_s6 + $0x1b40] ss:$16 sps:$4 sm:$0xff]  }
 0xbe8   : > { %16153 = vmatprep.subr.bf16.mxu1 %v21447_v2  ;;  %v21504_v2 = vld [vmem:[%s23612_s6 + $0x1964] ss:$16 sps:$4 sm:$0xff]  }
 0xbe9   : > { %16113 = vmatpush1.bf16.msra.mxu0 %v21442_v26  ;;  %v21507_v26 = vld [vmem:[%s23612_s6 + $0x1b64] ss:$16 sps:$4 sm:$0xff]  }
 0xbea   : > { %16154 = vmatpush1.bf16.msra.mxu1 %v21445_v19  ;;  %16114 = vmatprep.subr.bf16.mxu0 %v21450_v22  ;;  %v21502_v19 = vld [vmem:[%s23612_s6 + $0x1960] ss:$16 sps:$4 sm:$0xff]  }
 0xbeb   : > { %16155 = vmatprep.subr.bf16.mxu1 %v21453_v53  ;;  %v21505_v22 = vld [vmem:[%s23612_s6 + $0x1b60] ss:$16 sps:$4 sm:$0xff]   ;;  %v21510_v53 = vld [vmem:[%s23612_s6 + $0x1984] ss:$16 sps:$4 sm:$0xff]  }
 0xbed   : > { %16115 = vmatpush1.bf16.msra.mxu0 %v21448_v28  ;;  %v21513_v28 = vld [vmem:[%s23612_s6 + $0x1b84] ss:$16 sps:$4 sm:$0xff]  }
 0xbee   : > { %16156 = vmatpush1.bf16.msra.mxu1 %v21451_v60  ;;  %16116 = vmatprep.subr.bf16.mxu0 %v21456_v14  ;;  %v21508_v60 = vld [vmem:[%s23612_s6 + $0x1980] ss:$16 sps:$4 sm:$0xff]  }
 0xbef   : > { %16157 = vmatprep.subr.bf16.mxu1 %v21459_v59  ;;  %v21511_v14 = vld [vmem:[%s23612_s6 + $0x1b80] ss:$16 sps:$4 sm:$0xff]   ;;  %v21516_v59 = vld [vmem:[%s23612_s6 + $0x19a4] ss:$16 sps:$4 sm:$0xff]  }
 0xbf1   : > { %16117 = vmatpush1.bf16.msra.mxu0 %v21454_v12  ;;  %v21519_v12 = vld [vmem:[%s23612_s6 + $0x1ba4] ss:$16 sps:$4 sm:$0xff]  }
 0xbf2   : > { %16158 = vmatpush1.bf16.msra.mxu1 %v21457_v41  ;;  %16118 = vmatprep.subr.bf16.mxu0 %v21462_v63  ;;  %v21514_v41 = vld [vmem:[%s23612_s6 + $0x19a0] ss:$16 sps:$4 sm:$0xff]   ;;  %v9557_v63 = vrot.slane %v25223_v48, %v23097_v35 }
 0xbf3   : > { %16159 = vmatprep.subr.bf16.mxu1 %v21465_v39  ;;  %v21517_v39 = vld [vmem:[%s23612_s6 + $0x1ba0] ss:$16 sps:$4 sm:$0xff]  }
 0xbf5   : > { %16119 = vmatpush1.bf16.msra.mxu0 %v21460_v32  ;;  %v21522_v32 = vld [vmem:[%s23612_s6 + $0x19c4] ss:$16 sps:$4 sm:$0xff]  }
 0xbf6   : > { %16160 = vmatpush1.bf16.msra.mxu1 %v21463_v16  ;;  %16120 = vmatprep.subr.bf16.mxu0 %v21468_v36  ;;  %v9565_v16 = vrot.slane %v25223_v48, %v23104_v38  ;;  %v21525_v36 = vld [vmem:[%s23612_s6 + $0x1bc4] ss:$16 sps:$4 sm:$0xff]  }
 0xbf7   : > { %16161 = vmatprep.subr.bf16.mxu1 %v21471_v18  ;;  %v21520_v18 = vld [vmem:[%s23612_s6 + $0x19c0] ss:$16 sps:$4 sm:$0xff]  }
 0xbf9   : > { %16121 = vmatpush1.bf16.msra.mxu0 %v21466_v11  ;;  %v20255_v11 = vadd.f32 %v25185_v31, %v9557_v63  ;;  %v21534_v31 = vld [vmem:[%s23612_s6 + $0x1c04] ss:$16 sps:$4 sm:$0xff]   ;;  %v9585_v63 = vrot.slane %v25223_v48, %v23826_v50 }
 0xbfa   : > { %16162 = vmatpush1.bf16.msra.mxu1 %v21469_v3  ;;  %16122 = vmatprep.subr.bf16.mxu0 %v21474_v42  ;;  %v21523_v3 = vld [vmem:[%s23612_s6 + $0x1bc0] ss:$16 sps:$4 sm:$0xff]   ;;  %v21528_v42 = vld [vmem:[%s23612_s6 + $0x19e4] ss:$16 sps:$4 sm:$0xff]  }
 0xbfb   : > { %16163 = vmatprep.subr.bf16.mxu1 %v21477_v49  ;;  %v20257_v49 = vadd.f32 %v25188_v55, %v9565_v16 }
 0xbfd   : > { %16123 = vmatpush1.bf16.msra.mxu0 %v21472_v44  ;;  %v21531_v44 = vld [vmem:[%s23612_s6 + $0x1be4] ss:$16 sps:$4 sm:$0xff]  }
 0xbfe   : > { %16164 = vmatpush1.bf16.msra.mxu1 %v21475_v57  ;;  %16124 = vmatprep.subr.bf16.mxu0 %v21480_v9  ;;  %v21526_v57 = vld [vmem:[%s23612_s6 + $0x19e0] ss:$16 sps:$4 sm:$0xff]   ;;  %v12826_v9 = vmax.f32 %v20255_v11, 0.0 }
 0xbff   : > { %16165 = vmatprep.subr.bf16.mxu1 %v21483_v54  ;;  %v21529_v54 = vld [vmem:[%s23612_s6 + $0x1be0] ss:$16 sps:$4 sm:$0xff]  }
 0xc00   : > { %v25332_v55 = vpack.c.bf16 %v12826_v9, %v12826_v9  ;;  %v21571_v9 = vld [vmem:[%s23612_s6 + $0x1ec0] ss:$16 sps:$4 sm:$0xff]  }
 0xc01   : > { %16125 = vmatpush1.bf16.msra.mxu0 %v21478_v61  ;;  %v12828_v61 = vmax.f32 %v20257_v49, 0.0  ;;  %v21568_v49 = vld [vmem:[%s23612_s6 + $0x1cc0] ss:$16 sps:$4 sm:$0xff]  }
 0xc02   : > { %16166 = vmatpush1.bf16.msra.mxu1 %v21481_v62  ;;  %16126 = vmatprep.subr.bf16.mxu0 %v21486_v47  ;;  %v21537_v62 = vld [vmem:[%s23612_s6 + $0x1e04] ss:$16 sps:$4 sm:$0xff]   ;;  %v21532_v47 = vld [vmem:[%s23612_s6 + $0x1c00] ss:$16 sps:$4 sm:$0xff]  }
 0xc03   : > { %16167 = vmatprep.subr.bf16.mxu1 %v21489_v45  ;;  %v21535_v45 = vld [vmem:[%s23612_s6 + $0x1e00] ss:$16 sps:$4 sm:$0xff]  }
 0xc05   : > { %16127 = vmatpush1.bf16.msra.mxu0 %v21484_v0  ;;  %v21540_v0 = vld [vmem:[%s23612_s6 + $0x1c24] ss:$16 sps:$4 sm:$0xff]  }
 0xc06   : > { %16168 = vmatpush1.bf16.msra.mxu1 %v21487_v20  ;;  %16128 = vmatprep.subr.bf16.mxu0 %v21492_v51  ;;  %v25336_v20 = vpack.c.bf16 %v12828_v61, %v12828_v61  ;;  %v21543_v51 = vld [vmem:[%s23612_s6 + $0x1e24] ss:$16 sps:$4 sm:$0xff]  }
 0xc07   : > { %16169 = vmatprep.subr.bf16.mxu1 %v21495_v17  ;;  %v21538_v17 = vld [vmem:[%s23612_s6 + $0x1c20] ss:$16 sps:$4 sm:$0xff]  }
 0xc09   : > { %16129 = vmatpush1.bf16.msra.mxu0 %v21490_v30  ;;  %v21541_v30 = vld [vmem:[%s23612_s6 + $0x1e20] ss:$16 sps:$4 sm:$0xff]  }
 0xc0a   : > { %16170 = vmatpush1.bf16.msra.mxu1 %v21493_v6  ;;  %16130 = vmatprep.subr.bf16.mxu0 %v21498_v29  ;;  %v21546_v6 = vld [vmem:[%s23612_s6 + $0x1c44] ss:$16 sps:$4 sm:$0xff]  }
 0xc0b   : > { %16171 = vmatprep.subr.bf16.mxu1 %v21501_v15  ;;  %v21549_v29 = vld [vmem:[%s23612_s6 + $0x1e44] ss:$16 sps:$4 sm:$0xff]   ;;  %v21544_v15 = vld [vmem:[%s23612_s6 + $0x1c40] ss:$16 sps:$4 sm:$0xff]  }
 0xc0d   : > { %16131 = vmatpush1.bf16.msra.mxu0 %v21496_v33  ;;  %v21547_v33 = vld [vmem:[%s23612_s6 + $0x1e40] ss:$16 sps:$4 sm:$0xff]  }
 0xc0e   : > { %16172 = vmatpush1.bf16.msra.mxu1 %v21499_v8  ;;  %16132 = vmatprep.subr.bf16.mxu0 %v21504_v2  ;;  %v21552_v8 = vld [vmem:[%s23612_s6 + $0x1c64] ss:$16 sps:$4 sm:$0xff]  }
 0xc0f   : > { %16173 = vmatprep.subr.bf16.mxu1 %v21507_v26  ;;  %v21555_v2 = vld [vmem:[%s23612_s6 + $0x1e64] ss:$16 sps:$4 sm:$0xff]   ;;  %v21550_v26 = vld [vmem:[%s23612_s6 + $0x1c60] ss:$16 sps:$4 sm:$0xff]  }
 0xc11   : > { %16133 = vmatpush1.bf16.msra.mxu0 %v21502_v19  ;;  %v21553_v19 = vld [vmem:[%s23612_s6 + $0x1e60] ss:$16 sps:$4 sm:$0xff]  }
 0xc12   : > { %16174 = vmatpush1.bf16.msra.mxu1 %v21505_v22  ;;  %16134 = vmatprep.subr.bf16.mxu0 %v21510_v53  ;;  %v21558_v22 = vld [vmem:[%s23612_s6 + $0x1c84] ss:$16 sps:$4 sm:$0xff]  }
 0xc13   : > { %16175 = vmatprep.subr.bf16.mxu1 %v21513_v28  ;;  %v21561_v53 = vld [vmem:[%s23612_s6 + $0x1e84] ss:$16 sps:$4 sm:$0xff]   ;;  %v21556_v28 = vld [vmem:[%s23612_s6 + $0x1c80] ss:$16 sps:$4 sm:$0xff]  }
 0xc15   : > { %16135 = vmatpush1.bf16.msra.mxu0 %v21508_v60  ;;  %v21559_v60 = vld [vmem:[%s23612_s6 + $0x1e80] ss:$16 sps:$4 sm:$0xff]  }
 0xc16   : > { %16176 = vmatpush1.bf16.msra.mxu1 %v21511_v14  ;;  %16136 = vmatprep.subr.bf16.mxu0 %v21516_v59  ;;  %v21564_v14 = vld [vmem:[%s23612_s6 + $0x1ca4] ss:$16 sps:$4 sm:$0xff]  }
 0xc17   : > { %16177 = vmatprep.subr.bf16.mxu1 %v21519_v12  ;;  %v21567_v59 = vld [vmem:[%s23612_s6 + $0x1ea4] ss:$16 sps:$4 sm:$0xff]   ;;  %v9577_v12 = vrot.slane %v25223_v48, %v23821_v46 }
 0xc19   : > { %16137 = vmatpush1.bf16.msra.mxu0 %v21514_v41  ;;  %v21562_v41 = vld [vmem:[%s23612_s6 + $0x1ca0] ss:$16 sps:$4 sm:$0xff]  }
 0xc1a   : > { %16178 = vmatpush1.bf16.msra.mxu1 %v21517_v39  ;;  %16138 = vmatprep.subr.bf16.mxu0 %v21522_v32  ;;  %v21565_v39 = vld [vmem:[%s23612_s6 + $0x1ea0] ss:$16 sps:$4 sm:$0xff]   ;;  %v21570_v32 = vld [vmem:[%s23612_s6 + $0x1cc4] ss:$16 sps:$4 sm:$0xff]  }
 0xc1b   : > { %16179 = vmatprep.subr.bf16.mxu1 %v21525_v36  ;;  %v21573_v36 = vld [vmem:[%s23612_s6 + $0x1ec4] ss:$16 sps:$4 sm:$0xff]  }
 0xc1d   : > { %16139 = vmatpush1.bf16.msra.mxu0 %v21520_v18 }
 0xc1e   : > { %16180 = vmatpush1.bf16.msra.mxu1 %v21523_v3  ;;  %16140 = vmatprep.subr.bf16.mxu0 %v21528_v42 }
 0xc1f   : > { %16181 = vmatprep.subr.bf16.mxu1 %v21531_v44 }
 0xc21   : > { %16141 = vmatpush1.bf16.msra.mxu0 %v21526_v57 }
 0xc22   : > { %16182 = vmatpush1.bf16.msra.mxu1 %v21529_v54  ;;  %16192 = vmatprep.subr.bf16.mxu0 %v21534_v31  ;;  %v21576_v54 = vld [vmem:[%s23612_s6 + $0x1ce4] ss:$16 sps:$4 sm:$0xff]  }
 0xc23   : > { %16233 = vmatprep.subr.bf16.mxu1 %v21537_v62  ;;  %v21579_v62 = vld [vmem:[%s23612_s6 + $0x1ee4] ss:$16 sps:$4 sm:$0xff]  }
 0xc24   : > { %16143 = vmatmul.mubr.bf16.vlgmr.msra.gmra.mrb[80].mxu0 %v25332_v55 }
 0xc25   : > { %16184 = vmatmul.mubr.bf16.vlgmr.msra.gmra.mrb[80].mxu1 %v25336_v20  ;;  %16193 = vmatpush1.bf16.msra.mxu0 %v21532_v47 }
 0xc26   : > { %16234 = vmatpush1.bf16.msra.mxu1 %v21535_v45  ;;  %16194 = vmatprep.subr.bf16.mxu0 %v21540_v0  ;;  %v21574_v0 = vld [vmem:[%s23612_s6 + $0x1ce0] ss:$16 sps:$4 sm:$0xff]  }
 0xc27   : > { %16235 = vmatprep.subr.bf16.mxu1 %v21543_v51 }
 0xc29   : > { %16195 = vmatpush1.bf16.msra.mxu0 %v21538_v17  ;;  %v21577_v17 = vld [vmem:[%s23612_s6 + $0x1ee0] ss:$16 sps:$4 sm:$0xff]  }
 0xc2a   : > { %16236 = vmatpush1.bf16.msra.mxu1 %v21541_v30  ;;  %16196 = vmatprep.subr.bf16.mxu0 %v21546_v6  ;;  %v21582_v30 = vld [vmem:[%s23612_s6 + $0x1d04] ss:$16 sps:$4 sm:$0xff]  }
 0xc2b   : > { %16237 = vmatprep.subr.bf16.mxu1 %v21549_v29  ;;  %v21585_v6 = vld [vmem:[%s23612_s6 + $0x1f04] ss:$16 sps:$4 sm:$0xff]   ;;  %v21580_v29 = vld [vmem:[%s23612_s6 + $0x1d00] ss:$16 sps:$4 sm:$0xff]  }
 0xc2d   : > { %16197 = vmatpush1.bf16.msra.mxu0 %v21544_v15  ;;  %v21583_v15 = vld [vmem:[%s23612_s6 + $0x1f00] ss:$16 sps:$4 sm:$0xff]  }
 0xc2e   : > { %16238 = vmatpush1.bf16.msra.mxu1 %v21547_v33  ;;  %16198 = vmatprep.subr.bf16.mxu0 %v21552_v8  ;;  %v21588_v33 = vld [vmem:[%s23612_s6 + $0x1d24] ss:$16 sps:$4 sm:$0xff]  }
 0xc2f   : > { %16239 = vmatprep.subr.bf16.mxu1 %v21555_v2  ;;  %v21591_v8 = vld [vmem:[%s23612_s6 + $0x1f24] ss:$16 sps:$4 sm:$0xff]   ;;  %v21586_v2 = vld [vmem:[%s23612_s6 + $0x1d20] ss:$16 sps:$4 sm:$0xff]  }
 0xc31   : > { %16199 = vmatpush1.bf16.msra.mxu0 %v21550_v26  ;;  %v21589_v26 = vld [vmem:[%s23612_s6 + $0x1f20] ss:$16 sps:$4 sm:$0xff]  }
 0xc32   : > { %16240 = vmatpush1.bf16.msra.mxu1 %v21553_v19  ;;  %16200 = vmatprep.subr.bf16.mxu0 %v21558_v22  ;;  %v21594_v19 = vld [vmem:[%s23612_s6 + $0x1d44] ss:$16 sps:$4 sm:$0xff]  }
 0xc33   : > { %16241 = vmatprep.subr.bf16.mxu1 %v21561_v53  ;;  %v21597_v22 = vld [vmem:[%s23612_s6 + $0x1f44] ss:$16 sps:$4 sm:$0xff]   ;;  %v21592_v53 = vld [vmem:[%s23612_s6 + $0x1d40] ss:$16 sps:$4 sm:$0xff]  }
 0xc35   : > { %16201 = vmatpush1.bf16.msra.mxu0 %v21556_v28  ;;  %v21595_v28 = vld [vmem:[%s23612_s6 + $0x1f40] ss:$16 sps:$4 sm:$0xff]  }
 0xc36   : > { %16242 = vmatpush1.bf16.msra.mxu1 %v21559_v60  ;;  %16202 = vmatprep.subr.bf16.mxu0 %v21564_v14  ;;  %v21600_v60 = vld [vmem:[%s23612_s6 + $0x1d64] ss:$16 sps:$4 sm:$0xff]  }
 0xc37   : > { %v25364_v16 = vpop.f32.mrb[68].mxu0  ;;  %16243 = vmatprep.subr.bf16.mxu1 %v21567_v59  ;;  %v21603_v14 = vld [vmem:[%s23612_s6 + $0x1f64] ss:$16 sps:$4 sm:$0xff]   ;;  %v21598_v59 = vld [vmem:[%s23612_s6 + $0x1d60] ss:$16 sps:$4 sm:$0xff]  }
 0xc38   : > { %v25367_v18 = vpop.f32.mrb[68].mxu1  ;;  %v12731_v11 = vpop.f32.mrb[69].mxu0 }
 0xc39   : > { %v20260_v46 = vadd.f32 %v12731_v11, %v9577_v12  ;;  %v12813_v3 = vpop.f32.mrb[69].mxu1  ;;  %v12733_v42 = vpop.f32.mrb[70].mxu0  ;;  %16203 = vmatpush1.bf16.msra.mxu0 %v21562_v41  ;;  %v21601_v12 = vld [vmem:[%s23612_s6 + $0x1f60] ss:$16 sps:$4 sm:$0xff]   ;;  %v21606_v41 = vld [vmem:[%s23612_s6 + $0x1d84] ss:$16 sps:$4 sm:$0xff]  }
 0xc3a   : > { %v20262_v50 = vadd.f32 %v12813_v3, %v9585_v63  ;;  %v12815_v44 = vpop.f32.mrb[70].mxu1  ;;  %16244 = vmatpush1.bf16.msra.mxu1 %v21565_v39  ;;  %v12734_v57 = vpop.f32.mrb[71].mxu0  ;;  %16204 = vmatprep.subr.bf16.mxu0 %v21570_v32  ;;  %v21609_v63 = vld [vmem:[%s23612_s6 + $0x1f84] ss:$16 sps:$4 sm:$0xff]   ;;  %v21604_v39 = vld [vmem:[%s23612_s6 + $0x1d80] ss:$16 sps:$4 sm:$0xff]   ;;  %v9573_v3 = vrot.slane %v25223_v48, %v23919_v25 }
 0xc3b   : > { %v12831_v31 = vmax.f32 %v20260_v46, 0.0  ;;  %v12816_v61 = vpop.f32.mrb[71].mxu1  ;;  %16245 = vmatprep.subr.bf16.mxu1 %v21573_v36  ;;  %v21607_v32 = vld [vmem:[%s23612_s6 + $0x1f80] ss:$16 sps:$4 sm:$0xff]   ;;  %v21612_v36 = vld [vmem:[%s23612_s6 + $0x1da4] ss:$16 sps:$4 sm:$0xff]  }
 0xc3c   : > { %v12833_v47 = vmax.f32 %v20262_v50, 0.0  ;;  %v21615_v11 = vld [vmem:[%s23612_s6 + $0x1fa4] ss:$16 sps:$4 sm:$0xff]   ;;  %v21610_v46 = vld [vmem:[%s23612_s6 + $0x1da0] ss:$16 sps:$4 sm:$0xff]   ;;  %v9581_v50 = vrot.slane %v25223_v48, %v23924_v40 }
 0xc3d   : > { %v25373_v45 = vpack.c.bf16 %v12831_v31, %v12831_v31  ;;  %16205 = vmatpush1.bf16.msra.mxu0 %v21568_v49  ;;  %v21613_v42 = vld [vmem:[%s23612_s6 + $0x1fa0] ss:$16 sps:$4 sm:$0xff]   ;;  %v21618_v49 = vld [vmem:[%s23612_s6 + $0x1dc4] ss:$16 sps:$4 sm:$0xff]  }
 0xc3e   : > { %v25376_v51 = vpack.c.bf16 %v12833_v47, %v12833_v47  ;;  %16246 = vmatpush1.bf16.msra.mxu1 %v21571_v9  ;;  %16206 = vmatprep.subr.bf16.mxu0 %v21576_v54  ;;  %v21621_v44 = vld [vmem:[%s23612_s6 + $0x1fc4] ss:$16 sps:$4 sm:$0xff]   ;;  %v21616_v57 = vld [vmem:[%s23612_s6 + $0x1dc0] ss:$16 sps:$4 sm:$0xff]   ;;  %v20259_v9 = vadd.f32 %v25364_v16, %v9573_v3  ;;  %v20261_v61 = vadd.f32 %v25367_v18, %v9581_v50  ;;  %v21630_v16 = vld [vmem:[%s23612_s6 + $0x100c] ss:$16 sps:$4 sm:$0xff]  }
 0xc3f   : > { %16224 = vmatprep.mubr.bf16.mxu0 %v25373_v45  ;;  %16247 = vmatprep.subr.bf16.mxu1 %v21579_v62  ;;  %v21619_v54 = vld [vmem:[%s23612_s6 + $0x1fc0] ss:$16 sps:$4 sm:$0xff]   ;;  %v21624_v31 = vld [vmem:[%s23612_s6 + $0x1de4] ss:$16 sps:$4 sm:$0xff]   ;;  %v21658_v3 = vld [vmem:[%s23612_s6 + $0x10a8] ss:$16 sps:$4 sm:$0xff]  }
 0xc40   : > { %16265 = vmatprep.mubr.bf16.mxu1 %v25376_v51  ;;  %v21627_v62 = vld [vmem:[%s23612_s6 + $0x1fe4] ss:$16 sps:$4 sm:$0xff]   ;;  %v21622_v48 = vld [vmem:[%s23612_s6 + $0x1de0] ss:$16 sps:$4 sm:$0xff]   ;;  %v12830_v47 = vmax.f32 %v20259_v9, 0.0 }
 0xc41   : > { %16207 = vmatpush1.bf16.msra.mxu0 %v21574_v0  ;;  %v21625_v0 = vld [vmem:[%s23612_s6 + $0x1fe0] ss:$16 sps:$4 sm:$0xff]  }
 0xc42   : > { %16248 = vmatpush1.bf16.msra.mxu1 %v21577_v17  ;;  %16208 = vmatprep.subr.bf16.mxu0 %v21582_v30  ;;  %v12832_v17 = vmax.f32 %v20261_v61, 0.0  ;;  %v21633_v30 = vld [vmem:[%s23612_s6 + $0x120c] ss:$16 sps:$4 sm:$0xff]   ;;  %v25422_v18 = vpack.c.bf16 %v12830_v47, %v12830_v47 }
 0xc43   : > { %16249 = vmatprep.subr.bf16.mxu1 %v21585_v6  ;;  %v21628_v6 = vld [vmem:[%s23612_s6 + $0x1008] ss:$16 sps:$4 sm:$0xff]  }
 0xc45   : > { %16209 = vmatpush1.bf16.msra.mxu0 %v21580_v29  ;;  %v21631_v29 = vld [vmem:[%s23612_s6 + $0x1208] ss:$16 sps:$4 sm:$0xff]  }
 0xc46   : > { %16250 = vmatpush1.bf16.msra.mxu1 %v21583_v15  ;;  %16210 = vmatprep.subr.bf16.mxu0 %v21588_v33  ;;  %v25425_v15 = vpack.c.bf16 %v12832_v17, %v12832_v17  ;;  %v21636_v33 = vld [vmem:[%s23612_s6 + $0x102c] ss:$16 sps:$4 sm:$0xff]   ;;  %v21667_v17 = vld [vmem:[%s23612_s6 + $0x12c8] ss:$16 sps:$4 sm:$0xff]  }
 0xc47   : > { %16251 = vmatprep.subr.bf16.mxu1 %v21591_v8  ;;  %v21639_v8 = vld [vmem:[%s23612_s6 + $0x122c] ss:$16 sps:$4 sm:$0xff]  }
 0xc49   : > { %16211 = vmatpush1.bf16.msra.mxu0 %v21586_v2  ;;  %v21634_v2 = vld [vmem:[%s23612_s6 + $0x1028] ss:$16 sps:$4 sm:$0xff]  }
 0xc4a   : > { %16252 = vmatpush1.bf16.msra.mxu1 %v21589_v26  ;;  %16212 = vmatprep.subr.bf16.mxu0 %v21594_v19  ;;  %v21637_v26 = vld [vmem:[%s23612_s6 + $0x1228] ss:$16 sps:$4 sm:$0xff]   ;;  %v21642_v19 = vld [vmem:[%s23612_s6 + $0x104c] ss:$16 sps:$4 sm:$0xff]  }
 0xc4b   : > { %16253 = vmatprep.subr.bf16.mxu1 %v21597_v22  ;;  %v21645_v22 = vld [vmem:[%s23612_s6 + $0x124c] ss:$16 sps:$4 sm:$0xff]  }
 0xc4d   : > { %16213 = vmatpush1.bf16.msra.mxu0 %v21592_v53  ;;  %v21640_v53 = vld [vmem:[%s23612_s6 + $0x1048] ss:$16 sps:$4 sm:$0xff]  }
 0xc4e   : > { %16254 = vmatpush1.bf16.msra.mxu1 %v21595_v28  ;;  %16214 = vmatprep.subr.bf16.mxu0 %v21600_v60  ;;  %v21643_v28 = vld [vmem:[%s23612_s6 + $0x1248] ss:$16 sps:$4 sm:$0xff]   ;;  %v21651_v60 = vld [vmem:[%s23612_s6 + $0x126c] ss:$16 sps:$4 sm:$0xff]  }
 0xc4f   : > { %16255 = vmatprep.subr.bf16.mxu1 %v21603_v14  ;;  %v21649_v14 = vld [vmem:[%s23612_s6 + $0x1268] ss:$16 sps:$4 sm:$0xff]  }
 0xc51   : > { %16215 = vmatpush1.bf16.msra.mxu0 %v21598_v59  ;;  %v21654_v59 = vld [vmem:[%s23612_s6 + $0x108c] ss:$16 sps:$4 sm:$0xff]  }
 0xc52   : > { %16256 = vmatpush1.bf16.msra.mxu1 %v21601_v12  ;;  %16216 = vmatprep.subr.bf16.mxu0 %v21606_v41  ;;  %v21657_v12 = vld [vmem:[%s23612_s6 + $0x128c] ss:$16 sps:$4 sm:$0xff]   ;;  %v21652_v41 = vld [vmem:[%s23612_s6 + $0x1088] ss:$16 sps:$4 sm:$0xff]  }
 0xc53   : > { %16257 = vmatprep.subr.bf16.mxu1 %v21609_v63  ;;  %v19705_v63 = vld [vmem:[%s24150_s2 + $0x4] sm:$0xf] }
 0xc55   : > { %16217 = vmatpush1.bf16.msra.mxu0 %v21604_v39  ;;  %v21655_v39 = vld [vmem:[%s23612_s6 + $0x1288] ss:$16 sps:$4 sm:$0xff]  }
 0xc56   : > { %16258 = vmatpush1.bf16.msra.mxu1 %v21607_v32  ;;  %16218 = vmatprep.subr.bf16.mxu0 %v21612_v36  ;;  %v21660_v32 = vld [vmem:[%s23612_s6 + $0x10ac] ss:$16 sps:$4 sm:$0xff]  }
 0xc57   : > { %16259 = vmatprep.subr.bf16.mxu1 %v21615_v11  ;;  %v21663_v36 = vld [vmem:[%s23612_s6 + $0x12ac] ss:$16 sps:$4 sm:$0xff]   ;;  %v13369_v11 = vrot.slane %v19705_v63, %v23097_v35 }
 0xc59   : > { %16219 = vmatpush1.bf16.msra.mxu0 %v21610_v46  ;;  %v13373_v46 = vrot.slane %v19705_v63, %v23101_v37  ;;  %v21696_v63 = vld [vmem:[%s23612_s6 + $0x116c] ss:$16 sps:$4 sm:$0xff]  }
 0xc5a   : > { %16260 = vmatpush1.bf16.msra.mxu1 %v21613_v42  ;;  %16220 = vmatprep.subr.bf16.mxu0 %v21618_v49  ;;  %v21661_v42 = vld [vmem:[%s23612_s6 + $0x12a8] ss:$16 sps:$4 sm:$0xff]   ;;  %v21666_v49 = vld [vmem:[%s23612_s6 + $0x10cc] ss:$16 sps:$4 sm:$0xff]  }
 0xc5b   : > { %16261 = vmatprep.subr.bf16.mxu1 %v21621_v44  ;;  %v21669_v44 = vld [vmem:[%s23612_s6 + $0x12cc] ss:$16 sps:$4 sm:$0xff]  }
 0xc5d   : > { %16221 = vmatpush1.bf16.msra.mxu0 %v21616_v57 }
 0xc5e   : > { %16262 = vmatpush1.bf16.msra.mxu1 %v21619_v54  ;;  %16222 = vmatprep.subr.bf16.mxu0 %v21624_v31 }
 0xc5f   : > { %16263 = vmatprep.subr.bf16.mxu1 %v21627_v62 }
 0xc61   : > { %16223 = vmatpush1.bf16.msra.mxu0 %v21622_v48  ;;  %v21664_v48 = vld [vmem:[%s23612_s6 + $0x10c8] ss:$16 sps:$4 sm:$0xff]  }
 0xc62   : > { %16264 = vmatpush1.bf16.msra.mxu1 %v21625_v0  ;;  %16274 = vmatprep.subr.bf16.mxu0 %v21630_v16 }
 0xc63   : > { %16315 = vmatprep.subr.bf16.mxu1 %v21633_v30  ;;  %v21672_v30 = vld [vmem:[%s23612_s6 + $0x10ec] ss:$16 sps:$4 sm:$0xff]  }
 0xc64   : > { %16225 = vmatmul.mubr.bf16.vlgmr.msra.gmra.mrb[84].mxu0 %v25422_v18 }
 0xc65   : > { %16266 = vmatmul.mubr.bf16.vlgmr.msra.gmra.mrb[84].mxu1 %v25425_v15  ;;  %16275 = vmatpush1.bf16.msra.mxu0 %v21628_v6 }
 0xc66   : > { %16306 = vmatprep.mubr.bf16.mxu0 %v25069_v24  ;;  %16316 = vmatpush1.bf16.msra.mxu1 %v21631_v29  ;;  %v21648_v24 = vld [vmem:[%s23612_s6 + $0x106c] ss:$16 sps:$4 sm:$0xff]  }
 0xc67   : > { %16347 = vmatprep.mubr.bf16.mxu1 %v25073_v58  ;;  %16276 = vmatprep.subr.bf16.mxu0 %v21636_v33  ;;  %v21646_v58 = vld [vmem:[%s23612_s6 + $0x1068] ss:$16 sps:$4 sm:$0xff]   ;;  %v21675_v33 = vld [vmem:[%s23612_s6 + $0x12ec] ss:$16 sps:$4 sm:$0xff]  }
 0xc68   : > { %16317 = vmatprep.subr.bf16.mxu1 %v21639_v8  ;;  %v21670_v8 = vld [vmem:[%s23612_s6 + $0x10e8] ss:$16 sps:$4 sm:$0xff]  }
 0xc69   : > { %16277 = vmatpush1.bf16.msra.mxu0 %v21634_v2  ;;  %v21673_v2 = vld [vmem:[%s23612_s6 + $0x12e8] ss:$16 sps:$4 sm:$0xff]  }
 0xc6a   : > { %16318 = vmatpush1.bf16.msra.mxu1 %v21637_v26  ;;  %16278 = vmatprep.subr.bf16.mxu0 %v21642_v19  ;;  %v21678_v26 = vld [vmem:[%s23612_s6 + $0x110c] ss:$16 sps:$4 sm:$0xff]  }
 0xc6b   : > { %16319 = vmatprep.subr.bf16.mxu1 %v21645_v22  ;;  %v21681_v19 = vld [vmem:[%s23612_s6 + $0x130c] ss:$16 sps:$4 sm:$0xff]   ;;  %v21676_v22 = vld [vmem:[%s23612_s6 + $0x1108] ss:$16 sps:$4 sm:$0xff]  }
 0xc6d   : > { %16279 = vmatpush1.bf16.msra.mxu0 %v21640_v53  ;;  %v21679_v53 = vld [vmem:[%s23612_s6 + $0x1308] ss:$16 sps:$4 sm:$0xff]  }
 0xc6e   : > { %16320 = vmatpush1.bf16.msra.mxu1 %v21643_v28  ;;  %16280 = vmatprep.subr.bf16.mxu0 %v21648_v24  ;;  %v21684_v28 = vld [vmem:[%s23612_s6 + $0x112c] ss:$16 sps:$4 sm:$0xff]  }
 0xc6f   : > { %16321 = vmatprep.subr.bf16.mxu1 %v21651_v60  ;;  %v21687_v24 = vld [vmem:[%s23612_s6 + $0x132c] ss:$16 sps:$4 sm:$0xff]   ;;  %v21682_v60 = vld [vmem:[%s23612_s6 + $0x1128] ss:$16 sps:$4 sm:$0xff]  }
 0xc71   : > { %16281 = vmatpush1.bf16.msra.mxu0 %v21646_v58  ;;  %v21685_v58 = vld [vmem:[%s23612_s6 + $0x1328] ss:$16 sps:$4 sm:$0xff]  }
 0xc72   : > { %16322 = vmatpush1.bf16.msra.mxu1 %v21649_v14  ;;  %16282 = vmatprep.subr.bf16.mxu0 %v21654_v59  ;;  %v21690_v14 = vld [vmem:[%s23612_s6 + $0x114c] ss:$16 sps:$4 sm:$0xff]  }
 0xc73   : > { %16323 = vmatprep.subr.bf16.mxu1 %v21657_v12  ;;  %v21693_v59 = vld [vmem:[%s23612_s6 + $0x134c] ss:$16 sps:$4 sm:$0xff]   ;;  %v21688_v12 = vld [vmem:[%s23612_s6 + $0x1148] ss:$16 sps:$4 sm:$0xff]  }
 0xc75   : > { %16283 = vmatpush1.bf16.msra.mxu0 %v21652_v41  ;;  %v21691_v41 = vld [vmem:[%s23612_s6 + $0x1348] ss:$16 sps:$4 sm:$0xff]  }
 0xc76   : > { %16324 = vmatpush1.bf16.msra.mxu1 %v21655_v39  ;;  %16284 = vmatprep.subr.bf16.mxu0 %v21660_v32  ;;  %v21699_v39 = vld [vmem:[%s23612_s6 + $0x136c] ss:$16 sps:$4 sm:$0xff]   ;;  %v21694_v32 = vld [vmem:[%s23612_s6 + $0x1168] ss:$16 sps:$4 sm:$0xff]  }
 0xc77   : > { %v15980_v50 = vpop.f32.mrb[72].mxu0  ;;  %16325 = vmatprep.subr.bf16.mxu1 %v21663_v36  ;;  %v21697_v36 = vld [vmem:[%s23612_s6 + $0x1368] ss:$16 sps:$4 sm:$0xff]  }
 0xc78   : > { %v15981_v57 = vadd.f32 %v15980_v50, %v13369_v11  ;;  %v16021_v9 = vpop.f32.mrb[72].mxu1  ;;  %v15982_v54 = vpop.f32.mrb[73].mxu0  ;;  %v21702_v11 = vld [vmem:[%s23612_s6 + $0x118c] ss:$16 sps:$4 sm:$0xff]  }
 0xc79   : > { %v15983_v31 = vadd.f32 %v15982_v54, %v13373_v46  ;;  %v16023_v61 = vpop.f32.mrb[73].mxu1  ;;  %v15984_v62 = vpop.f32.mrb[74].mxu0  ;;  %16285 = vmatpush1.bf16.msra.mxu0 %v21658_v3  ;;  %v21705_v46 = vld [vmem:[%s23612_s6 + $0x138c] ss:$16 sps:$4 sm:$0xff]   ;;  %v21700_v3 = vld [vmem:[%s23612_s6 + $0x1188] ss:$16 sps:$4 sm:$0xff]  }
 0xc7a   : > { %v25457_v47 = vadd.f32 %v16021_v9, %v15981_v57  ;;  %v16025_v0 = vpop.f32.mrb[74].mxu1  ;;  %16326 = vmatpush1.bf16.msra.mxu1 %v21661_v42  ;;  %v15985_v16 = vpop.f32.mrb[75].mxu0  ;;  %16286 = vmatprep.subr.bf16.mxu0 %v21666_v49  ;;  %v21703_v42 = vld [vmem:[%s23612_s6 + $0x1388] ss:$16 sps:$4 sm:$0xff]   ;;  %v21708_v49 = vld [vmem:[%s23612_s6 + $0x11ac] ss:$16 sps:$4 sm:$0xff]  }
 0xc7b   : > { %v25461_v6 = vadd.f32 %v16023_v61, %v15983_v31  ;;  %v16026_v29 = vpop.f32.mrb[75].mxu1  ;;  %16327 = vmatprep.subr.bf16.mxu1 %v21669_v44  ;;  %v21711_v50 = vld [vmem:[%s23612_s6 + $0x13ac] ss:$16 sps:$4 sm:$0xff]   ;;  %v21706_v44 = vld [vmem:[%s23612_s6 + $0x11a8] ss:$16 sps:$4 sm:$0xff]  }
 0xc7c   : > { %v21709_v57 = vld [vmem:[%s23612_s6 + $0x13a8] ss:$16 sps:$4 sm:$0xff]   ;;  %v21714_v9 = vld [vmem:[%s23612_s6 + $0x11cc] ss:$16 sps:$4 sm:$0xff]  }
 0xc7d   : > { %16287 = vmatpush1.bf16.msra.mxu0 %v21664_v48  ;;  %v21717_v54 = vld [vmem:[%s23612_s6 + $0x13cc] ss:$16 sps:$4 sm:$0xff]   ;;  %v21712_v31 = vld [vmem:[%s23612_s6 + $0x11c8] ss:$16 sps:$4 sm:$0xff]  }
 0xc7e   : > { %16328 = vmatpush1.bf16.msra.mxu1 %v21667_v17  ;;  %16288 = vmatprep.subr.bf16.mxu0 %v21672_v30  ;;  %v21715_v61 = vld [vmem:[%s23612_s6 + $0x13c8] ss:$16 sps:$4 sm:$0xff]   ;;  %v21720_v62 = vld [vmem:[%s23612_s6 + $0x11ec] ss:$16 sps:$4 sm:$0xff]  }
 0xc7f   : > { %16329 = vmatprep.subr.bf16.mxu1 %v21675_v33  ;;  %v21723_v48 = vld [vmem:[%s23612_s6 + $0x13ec] ss:$16 sps:$4 sm:$0xff]   ;;  %v21718_v0 = vld [vmem:[%s23612_s6 + $0x11e8] ss:$16 sps:$4 sm:$0xff]  }
 0xc80   : > { %v21721_v16 = vld [vmem:[%s23612_s6 + $0x13e8] ss:$16 sps:$4 sm:$0xff]   ;;  %v21726_v17 = vld [vmem:[%s23612_s6 + $0x140c] ss:$16 sps:$4 sm:$0xff]  }
 0xc81   : > { %16289 = vmatpush1.bf16.msra.mxu0 %v21670_v8  ;;  %v21729_v30 = vld [vmem:[%s23612_s6 + $0x160c] ss:$16 sps:$4 sm:$0xff]   ;;  %v21724_v29 = vld [vmem:[%s23612_s6 + $0x1408] ss:$16 sps:$4 sm:$0xff]  }
 0xc82   : > { %16330 = vmatpush1.bf16.msra.mxu1 %v21673_v2  ;;  %16290 = vmatprep.subr.bf16.mxu0 %v21678_v26  ;;  %v21727_v33 = vld [vmem:[%s23612_s6 + $0x1608] ss:$16 sps:$4 sm:$0xff]   ;;  %v21732_v8 = vld [vmem:[%s23612_s6 + $0x142c] ss:$16 sps:$4 sm:$0xff]  }
 0xc83   : > { %16331 = vmatprep.subr.bf16.mxu1 %v21681_v19  ;;  %v21735_v2 = vld [vmem:[%s23612_s6 + $0x162c] ss:$16 sps:$4 sm:$0xff]   ;;  %v21730_v26 = vld [vmem:[%s23612_s6 + $0x1428] ss:$16 sps:$4 sm:$0xff]  }
 0xc84   : > { %v21733_v19 = vld [vmem:[%s23612_s6 + $0x1628] ss:$16 sps:$4 sm:$0xff]  }
 0xc85   : > { %16291 = vmatpush1.bf16.msra.mxu0 %v21676_v22  ;;  %v21738_v22 = vld [vmem:[%s23612_s6 + $0x144c] ss:$16 sps:$4 sm:$0xff]  }
 0xc86   : > { %16332 = vmatpush1.bf16.msra.mxu1 %v21679_v53  ;;  %16292 = vmatprep.subr.bf16.mxu0 %v21684_v28  ;;  %v21739_v53 = vld [vmem:[%s23612_s6 + $0x1648] ss:$16 sps:$4 sm:$0xff]   ;;  %v21747_v28 = vld [vmem:[%s23612_s6 + $0x166c] ss:$16 sps:$4 sm:$0xff]  }
 0xc87   : > { %16333 = vmatprep.subr.bf16.mxu1 %v21687_v24  ;;  %v21745_v24 = vld [vmem:[%s23612_s6 + $0x1668] ss:$16 sps:$4 sm:$0xff]  }
 0xc89   : > { %16293 = vmatpush1.bf16.msra.mxu0 %v21682_v60  ;;  %v21750_v60 = vld [vmem:[%s23612_s6 + $0x148c] ss:$16 sps:$4 sm:$0xff]  }
 0xc8a   : > { %16334 = vmatpush1.bf16.msra.mxu1 %v21685_v58  ;;  %16294 = vmatprep.subr.bf16.mxu0 %v21690_v14  ;;  %v21753_v58 = vld [vmem:[%s23612_s6 + $0x168c] ss:$16 sps:$4 sm:$0xff]   ;;  %v21748_v14 = vld [vmem:[%s23612_s6 + $0x1488] ss:$16 sps:$4 sm:$0xff]  }
 0xc8b   : > { %16335 = vmatprep.subr.bf16.mxu1 %v21693_v59  ;;  %v21751_v59 = vld [vmem:[%s23612_s6 + $0x1688] ss:$16 sps:$4 sm:$0xff]  }
 0xc8d   : > { %16295 = vmatpush1.bf16.msra.mxu0 %v21688_v12  ;;  %v21756_v12 = vld [vmem:[%s23612_s6 + $0x14ac] ss:$16 sps:$4 sm:$0xff]  }
 0xc8e   : > { %16336 = vmatpush1.bf16.msra.mxu1 %v21691_v41  ;;  %16296 = vmatprep.subr.bf16.mxu0 %v21696_v63  ;;  %v21759_v41 = vld [vmem:[%s23612_s6 + $0x16ac] ss:$16 sps:$4 sm:$0xff]   ;;  %v21754_v63 = vld [vmem:[%s23612_s6 + $0x14a8] ss:$16 sps:$4 sm:$0xff]  }
 0xc8f   : > { %16337 = vmatprep.subr.bf16.mxu1 %v21699_v39  ;;  %v21757_v39 = vld [vmem:[%s23612_s6 + $0x16a8] ss:$16 sps:$4 sm:$0xff]  }
 0xc91   : > { %16297 = vmatpush1.bf16.msra.mxu0 %v21694_v32  ;;  %v21762_v32 = vld [vmem:[%s23612_s6 + $0x14cc] ss:$16 sps:$4 sm:$0xff]  }
 0xc92   : > { %16338 = vmatpush1.bf16.msra.mxu1 %v21697_v36  ;;  %16298 = vmatprep.subr.bf16.mxu0 %v21702_v11  ;;  %v21765_v11 = vld [vmem:[%s23612_s6 + $0x16cc] ss:$16 sps:$4 sm:$0xff]  }
 0xc93   : > { %16339 = vmatprep.subr.bf16.mxu1 %v21705_v46 }
 0xc95   : > { %16299 = vmatpush1.bf16.msra.mxu0 %v21700_v3 }
 0xc96   : > { %16340 = vmatpush1.bf16.msra.mxu1 %v21703_v42  ;;  %16300 = vmatprep.subr.bf16.mxu0 %v21708_v49 }
 0xc97   : > { %16341 = vmatprep.subr.bf16.mxu1 %v21711_v50 }
 0xc99   : > { %16301 = vmatpush1.bf16.msra.mxu0 %v21706_v44 }
 0xc9a   : > { %16342 = vmatpush1.bf16.msra.mxu1 %v21709_v57  ;;  %16302 = vmatprep.subr.bf16.mxu0 %v21714_v9  ;;  %v21760_v57 = vld [vmem:[%s23612_s6 + $0x14c8] ss:$16 sps:$4 sm:$0xff]  }
 0xc9b   : > { %16343 = vmatprep.subr.bf16.mxu1 %v21717_v54 }
 0xc9d   : > { %16303 = vmatpush1.bf16.msra.mxu0 %v21712_v31 }
 0xc9e   : > { %16344 = vmatpush1.bf16.msra.mxu1 %v21715_v61  ;;  %16304 = vmatprep.subr.bf16.mxu0 %v21720_v62  ;;  %v21768_v61 = vld [vmem:[%s23612_s6 + $0x14ec] ss:$16 sps:$4 sm:$0xff]  }
 0xc9f   : > { %16345 = vmatprep.subr.bf16.mxu1 %v21723_v48  ;;  %v21771_v48 = vld [vmem:[%s23612_s6 + $0x16ec] ss:$16 sps:$4 sm:$0xff]  }
 0xca1   : > { %16305 = vmatpush1.bf16.msra.mxu0 %v21718_v0  ;;  %v21766_v0 = vld [vmem:[%s23612_s6 + $0x14e8] ss:$16 sps:$4 sm:$0xff]  }
 0xca2   : > { %16346 = vmatpush1.bf16.msra.mxu1 %v21721_v16  ;;  %16356 = vmatprep.subr.bf16.mxu0 %v21726_v17  ;;  %v21769_v16 = vld [vmem:[%s23612_s6 + $0x16e8] ss:$16 sps:$4 sm:$0xff]   ;;  %v21774_v17 = vld [vmem:[%s23612_s6 + $0x150c] ss:$16 sps:$4 sm:$0xff]  }
 0xca3   : > { %16397 = vmatprep.subr.bf16.mxu1 %v21729_v30  ;;  %v21777_v30 = vld [vmem:[%s23612_s6 + $0x170c] ss:$16 sps:$4 sm:$0xff]  }
 0xca4   : > { %16307 = vmatmul.mubr.bf16.vlgmr.msra.gmra.mrb[88].mxu0 %v25151_v13  ;;  %v21741_v13 = vld [vmem:[%s23612_s6 + $0x164c] ss:$16 sps:$4 sm:$0xff]  }
 0xca5   : > { %16348 = vmatmul.mubr.bf16.vlgmr.msra.gmra.mrb[88].mxu1 %v25154_v4  ;;  %16357 = vmatpush1.bf16.msra.mxu0 %v21724_v29  ;;  %v21736_v4 = vld [vmem:[%s23612_s6 + $0x1448] ss:$16 sps:$4 sm:$0xff]  }
 0xca6   : > { %16388 = vmatprep.mubr.bf16.mxu0 %v25157_v1  ;;  %16398 = vmatpush1.bf16.msra.mxu1 %v21727_v33  ;;  %v21744_v1 = vld [vmem:[%s23612_s6 + $0x146c] ss:$16 sps:$4 sm:$0xff]   ;;  %v21772_v29 = vld [vmem:[%s23612_s6 + $0x1508] ss:$16 sps:$4 sm:$0xff]  }
 0xca7   : > { %16429 = vmatprep.mubr.bf16.mxu1 %v25161_v5  ;;  %16358 = vmatprep.subr.bf16.mxu0 %v21732_v8  ;;  %v21742_v5 = vld [vmem:[%s23612_s6 + $0x1468] ss:$16 sps:$4 sm:$0xff]   ;;  %v21780_v8 = vld [vmem:[%s23612_s6 + $0x152c] ss:$16 sps:$4 sm:$0xff]  }
 0xca8   : > { %16399 = vmatprep.subr.bf16.mxu1 %v21735_v2  ;;  %v21775_v33 = vld [vmem:[%s23612_s6 + $0x1708] ss:$16 sps:$4 sm:$0xff]   ;;  %v21783_v2 = vld [vmem:[%s23612_s6 + $0x172c] ss:$16 sps:$4 sm:$0xff]  }
 0xca9   : > { %16359 = vmatpush1.bf16.msra.mxu0 %v21730_v26  ;;  %v21778_v26 = vld [vmem:[%s23612_s6 + $0x1528] ss:$16 sps:$4 sm:$0xff]  }
 0xcaa   : > { %16400 = vmatpush1.bf16.msra.mxu1 %v21733_v19  ;;  %16360 = vmatprep.subr.bf16.mxu0 %v21738_v22  ;;  %v21781_v19 = vld [vmem:[%s23612_s6 + $0x1728] ss:$16 sps:$4 sm:$0xff]   ;;  %v21786_v22 = vld [vmem:[%s23612_s6 + $0x154c] ss:$16 sps:$4 sm:$0xff]  }
 0xcab   : > { %16401 = vmatprep.subr.bf16.mxu1 %v21741_v13  ;;  %v21789_v13 = vld [vmem:[%s23612_s6 + $0x174c] ss:$16 sps:$4 sm:$0xff]  }
 0xcad   : > { %16361 = vmatpush1.bf16.msra.mxu0 %v21736_v4  ;;  %v21784_v4 = vld [vmem:[%s23612_s6 + $0x1548] ss:$16 sps:$4 sm:$0xff]  }
 0xcae   : > { %16402 = vmatpush1.bf16.msra.mxu1 %v21739_v53  ;;  %16362 = vmatprep.subr.bf16.mxu0 %v21744_v1  ;;  %v21787_v53 = vld [vmem:[%s23612_s6 + $0x1748] ss:$16 sps:$4 sm:$0xff]   ;;  %v21792_v1 = vld [vmem:[%s23612_s6 + $0x156c] ss:$16 sps:$4 sm:$0xff]  }
 0xcaf   : > { %16403 = vmatprep.subr.bf16.mxu1 %v21747_v28  ;;  %v21795_v28 = vld [vmem:[%s23612_s6 + $0x176c] ss:$16 sps:$4 sm:$0xff]  }
 0xcb1   : > { %16363 = vmatpush1.bf16.msra.mxu0 %v21742_v5  ;;  %v21790_v5 = vld [vmem:[%s23612_s6 + $0x1568] ss:$16 sps:$4 sm:$0xff]  }
 0xcb2   : > { %16404 = vmatpush1.bf16.msra.mxu1 %v21745_v24  ;;  %16364 = vmatprep.subr.bf16.mxu0 %v21750_v60  ;;  %v21793_v24 = vld [vmem:[%s23612_s6 + $0x1768] ss:$16 sps:$4 sm:$0xff]   ;;  %v21798_v60 = vld [vmem:[%s23612_s6 + $0x158c] ss:$16 sps:$4 sm:$0xff]  }
 0xcb3   : > { %16405 = vmatprep.subr.bf16.mxu1 %v21753_v58  ;;  %v21801_v58 = vld [vmem:[%s23612_s6 + $0x178c] ss:$16 sps:$4 sm:$0xff]  }
 0xcb5   : > { %16365 = vmatpush1.bf16.msra.mxu0 %v21748_v14  ;;  %v21796_v14 = vld [vmem:[%s23612_s6 + $0x1588] ss:$16 sps:$4 sm:$0xff]  }
 0xcb6   : > { %16406 = vmatpush1.bf16.msra.mxu1 %v21751_v59  ;;  %16366 = vmatprep.subr.bf16.mxu0 %v21756_v12  ;;  %v21799_v59 = vld [vmem:[%s23612_s6 + $0x1788] ss:$16 sps:$4 sm:$0xff]   ;;  %v21804_v12 = vld [vmem:[%s23612_s6 + $0x15ac] ss:$16 sps:$4 sm:$0xff]  }
 0xcb7   : > { %v16062_v36 = vpop.f32.mrb[76].mxu0  ;;  %16407 = vmatprep.subr.bf16.mxu1 %v21759_v41  ;;  %v21807_v41 = vld [vmem:[%s23612_s6 + $0x17ac] ss:$16 sps:$4 sm:$0xff]  }
 0xcb8   : > { %v16063_v46 = vadd.f32 %v16062_v36, %v25457_v47  ;;  %v16103_v3 = vpop.f32.mrb[76].mxu1  ;;  %v16064_v42 = vpop.f32.mrb[77].mxu0  ;;  %v21763_v47 = vld [vmem:[%s23612_s6 + $0x16c8] ss:$16 sps:$4 sm:$0xff]   ;;  %v21813_v36 = vld [vmem:[%s23612_s6 + $0x17cc] ss:$16 sps:$4 sm:$0xff]  }
 0xcb9   : > { %v16065_v49 = vadd.f32 %v16064_v42, %v25461_v6  ;;  %v16105_v50 = vpop.f32.mrb[77].mxu1  ;;  %v16066_v44 = vpop.f32.mrb[78].mxu0  ;;  %16367 = vmatpush1.bf16.msra.mxu0 %v21754_v63  ;;  %v21802_v63 = vld [vmem:[%s23612_s6 + $0x15a8] ss:$16 sps:$4 sm:$0xff]   ;;  %v21819_v42 = vld [vmem:[%s23612_s6 + $0x17ec] ss:$16 sps:$4 sm:$0xff]  }
 0xcba   : > { %v25531_v9 = vadd.f32 %v16103_v3, %v16063_v46  ;;  %v16107_v54 = vpop.f32.mrb[78].mxu1  ;;  %16408 = vmatpush1.bf16.msra.mxu1 %v21757_v39  ;;  %v16067_v31 = vpop.f32.mrb[79].mxu0  ;;  %16368 = vmatprep.subr.bf16.mxu0 %v21762_v32  ;;  %v21805_v39 = vld [vmem:[%s23612_s6 + $0x17a8] ss:$16 sps:$4 sm:$0xff]   ;;  %v21810_v32 = vld [vmem:[%s23612_s6 + $0x15cc] ss:$16 sps:$4 sm:$0xff]  }
 0xcbb   : > { %v25535_v62 = vadd.f32 %v16105_v50, %v16065_v49  ;;  %v16108_v6 = vpop.f32.mrb[79].mxu1  ;;  %16409 = vmatprep.subr.bf16.mxu1 %v21765_v11  ;;  %v21808_v11 = vld [vmem:[%s23612_s6 + $0x15c8] ss:$16 sps:$4 sm:$0xff]   ;;  %v21816_v3 = vld [vmem:[%s23612_s6 + $0x15ec] ss:$16 sps:$4 sm:$0xff]  }
 0xcbc   : > { %v21811_v46 = vld [vmem:[%s23612_s6 + $0x17c8] ss:$16 sps:$4 sm:$0xff]   ;;  %v21822_v44 = vld [vmem:[%s23612_s6 + $0x180c] ss:$16 sps:$4 sm:$0xff]  }
 0xcbd   : > { %16369 = vmatpush1.bf16.msra.mxu0 %v21760_v57  ;;  %v21814_v49 = vld [vmem:[%s23612_s6 + $0x15e8] ss:$16 sps:$4 sm:$0xff]   ;;  %v21825_v57 = vld [vmem:[%s23612_s6 + $0x1a0c] ss:$16 sps:$4 sm:$0xff]  }
 0xcbe   : > { %16410 = vmatpush1.bf16.msra.mxu1 %v21763_v47  ;;  %16370 = vmatprep.subr.bf16.mxu0 %v21768_v61  ;;  %v21817_v50 = vld [vmem:[%s23612_s6 + $0x17e8] ss:$16 sps:$4 sm:$0xff]   ;;  %v21828_v47 = vld [vmem:[%s23612_s6 + $0x182c] ss:$16 sps:$4 sm:$0xff]  }
 0xcbf   : > { %16411 = vmatprep.subr.bf16.mxu1 %v21771_v48  ;;  %v21820_v54 = vld [vmem:[%s23612_s6 + $0x1808] ss:$16 sps:$4 sm:$0xff]   ;;  %v21831_v61 = vld [vmem:[%s23612_s6 + $0x1a2c] ss:$16 sps:$4 sm:$0xff]  }
 0xcc0   : > { %v21823_v31 = vld [vmem:[%s23612_s6 + $0x1a08] ss:$16 sps:$4 sm:$0xff]  }
 0xcc1   : > { %16371 = vmatpush1.bf16.msra.mxu0 %v21766_v0  ;;  %v21826_v6 = vld [vmem:[%s23612_s6 + $0x1828] ss:$16 sps:$4 sm:$0xff]   ;;  %v21834_v0 = vld [vmem:[%s23612_s6 + $0x184c] ss:$16 sps:$4 sm:$0xff]  }
 0xcc2   : > { %16412 = vmatpush1.bf16.msra.mxu1 %v21769_v16  ;;  %16372 = vmatprep.subr.bf16.mxu0 %v21774_v17  ;;  %v21829_v48 = vld [vmem:[%s23612_s6 + $0x1a28] ss:$16 sps:$4 sm:$0xff]   ;;  %v21843_v17 = vld [vmem:[%s23612_s6 + $0x1a6c] ss:$16 sps:$4 sm:$0xff]  }
 0xcc3   : > { %16413 = vmatprep.subr.bf16.mxu1 %v21777_v30  ;;  %v21835_v16 = vld [vmem:[%s23612_s6 + $0x1a48] ss:$16 sps:$4 sm:$0xff]  }
 0xcc4   : > { %v21841_v30 = vld [vmem:[%s23612_s6 + $0x1a68] ss:$16 sps:$4 sm:$0xff]  }
 0xcc5   : > { %16373 = vmatpush1.bf16.msra.mxu0 %v21772_v29  ;;  %v21846_v29 = vld [vmem:[%s23612_s6 + $0x188c] ss:$16 sps:$4 sm:$0xff]  }
 0xcc6   : > { %16414 = vmatpush1.bf16.msra.mxu1 %v21775_v33  ;;  %16374 = vmatprep.subr.bf16.mxu0 %v21780_v8  ;;  %v21849_v33 = vld [vmem:[%s23612_s6 + $0x1a8c] ss:$16 sps:$4 sm:$0xff]   ;;  %v21844_v8 = vld [vmem:[%s23612_s6 + $0x1888] ss:$16 sps:$4 sm:$0xff]  }
 0xcc7   : > { %16415 = vmatprep.subr.bf16.mxu1 %v21783_v2  ;;  %v21847_v2 = vld [vmem:[%s23612_s6 + $0x1a88] ss:$16 sps:$4 sm:$0xff]  }
 0xcc9   : > { %16375 = vmatpush1.bf16.msra.mxu0 %v21778_v26  ;;  %v21852_v26 = vld [vmem:[%s23612_s6 + $0x18ac] ss:$16 sps:$4 sm:$0xff]  }
 0xcca   : > { %16416 = vmatpush1.bf16.msra.mxu1 %v21781_v19  ;;  %16376 = vmatprep.subr.bf16.mxu0 %v21786_v22  ;;  %v21855_v19 = vld [vmem:[%s23612_s6 + $0x1aac] ss:$16 sps:$4 sm:$0xff]   ;;  %v21850_v22 = vld [vmem:[%s23612_s6 + $0x18a8] ss:$16 sps:$4 sm:$0xff]  }
 0xccb   : > { %16417 = vmatprep.subr.bf16.mxu1 %v21789_v13  ;;  %v21853_v13 = vld [vmem:[%s23612_s6 + $0x1aa8] ss:$16 sps:$4 sm:$0xff]  }
 0xccd   : > { %16377 = vmatpush1.bf16.msra.mxu0 %v21784_v4  ;;  %v21858_v4 = vld [vmem:[%s23612_s6 + $0x18cc] ss:$16 sps:$4 sm:$0xff]  }
 0xcce   : > { %16418 = vmatpush1.bf16.msra.mxu1 %v21787_v53  ;;  %16378 = vmatprep.subr.bf16.mxu0 %v21792_v1  ;;  %v21861_v1 = vld [vmem:[%s23612_s6 + $0x1acc] ss:$16 sps:$4 sm:$0xff]  }
 0xccf   : > { %16419 = vmatprep.subr.bf16.mxu1 %v21795_v28 }
 0xcd1   : > { %16379 = vmatpush1.bf16.msra.mxu0 %v21790_v5 }
 0xcd2   : > { %16420 = vmatpush1.bf16.msra.mxu1 %v21793_v24  ;;  %16380 = vmatprep.subr.bf16.mxu0 %v21798_v60 }
 0xcd3   : > { %16421 = vmatprep.subr.bf16.mxu1 %v21801_v58 }
 0xcd5   : > { %16381 = vmatpush1.bf16.msra.mxu0 %v21796_v14 }
 0xcd6   : > { %16422 = vmatpush1.bf16.msra.mxu1 %v21799_v59  ;;  %16382 = vmatprep.subr.bf16.mxu0 %v21804_v12  ;;  %v21856_v59 = vld [vmem:[%s23612_s6 + $0x18c8] ss:$16 sps:$4 sm:$0xff]  }
 0xcd7   : > { %16423 = vmatprep.subr.bf16.mxu1 %v21807_v41 }
 0xcd9   : > { %16383 = vmatpush1.bf16.msra.mxu0 %v21802_v63 }
 0xcda   : > { %16424 = vmatpush1.bf16.msra.mxu1 %v21805_v39  ;;  %16384 = vmatprep.subr.bf16.mxu0 %v21810_v32  ;;  %v21864_v39 = vld [vmem:[%s23612_s6 + $0x18ec] ss:$16 sps:$4 sm:$0xff]  }
 0xcdb   : > { %16425 = vmatprep.subr.bf16.mxu1 %v21813_v36  ;;  %v21867_v36 = vld [vmem:[%s23612_s6 + $0x1aec] ss:$16 sps:$4 sm:$0xff]  }
 0xcdd   : > { %16385 = vmatpush1.bf16.msra.mxu0 %v21808_v11  ;;  %v21862_v11 = vld [vmem:[%s23612_s6 + $0x18e8] ss:$16 sps:$4 sm:$0xff]  }
 0xcde   : > { %16426 = vmatpush1.bf16.msra.mxu1 %v21811_v46  ;;  %16386 = vmatprep.subr.bf16.mxu0 %v21816_v3  ;;  %v21865_v46 = vld [vmem:[%s23612_s6 + $0x1ae8] ss:$16 sps:$4 sm:$0xff]   ;;  %v21870_v3 = vld [vmem:[%s23612_s6 + $0x190c] ss:$16 sps:$4 sm:$0xff]  }
 0xcdf   : > { %16427 = vmatprep.subr.bf16.mxu1 %v21819_v42  ;;  %v21873_v42 = vld [vmem:[%s23612_s6 + $0x1b0c] ss:$16 sps:$4 sm:$0xff]  }
 0xce1   : > { %16387 = vmatpush1.bf16.msra.mxu0 %v21814_v49  ;;  %v21868_v49 = vld [vmem:[%s23612_s6 + $0x1908] ss:$16 sps:$4 sm:$0xff]  }
 0xce2   : > { %16428 = vmatpush1.bf16.msra.mxu1 %v21817_v50  ;;  %16438 = vmatprep.subr.bf16.mxu0 %v21822_v44  ;;  %v21871_v50 = vld [vmem:[%s23612_s6 + $0x1b08] ss:$16 sps:$4 sm:$0xff]   ;;  %v21876_v44 = vld [vmem:[%s23612_s6 + $0x192c] ss:$16 sps:$4 sm:$0xff]  }
 0xce3   : > { %16479 = vmatprep.subr.bf16.mxu1 %v21825_v57  ;;  %v21879_v57 = vld [vmem:[%s23612_s6 + $0x1b2c] ss:$16 sps:$4 sm:$0xff]  }
 0xce4   : > { %16389 = vmatmul.mubr.bf16.vlgmr.msra.gmra.mrb[92].mxu0 %v25250_v10  ;;  %v21837_v10 = vld [vmem:[%s23612_s6 + $0x1a4c] ss:$16 sps:$4 sm:$0xff]  }
 0xce5   : > { %16430 = vmatmul.mubr.bf16.vlgmr.msra.gmra.mrb[92].mxu1 %v25253_v27  ;;  %16439 = vmatpush1.bf16.msra.mxu0 %v21820_v54  ;;  %v21832_v27 = vld [vmem:[%s23612_s6 + $0x1848] ss:$16 sps:$4 sm:$0xff]  }
 0xce6   : > { %16470 = vmatprep.mubr.bf16.mxu0 %v25256_v34  ;;  %16480 = vmatpush1.bf16.msra.mxu1 %v21823_v31  ;;  %v21840_v34 = vld [vmem:[%s23612_s6 + $0x186c] ss:$16 sps:$4 sm:$0xff]   ;;  %v21874_v54 = vld [vmem:[%s23612_s6 + $0x1928] ss:$16 sps:$4 sm:$0xff]  }
 0xce7   : > { %16511 = vmatprep.mubr.bf16.mxu1 %v25260_v7  ;;  %16440 = vmatprep.subr.bf16.mxu0 %v21828_v47  ;;  %v21838_v7 = vld [vmem:[%s23612_s6 + $0x1868] ss:$16 sps:$4 sm:$0xff]   ;;  %v21882_v47 = vld [vmem:[%s23612_s6 + $0x194c] ss:$16 sps:$4 sm:$0xff]  }
 0xce8   : > { %16481 = vmatprep.subr.bf16.mxu1 %v21831_v61  ;;  %v21877_v31 = vld [vmem:[%s23612_s6 + $0x1b28] ss:$16 sps:$4 sm:$0xff]   ;;  %v21885_v61 = vld [vmem:[%s23612_s6 + $0x1b4c] ss:$16 sps:$4 sm:$0xff]  }
 0xce9   : > { %16441 = vmatpush1.bf16.msra.mxu0 %v21826_v6  ;;  %v21880_v6 = vld [vmem:[%s23612_s6 + $0x1948] ss:$16 sps:$4 sm:$0xff]  }
 0xcea   : > { %16482 = vmatpush1.bf16.msra.mxu1 %v21829_v48  ;;  %16442 = vmatprep.subr.bf16.mxu0 %v21834_v0  ;;  %v21883_v48 = vld [vmem:[%s23612_s6 + $0x1b48] ss:$16 sps:$4 sm:$0xff]   ;;  %v21888_v0 = vld [vmem:[%s23612_s6 + $0x196c] ss:$16 sps:$4 sm:$0xff]  }
 0xceb   : > { %16483 = vmatprep.subr.bf16.mxu1 %v21837_v10  ;;  %v21891_v10 = vld [vmem:[%s23612_s6 + $0x1b6c] ss:$16 sps:$4 sm:$0xff]  }
 0xced   : > { %16443 = vmatpush1.bf16.msra.mxu0 %v21832_v27  ;;  %v21886_v27 = vld [vmem:[%s23612_s6 + $0x1968] ss:$16 sps:$4 sm:$0xff]  }
 0xcee   : > { %16484 = vmatpush1.bf16.msra.mxu1 %v21835_v16  ;;  %16444 = vmatprep.subr.bf16.mxu0 %v21840_v34  ;;  %v21889_v16 = vld [vmem:[%s23612_s6 + $0x1b68] ss:$16 sps:$4 sm:$0xff]   ;;  %v21894_v34 = vld [vmem:[%s23612_s6 + $0x198c] ss:$16 sps:$4 sm:$0xff]  }
 0xcef   : > { %16485 = vmatprep.subr.bf16.mxu1 %v21843_v17  ;;  %v21897_v17 = vld [vmem:[%s23612_s6 + $0x1b8c] ss:$16 sps:$4 sm:$0xff]  }
 0xcf1   : > { %16445 = vmatpush1.bf16.msra.mxu0 %v21838_v7  ;;  %v21892_v7 = vld [vmem:[%s23612_s6 + $0x1988] ss:$16 sps:$4 sm:$0xff]  }
 0xcf2   : > { %16486 = vmatpush1.bf16.msra.mxu1 %v21841_v30  ;;  %16446 = vmatprep.subr.bf16.mxu0 %v21846_v29  ;;  %v21895_v30 = vld [vmem:[%s23612_s6 + $0x1b88] ss:$16 sps:$4 sm:$0xff]   ;;  %v21900_v29 = vld [vmem:[%s23612_s6 + $0x19ac] ss:$16 sps:$4 sm:$0xff]  }
 0xcf3   : > { %16487 = vmatprep.subr.bf16.mxu1 %v21849_v33  ;;  %v21903_v33 = vld [vmem:[%s23612_s6 + $0x1bac] ss:$16 sps:$4 sm:$0xff]  }
 0xcf5   : > { %16447 = vmatpush1.bf16.msra.mxu0 %v21844_v8  ;;  %v21898_v8 = vld [vmem:[%s23612_s6 + $0x19a8] ss:$16 sps:$4 sm:$0xff]  }
 0xcf6   : > { %16488 = vmatpush1.bf16.msra.mxu1 %v21847_v2  ;;  %16448 = vmatprep.subr.bf16.mxu0 %v21852_v26  ;;  %v21901_v2 = vld [vmem:[%s23612_s6 + $0x1ba8] ss:$16 sps:$4 sm:$0xff]   ;;  %v21906_v26 = vld [vmem:[%s23612_s6 + $0x19cc] ss:$16 sps:$4 sm:$0xff]  }
 0xcf7   : > { %v16144_v53 = vpop.f32.mrb[80].mxu0  ;;  %16489 = vmatprep.subr.bf16.mxu1 %v21855_v19  ;;  %v21909_v19 = vld [vmem:[%s23612_s6 + $0x1bcc] ss:$16 sps:$4 sm:$0xff]  }
 0xcf8   : > { %v16145_v28 = vadd.f32 %v16144_v53, %v25531_v9  ;;  %v16185_v5 = vpop.f32.mrb[80].mxu1  ;;  %v16146_v24 = vpop.f32.mrb[81].mxu0  ;;  %v21859_v9 = vld [vmem:[%s23612_s6 + $0x1ac8] ss:$16 sps:$4 sm:$0xff]   ;;  %v21915_v53 = vld [vmem:[%s23612_s6 + $0x1bec] ss:$16 sps:$4 sm:$0xff]  }
 0xcf9   : > { %v16147_v60 = vadd.f32 %v16146_v24, %v25535_v62  ;;  %v16187_v58 = vpop.f32.mrb[81].mxu1  ;;  %v16148_v14 = vpop.f32.mrb[82].mxu0  ;;  %16449 = vmatpush1.bf16.msra.mxu0 %v21850_v22  ;;  %v21904_v22 = vld [vmem:[%s23612_s6 + $0x19c8] ss:$16 sps:$4 sm:$0xff]   ;;  %v21921_v24 = vld [vmem:[%s23612_s6 + $0x1e0c] ss:$16 sps:$4 sm:$0xff]  }
 0xcfa   : > { %v25605_v12 = vadd.f32 %v16185_v5, %v16145_v28  ;;  %v16189_v41 = vpop.f32.mrb[82].mxu1  ;;  %16490 = vmatpush1.bf16.msra.mxu1 %v21853_v13  ;;  %v16149_v63 = vpop.f32.mrb[83].mxu0  ;;  %16450 = vmatprep.subr.bf16.mxu0 %v21858_v4  ;;  %v21907_v13 = vld [vmem:[%s23612_s6 + $0x1bc8] ss:$16 sps:$4 sm:$0xff]   ;;  %v21912_v4 = vld [vmem:[%s23612_s6 + $0x19ec] ss:$16 sps:$4 sm:$0xff]  }
 0xcfb   : > { %v25609_v32 = vadd.f32 %v16187_v58, %v16147_v60  ;;  %v16190_v62 = vpop.f32.mrb[83].mxu1  ;;  %16491 = vmatprep.subr.bf16.mxu1 %v21861_v1  ;;  %v21910_v1 = vld [vmem:[%s23612_s6 + $0x19e8] ss:$16 sps:$4 sm:$0xff]   ;;  %v21918_v5 = vld [vmem:[%s23612_s6 + $0x1c0c] ss:$16 sps:$4 sm:$0xff]  }
 0xcfc   : > { %v21913_v28 = vld [vmem:[%s23612_s6 + $0x1be8] ss:$16 sps:$4 sm:$0xff]   ;;  %v21924_v14 = vld [vmem:[%s23612_s6 + $0x1c2c] ss:$16 sps:$4 sm:$0xff]  }
 0xcfd   : > { %16451 = vmatpush1.bf16.msra.mxu0 %v21856_v59  ;;  %v21916_v60 = vld [vmem:[%s23612_s6 + $0x1c08] ss:$16 sps:$4 sm:$0xff]   ;;  %v21927_v59 = vld [vmem:[%s23612_s6 + $0x1e2c] ss:$16 sps:$4 sm:$0xff]  }
 0xcfe   : > { %16492 = vmatpush1.bf16.msra.mxu1 %v21859_v9  ;;  %16452 = vmatprep.subr.bf16.mxu0 %v21864_v39  ;;  %v21919_v58 = vld [vmem:[%s23612_s6 + $0x1e08] ss:$16 sps:$4 sm:$0xff]   ;;  %v21930_v9 = vld [vmem:[%s23612_s6 + $0x1c4c] ss:$16 sps:$4 sm:$0xff]  }
 0xcff   : > { %16493 = vmatprep.subr.bf16.mxu1 %v21867_v36  ;;  %v21922_v41 = vld [vmem:[%s23612_s6 + $0x1c28] ss:$16 sps:$4 sm:$0xff]   ;;  %v21939_v62 = vld [vmem:[%s23612_s6 + $0x1e6c] ss:$16 sps:$4 sm:$0xff]  }
 0xd00   : > { %v21925_v63 = vld [vmem:[%s23612_s6 + $0x1e28] ss:$16 sps:$4 sm:$0xff]  }
 0xd01   : > { %16453 = vmatpush1.bf16.msra.mxu0 %v21862_v11  ;;  %v21931_v39 = vld [vmem:[%s23612_s6 + $0x1e48] ss:$16 sps:$4 sm:$0xff]   ;;  %v21942_v11 = vld [vmem:[%s23612_s6 + $0x1c8c] ss:$16 sps:$4 sm:$0xff]  }
 0xd02   : > { %16494 = vmatpush1.bf16.msra.mxu1 %v21865_v46  ;;  %16454 = vmatprep.subr.bf16.mxu0 %v21870_v3  ;;  %v21937_v36 = vld [vmem:[%s23612_s6 + $0x1e68] ss:$16 sps:$4 sm:$0xff]   ;;  %v21945_v46 = vld [vmem:[%s23612_s6 + $0x1e8c] ss:$16 sps:$4 sm:$0xff]  }
 0xd03   : > { %16495 = vmatprep.subr.bf16.mxu1 %v21873_v42  ;;  %v21940_v3 = vld [vmem:[%s23612_s6 + $0x1c88] ss:$16 sps:$4 sm:$0xff]  }
 0xd04   : > { %v21943_v42 = vld [vmem:[%s23612_s6 + $0x1e88] ss:$16 sps:$4 sm:$0xff]  }
 0xd05   : > { %16455 = vmatpush1.bf16.msra.mxu0 %v21868_v49  ;;  %v21948_v49 = vld [vmem:[%s23612_s6 + $0x1cac] ss:$16 sps:$4 sm:$0xff]  }
 0xd06   : > { %16496 = vmatpush1.bf16.msra.mxu1 %v21871_v50  ;;  %16456 = vmatprep.subr.bf16.mxu0 %v21876_v44  ;;  %v21951_v50 = vld [vmem:[%s23612_s6 + $0x1eac] ss:$16 sps:$4 sm:$0xff]   ;;  %v21946_v44 = vld [vmem:[%s23612_s6 + $0x1ca8] ss:$16 sps:$4 sm:$0xff]  }
 0xd07   : > { %16497 = vmatprep.subr.bf16.mxu1 %v21879_v57  ;;  %v21949_v57 = vld [vmem:[%s23612_s6 + $0x1ea8] ss:$16 sps:$4 sm:$0xff]  }
 0xd09   : > { %16457 = vmatpush1.bf16.msra.mxu0 %v21874_v54  ;;  %v21954_v54 = vld [vmem:[%s23612_s6 + $0x1ccc] ss:$16 sps:$4 sm:$0xff]  }
 0xd0a   : > { %16498 = vmatpush1.bf16.msra.mxu1 %v21877_v31  ;;  %16458 = vmatprep.subr.bf16.mxu0 %v21882_v47  ;;  %v21957_v47 = vld [vmem:[%s23612_s6 + $0x1ecc] ss:$16 sps:$4 sm:$0xff]  }
 0xd0b   : > { %16499 = vmatprep.subr.bf16.mxu1 %v21885_v61 }
 0xd0d   : > { %16459 = vmatpush1.bf16.msra.mxu0 %v21880_v6 }
 0xd0e   : > { %16500 = vmatpush1.bf16.msra.mxu1 %v21883_v48  ;;  %16460 = vmatprep.subr.bf16.mxu0 %v21888_v0 }
 0xd0f   : > { %16501 = vmatprep.subr.bf16.mxu1 %v21891_v10 }
 0xd11   : > { %16461 = vmatpush1.bf16.msra.mxu0 %v21886_v27 }
 0xd12   : > { %16502 = vmatpush1.bf16.msra.mxu1 %v21889_v16  ;;  %16462 = vmatprep.subr.bf16.mxu0 %v21894_v34  ;;  %v21952_v16 = vld [vmem:[%s23612_s6 + $0x1cc8] ss:$16 sps:$4 sm:$0xff]  }
 0xd13   : > { %16503 = vmatprep.subr.bf16.mxu1 %v21897_v17 }
 0xd15   : > { %16463 = vmatpush1.bf16.msra.mxu0 %v21892_v7 }
 0xd16   : > { %16504 = vmatpush1.bf16.msra.mxu1 %v21895_v30  ;;  %16464 = vmatprep.subr.bf16.mxu0 %v21900_v29  ;;  %v21960_v30 = vld [vmem:[%s23612_s6 + $0x1cec] ss:$16 sps:$4 sm:$0xff]  }
 0xd17   : > { %16505 = vmatprep.subr.bf16.mxu1 %v21903_v33  ;;  %v21963_v33 = vld [vmem:[%s23612_s6 + $0x1eec] ss:$16 sps:$4 sm:$0xff]  }
 0xd19   : > { %16465 = vmatpush1.bf16.msra.mxu0 %v21898_v8  ;;  %v21958_v8 = vld [vmem:[%s23612_s6 + $0x1ce8] ss:$16 sps:$4 sm:$0xff]  }
 0xd1a   : > { %16506 = vmatpush1.bf16.msra.mxu1 %v21901_v2  ;;  %16466 = vmatprep.subr.bf16.mxu0 %v21906_v26  ;;  %v21961_v2 = vld [vmem:[%s23612_s6 + $0x1ee8] ss:$16 sps:$4 sm:$0xff]   ;;  %v21966_v26 = vld [vmem:[%s23612_s6 + $0x1d0c] ss:$16 sps:$4 sm:$0xff]  }
 0xd1b   : > { %16507 = vmatprep.subr.bf16.mxu1 %v21909_v19  ;;  %v21969_v19 = vld [vmem:[%s23612_s6 + $0x1f0c] ss:$16 sps:$4 sm:$0xff]  }
 0xd1d   : > { %16467 = vmatpush1.bf16.msra.mxu0 %v21904_v22  ;;  %v21964_v22 = vld [vmem:[%s23612_s6 + $0x1d08] ss:$16 sps:$4 sm:$0xff]  }
 0xd1e   : > { %16508 = vmatpush1.bf16.msra.mxu1 %v21907_v13  ;;  %16468 = vmatprep.subr.bf16.mxu0 %v21912_v4  ;;  %v21967_v13 = vld [vmem:[%s23612_s6 + $0x1f08] ss:$16 sps:$4 sm:$0xff]   ;;  %v21972_v4 = vld [vmem:[%s23612_s6 + $0x1d2c] ss:$16 sps:$4 sm:$0xff]  }
 0xd1f   : > { %16509 = vmatprep.subr.bf16.mxu1 %v21915_v53  ;;  %v21975_v53 = vld [vmem:[%s23612_s6 + $0x1f2c] ss:$16 sps:$4 sm:$0xff]  }
 0xd21   : > { %16469 = vmatpush1.bf16.msra.mxu0 %v21910_v1  ;;  %v21970_v1 = vld [vmem:[%s23612_s6 + $0x1d28] ss:$16 sps:$4 sm:$0xff]  }
 0xd22   : > { %16510 = vmatpush1.bf16.msra.mxu1 %v21913_v28  ;;  %16520 = vmatprep.subr.bf16.mxu0 %v21918_v5  ;;  %v21973_v28 = vld [vmem:[%s23612_s6 + $0x1f28] ss:$16 sps:$4 sm:$0xff]   ;;  %v21978_v5 = vld [vmem:[%s23612_s6 + $0x1d4c] ss:$16 sps:$4 sm:$0xff]  }
 0xd23   : > { %16561 = vmatprep.subr.bf16.mxu1 %v21921_v24  ;;  %v21981_v24 = vld [vmem:[%s23612_s6 + $0x1f4c] ss:$16 sps:$4 sm:$0xff]  }
 0xd24   : > { %16471 = vmatmul.mubr.bf16.vlgmr.msra.gmra.mrb[96].mxu0 %v25332_v55  ;;  %v21933_v55 = vld [vmem:[%s23612_s6 + $0x1e4c] ss:$16 sps:$4 sm:$0xff]  }
 0xd25   : > { %16512 = vmatmul.mubr.bf16.vlgmr.msra.gmra.mrb[96].mxu1 %v25336_v20  ;;  %16521 = vmatpush1.bf16.msra.mxu0 %v21916_v60  ;;  %v21928_v20 = vld [vmem:[%s23612_s6 + $0x1c48] ss:$16 sps:$4 sm:$0xff]  }
 0xd26   : > { %16552 = vmatprep.mubr.bf16.mxu0 %v25373_v45  ;;  %16562 = vmatpush1.bf16.msra.mxu1 %v21919_v58  ;;  %v21936_v45 = vld [vmem:[%s23612_s6 + $0x1c6c] ss:$16 sps:$4 sm:$0xff]   ;;  %v21976_v60 = vld [vmem:[%s23612_s6 + $0x1d48] ss:$16 sps:$4 sm:$0xff]  }
 0xd27   : > { %16593 = vmatprep.mubr.bf16.mxu1 %v25376_v51  ;;  %16522 = vmatprep.subr.bf16.mxu0 %v21924_v14  ;;  %v21934_v51 = vld [vmem:[%s23612_s6 + $0x1c68] ss:$16 sps:$4 sm:$0xff]   ;;  %v21984_v14 = vld [vmem:[%s23612_s6 + $0x1d6c] ss:$16 sps:$4 sm:$0xff]  }
 0xd28   : > { %16563 = vmatprep.subr.bf16.mxu1 %v21927_v59  ;;  %v21979_v58 = vld [vmem:[%s23612_s6 + $0x1f48] ss:$16 sps:$4 sm:$0xff]   ;;  %v21987_v59 = vld [vmem:[%s23612_s6 + $0x1f6c] ss:$16 sps:$4 sm:$0xff]  }
 0xd29   : > { %16523 = vmatpush1.bf16.msra.mxu0 %v21922_v41  ;;  %v21982_v41 = vld [vmem:[%s23612_s6 + $0x1d68] ss:$16 sps:$4 sm:$0xff]  }
 0xd2a   : > { %16564 = vmatpush1.bf16.msra.mxu1 %v21925_v63  ;;  %16524 = vmatprep.subr.bf16.mxu0 %v21930_v9  ;;  %v21985_v63 = vld [vmem:[%s23612_s6 + $0x1f68] ss:$16 sps:$4 sm:$0xff]   ;;  %v21990_v9 = vld [vmem:[%s23612_s6 + $0x1d8c] ss:$16 sps:$4 sm:$0xff]  }
 0xd2b   : > { %16565 = vmatprep.subr.bf16.mxu1 %v21933_v55  ;;  %v21993_v55 = vld [vmem:[%s23612_s6 + $0x1f8c] ss:$16 sps:$4 sm:$0xff]  }
 0xd2d   : > { %16525 = vmatpush1.bf16.msra.mxu0 %v21928_v20  ;;  %v21988_v20 = vld [vmem:[%s23612_s6 + $0x1d88] ss:$16 sps:$4 sm:$0xff]  }
 0xd2e   : > { %16566 = vmatpush1.bf16.msra.mxu1 %v21931_v39  ;;  %16526 = vmatprep.subr.bf16.mxu0 %v21936_v45  ;;  %v21991_v39 = vld [vmem:[%s23612_s6 + $0x1f88] ss:$16 sps:$4 sm:$0xff]   ;;  %v21996_v45 = vld [vmem:[%s23612_s6 + $0x1dac] ss:$16 sps:$4 sm:$0xff]  }
 0xd2f   : > { %16567 = vmatprep.subr.bf16.mxu1 %v21939_v62  ;;  %v21999_v62 = vld [vmem:[%s23612_s6 + $0x1fac] ss:$16 sps:$4 sm:$0xff]  }
 0xd31   : > { %16527 = vmatpush1.bf16.msra.mxu0 %v21934_v51  ;;  %v21994_v51 = vld [vmem:[%s23612_s6 + $0x1da8] ss:$16 sps:$4 sm:$0xff]  }
 0xd32   : > { %16568 = vmatpush1.bf16.msra.mxu1 %v21937_v36  ;;  %16528 = vmatprep.subr.bf16.mxu0 %v21942_v11  ;;  %v21997_v36 = vld [vmem:[%s23612_s6 + $0x1fa8] ss:$16 sps:$4 sm:$0xff]   ;;  %v22002_v11 = vld [vmem:[%s23612_s6 + $0x1dcc] ss:$16 sps:$4 sm:$0xff]  }
 0xd33   : > { %16569 = vmatprep.subr.bf16.mxu1 %v21945_v46  ;;  %v22005_v46 = vld [vmem:[%s23612_s6 + $0x1fcc] ss:$16 sps:$4 sm:$0xff]  }
 0xd35   : > { %16529 = vmatpush1.bf16.msra.mxu0 %v21940_v3  ;;  %v22000_v3 = vld [vmem:[%s23612_s6 + $0x1dc8] ss:$16 sps:$4 sm:$0xff]  }
 0xd36   : > { %16570 = vmatpush1.bf16.msra.mxu1 %v21943_v42  ;;  %16530 = vmatprep.subr.bf16.mxu0 %v21948_v49  ;;  %v22003_v42 = vld [vmem:[%s23612_s6 + $0x1fc8] ss:$16 sps:$4 sm:$0xff]   ;;  %v22008_v49 = vld [vmem:[%s23612_s6 + $0x1dec] ss:$16 sps:$4 sm:$0xff]  }
 0xd37   : > { %v16226_v31 = vpop.f32.mrb[84].mxu0  ;;  %16571 = vmatprep.subr.bf16.mxu1 %v21951_v50  ;;  %v22011_v50 = vld [vmem:[%s23612_s6 + $0x1fec] ss:$16 sps:$4 sm:$0xff]  }
 0xd38   : > { %v16227_v61 = vadd.f32 %v16226_v31, %v25605_v12  ;;  %v16267_v6 = vpop.f32.mrb[84].mxu1  ;;  %v16228_v48 = vpop.f32.mrb[85].mxu0  ;;  %v21955_v12 = vld [vmem:[%s23612_s6 + $0x1ec8] ss:$16 sps:$4 sm:$0xff]  }
 0xd39   : > { %v16229_v0 = vadd.f32 %v16228_v48, %v25609_v32  ;;  %v16269_v10 = vpop.f32.mrb[85].mxu1  ;;  %v16230_v27 = vpop.f32.mrb[86].mxu0  ;;  %16531 = vmatpush1.bf16.msra.mxu0 %v21946_v44  ;;  %v22006_v44 = vld [vmem:[%s23612_s6 + $0x1de8] ss:$16 sps:$4 sm:$0xff]  }
 0xd3a   : > { %v25679_v34 = vadd.f32 %v16267_v6, %v16227_v61  ;;  %v16271_v17 = vpop.f32.mrb[86].mxu1  ;;  %16572 = vmatpush1.bf16.msra.mxu1 %v21949_v57  ;;  %v16231_v7 = vpop.f32.mrb[87].mxu0  ;;  %16532 = vmatprep.subr.bf16.mxu0 %v21954_v54  ;;  %v22009_v57 = vld [vmem:[%s23612_s6 + $0x1fe8] ss:$16 sps:$4 sm:$0xff]   ;;  %v22021_v54 = vld [vmem:[%s24150_s2 + $0x4] sm:$0xf] }
 0xd3b   : > { %v25683_v29 = vadd.f32 %v16269_v10, %v16229_v0  ;;  %v16272_v32 = vpop.f32.mrb[87].mxu1  ;;  %16573 = vmatprep.subr.bf16.mxu1 %v21957_v47  ;;  %v13377_v31 = vrot.slane %v22021_v54, %v23104_v38  ;;  %v13381_v47 = vrot.slane %v22021_v54, %v23109_v43 }
 0xd3d   : > { %16533 = vmatpush1.bf16.msra.mxu0 %v21952_v16 }
 0xd3e   : > { %16574 = vmatpush1.bf16.msra.mxu1 %v21955_v12  ;;  %16534 = vmatprep.subr.bf16.mxu0 %v21960_v30 }
 0xd3f   : > { %16575 = vmatprep.subr.bf16.mxu1 %v21963_v33 }
 0xd41   : > { %16535 = vmatpush1.bf16.msra.mxu0 %v21958_v8 }
 0xd42   : > { %16576 = vmatpush1.bf16.msra.mxu1 %v21961_v2  ;;  %16536 = vmatprep.subr.bf16.mxu0 %v21966_v26 }
 0xd43   : > { %16577 = vmatprep.subr.bf16.mxu1 %v21969_v19 }
 0xd45   : > { %16537 = vmatpush1.bf16.msra.mxu0 %v21964_v22 }
 0xd46   : > { %16578 = vmatpush1.bf16.msra.mxu1 %v21967_v13  ;;  %16538 = vmatprep.subr.bf16.mxu0 %v21972_v4 }
 0xd47   : > { %16579 = vmatprep.subr.bf16.mxu1 %v21975_v53 }
 0xd49   : > { %16539 = vmatpush1.bf16.msra.mxu0 %v21970_v1 }
 0xd4a   : > { %16580 = vmatpush1.bf16.msra.mxu1 %v21973_v28  ;;  %16540 = vmatprep.subr.bf16.mxu0 %v21978_v5 }
 0xd4b   : > { %16581 = vmatprep.subr.bf16.mxu1 %v21981_v24 }
 0xd4d   : > { %16541 = vmatpush1.bf16.msra.mxu0 %v21976_v60 }
 0xd4e   : > { %16582 = vmatpush1.bf16.msra.mxu1 %v21979_v58  ;;  %16542 = vmatprep.subr.bf16.mxu0 %v21984_v14 }
 0xd4f   : > { %16583 = vmatprep.subr.bf16.mxu1 %v21987_v59 }
 0xd51   : > { %16543 = vmatpush1.bf16.msra.mxu0 %v21982_v41 }
 0xd52   : > { %16584 = vmatpush1.bf16.msra.mxu1 %v21985_v63  ;;  %16544 = vmatprep.subr.bf16.mxu0 %v21990_v9 }
 0xd53   : > { %16585 = vmatprep.subr.bf16.mxu1 %v21993_v55 }
 0xd55   : > { %16545 = vmatpush1.bf16.msra.mxu0 %v21988_v20 }
 0xd56   : > { %16586 = vmatpush1.bf16.msra.mxu1 %v21991_v39  ;;  %16546 = vmatprep.subr.bf16.mxu0 %v21996_v45  ;;  %v16602_v45 = vadd.f32 %v25679_v34, %v24433_v52 }
 0xd57   : > { %16587 = vmatprep.subr.bf16.mxu1 %v21999_v62  ;;  %v16603_v62 = vadd.f32 %v25683_v29, %v24437_v21 }
 0xd59   : > { %16547 = vmatpush1.bf16.msra.mxu0 %v21994_v51 }
 0xd5a   : > { %16588 = vmatpush1.bf16.msra.mxu1 %v21997_v36  ;;  %16548 = vmatprep.subr.bf16.mxu0 %v22002_v11 }
 0xd5b   : > { %16589 = vmatprep.subr.bf16.mxu1 %v22005_v46 }
 0xd5d   : > { %16549 = vmatpush1.bf16.msra.mxu0 %v22000_v3 }
 0xd5e   : > { %16590 = vmatpush1.bf16.msra.mxu1 %v22003_v42  ;;  %16550 = vmatprep.subr.bf16.mxu0 %v22008_v49 }
 0xd5f   : > { %16591 = vmatprep.subr.bf16.mxu1 %v22011_v50 }
 0xd61   : > { %16551 = vmatpush1.bf16.msra.mxu0 %v22006_v44 }
 0xd62   : > { %16592 = vmatpush1.bf16.msra.mxu1 %v22009_v57 }
 0xd64   : > { %16553 = vmatmul.mubr.bf16.vlgmr.msra.gmra.mrb[100].mxu0 %v25422_v18 }
 0xd65   : > { %16594 = vmatmul.mubr.bf16.vlgmr.msra.gmra.mrb[100].mxu1 %v25425_v15 }
 0xd77   : > { %v16308_v61 = vpop.f32.mrb[88].mxu0 }
 0xd78   : > { %v16309_v6 = vadd.f32 %v16308_v61, %v13377_v31  ;;  %v16349_v48 = vpop.f32.mrb[88].mxu1  ;;  %v16310_v0 = vpop.f32.mrb[89].mxu0  ;;  %v16608_v31 = vadd.f32 %v16603_v62, %v16602_v45 }
 0xd79   : > { %v16311_v10 = vadd.f32 %v16310_v0, %v13381_v47  ;;  %v16351_v27 = vpop.f32.mrb[89].mxu1  ;;  %v16312_v16 = vpop.f32.mrb[90].mxu0 }
 0xd7a   : > { %v16350_v17 = vadd.f32 %v16349_v48, %v16309_v6  ;;  %v16353_v7 = vpop.f32.mrb[90].mxu1  ;;  %v16313_v12 = vpop.f32.mrb[91].mxu0 }
 0xd7b   : > { %v16352_v30 = vadd.f32 %v16351_v27, %v16311_v10  ;;  %v16354_v32 = vpop.f32.mrb[91].mxu1 }
 0xdb7   : > { %v16390_v18 = vpop.f32.mrb[92].mxu0 }
 0xdb8   : > { %v16391_v33 = vadd.f32 %v16390_v18, %v16350_v17  ;;  %v16431_v15 = vpop.f32.mrb[92].mxu1  ;;  %v16392_v8 = vpop.f32.mrb[93].mxu0 }
 0xdb9   : > { %v16393_v2 = vadd.f32 %v16392_v8, %v16352_v30  ;;  %v16433_v26 = vpop.f32.mrb[93].mxu1  ;;  %v16394_v19 = vpop.f32.mrb[94].mxu0  ;;  %v16606_v8 = vld [vmem:[%s834_s3] sm:$0xf] }
 0xdba   : > { %v16432_v22 = vadd.f32 %v16431_v15, %v16391_v33  ;;  %v16435_v13 = vpop.f32.mrb[94].mxu1  ;;  %v16395_v4 = vpop.f32.mrb[95].mxu0  ;;  %v16684_v33 = vld [vmem:[%s952_s25] sm:$0xf] }
 0xdbb   : > { %v16434_v53 = vadd.f32 %v16433_v26, %v16393_v2  ;;  %v16436_v1 = vpop.f32.mrb[95].mxu1  ;;  %v16685_v15 = vunpack.c.l.bf16 %v16684_v33  ;;  %v16607_v2 = vld [vmem:[%s843_s21] sm:$0xf]  ;;  %v16642_v13 = vrot.slane %v16606_v8, %v23101_v37  ;;  %v16646_v4 = vrot.slane %v16606_v8, %v23104_v38 }
 0xdbd   : > { %v16690_v26 = vrot.slane %v16685_v15, %v23097_v35  ;;  %v16694_v19 = vrot.slane %v16685_v15, %v23104_v38 }
 0xdf7   : > { %v16472_v28 = vpop.f32.mrb[96].mxu0 }
 0xdf8   : > { %v16473_v5 = vadd.f32 %v16472_v28, %v16432_v22  ;;  %v16513_v24 = vpop.f32.mrb[96].mxu1  ;;  %v16474_v60 = vpop.f32.mrb[97].mxu0  ;;  %v16638_v22 = vrot.slane %v16606_v8, %v23097_v35  ;;  %v16663_v28 = vrot.slane %v16607_v2, %v23097_v35 }
 0xdf9   : > { %v16475_v58 = vadd.f32 %v16474_v60, %v16434_v53  ;;  %v16515_v14 = vpop.f32.mrb[97].mxu1  ;;  %v16476_v59 = vpop.f32.mrb[98].mxu0  ;;  %v16650_v53 = vrot.slane %v16606_v8, %v23109_v43  ;;  %v16698_v60 = vrot.slane %v16685_v15, %v23919_v25 }
 0xdfa   : > { %v16514_v41 = vadd.f32 %v16513_v24, %v16473_v5  ;;  %v16517_v63 = vpop.f32.mrb[98].mxu1  ;;  %v16477_v9 = vpop.f32.mrb[99].mxu0  ;;  %v16667_v5 = vrot.slane %v16607_v2, %v23101_v37  ;;  %v16671_v24 = vrot.slane %v16607_v2, %v23104_v38 }
 0xdfb   : > { %v16516_v55 = vadd.f32 %v16515_v14, %v16475_v58  ;;  %v16518_v20 = vpop.f32.mrb[99].mxu1  ;;  %v16675_v63 = vrot.slane %v16607_v2, %v23109_v43  ;;  %v16702_v9 = vrot.slane %v16685_v15, %v23924_v40 }
 0xdfc   : > { %v16714_v20 = vrot.slane %v16694_v19, %v23097_v35 }
 0xdfd   : > { %v16722_v43 = vrot.slane %v16702_v9, %v23097_v35 }
 0xe37   : > { %v16554_v39 = vpop.f32.mrb[100].mxu0 }
 0xe38   : > { %v16555_v51 = vadd.f32 %v16554_v39, %v16514_v41  ;;  %v16595_v36 = vpop.f32.mrb[100].mxu1  ;;  %v16556_v11 = vpop.f32.mrb[101].mxu0 }
 0xe39   : > { %v16557_v46 = vadd.f32 %v16556_v11, %v16516_v55  ;;  %v16597_v3 = vpop.f32.mrb[101].mxu1  ;;  %v16558_v42 = vpop.f32.mrb[102].mxu0  ;;  %v16710_v55 = vrot.slane %v16690_v26, %v23097_v35 }
 0xe3a   : > { %v16596_v49 = vadd.f32 %v16595_v36, %v16555_v51  ;;  %v16599_v50 = vpop.f32.mrb[102].mxu1  ;;  %v16559_v44 = vpop.f32.mrb[103].mxu0  ;;  %v16718_v36 = vrot.slane %v16698_v60, %v23097_v35 }
 0xe3b   : > { %v16598_v57 = vadd.f32 %v16597_v3, %v16557_v46  ;;  %v16600_v54 = vpop.f32.mrb[103].mxu1 }
 0xe3c   : > { %v16604_v47 = vadd.f32 %v16596_v49, %v24440_v56 }
 0xe3d   : > { %v16605_v61 = vadd.f32 %v16598_v57, %v24445_v23  ;;  %v20218_v57 = vld [vmem:[%s955_s0] ss:$0 sm:$0xff] }
 0xe3e   : > { %v16609_v52 = vadd.f32 %v16608_v31, %v16604_v47 }
 0xe40   : > { %v16610_v34 = vadd.f32 %v16609_v52, %v16605_v61 }
 0xe42   : > { %16611 = vadd.xlane.f32.xlu0 %v16610_v34 }
 0xecf   : > { %v16612_v21 = vpop.xlane.xlu0 %16611 }
 0xed0   : > { %v16613_v29 = vmul.f32 0.001953125, %v16612_v21 }
 0xed2   : > { %v16614_v6 = vsub.f32 %v16602_v45, %v16613_v29  ;;  %v16615_v48 = vsub.f32 %v16603_v62, %v16613_v29  ;;  %v16616_v0 = vsub.f32 %v16604_v47, %v16613_v29  ;;  %v16617_v10 = vsub.f32 %v16605_v61, %v16613_v29 }
 0xed4   : > { %v16618_v27 = vmul.f32 %v16614_v6, %v16614_v6  ;;  %v16619_v16 = vmul.f32 %v16615_v48, %v16615_v48  ;;  %v16620_v17 = vmul.f32 %v16616_v0, %v16616_v0  ;;  %v16621_v12 = vmul.f32 %v16617_v10, %v16617_v10 }
 0xed6   : > { %v16622_v7 = vadd.f32 %v16619_v16, %v16618_v27 }
 0xed8   : > { %v16623_v56 = vadd.f32 %v16622_v7, %v16620_v17 }
 0xeda   : > { %v16624_v23 = vadd.f32 %v16623_v56, %v16621_v12 }
 0xedc   : > { %16625 = vadd.xlane.f32.xlu1 %v16624_v23 }
 0xf69   : > { %v16626_v30 = vpop.xlane.xlu1 %16625 }
 0xf6a   : > { %v16627_v32 = vmul.f32 0.001953125, %v16626_v30 }
 0xf6c   : > { %v16628_v18 = vadd.f32 1e-05, %v16627_v32 }
 0xf6e   : > { %22016 = vrsqrt.f32 %v16628_v18 }
 0xf78   : > { %v22017_v1 = vpop.eup %22016 }
 0xf79   : > { %v16630_v58 = vmul.f32 %v22017_v1, %v16614_v6  ;;  %v16631_v14 = vmul.f32 %v22017_v1, %v16615_v48  ;;  %v16632_v59 = vmul.f32 %v22017_v1, %v16616_v0  ;;  %v16633_v41 = vmul.f32 %v22017_v1, %v16617_v10 }
 0xf7b   : > { %v16655_v39 = vmul.f32 %v16638_v22, %v16630_v58  ;;  %v16656_v45 = vmul.f32 %v16642_v13, %v16631_v14  ;;  %v16657_v62 = vmul.f32 %v16646_v4, %v16632_v59  ;;  %v16658_v37 = vmul.f32 %v16650_v53, %v16633_v41 }
 0xf7d   : > { %v16680_v38 = vadd.f32 %v16663_v28, %v16655_v39  ;;  %v16681_v25 = vadd.f32 %v16667_v5, %v16656_v45  ;;  %v16682_v51 = vadd.f32 %v16671_v24, %v16657_v62  ;;  %v16683_v11 = vadd.f32 %v16675_v63, %v16658_v37 }
 0xf7f   : > { %v16723_v46 = vmul.f32 %v16710_v55, %v16680_v38  ;;  %v16724_v40 = vmul.f32 %v16714_v20, %v16681_v25  ;;  %v16725_v3 = vmul.f32 %v16718_v36, %v16682_v51  ;;  %v16726_v49 = vmul.f32 %v16722_v43, %v16683_v11 }
 0xf81   : > { %v16727_v42 = vadd.f32 %v16724_v40, %v16723_v46 }
 0xf83   : > { %v16728_v50 = vadd.f32 %v16727_v42, %v16725_v3 }
 0xf85   : > { %v16729_v44 = vadd.f32 %v16728_v50, %v16726_v49 }
 0xf87   : > { %16730 = vadd.xlane.f32.xlu0 %v16729_v44 }
0x1014   : > { %v16731_v35 = vpop.xlane.xlu0 %16730 }
0x1015   : > { %v16739_v54 = vadd.f32 %v20218_v57, %v16731_v35 }
0x1017   : > { %16741 = vst.msk [vmem:[%s962_s8] sm:$0xff] %vm16740_vm3, %v16739_v54 }
0x1018 PF: > { %s25890_s19 = sld [smem:[#allocation24_spill]]  ;;  %s25891_s18 = sld [smem:[#allocation20_spill]] }
0x1019   : > { %s25893_s20 = sld [smem:[#allocation28_spill]]  ;;  %s25894_s21 = sld [smem:[#allocation23_spill]] }
0x101a   : > { %s25895_s22 = sld [smem:[#allocation25_spill]] }
0x101e   : > { %s27_s23 = sadd.s32 1, %s25890_s19   ;;  %s25892_s19 = sld [smem:[#allocation21_spill]] }
0x101f   : > { %p24_p1 = scmp.ge.s32.totalorder %s27_s23, 4  }
0x1021   :  { %26 = sbr.rel (!%p24_p1) target bundleno = 16 (0x10), region = 251 }
0x1028   :  { %16767 = vsyncpa [#allocation3], 1 }
0x1029   :  { %16769 = vsyncpa [#allocation3 + $0x1], 1 }
0x102a   :  { %16770 = vsyncpa [#allocation5], 1 }

</bundles_post_ra>
